<compile_context>
chip_gen: v6e
topology: v6e:2x2x1
jax: 0.10.0
libtpu: 0.0.40
codegen_flags: <defaults>
</compile_context>

<pallas_src>
import functools

import numpy as np
import jax
import jax.numpy as jnp
from jax import lax
from jax.experimental import pallas as pl
from jax.experimental.pallas import tpu as pltpu


# ----------------------------------------------------------------------------
# Fused Pallas kernel: conv1 + BN + ReLU + maxpool + conv2, one batch element
# ----------------------------------------------------------------------------
def _fused_chain_kernel(xph_ref, w1_ref, scale_ref, shift_ref, w2_ref,
                        shiftw_ref, padm_ref, o_ref, *, Ho, W2, H2, Cin, C1):
    """All intermediates stay in VMEM.

    xph_ref : (8, Hh, Wq, Cin) bf16 -- stride-phase-decomposed padded input:
              xph[py*4 + m, a, u, :] = x_pad[2*a + py, 4*u + m, :]
    w1_ref  : (7, 7, Cin, C1) bf16   (tap-major HWIO conv1 weights)
    scale_ref, shift_ref : (1, C1) f32 folded eval-mode BatchNorm affine
    w2_ref  : (3, 3, C1, C1) bf16    (tap-major HWIO conv2 weights)
    shiftw_ref : (Ho*W2, Ho*W2) f32 constant "shift odd columns by one pool
                 column" selection matrix
    padm_ref   : ((H2+2)*(W2+2), H2*W2) f32 constant zero-pad scatter matrix
    o_ref   : (H2, W2, C1) f32 final activation for this batch element
    """
    n1 = Ho * W2
    acc_e = jnp.zeros((n1, C1), jnp.float32)   # conv1 out, even output columns
    acc_o = jnp.zeros((n1, C1), jnp.float32)   # conv1 out, odd  output columns

    # ---- conv1 (7x7, stride 2, pad 3): 49-tap accumulation from VMEM ------
    for dy in range(7):
        py, qy = dy % 2, dy // 2
        for dx in range(7):
            w_tap = w1_ref[dy, dx]                           # (Cin, C1) bf16
            # even output column w = 2b reads padded column 4b + dx
            pe, ue = py * 4 + dx % 4, dx // 4
            slab = xph_ref[pe, qy:qy + Ho, ue:ue + W2, :]    # (Ho, W2, Cin)
            acc_e = acc_e + jnp.dot(slab.reshape(n1, Cin), w_tap,
                                    preferred_element_type=jnp.float32)
            # odd output column w = 2b+1 reads padded column 4b + dx + 2
            po, uo = py * 4 + (dx + 2) % 4, (dx + 2) // 4
            slab = xph_ref[po, qy:qy + Ho, uo:uo + W2, :]
            acc_o = acc_o + jnp.dot(slab.reshape(n1, Cin), w_tap,
                                    preferred_element_type=jnp.float32)

    # ---- fused eval-mode BatchNorm + ReLU (f32 epilogue) -------------------
    scale, shift = scale_ref[...], shift_ref[...]
    y_e = jnp.maximum(acc_e * scale + shift, 0.0)            # (Ho*W2, C1)
    y_o = jnp.maximum(acc_o * scale + shift, 0.0)

    # ---- MaxPool2d(3, stride 2, pad 1) -------------------------------------
    # Horizontal 3-tap max: cols {2j-1, 2j, 2j+1} = {odd[j-1], even[j], odd[j]}.
    # The j-1 shift is a constant selection matmul (MXU), avoiding unaligned
    # sublane shuffles.  Zero-padding is equivalent to -inf since the pool
    # input is post-ReLU (>= 0).
    y_o_left = jnp.dot(shiftw_ref[...], y_o,
                       preferred_element_type=jnp.float32)
    hmax = jnp.maximum(jnp.maximum(y_e, y_o), y_o_left)      # (Ho*W2, C1)
    # Vertical 3-tap max at stride 2: split even/odd conv1 rows (leading dim).
    hmax = hmax.reshape(H2, 2, W2, C1)
    h_even, h_odd = hmax[:, 0], hmax[:, 1]
    h_odd_up = jnp.concatenate(
        [jnp.zeros((1, W2, C1), jnp.float32), h_odd[:H2 - 1]], axis=0)
    pooled = jnp.maximum(jnp.maximum(h_even, h_odd), h_odd_up)  # (H2, W2, C1)

    # ---- sub_layer = layer1[:0] is the identity ----------------------------

    # ---- sub_conv = layer1[0].conv1: 3x3 / stride 1 / pad 1 / no bias ------
    # Zero-pad via a constant scatter matmul, then 9-tap accumulation.
    pp = jnp.dot(padm_ref[...], pooled.reshape(H2 * W2, C1),
                 preferred_element_type=jnp.float32)
    pp = pp.reshape(H2 + 2, W2 + 2, C1).astype(jnp.bfloat16)
    acc2 = jnp.zeros((H2 * W2, C1), jnp.float32)
    for dy in range(3):
        for dx in range(3):
            slab = pp[dy:dy + H2, dx:dx + W2, :].reshape(H2 * W2, C1)
            acc2 = acc2 + jnp.dot(slab, w2_ref[dy, dx],
                                  preferred_element_type=jnp.float32)

    o_ref[...] = acc2.reshape(H2, W2, C1).astype(o_ref.dtype)


# ----------------------------------------------------------------------------
# Wrapper: layout glue (bf16 cast, pad, stride-phase split) + pallas_call
# ----------------------------------------------------------------------------
def layer_activation_forward(x_nchw, params):
    """LayerActivation(model, 'layer1.0.conv1') forward.  NCHW in / NCHW out."""
    w1 = params["w1_oihw"]
    w2 = params["w2_oihw"]
    C1, Cin = int(w1.shape[0]), int(w1.shape[1])
    B, _, H, W = (int(s) for s in x_nchw.shape)
    assert H % 4 == 0 and W % 4 == 0, "fused kernel assumes H, W divisible by 4"
    Ho, Wo = H // 2, W // 2          # conv1 (7x7, s2, p3) output
    H2, W2 = Ho // 2, Wo // 2        # maxpool(3, s2, p1) / conv2 output

    # bf16 cast *before* padding, then mod-2 (rows) x mod-4 (cols) phase split
    # so every stride-2 access in the kernel is a contiguous static slice.
    x = jnp.transpose(x_nchw, (0, 2, 3, 1)).astype(jnp.bfloat16)   # NHWC
    Hh = (H + 6 + 1) // 2
    Wq = (W + 6 + 3) // 4
    xp = jnp.pad(x, ((0, 0), (3, 2 * Hh - H - 3), (3, 4 * Wq - W - 3), (0, 0)))
    xph = xp.reshape(B, Hh, 2, Wq, 4, Cin)
    xph = jnp.transpose(xph, (0, 2, 4, 1, 3, 5)).reshape(B, 8, Hh, Wq, Cin)

    w1_t = jnp.transpose(w1, (2, 3, 1, 0)).astype(jnp.bfloat16)    # (7,7,Cin,C1)
    w2_t = jnp.transpose(w2, (2, 3, 1, 0)).astype(jnp.bfloat16)    # (3,3,C1,C1)
    scale = jnp.reshape(params["bn_scale"], (1, C1)).astype(jnp.float32)
    shift = jnp.reshape(params["bn_shift"], (1, C1)).astype(jnp.float32)

    # Tiny constant selection matrices (built at trace time with numpy).
    n1 = Ho * W2
    sw = np.zeros((n1, n1), np.float32)          # odd-column left shift
    for r in range(n1):
        if r % W2 != 0:
            sw[r, r - 1] = 1.0
    n_pp = (H2 + 2) * (W2 + 2)
    pm = np.zeros((n_pp, H2 * W2), np.float32)   # conv2 zero-pad scatter
    for i in range(H2):
        for j in range(W2):
            pm[(i + 1) * (W2 + 2) + (j + 1), i * W2 + j] = 1.0

    kernel = functools.partial(_fused_chain_kernel, Ho=Ho, W2=W2, H2=H2,
                               Cin=Cin, C1=C1)

    flops = int(2 * B * (Ho * Wo * 49 * Cin * C1       # conv1
                         + n1 * n1 * C1                # pool shift matmul
                         + n_pp * H2 * W2 * C1         # conv2 zero-pad matmul
                         + H2 * W2 * 9 * C1 * C1))     # conv2
    bytes_accessed = int(xph.size * 2 + w1_t.size * 2 + w2_t.size * 2
                         + (scale.size + shift.size) * 4
                         + sw.size * 4 + pm.size * 4
                         + B * H2 * W2 * C1 * 4)

    out = pl.pallas_call(
        kernel,
        out_shape=jax.ShapeDtypeStruct((B, H2, W2, C1), jnp.float32),
        grid=(B,),
        in_specs=[
            pl.BlockSpec((None, 8, Hh, Wq, Cin), lambda b: (b, 0, 0, 0, 0)),
            pl.BlockSpec((7, 7, Cin, C1), lambda b: (0, 0, 0, 0)),
            pl.BlockSpec((1, C1), lambda b: (0, 0)),
            pl.BlockSpec((1, C1), lambda b: (0, 0)),
            pl.BlockSpec((3, 3, C1, C1), lambda b: (0, 0, 0, 0)),
            pl.BlockSpec((n1, n1), lambda b: (0, 0)),
            pl.BlockSpec((n_pp, H2 * W2), lambda b: (0, 0)),
        ],
        out_specs=pl.BlockSpec((None, H2, W2, C1), lambda b: (b, 0, 0, 0)),
        compiler_params=pltpu.CompilerParams(
            dimension_semantics=("parallel",),
            vmem_limit_bytes=32 * 1024 * 1024),
        cost_estimate=pl.CostEstimate(flops=flops, transcendentals=0,
                                      bytes_accessed=bytes_accessed),
    )(xph, w1_t, scale, shift, w2_t, jnp.asarray(sw), jnp.asarray(pm))

    return jnp.transpose(out, (0, 3, 1, 2))             # NHWC -> NCHW


# ----------------------------------------------------------------------------
# Pure-JAX reference (correctness check only)
# ----------------------------------------------------------------------------
def _conv_ref(x_nhwc, w_oihw, stride, pad):
    w_hwio = jnp.transpose(w_oihw, (2, 3, 1, 0))
    return lax.conv_general_dilated(
        x_nhwc, w_hwio, (stride, stride), [(pad, pad), (pad, pad)],
        dimension_numbers=("NHWC", "HWIO", "NHWC"),
        precision=lax.Precision.HIGHEST)


def reference_forward(x_nchw, params):
    x = jnp.transpose(x_nchw, (0, 2, 3, 1)).astype(jnp.float32)
    y = _conv_ref(x, params["w1_oihw"], 2, 3)
    y = (y * params["bn_scale"].reshape(1, 1, 1, -1)
         + params["bn_shift"].reshape(1, 1, 1, -1))
    y = jnp.maximum(y, 0.0)
    y = lax.reduce_window(y, -jnp.inf, lax.max, (1, 3, 3, 1), (1, 2, 2, 1),
                          ((0, 0), (1, 1), (1, 1), (0, 0)))
    y = _conv_ref(y, params["w2_oihw"], 1, 1)
    return jnp.transpose(y, (0, 3, 1, 2))


# ----------------------------------------------------------------------------
def make_params(key, cin=3, c1=8):
    k1, k2, k3, k4, k5, k6 = jax.random.split(key, 6)
    w1 = 0.05 * jax.random.normal(k1, (c1, cin, 7, 7), jnp.float32)   # conv1 OIHW
    w2 = 0.05 * jax.random.normal(k2, (c1, c1, 3, 3), jnp.float32)    # block conv1
    gamma = 1.0 + 0.1 * jax.random.normal(k3, (c1,), jnp.float32)
    beta = 0.1 * jax.random.normal(k4, (c1,), jnp.float32)
    run_mean = 0.1 * jax.random.normal(k5, (c1,), jnp.float32)
    run_var = 1.0 + 0.2 * jax.random.uniform(k6, (c1,), jnp.float32)
    eps = 1e-5
    scale = gamma / jnp.sqrt(run_var + eps)
    shift = beta - run_mean * scale
    return {
        "w1_oihw": w1,
        "w2_oihw": w2,
        "bn_scale": scale.reshape(1, c1),
        "bn_shift": shift.reshape(1, c1),
    }


if __name__ == "__main__":
    key = jax.random.PRNGKey(0)
    kx, kp = jax.random.split(key)
    x = jax.random.normal(kx, (2, 3, 16, 16), jnp.float32)   # NCHW input
    params = make_params(kp, cin=3, c1=8)

    fwd = jax.jit(layer_activation_forward)
    out = jax.block_until_ready(fwd(x, params))
    ref = jax.block_until_ready(reference_forward(x, params))

    assert out.shape == (2, 8, 4, 4), out.shape
    # bf16 MXU operands vs. f32 HIGHEST reference -> slightly looser tolerance.
    np.testing.assert_allclose(np.asarray(out), np.asarray(ref),
                               rtol=2e-2, atol=2e-2)
    print("KERNEL_OK")
</pallas_src>

<mosaic_0001>
module attributes {stable_mosaic.version = 11 : i64} {
  func.func @_fused_chain_kernel(%arg0: i32, %arg1: memref<1x8x11x6x3xbf16, #tpu.memory_space<vmem>>, %arg2: memref<7x7x3x8xbf16, #tpu.memory_space<vmem>>, %arg3: memref<1x8xf32, #tpu.memory_space<vmem>>, %arg4: memref<1x8xf32, #tpu.memory_space<vmem>>, %arg5: memref<3x3x8x8xbf16, #tpu.memory_space<vmem>>, %arg6: memref<32x32xf32, #tpu.memory_space<vmem>>, %arg7: memref<36x16xf32, #tpu.memory_space<vmem>>, %arg8: memref<1x4x4x8xf32, #tpu.memory_space<vmem>>) attributes {dimension_semantics = [#tpu.dimension_semantics<parallel>], iteration_bounds = array<i64: 2>, scalar_prefetch = 0 : i64, scratch_operands = 0 : i64, tpu.core_type = #tpu.core_type<tc>, window_params = [{transform_indices = @transform_0, window_bounds = array<i64: 1, 8, 11, 6, 3>}, {pipeline_mode = #tpu.pipeline_mode<synchronous>, transform_indices = @transform_1, window_bounds = array<i64: 7, 7, 3, 8>}, {pipeline_mode = #tpu.pipeline_mode<synchronous>, transform_indices = @transform_2, window_bounds = array<i64: 1, 8>}, {pipeline_mode = #tpu.pipeline_mode<synchronous>, transform_indices = @transform_3, window_bounds = array<i64: 1, 8>}, {pipeline_mode = #tpu.pipeline_mode<synchronous>, transform_indices = @transform_4, window_bounds = array<i64: 3, 3, 8, 8>}, {pipeline_mode = #tpu.pipeline_mode<synchronous>, transform_indices = @transform_5, window_bounds = array<i64: 32, 32>}, {pipeline_mode = #tpu.pipeline_mode<synchronous>, transform_indices = @transform_6, window_bounds = array<i64: 36, 16>}, {transform_indices = @transform_7, window_bounds = array<i64: 1, 4, 4, 8>}]} {
    %cst = arith.constant 0.000000e+00 : f32
    %0 = vector.broadcast %cst : f32 to vector<32x8xf32>
    %cst_0 = arith.constant 0.000000e+00 : f32
    %1 = vector.broadcast %cst_0 : f32 to vector<32x8xf32>
    %c0 = arith.constant 0 : index
    %c0_1 = arith.constant 0 : index
    %c0_2 = arith.constant 0 : index
    %c0_3 = arith.constant 0 : index
    %2 = vector.load %arg2[%c0, %c0_1, %c0_2, %c0_3] : memref<7x7x3x8xbf16, #tpu.memory_space<vmem>>, vector<1x1x3x8xbf16>
    %3 = vector.shape_cast %2 : vector<1x1x3x8xbf16> to vector<3x8xbf16>
    %c0_4 = arith.constant 0 : index
    %c0_5 = arith.constant 0 : index
    %c0_6 = arith.constant 0 : index
    %c0_7 = arith.constant 0 : index
    %c0_8 = arith.constant 0 : index
    %4 = vector.load %arg1[%c0_4, %c0_5, %c0_6, %c0_7, %c0_8] : memref<1x8x11x6x3xbf16, #tpu.memory_space<vmem>>, vector<1x1x8x4x3xbf16>
    %5 = vector.shape_cast %4 : vector<1x1x8x4x3xbf16> to vector<8x4x3xbf16>
    %6 = vector.shape_cast %5 : vector<8x4x3xbf16> to vector<32x3xbf16>
    %cst_9 = arith.constant dense<0.000000e+00> : vector<32x8xf32>
    %7 = tpu.matmul %6, %3, %cst_9 {dimension_numbers = #tpu.dot_dimension_numbers<[1], [0], [0], [1], [0, 0, 1, 1], [], []>} : vector<32x3xbf16>, vector<3x8xbf16>, vector<32x8xf32> -> vector<32x8xf32>
    %8 = arith.addf %0, %7 : vector<32x8xf32>
    %c0_10 = arith.constant 0 : index
    %c2 = arith.constant 2 : index
    %c0_11 = arith.constant 0 : index
    %c0_12 = arith.constant 0 : index
    %c0_13 = arith.constant 0 : index
    %9 = vector.load %arg1[%c0_10, %c2, %c0_11, %c0_12, %c0_13] : memref<1x8x11x6x3xbf16, #tpu.memory_space<vmem>>, vector<1x1x8x4x3xbf16>
    %10 = vector.shape_cast %9 : vector<1x1x8x4x3xbf16> to vector<8x4x3xbf16>
    %11 = vector.shape_cast %10 : vector<8x4x3xbf16> to vector<32x3xbf16>
    %cst_14 = arith.constant dense<0.000000e+00> : vector<32x8xf32>
    %12 = tpu.matmul %11, %3, %cst_14 {dimension_numbers = #tpu.dot_dimension_numbers<[1], [0], [0], [1], [0, 0, 1, 1], [], []>} : vector<32x3xbf16>, vector<3x8xbf16>, vector<32x8xf32> -> vector<32x8xf32>
    %13 = arith.addf %1, %12 : vector<32x8xf32>
    %c0_15 = arith.constant 0 : index
    %c1 = arith.constant 1 : index
    %c0_16 = arith.constant 0 : index
    %c0_17 = arith.constant 0 : index
    %14 = vector.load %arg2[%c0_15, %c1, %c0_16, %c0_17] : memref<7x7x3x8xbf16, #tpu.memory_space<vmem>>, vector<1x1x3x8xbf16>
    %15 = vector.shape_cast %14 : vector<1x1x3x8xbf16> to vector<3x8xbf16>
    %c0_18 = arith.constant 0 : index
    %c1_19 = arith.constant 1 : index
    %c0_20 = arith.constant 0 : index
    %c0_21 = arith.constant 0 : index
    %c0_22 = arith.constant 0 : index
    %16 = vector.load %arg1[%c0_18, %c1_19, %c0_20, %c0_21, %c0_22] : memref<1x8x11x6x3xbf16, #tpu.memory_space<vmem>>, vector<1x1x8x4x3xbf16>
    %17 = vector.shape_cast %16 : vector<1x1x8x4x3xbf16> to vector<8x4x3xbf16>
    %18 = vector.shape_cast %17 : vector<8x4x3xbf16> to vector<32x3xbf16>
    %cst_23 = arith.constant dense<0.000000e+00> : vector<32x8xf32>
    %19 = tpu.matmul %18, %15, %cst_23 {dimension_numbers = #tpu.dot_dimension_numbers<[1], [0], [0], [1], [0, 0, 1, 1], [], []>} : vector<32x3xbf16>, vector<3x8xbf16>, vector<32x8xf32> -> vector<32x8xf32>
    %20 = arith.addf %8, %19 : vector<32x8xf32>
    %c0_24 = arith.constant 0 : index
    %c3 = arith.constant 3 : index
    %c0_25 = arith.constant 0 : index
    %c0_26 = arith.constant 0 : index
    %c0_27 = arith.constant 0 : index
    %21 = vector.load %arg1[%c0_24, %c3, %c0_25, %c0_26, %c0_27] : memref<1x8x11x6x3xbf16, #tpu.memory_space<vmem>>, vector<1x1x8x4x3xbf16>
    %22 = vector.shape_cast %21 : vector<1x1x8x4x3xbf16> to vector<8x4x3xbf16>
    %23 = vector.shape_cast %22 : vector<8x4x3xbf16> to vector<32x3xbf16>
    %cst_28 = arith.constant dense<0.000000e+00> : vector<32x8xf32>
    %24 = tpu.matmul %23, %15, %cst_28 {dimension_numbers = #tpu.dot_dimension_numbers<[1], [0], [0], [1], [0, 0, 1, 1], [], []>} : vector<32x3xbf16>, vector<3x8xbf16>, vector<32x8xf32> -> vector<32x8xf32>
    %25 = arith.addf %13, %24 : vector<32x8xf32>
    %c0_29 = arith.constant 0 : index
    %c2_30 = arith.constant 2 : index
    %c0_31 = arith.constant 0 : index
    %c0_32 = arith.constant 0 : index
    %26 = vector.load %arg2[%c0_29, %c2_30, %c0_31, %c0_32] : memref<7x7x3x8xbf16, #tpu.memory_space<vmem>>, vector<1x1x3x8xbf16>
    %27 = vector.shape_cast %26 : vector<1x1x3x8xbf16> to vector<3x8xbf16>
    %c0_33 = arith.constant 0 : index
    %c2_34 = arith.constant 2 : index
    %c0_35 = arith.constant 0 : index
    %c0_36 = arith.constant 0 : index
    %c0_37 = arith.constant 0 : index
    %28 = vector.load %arg1[%c0_33, %c2_34, %c0_35, %c0_36, %c0_37] : memref<1x8x11x6x3xbf16, #tpu.memory_space<vmem>>, vector<1x1x8x4x3xbf16>
    %29 = vector.shape_cast %28 : vector<1x1x8x4x3xbf16> to vector<8x4x3xbf16>
    %30 = vector.shape_cast %29 : vector<8x4x3xbf16> to vector<32x3xbf16>
    %cst_38 = arith.constant dense<0.000000e+00> : vector<32x8xf32>
    %31 = tpu.matmul %30, %27, %cst_38 {dimension_numbers = #tpu.dot_dimension_numbers<[1], [0], [0], [1], [0, 0, 1, 1], [], []>} : vector<32x3xbf16>, vector<3x8xbf16>, vector<32x8xf32> -> vector<32x8xf32>
    %32 = arith.addf %20, %31 : vector<32x8xf32>
    %c0_39 = arith.constant 0 : index
    %c0_40 = arith.constant 0 : index
    %c0_41 = arith.constant 0 : index
    %c1_42 = arith.constant 1 : index
    %c0_43 = arith.constant 0 : index
    %33 = vector.load %arg1[%c0_39, %c0_40, %c0_41, %c1_42, %c0_43] : memref<1x8x11x6x3xbf16, #tpu.memory_space<vmem>>, vector<1x1x8x4x3xbf16>
    %34 = vector.shape_cast %33 : vector<1x1x8x4x3xbf16> to vector<8x4x3xbf16>
    %35 = vector.shape_cast %34 : vector<8x4x3xbf16> to vector<32x3xbf16>
    %cst_44 = arith.constant dense<0.000000e+00> : vector<32x8xf32>
    %36 = tpu.matmul %35, %27, %cst_44 {dimension_numbers = #tpu.dot_dimension_numbers<[1], [0], [0], [1], [0, 0, 1, 1], [], []>} : vector<32x3xbf16>, vector<3x8xbf16>, vector<32x8xf32> -> vector<32x8xf32>
    %37 = arith.addf %25, %36 : vector<32x8xf32>
    %c0_45 = arith.constant 0 : index
    %c3_46 = arith.constant 3 : index
    %c0_47 = arith.constant 0 : index
    %c0_48 = arith.constant 0 : index
    %38 = vector.load %arg2[%c0_45, %c3_46, %c0_47, %c0_48] : memref<7x7x3x8xbf16, #tpu.memory_space<vmem>>, vector<1x1x3x8xbf16>
    %39 = vector.shape_cast %38 : vector<1x1x3x8xbf16> to vector<3x8xbf16>
    %c0_49 = arith.constant 0 : index
    %c3_50 = arith.constant 3 : index
    %c0_51 = arith.constant 0 : index
    %c0_52 = arith.constant 0 : index
    %c0_53 = arith.constant 0 : index
    %40 = vector.load %arg1[%c0_49, %c3_50, %c0_51, %c0_52, %c0_53] : memref<1x8x11x6x3xbf16, #tpu.memory_space<vmem>>, vector<1x1x8x4x3xbf16>
    %41 = vector.shape_cast %40 : vector<1x1x8x4x3xbf16> to vector<8x4x3xbf16>
    %42 = vector.shape_cast %41 : vector<8x4x3xbf16> to vector<32x3xbf16>
    %cst_54 = arith.constant dense<0.000000e+00> : vector<32x8xf32>
    %43 = tpu.matmul %42, %39, %cst_54 {dimension_numbers = #tpu.dot_dimension_numbers<[1], [0], [0], [1], [0, 0, 1, 1], [], []>} : vector<32x3xbf16>, vector<3x8xbf16>, vector<32x8xf32> -> vector<32x8xf32>
    %44 = arith.addf %32, %43 : vector<32x8xf32>
    %c0_55 = arith.constant 0 : index
    %c1_56 = arith.constant 1 : index
    %c0_57 = arith.constant 0 : index
    %c1_58 = arith.constant 1 : index
    %c0_59 = arith.constant 0 : index
    %45 = vector.load %arg1[%c0_55, %c1_56, %c0_57, %c1_58, %c0_59] : memref<1x8x11x6x3xbf16, #tpu.memory_space<vmem>>, vector<1x1x8x4x3xbf16>
    %46 = vector.shape_cast %45 : vector<1x1x8x4x3xbf16> to vector<8x4x3xbf16>
    %47 = vector.shape_cast %46 : vector<8x4x3xbf16> to vector<32x3xbf16>
    %cst_60 = arith.constant dense<0.000000e+00> : vector<32x8xf32>
    %48 = tpu.matmul %47, %39, %cst_60 {dimension_numbers = #tpu.dot_dimension_numbers<[1], [0], [0], [1], [0, 0, 1, 1], [], []>} : vector<32x3xbf16>, vector<3x8xbf16>, vector<32x8xf32> -> vector<32x8xf32>
    %49 = arith.addf %37, %48 : vector<32x8xf32>
    %c0_61 = arith.constant 0 : index
    %c4 = arith.constant 4 : index
    %c0_62 = arith.constant 0 : index
    %c0_63 = arith.constant 0 : index
    %50 = vector.load %arg2[%c0_61, %c4, %c0_62, %c0_63] : memref<7x7x3x8xbf16, #tpu.memory_space<vmem>>, vector<1x1x3x8xbf16>
    %51 = vector.shape_cast %50 : vector<1x1x3x8xbf16> to vector<3x8xbf16>
    %c0_64 = arith.constant 0 : index
    %c0_65 = arith.constant 0 : index
    %c0_66 = arith.constant 0 : index
    %c1_67 = arith.constant 1 : index
    %c0_68 = arith.constant 0 : index
    %52 = vector.load %arg1[%c0_64, %c0_65, %c0_66, %c1_67, %c0_68] : memref<1x8x11x6x3xbf16, #tpu.memory_space<vmem>>, vector<1x1x8x4x3xbf16>
    %53 = vector.shape_cast %52 : vector<1x1x8x4x3xbf16> to vector<8x4x3xbf16>
    %54 = vector.shape_cast %53 : vector<8x4x3xbf16> to vector<32x3xbf16>
    %cst_69 = arith.constant dense<0.000000e+00> : vector<32x8xf32>
    %55 = tpu.matmul %54, %51, %cst_69 {dimension_numbers = #tpu.dot_dimension_numbers<[1], [0], [0], [1], [0, 0, 1, 1], [], []>} : vector<32x3xbf16>, vector<3x8xbf16>, vector<32x8xf32> -> vector<32x8xf32>
    %56 = arith.addf %44, %55 : vector<32x8xf32>
    %c0_70 = arith.constant 0 : index
    %c2_71 = arith.constant 2 : index
    %c0_72 = arith.constant 0 : index
    %c1_73 = arith.constant 1 : index
    %c0_74 = arith.constant 0 : index
    %57 = vector.load %arg1[%c0_70, %c2_71, %c0_72, %c1_73, %c0_74] : memref<1x8x11x6x3xbf16, #tpu.memory_space<vmem>>, vector<1x1x8x4x3xbf16>
    %58 = vector.shape_cast %57 : vector<1x1x8x4x3xbf16> to vector<8x4x3xbf16>
    %59 = vector.shape_cast %58 : vector<8x4x3xbf16> to vector<32x3xbf16>
    %cst_75 = arith.constant dense<0.000000e+00> : vector<32x8xf32>
    %60 = tpu.matmul %59, %51, %cst_75 {dimension_numbers = #tpu.dot_dimension_numbers<[1], [0], [0], [1], [0, 0, 1, 1], [], []>} : vector<32x3xbf16>, vector<3x8xbf16>, vector<32x8xf32> -> vector<32x8xf32>
    %61 = arith.addf %49, %60 : vector<32x8xf32>
    %c0_76 = arith.constant 0 : index
    %c5 = arith.constant 5 : index
    %c0_77 = arith.constant 0 : index
    %c0_78 = arith.constant 0 : index
    %62 = vector.load %arg2[%c0_76, %c5, %c0_77, %c0_78] : memref<7x7x3x8xbf16, #tpu.memory_space<vmem>>, vector<1x1x3x8xbf16>
    %63 = vector.shape_cast %62 : vector<1x1x3x8xbf16> to vector<3x8xbf16>
    %c0_79 = arith.constant 0 : index
    %c1_80 = arith.constant 1 : index
    %c0_81 = arith.constant 0 : index
    %c1_82 = arith.constant 1 : index
    %c0_83 = arith.constant 0 : index
    %64 = vector.load %arg1[%c0_79, %c1_80, %c0_81, %c1_82, %c0_83] : memref<1x8x11x6x3xbf16, #tpu.memory_space<vmem>>, vector<1x1x8x4x3xbf16>
    %65 = vector.shape_cast %64 : vector<1x1x8x4x3xbf16> to vector<8x4x3xbf16>
    %66 = vector.shape_cast %65 : vector<8x4x3xbf16> to vector<32x3xbf16>
    %cst_84 = arith.constant dense<0.000000e+00> : vector<32x8xf32>
    %67 = tpu.matmul %66, %63, %cst_84 {dimension_numbers = #tpu.dot_dimension_numbers<[1], [0], [0], [1], [0, 0, 1, 1], [], []>} : vector<32x3xbf16>, vector<3x8xbf16>, vector<32x8xf32> -> vector<32x8xf32>
    %68 = arith.addf %56, %67 : vector<32x8xf32>
    %c0_85 = arith.constant 0 : index
    %c3_86 = arith.constant 3 : index
    %c0_87 = arith.constant 0 : index
    %c1_88 = arith.constant 1 : index
    %c0_89 = arith.constant 0 : index
    %69 = vector.load %arg1[%c0_85, %c3_86, %c0_87, %c1_88, %c0_89] : memref<1x8x11x6x3xbf16, #tpu.memory_space<vmem>>, vector<1x1x8x4x3xbf16>
    %70 = vector.shape_cast %69 : vector<1x1x8x4x3xbf16> to vector<8x4x3xbf16>
    %71 = vector.shape_cast %70 : vector<8x4x3xbf16> to vector<32x3xbf16>
    %cst_90 = arith.constant dense<0.000000e+00> : vector<32x8xf32>
    %72 = tpu.matmul %71, %63, %cst_90 {dimension_numbers = #tpu.dot_dimension_numbers<[1], [0], [0], [1], [0, 0, 1, 1], [], []>} : vector<32x3xbf16>, vector<3x8xbf16>, vector<32x8xf32> -> vector<32x8xf32>
    %73 = arith.addf %61, %72 : vector<32x8xf32>
    %c0_91 = arith.constant 0 : index
    %c6 = arith.constant 6 : index
    %c0_92 = arith.constant 0 : index
    %c0_93 = arith.constant 0 : index
    %74 = vector.load %arg2[%c0_91, %c6, %c0_92, %c0_93] : memref<7x7x3x8xbf16, #tpu.memory_space<vmem>>, vector<1x1x3x8xbf16>
    %75 = vector.shape_cast %74 : vector<1x1x3x8xbf16> to vector<3x8xbf16>
    %c0_94 = arith.constant 0 : index
    %c2_95 = arith.constant 2 : index
    %c0_96 = arith.constant 0 : index
    %c1_97 = arith.constant 1 : index
    %c0_98 = arith.constant 0 : index
    %76 = vector.load %arg1[%c0_94, %c2_95, %c0_96, %c1_97, %c0_98] : memref<1x8x11x6x3xbf16, #tpu.memory_space<vmem>>, vector<1x1x8x4x3xbf16>
    %77 = vector.shape_cast %76 : vector<1x1x8x4x3xbf16> to vector<8x4x3xbf16>
    %78 = vector.shape_cast %77 : vector<8x4x3xbf16> to vector<32x3xbf16>
    %cst_99 = arith.constant dense<0.000000e+00> : vector<32x8xf32>
    %79 = tpu.matmul %78, %75, %cst_99 {dimension_numbers = #tpu.dot_dimension_numbers<[1], [0], [0], [1], [0, 0, 1, 1], [], []>} : vector<32x3xbf16>, vector<3x8xbf16>, vector<32x8xf32> -> vector<32x8xf32>
    %80 = arith.addf %68, %79 : vector<32x8xf32>
    %c0_100 = arith.constant 0 : index
    %c0_101 = arith.constant 0 : index
    %c0_102 = arith.constant 0 : index
    %c2_103 = arith.constant 2 : index
    %c0_104 = arith.constant 0 : index
    %81 = vector.load %arg1[%c0_100, %c0_101, %c0_102, %c2_103, %c0_104] : memref<1x8x11x6x3xbf16, #tpu.memory_space<vmem>>, vector<1x1x8x4x3xbf16>
    %82 = vector.shape_cast %81 : vector<1x1x8x4x3xbf16> to vector<8x4x3xbf16>
    %83 = vector.shape_cast %82 : vector<8x4x3xbf16> to vector<32x3xbf16>
    %cst_105 = arith.constant dense<0.000000e+00> : vector<32x8xf32>
    %84 = tpu.matmul %83, %75, %cst_105 {dimension_numbers = #tpu.dot_dimension_numbers<[1], [0], [0], [1], [0, 0, 1, 1], [], []>} : vector<32x3xbf16>, vector<3x8xbf16>, vector<32x8xf32> -> vector<32x8xf32>
    %85 = arith.addf %73, %84 : vector<32x8xf32>
    %c1_106 = arith.constant 1 : index
    %c0_107 = arith.constant 0 : index
    %c0_108 = arith.constant 0 : index
    %c0_109 = arith.constant 0 : index
    %86 = vector.load %arg2[%c1_106, %c0_107, %c0_108, %c0_109] : memref<7x7x3x8xbf16, #tpu.memory_space<vmem>>, vector<1x1x3x8xbf16>
    %87 = vector.shape_cast %86 : vector<1x1x3x8xbf16> to vector<3x8xbf16>
    %c0_110 = arith.constant 0 : index
    %c4_111 = arith.constant 4 : index
    %c0_112 = arith.constant 0 : index
    %c0_113 = arith.constant 0 : index
    %c0_114 = arith.constant 0 : index
    %88 = vector.load %arg1[%c0_110, %c4_111, %c0_112, %c0_113, %c0_114] : memref<1x8x11x6x3xbf16, #tpu.memory_space<vmem>>, vector<1x1x8x4x3xbf16>
    %89 = vector.shape_cast %88 : vector<1x1x8x4x3xbf16> to vector<8x4x3xbf16>
    %90 = vector.shape_cast %89 : vector<8x4x3xbf16> to vector<32x3xbf16>
    %cst_115 = arith.constant dense<0.000000e+00> : vector<32x8xf32>
    %91 = tpu.matmul %90, %87, %cst_115 {dimension_numbers = #tpu.dot_dimension_numbers<[1], [0], [0], [1], [0, 0, 1, 1], [], []>} : vector<32x3xbf16>, vector<3x8xbf16>, vector<32x8xf32> -> vector<32x8xf32>
    %92 = arith.addf %80, %91 : vector<32x8xf32>
    %c0_116 = arith.constant 0 : index
    %c6_117 = arith.constant 6 : index
    %c0_118 = arith.constant 0 : index
    %c0_119 = arith.constant 0 : index
    %c0_120 = arith.constant 0 : index
    %93 = vector.load %arg1[%c0_116, %c6_117, %c0_118, %c0_119, %c0_120] : memref<1x8x11x6x3xbf16, #tpu.memory_space<vmem>>, vector<1x1x8x4x3xbf16>
    %94 = vector.shape_cast %93 : vector<1x1x8x4x3xbf16> to vector<8x4x3xbf16>
    %95 = vector.shape_cast %94 : vector<8x4x3xbf16> to vector<32x3xbf16>
    %cst_121 = arith.constant dense<0.000000e+00> : vector<32x8xf32>
    %96 = tpu.matmul %95, %87, %cst_121 {dimension_numbers = #tpu.dot_dimension_numbers<[1], [0], [0], [1], [0, 0, 1, 1], [], []>} : vector<32x3xbf16>, vector<3x8xbf16>, vector<32x8xf32> -> vector<32x8xf32>
    %97 = arith.addf %85, %96 : vector<32x8xf32>
    %c1_122 = arith.constant 1 : index
    %c1_123 = arith.constant 1 : index
    %c0_124 = arith.constant 0 : index
    %c0_125 = arith.constant 0 : index
    %98 = vector.load %arg2[%c1_122, %c1_123, %c0_124, %c0_125] : memref<7x7x3x8xbf16, #tpu.memory_space<vmem>>, vector<1x1x3x8xbf16>
    %99 = vector.shape_cast %98 : vector<1x1x3x8xbf16> to vector<3x8xbf16>
    %c0_126 = arith.constant 0 : index
    %c5_127 = arith.constant 5 : index
    %c0_128 = arith.constant 0 : index
    %c0_129 = arith.constant 0 : index
    %c0_130 = arith.constant 0 : index
    %100 = vector.load %arg1[%c0_126, %c5_127, %c0_128, %c0_129, %c0_130] : memref<1x8x11x6x3xbf16, #tpu.memory_space<vmem>>, vector<1x1x8x4x3xbf16>
    %101 = vector.shape_cast %100 : vector<1x1x8x4x3xbf16> to vector<8x4x3xbf16>
    %102 = vector.shape_cast %101 : vector<8x4x3xbf16> to vector<32x3xbf16>
    %cst_131 = arith.constant dense<0.000000e+00> : vector<32x8xf32>
    %103 = tpu.matmul %102, %99, %cst_131 {dimension_numbers = #tpu.dot_dimension_numbers<[1], [0], [0], [1], [0, 0, 1, 1], [], []>} : vector<32x3xbf16>, vector<3x8xbf16>, vector<32x8xf32> -> vector<32x8xf32>
    %104 = arith.addf %92, %103 : vector<32x8xf32>
    %c0_132 = arith.constant 0 : index
    %c7 = arith.constant 7 : index
    %c0_133 = arith.constant 0 : index
    %c0_134 = arith.constant 0 : index
    %c0_135 = arith.constant 0 : index
    %105 = vector.load %arg1[%c0_132, %c7, %c0_133, %c0_134, %c0_135] : memref<1x8x11x6x3xbf16, #tpu.memory_space<vmem>>, vector<1x1x8x4x3xbf16>
    %106 = vector.shape_cast %105 : vector<1x1x8x4x3xbf16> to vector<8x4x3xbf16>
    %107 = vector.shape_cast %106 : vector<8x4x3xbf16> to vector<32x3xbf16>
    %cst_136 = arith.constant dense<0.000000e+00> : vector<32x8xf32>
    %108 = tpu.matmul %107, %99, %cst_136 {dimension_numbers = #tpu.dot_dimension_numbers<[1], [0], [0], [1], [0, 0, 1, 1], [], []>} : vector<32x3xbf16>, vector<3x8xbf16>, vector<32x8xf32> -> vector<32x8xf32>
    %109 = arith.addf %97, %108 : vector<32x8xf32>
    %c1_137 = arith.constant 1 : index
    %c2_138 = arith.constant 2 : index
    %c0_139 = arith.constant 0 : index
    %c0_140 = arith.constant 0 : index
    %110 = vector.load %arg2[%c1_137, %c2_138, %c0_139, %c0_140] : memref<7x7x3x8xbf16, #tpu.memory_space<vmem>>, vector<1x1x3x8xbf16>
    %111 = vector.shape_cast %110 : vector<1x1x3x8xbf16> to vector<3x8xbf16>
    %c0_141 = arith.constant 0 : index
    %c6_142 = arith.constant 6 : index
    %c0_143 = arith.constant 0 : index
    %c0_144 = arith.constant 0 : index
    %c0_145 = arith.constant 0 : index
    %112 = vector.load %arg1[%c0_141, %c6_142, %c0_143, %c0_144, %c0_145] : memref<1x8x11x6x3xbf16, #tpu.memory_space<vmem>>, vector<1x1x8x4x3xbf16>
    %113 = vector.shape_cast %112 : vector<1x1x8x4x3xbf16> to vector<8x4x3xbf16>
    %114 = vector.shape_cast %113 : vector<8x4x3xbf16> to vector<32x3xbf16>
    %cst_146 = arith.constant dense<0.000000e+00> : vector<32x8xf32>
    %115 = tpu.matmul %114, %111, %cst_146 {dimension_numbers = #tpu.dot_dimension_numbers<[1], [0], [0], [1], [0, 0, 1, 1], [], []>} : vector<32x3xbf16>, vector<3x8xbf16>, vector<32x8xf32> -> vector<32x8xf32>
    %116 = arith.addf %104, %115 : vector<32x8xf32>
    %c0_147 = arith.constant 0 : index
    %c4_148 = arith.constant 4 : index
    %c0_149 = arith.constant 0 : index
    %c1_150 = arith.constant 1 : index
    %c0_151 = arith.constant 0 : index
    %117 = vector.load %arg1[%c0_147, %c4_148, %c0_149, %c1_150, %c0_151] : memref<1x8x11x6x3xbf16, #tpu.memory_space<vmem>>, vector<1x1x8x4x3xbf16>
    %118 = vector.shape_cast %117 : vector<1x1x8x4x3xbf16> to vector<8x4x3xbf16>
    %119 = vector.shape_cast %118 : vector<8x4x3xbf16> to vector<32x3xbf16>
    %cst_152 = arith.constant dense<0.000000e+00> : vector<32x8xf32>
    %120 = tpu.matmul %119, %111, %cst_152 {dimension_numbers = #tpu.dot_dimension_numbers<[1], [0], [0], [1], [0, 0, 1, 1], [], []>} : vector<32x3xbf16>, vector<3x8xbf16>, vector<32x8xf32> -> vector<32x8xf32>
    %121 = arith.addf %109, %120 : vector<32x8xf32>
    %c1_153 = arith.constant 1 : index
    %c3_154 = arith.constant 3 : index
    %c0_155 = arith.constant 0 : index
    %c0_156 = arith.constant 0 : index
    %122 = vector.load %arg2[%c1_153, %c3_154, %c0_155, %c0_156] : memref<7x7x3x8xbf16, #tpu.memory_space<vmem>>, vector<1x1x3x8xbf16>
    %123 = vector.shape_cast %122 : vector<1x1x3x8xbf16> to vector<3x8xbf16>
    %c0_157 = arith.constant 0 : index
    %c7_158 = arith.constant 7 : index
    %c0_159 = arith.constant 0 : index
    %c0_160 = arith.constant 0 : index
    %c0_161 = arith.constant 0 : index
    %124 = vector.load %arg1[%c0_157, %c7_158, %c0_159, %c0_160, %c0_161] : memref<1x8x11x6x3xbf16, #tpu.memory_space<vmem>>, vector<1x1x8x4x3xbf16>
    %125 = vector.shape_cast %124 : vector<1x1x8x4x3xbf16> to vector<8x4x3xbf16>
    %126 = vector.shape_cast %125 : vector<8x4x3xbf16> to vector<32x3xbf16>
    %cst_162 = arith.constant dense<0.000000e+00> : vector<32x8xf32>
    %127 = tpu.matmul %126, %123, %cst_162 {dimension_numbers = #tpu.dot_dimension_numbers<[1], [0], [0], [1], [0, 0, 1, 1], [], []>} : vector<32x3xbf16>, vector<3x8xbf16>, vector<32x8xf32> -> vector<32x8xf32>
    %128 = arith.addf %116, %127 : vector<32x8xf32>
    %c0_163 = arith.constant 0 : index
    %c5_164 = arith.constant 5 : index
    %c0_165 = arith.constant 0 : index
    %c1_166 = arith.constant 1 : index
    %c0_167 = arith.constant 0 : index
    %129 = vector.load %arg1[%c0_163, %c5_164, %c0_165, %c1_166, %c0_167] : memref<1x8x11x6x3xbf16, #tpu.memory_space<vmem>>, vector<1x1x8x4x3xbf16>
    %130 = vector.shape_cast %129 : vector<1x1x8x4x3xbf16> to vector<8x4x3xbf16>
    %131 = vector.shape_cast %130 : vector<8x4x3xbf16> to vector<32x3xbf16>
    %cst_168 = arith.constant dense<0.000000e+00> : vector<32x8xf32>
    %132 = tpu.matmul %131, %123, %cst_168 {dimension_numbers = #tpu.dot_dimension_numbers<[1], [0], [0], [1], [0, 0, 1, 1], [], []>} : vector<32x3xbf16>, vector<3x8xbf16>, vector<32x8xf32> -> vector<32x8xf32>
    %133 = arith.addf %121, %132 : vector<32x8xf32>
    %c1_169 = arith.constant 1 : index
    %c4_170 = arith.constant 4 : index
    %c0_171 = arith.constant 0 : index
    %c0_172 = arith.constant 0 : index
    %134 = vector.load %arg2[%c1_169, %c4_170, %c0_171, %c0_172] : memref<7x7x3x8xbf16, #tpu.memory_space<vmem>>, vector<1x1x3x8xbf16>
    %135 = vector.shape_cast %134 : vector<1x1x3x8xbf16> to vector<3x8xbf16>
    %c0_173 = arith.constant 0 : index
    %c4_174 = arith.constant 4 : index
    %c0_175 = arith.constant 0 : index
    %c1_176 = arith.constant 1 : index
    %c0_177 = arith.constant 0 : index
    %136 = vector.load %arg1[%c0_173, %c4_174, %c0_175, %c1_176, %c0_177] : memref<1x8x11x6x3xbf16, #tpu.memory_space<vmem>>, vector<1x1x8x4x3xbf16>
    %137 = vector.shape_cast %136 : vector<1x1x8x4x3xbf16> to vector<8x4x3xbf16>
    %138 = vector.shape_cast %137 : vector<8x4x3xbf16> to vector<32x3xbf16>
    %cst_178 = arith.constant dense<0.000000e+00> : vector<32x8xf32>
    %139 = tpu.matmul %138, %135, %cst_178 {dimension_numbers = #tpu.dot_dimension_numbers<[1], [0], [0], [1], [0, 0, 1, 1], [], []>} : vector<32x3xbf16>, vector<3x8xbf16>, vector<32x8xf32> -> vector<32x8xf32>
    %140 = arith.addf %128, %139 : vector<32x8xf32>
    %c0_179 = arith.constant 0 : index
    %c6_180 = arith.constant 6 : index
    %c0_181 = arith.constant 0 : index
    %c1_182 = arith.constant 1 : index
    %c0_183 = arith.constant 0 : index
    %141 = vector.load %arg1[%c0_179, %c6_180, %c0_181, %c1_182, %c0_183] : memref<1x8x11x6x3xbf16, #tpu.memory_space<vmem>>, vector<1x1x8x4x3xbf16>
    %142 = vector.shape_cast %141 : vector<1x1x8x4x3xbf16> to vector<8x4x3xbf16>
    %143 = vector.shape_cast %142 : vector<8x4x3xbf16> to vector<32x3xbf16>
    %cst_184 = arith.constant dense<0.000000e+00> : vector<32x8xf32>
    %144 = tpu.matmul %143, %135, %cst_184 {dimension_numbers = #tpu.dot_dimension_numbers<[1], [0], [0], [1], [0, 0, 1, 1], [], []>} : vector<32x3xbf16>, vector<3x8xbf16>, vector<32x8xf32> -> vector<32x8xf32>
    %145 = arith.addf %133, %144 : vector<32x8xf32>
    %c1_185 = arith.constant 1 : index
    %c5_186 = arith.constant 5 : index
    %c0_187 = arith.constant 0 : index
    %c0_188 = arith.constant 0 : index
    %146 = vector.load %arg2[%c1_185, %c5_186, %c0_187, %c0_188] : memref<7x7x3x8xbf16, #tpu.memory_space<vmem>>, vector<1x1x3x8xbf16>
    %147 = vector.shape_cast %146 : vector<1x1x3x8xbf16> to vector<3x8xbf16>
    %c0_189 = arith.constant 0 : index
    %c5_190 = arith.constant 5 : index
    %c0_191 = arith.constant 0 : index
    %c1_192 = arith.constant 1 : index
    %c0_193 = arith.constant 0 : index
    %148 = vector.load %arg1[%c0_189, %c5_190, %c0_191, %c1_192, %c0_193] : memref<1x8x11x6x3xbf16, #tpu.memory_space<vmem>>, vector<1x1x8x4x3xbf16>
    %149 = vector.shape_cast %148 : vector<1x1x8x4x3xbf16> to vector<8x4x3xbf16>
    %150 = vector.shape_cast %149 : vector<8x4x3xbf16> to vector<32x3xbf16>
    %cst_194 = arith.constant dense<0.000000e+00> : vector<32x8xf32>
    %151 = tpu.matmul %150, %147, %cst_194 {dimension_numbers = #tpu.dot_dimension_numbers<[1], [0], [0], [1], [0, 0, 1, 1], [], []>} : vector<32x3xbf16>, vector<3x8xbf16>, vector<32x8xf32> -> vector<32x8xf32>
    %152 = arith.addf %140, %151 : vector<32x8xf32>
    %c0_195 = arith.constant 0 : index
    %c7_196 = arith.constant 7 : index
    %c0_197 = arith.constant 0 : index
    %c1_198 = arith.constant 1 : index
    %c0_199 = arith.constant 0 : index
    %153 = vector.load %arg1[%c0_195, %c7_196, %c0_197, %c1_198, %c0_199] : memref<1x8x11x6x3xbf16, #tpu.memory_space<vmem>>, vector<1x1x8x4x3xbf16>
    %154 = vector.shape_cast %153 : vector<1x1x8x4x3xbf16> to vector<8x4x3xbf16>
    %155 = vector.shape_cast %154 : vector<8x4x3xbf16> to vector<32x3xbf16>
    %cst_200 = arith.constant dense<0.000000e+00> : vector<32x8xf32>
    %156 = tpu.matmul %155, %147, %cst_200 {dimension_numbers = #tpu.dot_dimension_numbers<[1], [0], [0], [1], [0, 0, 1, 1], [], []>} : vector<32x3xbf16>, vector<3x8xbf16>, vector<32x8xf32> -> vector<32x8xf32>
    %157 = arith.addf %145, %156 : vector<32x8xf32>
    %c1_201 = arith.constant 1 : index
    %c6_202 = arith.constant 6 : index
    %c0_203 = arith.constant 0 : index
    %c0_204 = arith.constant 0 : index
    %158 = vector.load %arg2[%c1_201, %c6_202, %c0_203, %c0_204] : memref<7x7x3x8xbf16, #tpu.memory_space<vmem>>, vector<1x1x3x8xbf16>
    %159 = vector.shape_cast %158 : vector<1x1x3x8xbf16> to vector<3x8xbf16>
    %c0_205 = arith.constant 0 : index
    %c6_206 = arith.constant 6 : index
    %c0_207 = arith.constant 0 : index
    %c1_208 = arith.constant 1 : index
    %c0_209 = arith.constant 0 : index
    %160 = vector.load %arg1[%c0_205, %c6_206, %c0_207, %c1_208, %c0_209] : memref<1x8x11x6x3xbf16, #tpu.memory_space<vmem>>, vector<1x1x8x4x3xbf16>
    %161 = vector.shape_cast %160 : vector<1x1x8x4x3xbf16> to vector<8x4x3xbf16>
    %162 = vector.shape_cast %161 : vector<8x4x3xbf16> to vector<32x3xbf16>
    %cst_210 = arith.constant dense<0.000000e+00> : vector<32x8xf32>
    %163 = tpu.matmul %162, %159, %cst_210 {dimension_numbers = #tpu.dot_dimension_numbers<[1], [0], [0], [1], [0, 0, 1, 1], [], []>} : vector<32x3xbf16>, vector<3x8xbf16>, vector<32x8xf32> -> vector<32x8xf32>
    %164 = arith.addf %152, %163 : vector<32x8xf32>
    %c0_211 = arith.constant 0 : index
    %c4_212 = arith.constant 4 : index
    %c0_213 = arith.constant 0 : index
    %c2_214 = arith.constant 2 : index
    %c0_215 = arith.constant 0 : index
    %165 = vector.load %arg1[%c0_211, %c4_212, %c0_213, %c2_214, %c0_215] : memref<1x8x11x6x3xbf16, #tpu.memory_space<vmem>>, vector<1x1x8x4x3xbf16>
    %166 = vector.shape_cast %165 : vector<1x1x8x4x3xbf16> to vector<8x4x3xbf16>
    %167 = vector.shape_cast %166 : vector<8x4x3xbf16> to vector<32x3xbf16>
    %cst_216 = arith.constant dense<0.000000e+00> : vector<32x8xf32>
    %168 = tpu.matmul %167, %159, %cst_216 {dimension_numbers = #tpu.dot_dimension_numbers<[1], [0], [0], [1], [0, 0, 1, 1], [], []>} : vector<32x3xbf16>, vector<3x8xbf16>, vector<32x8xf32> -> vector<32x8xf32>
    %169 = arith.addf %157, %168 : vector<32x8xf32>
    %c2_217 = arith.constant 2 : index
    %c0_218 = arith.constant 0 : index
    %c0_219 = arith.constant 0 : index
    %c0_220 = arith.constant 0 : index
    %170 = vector.load %arg2[%c2_217, %c0_218, %c0_219, %c0_220] : memref<7x7x3x8xbf16, #tpu.memory_space<vmem>>, vector<1x1x3x8xbf16>
    %171 = vector.shape_cast %170 : vector<1x1x3x8xbf16> to vector<3x8xbf16>
    %c0_221 = arith.constant 0 : index
    %c0_222 = arith.constant 0 : index
    %c1_223 = arith.constant 1 : index
    %c0_224 = arith.constant 0 : index
    %c0_225 = arith.constant 0 : index
    %172 = vector.load %arg1[%c0_221, %c0_222, %c1_223, %c0_224, %c0_225] : memref<1x8x11x6x3xbf16, #tpu.memory_space<vmem>>, vector<1x1x8x4x3xbf16>
    %173 = vector.shape_cast %172 : vector<1x1x8x4x3xbf16> to vector<8x4x3xbf16>
    %174 = vector.shape_cast %173 : vector<8x4x3xbf16> to vector<32x3xbf16>
    %cst_226 = arith.constant dense<0.000000e+00> : vector<32x8xf32>
    %175 = tpu.matmul %174, %171, %cst_226 {dimension_numbers = #tpu.dot_dimension_numbers<[1], [0], [0], [1], [0, 0, 1, 1], [], []>} : vector<32x3xbf16>, vector<3x8xbf16>, vector<32x8xf32> -> vector<32x8xf32>
    %176 = arith.addf %164, %175 : vector<32x8xf32>
    %c0_227 = arith.constant 0 : index
    %c2_228 = arith.constant 2 : index
    %c1_229 = arith.constant 1 : index
    %c0_230 = arith.constant 0 : index
    %c0_231 = arith.constant 0 : index
    %177 = vector.load %arg1[%c0_227, %c2_228, %c1_229, %c0_230, %c0_231] : memref<1x8x11x6x3xbf16, #tpu.memory_space<vmem>>, vector<1x1x8x4x3xbf16>
    %178 = vector.shape_cast %177 : vector<1x1x8x4x3xbf16> to vector<8x4x3xbf16>
    %179 = vector.shape_cast %178 : vector<8x4x3xbf16> to vector<32x3xbf16>
    %cst_232 = arith.constant dense<0.000000e+00> : vector<32x8xf32>
    %180 = tpu.matmul %179, %171, %cst_232 {dimension_numbers = #tpu.dot_dimension_numbers<[1], [0], [0], [1], [0, 0, 1, 1], [], []>} : vector<32x3xbf16>, vector<3x8xbf16>, vector<32x8xf32> -> vector<32x8xf32>
    %181 = arith.addf %169, %180 : vector<32x8xf32>
    %c2_233 = arith.constant 2 : index
    %c1_234 = arith.constant 1 : index
    %c0_235 = arith.constant 0 : index
    %c0_236 = arith.constant 0 : index
    %182 = vector.load %arg2[%c2_233, %c1_234, %c0_235, %c0_236] : memref<7x7x3x8xbf16, #tpu.memory_space<vmem>>, vector<1x1x3x8xbf16>
    %183 = vector.shape_cast %182 : vector<1x1x3x8xbf16> to vector<3x8xbf16>
    %c0_237 = arith.constant 0 : index
    %c1_238 = arith.constant 1 : index
    %c1_239 = arith.constant 1 : index
    %c0_240 = arith.constant 0 : index
    %c0_241 = arith.constant 0 : index
    %184 = vector.load %arg1[%c0_237, %c1_238, %c1_239, %c0_240, %c0_241] : memref<1x8x11x6x3xbf16, #tpu.memory_space<vmem>>, vector<1x1x8x4x3xbf16>
    %185 = vector.shape_cast %184 : vector<1x1x8x4x3xbf16> to vector<8x4x3xbf16>
    %186 = vector.shape_cast %185 : vector<8x4x3xbf16> to vector<32x3xbf16>
    %cst_242 = arith.constant dense<0.000000e+00> : vector<32x8xf32>
    %187 = tpu.matmul %186, %183, %cst_242 {dimension_numbers = #tpu.dot_dimension_numbers<[1], [0], [0], [1], [0, 0, 1, 1], [], []>} : vector<32x3xbf16>, vector<3x8xbf16>, vector<32x8xf32> -> vector<32x8xf32>
    %188 = arith.addf %176, %187 : vector<32x8xf32>
    %c0_243 = arith.constant 0 : index
    %c3_244 = arith.constant 3 : index
    %c1_245 = arith.constant 1 : index
    %c0_246 = arith.constant 0 : index
    %c0_247 = arith.constant 0 : index
    %189 = vector.load %arg1[%c0_243, %c3_244, %c1_245, %c0_246, %c0_247] : memref<1x8x11x6x3xbf16, #tpu.memory_space<vmem>>, vector<1x1x8x4x3xbf16>
    %190 = vector.shape_cast %189 : vector<1x1x8x4x3xbf16> to vector<8x4x3xbf16>
    %191 = vector.shape_cast %190 : vector<8x4x3xbf16> to vector<32x3xbf16>
    %cst_248 = arith.constant dense<0.000000e+00> : vector<32x8xf32>
    %192 = tpu.matmul %191, %183, %cst_248 {dimension_numbers = #tpu.dot_dimension_numbers<[1], [0], [0], [1], [0, 0, 1, 1], [], []>} : vector<32x3xbf16>, vector<3x8xbf16>, vector<32x8xf32> -> vector<32x8xf32>
    %193 = arith.addf %181, %192 : vector<32x8xf32>
    %c2_249 = arith.constant 2 : index
    %c2_250 = arith.constant 2 : index
    %c0_251 = arith.constant 0 : index
    %c0_252 = arith.constant 0 : index
    %194 = vector.load %arg2[%c2_249, %c2_250, %c0_251, %c0_252] : memref<7x7x3x8xbf16, #tpu.memory_space<vmem>>, vector<1x1x3x8xbf16>
    %195 = vector.shape_cast %194 : vector<1x1x3x8xbf16> to vector<3x8xbf16>
    %c0_253 = arith.constant 0 : index
    %c2_254 = arith.constant 2 : index
    %c1_255 = arith.constant 1 : index
    %c0_256 = arith.constant 0 : index
    %c0_257 = arith.constant 0 : index
    %196 = vector.load %arg1[%c0_253, %c2_254, %c1_255, %c0_256, %c0_257] : memref<1x8x11x6x3xbf16, #tpu.memory_space<vmem>>, vector<1x1x8x4x3xbf16>
    %197 = vector.shape_cast %196 : vector<1x1x8x4x3xbf16> to vector<8x4x3xbf16>
    %198 = vector.shape_cast %197 : vector<8x4x3xbf16> to vector<32x3xbf16>
    %cst_258 = arith.constant dense<0.000000e+00> : vector<32x8xf32>
    %199 = tpu.matmul %198, %195, %cst_258 {dimension_numbers = #tpu.dot_dimension_numbers<[1], [0], [0], [1], [0, 0, 1, 1], [], []>} : vector<32x3xbf16>, vector<3x8xbf16>, vector<32x8xf32> -> vector<32x8xf32>
    %200 = arith.addf %188, %199 : vector<32x8xf32>
    %c0_259 = arith.constant 0 : index
    %c0_260 = arith.constant 0 : index
    %c1_261 = arith.constant 1 : index
    %c1_262 = arith.constant 1 : index
    %c0_263 = arith.constant 0 : index
    %201 = vector.load %arg1[%c0_259, %c0_260, %c1_261, %c1_262, %c0_263] : memref<1x8x11x6x3xbf16, #tpu.memory_space<vmem>>, vector<1x1x8x4x3xbf16>
    %202 = vector.shape_cast %201 : vector<1x1x8x4x3xbf16> to vector<8x4x3xbf16>
    %203 = vector.shape_cast %202 : vector<8x4x3xbf16> to vector<32x3xbf16>
    %cst_264 = arith.constant dense<0.000000e+00> : vector<32x8xf32>
    %204 = tpu.matmul %203, %195, %cst_264 {dimension_numbers = #tpu.dot_dimension_numbers<[1], [0], [0], [1], [0, 0, 1, 1], [], []>} : vector<32x3xbf16>, vector<3x8xbf16>, vector<32x8xf32> -> vector<32x8xf32>
    %205 = arith.addf %193, %204 : vector<32x8xf32>
    %c2_265 = arith.constant 2 : index
    %c3_266 = arith.constant 3 : index
    %c0_267 = arith.constant 0 : index
    %c0_268 = arith.constant 0 : index
    %206 = vector.load %arg2[%c2_265, %c3_266, %c0_267, %c0_268] : memref<7x7x3x8xbf16, #tpu.memory_space<vmem>>, vector<1x1x3x8xbf16>
    %207 = vector.shape_cast %206 : vector<1x1x3x8xbf16> to vector<3x8xbf16>
    %c0_269 = arith.constant 0 : index
    %c3_270 = arith.constant 3 : index
    %c1_271 = arith.constant 1 : index
    %c0_272 = arith.constant 0 : index
    %c0_273 = arith.constant 0 : index
    %208 = vector.load %arg1[%c0_269, %c3_270, %c1_271, %c0_272, %c0_273] : memref<1x8x11x6x3xbf16, #tpu.memory_space<vmem>>, vector<1x1x8x4x3xbf16>
    %209 = vector.shape_cast %208 : vector<1x1x8x4x3xbf16> to vector<8x4x3xbf16>
    %210 = vector.shape_cast %209 : vector<8x4x3xbf16> to vector<32x3xbf16>
    %cst_274 = arith.constant dense<0.000000e+00> : vector<32x8xf32>
    %211 = tpu.matmul %210, %207, %cst_274 {dimension_numbers = #tpu.dot_dimension_numbers<[1], [0], [0], [1], [0, 0, 1, 1], [], []>} : vector<32x3xbf16>, vector<3x8xbf16>, vector<32x8xf32> -> vector<32x8xf32>
    %212 = arith.addf %200, %211 : vector<32x8xf32>
    %c0_275 = arith.constant 0 : index
    %c1_276 = arith.constant 1 : index
    %c1_277 = arith.constant 1 : index
    %c1_278 = arith.constant 1 : index
    %c0_279 = arith.constant 0 : index
    %213 = vector.load %arg1[%c0_275, %c1_276, %c1_277, %c1_278, %c0_279] : memref<1x8x11x6x3xbf16, #tpu.memory_space<vmem>>, vector<1x1x8x4x3xbf16>
    %214 = vector.shape_cast %213 : vector<1x1x8x4x3xbf16> to vector<8x4x3xbf16>
    %215 = vector.shape_cast %214 : vector<8x4x3xbf16> to vector<32x3xbf16>
    %cst_280 = arith.constant dense<0.000000e+00> : vector<32x8xf32>
    %216 = tpu.matmul %215, %207, %cst_280 {dimension_numbers = #tpu.dot_dimension_numbers<[1], [0], [0], [1], [0, 0, 1, 1], [], []>} : vector<32x3xbf16>, vector<3x8xbf16>, vector<32x8xf32> -> vector<32x8xf32>
    %217 = arith.addf %205, %216 : vector<32x8xf32>
    %c2_281 = arith.constant 2 : index
    %c4_282 = arith.constant 4 : index
    %c0_283 = arith.constant 0 : index
    %c0_284 = arith.constant 0 : index
    %218 = vector.load %arg2[%c2_281, %c4_282, %c0_283, %c0_284] : memref<7x7x3x8xbf16, #tpu.memory_space<vmem>>, vector<1x1x3x8xbf16>
    %219 = vector.shape_cast %218 : vector<1x1x3x8xbf16> to vector<3x8xbf16>
    %c0_285 = arith.constant 0 : index
    %c0_286 = arith.constant 0 : index
    %c1_287 = arith.constant 1 : index
    %c1_288 = arith.constant 1 : index
    %c0_289 = arith.constant 0 : index
    %220 = vector.load %arg1[%c0_285, %c0_286, %c1_287, %c1_288, %c0_289] : memref<1x8x11x6x3xbf16, #tpu.memory_space<vmem>>, vector<1x1x8x4x3xbf16>
    %221 = vector.shape_cast %220 : vector<1x1x8x4x3xbf16> to vector<8x4x3xbf16>
    %222 = vector.shape_cast %221 : vector<8x4x3xbf16> to vector<32x3xbf16>
    %cst_290 = arith.constant dense<0.000000e+00> : vector<32x8xf32>
    %223 = tpu.matmul %222, %219, %cst_290 {dimension_numbers = #tpu.dot_dimension_numbers<[1], [0], [0], [1], [0, 0, 1, 1], [], []>} : vector<32x3xbf16>, vector<3x8xbf16>, vector<32x8xf32> -> vector<32x8xf32>
    %224 = arith.addf %212, %223 : vector<32x8xf32>
    %c0_291 = arith.constant 0 : index
    %c2_292 = arith.constant 2 : index
    %c1_293 = arith.constant 1 : index
    %c1_294 = arith.constant 1 : index
    %c0_295 = arith.constant 0 : index
    %225 = vector.load %arg1[%c0_291, %c2_292, %c1_293, %c1_294, %c0_295] : memref<1x8x11x6x3xbf16, #tpu.memory_space<vmem>>, vector<1x1x8x4x3xbf16>
    %226 = vector.shape_cast %225 : vector<1x1x8x4x3xbf16> to vector<8x4x3xbf16>
    %227 = vector.shape_cast %226 : vector<8x4x3xbf16> to vector<32x3xbf16>
    %cst_296 = arith.constant dense<0.000000e+00> : vector<32x8xf32>
    %228 = tpu.matmul %227, %219, %cst_296 {dimension_numbers = #tpu.dot_dimension_numbers<[1], [0], [0], [1], [0, 0, 1, 1], [], []>} : vector<32x3xbf16>, vector<3x8xbf16>, vector<32x8xf32> -> vector<32x8xf32>
    %229 = arith.addf %217, %228 : vector<32x8xf32>
    %c2_297 = arith.constant 2 : index
    %c5_298 = arith.constant 5 : index
    %c0_299 = arith.constant 0 : index
    %c0_300 = arith.constant 0 : index
    %230 = vector.load %arg2[%c2_297, %c5_298, %c0_299, %c0_300] : memref<7x7x3x8xbf16, #tpu.memory_space<vmem>>, vector<1x1x3x8xbf16>
    %231 = vector.shape_cast %230 : vector<1x1x3x8xbf16> to vector<3x8xbf16>
    %c0_301 = arith.constant 0 : index
    %c1_302 = arith.constant 1 : index
    %c1_303 = arith.constant 1 : index
    %c1_304 = arith.constant 1 : index
    %c0_305 = arith.constant 0 : index
    %232 = vector.load %arg1[%c0_301, %c1_302, %c1_303, %c1_304, %c0_305] : memref<1x8x11x6x3xbf16, #tpu.memory_space<vmem>>, vector<1x1x8x4x3xbf16>
    %233 = vector.shape_cast %232 : vector<1x1x8x4x3xbf16> to vector<8x4x3xbf16>
    %234 = vector.shape_cast %233 : vector<8x4x3xbf16> to vector<32x3xbf16>
    %cst_306 = arith.constant dense<0.000000e+00> : vector<32x8xf32>
    %235 = tpu.matmul %234, %231, %cst_306 {dimension_numbers = #tpu.dot_dimension_numbers<[1], [0], [0], [1], [0, 0, 1, 1], [], []>} : vector<32x3xbf16>, vector<3x8xbf16>, vector<32x8xf32> -> vector<32x8xf32>
    %236 = arith.addf %224, %235 : vector<32x8xf32>
    %c0_307 = arith.constant 0 : index
    %c3_308 = arith.constant 3 : index
    %c1_309 = arith.constant 1 : index
    %c1_310 = arith.constant 1 : index
    %c0_311 = arith.constant 0 : index
    %237 = vector.load %arg1[%c0_307, %c3_308, %c1_309, %c1_310, %c0_311] : memref<1x8x11x6x3xbf16, #tpu.memory_space<vmem>>, vector<1x1x8x4x3xbf16>
    %238 = vector.shape_cast %237 : vector<1x1x8x4x3xbf16> to vector<8x4x3xbf16>
    %239 = vector.shape_cast %238 : vector<8x4x3xbf16> to vector<32x3xbf16>
    %cst_312 = arith.constant dense<0.000000e+00> : vector<32x8xf32>
    %240 = tpu.matmul %239, %231, %cst_312 {dimension_numbers = #tpu.dot_dimension_numbers<[1], [0], [0], [1], [0, 0, 1, 1], [], []>} : vector<32x3xbf16>, vector<3x8xbf16>, vector<32x8xf32> -> vector<32x8xf32>
    %241 = arith.addf %229, %240 : vector<32x8xf32>
    %c2_313 = arith.constant 2 : index
    %c6_314 = arith.constant 6 : index
    %c0_315 = arith.constant 0 : index
    %c0_316 = arith.constant 0 : index
    %242 = vector.load %arg2[%c2_313, %c6_314, %c0_315, %c0_316] : memref<7x7x3x8xbf16, #tpu.memory_space<vmem>>, vector<1x1x3x8xbf16>
    %243 = vector.shape_cast %242 : vector<1x1x3x8xbf16> to vector<3x8xbf16>
    %c0_317 = arith.constant 0 : index
    %c2_318 = arith.constant 2 : index
    %c1_319 = arith.constant 1 : index
    %c1_320 = arith.constant 1 : index
    %c0_321 = arith.constant 0 : index
    %244 = vector.load %arg1[%c0_317, %c2_318, %c1_319, %c1_320, %c0_321] : memref<1x8x11x6x3xbf16, #tpu.memory_space<vmem>>, vector<1x1x8x4x3xbf16>
    %245 = vector.shape_cast %244 : vector<1x1x8x4x3xbf16> to vector<8x4x3xbf16>
    %246 = vector.shape_cast %245 : vector<8x4x3xbf16> to vector<32x3xbf16>
    %cst_322 = arith.constant dense<0.000000e+00> : vector<32x8xf32>
    %247 = tpu.matmul %246, %243, %cst_322 {dimension_numbers = #tpu.dot_dimension_numbers<[1], [0], [0], [1], [0, 0, 1, 1], [], []>} : vector<32x3xbf16>, vector<3x8xbf16>, vector<32x8xf32> -> vector<32x8xf32>
    %248 = arith.addf %236, %247 : vector<32x8xf32>
    %c0_323 = arith.constant 0 : index
    %c0_324 = arith.constant 0 : index
    %c1_325 = arith.constant 1 : index
    %c2_326 = arith.constant 2 : index
    %c0_327 = arith.constant 0 : index
    %249 = vector.load %arg1[%c0_323, %c0_324, %c1_325, %c2_326, %c0_327] : memref<1x8x11x6x3xbf16, #tpu.memory_space<vmem>>, vector<1x1x8x4x3xbf16>
    %250 = vector.shape_cast %249 : vector<1x1x8x4x3xbf16> to vector<8x4x3xbf16>
    %251 = vector.shape_cast %250 : vector<8x4x3xbf16> to vector<32x3xbf16>
    %cst_328 = arith.constant dense<0.000000e+00> : vector<32x8xf32>
    %252 = tpu.matmul %251, %243, %cst_328 {dimension_numbers = #tpu.dot_dimension_numbers<[1], [0], [0], [1], [0, 0, 1, 1], [], []>} : vector<32x3xbf16>, vector<3x8xbf16>, vector<32x8xf32> -> vector<32x8xf32>
    %253 = arith.addf %241, %252 : vector<32x8xf32>
    %c3_329 = arith.constant 3 : index
    %c0_330 = arith.constant 0 : index
    %c0_331 = arith.constant 0 : index
    %c0_332 = arith.constant 0 : index
    %254 = vector.load %arg2[%c3_329, %c0_330, %c0_331, %c0_332] : memref<7x7x3x8xbf16, #tpu.memory_space<vmem>>, vector<1x1x3x8xbf16>
    %255 = vector.shape_cast %254 : vector<1x1x3x8xbf16> to vector<3x8xbf16>
    %c0_333 = arith.constant 0 : index
    %c4_334 = arith.constant 4 : index
    %c1_335 = arith.constant 1 : index
    %c0_336 = arith.constant 0 : index
    %c0_337 = arith.constant 0 : index
    %256 = vector.load %arg1[%c0_333, %c4_334, %c1_335, %c0_336, %c0_337] : memref<1x8x11x6x3xbf16, #tpu.memory_space<vmem>>, vector<1x1x8x4x3xbf16>
    %257 = vector.shape_cast %256 : vector<1x1x8x4x3xbf16> to vector<8x4x3xbf16>
    %258 = vector.shape_cast %257 : vector<8x4x3xbf16> to vector<32x3xbf16>
    %cst_338 = arith.constant dense<0.000000e+00> : vector<32x8xf32>
    %259 = tpu.matmul %258, %255, %cst_338 {dimension_numbers = #tpu.dot_dimension_numbers<[1], [0], [0], [1], [0, 0, 1, 1], [], []>} : vector<32x3xbf16>, vector<3x8xbf16>, vector<32x8xf32> -> vector<32x8xf32>
    %260 = arith.addf %248, %259 : vector<32x8xf32>
    %c0_339 = arith.constant 0 : index
    %c6_340 = arith.constant 6 : index
    %c1_341 = arith.constant 1 : index
    %c0_342 = arith.constant 0 : index
    %c0_343 = arith.constant 0 : index
    %261 = vector.load %arg1[%c0_339, %c6_340, %c1_341, %c0_342, %c0_343] : memref<1x8x11x6x3xbf16, #tpu.memory_space<vmem>>, vector<1x1x8x4x3xbf16>
    %262 = vector.shape_cast %261 : vector<1x1x8x4x3xbf16> to vector<8x4x3xbf16>
    %263 = vector.shape_cast %262 : vector<8x4x3xbf16> to vector<32x3xbf16>
    %cst_344 = arith.constant dense<0.000000e+00> : vector<32x8xf32>
    %264 = tpu.matmul %263, %255, %cst_344 {dimension_numbers = #tpu.dot_dimension_numbers<[1], [0], [0], [1], [0, 0, 1, 1], [], []>} : vector<32x3xbf16>, vector<3x8xbf16>, vector<32x8xf32> -> vector<32x8xf32>
    %265 = arith.addf %253, %264 : vector<32x8xf32>
    %c3_345 = arith.constant 3 : index
    %c1_346 = arith.constant 1 : index
    %c0_347 = arith.constant 0 : index
    %c0_348 = arith.constant 0 : index
    %266 = vector.load %arg2[%c3_345, %c1_346, %c0_347, %c0_348] : memref<7x7x3x8xbf16, #tpu.memory_space<vmem>>, vector<1x1x3x8xbf16>
    %267 = vector.shape_cast %266 : vector<1x1x3x8xbf16> to vector<3x8xbf16>
    %c0_349 = arith.constant 0 : index
    %c5_350 = arith.constant 5 : index
    %c1_351 = arith.constant 1 : index
    %c0_352 = arith.constant 0 : index
    %c0_353 = arith.constant 0 : index
    %268 = vector.load %arg1[%c0_349, %c5_350, %c1_351, %c0_352, %c0_353] : memref<1x8x11x6x3xbf16, #tpu.memory_space<vmem>>, vector<1x1x8x4x3xbf16>
    %269 = vector.shape_cast %268 : vector<1x1x8x4x3xbf16> to vector<8x4x3xbf16>
    %270 = vector.shape_cast %269 : vector<8x4x3xbf16> to vector<32x3xbf16>
    %cst_354 = arith.constant dense<0.000000e+00> : vector<32x8xf32>
    %271 = tpu.matmul %270, %267, %cst_354 {dimension_numbers = #tpu.dot_dimension_numbers<[1], [0], [0], [1], [0, 0, 1, 1], [], []>} : vector<32x3xbf16>, vector<3x8xbf16>, vector<32x8xf32> -> vector<32x8xf32>
    %272 = arith.addf %260, %271 : vector<32x8xf32>
    %c0_355 = arith.constant 0 : index
    %c7_356 = arith.constant 7 : index
    %c1_357 = arith.constant 1 : index
    %c0_358 = arith.constant 0 : index
    %c0_359 = arith.constant 0 : index
    %273 = vector.load %arg1[%c0_355, %c7_356, %c1_357, %c0_358, %c0_359] : memref<1x8x11x6x3xbf16, #tpu.memory_space<vmem>>, vector<1x1x8x4x3xbf16>
    %274 = vector.shape_cast %273 : vector<1x1x8x4x3xbf16> to vector<8x4x3xbf16>
    %275 = vector.shape_cast %274 : vector<8x4x3xbf16> to vector<32x3xbf16>
    %cst_360 = arith.constant dense<0.000000e+00> : vector<32x8xf32>
    %276 = tpu.matmul %275, %267, %cst_360 {dimension_numbers = #tpu.dot_dimension_numbers<[1], [0], [0], [1], [0, 0, 1, 1], [], []>} : vector<32x3xbf16>, vector<3x8xbf16>, vector<32x8xf32> -> vector<32x8xf32>
    %277 = arith.addf %265, %276 : vector<32x8xf32>
    %c3_361 = arith.constant 3 : index
    %c2_362 = arith.constant 2 : index
    %c0_363 = arith.constant 0 : index
    %c0_364 = arith.constant 0 : index
    %278 = vector.load %arg2[%c3_361, %c2_362, %c0_363, %c0_364] : memref<7x7x3x8xbf16, #tpu.memory_space<vmem>>, vector<1x1x3x8xbf16>
    %279 = vector.shape_cast %278 : vector<1x1x3x8xbf16> to vector<3x8xbf16>
    %c0_365 = arith.constant 0 : index
    %c6_366 = arith.constant 6 : index
    %c1_367 = arith.constant 1 : index
    %c0_368 = arith.constant 0 : index
    %c0_369 = arith.constant 0 : index
    %280 = vector.load %arg1[%c0_365, %c6_366, %c1_367, %c0_368, %c0_369] : memref<1x8x11x6x3xbf16, #tpu.memory_space<vmem>>, vector<1x1x8x4x3xbf16>
    %281 = vector.shape_cast %280 : vector<1x1x8x4x3xbf16> to vector<8x4x3xbf16>
    %282 = vector.shape_cast %281 : vector<8x4x3xbf16> to vector<32x3xbf16>
    %cst_370 = arith.constant dense<0.000000e+00> : vector<32x8xf32>
    %283 = tpu.matmul %282, %279, %cst_370 {dimension_numbers = #tpu.dot_dimension_numbers<[1], [0], [0], [1], [0, 0, 1, 1], [], []>} : vector<32x3xbf16>, vector<3x8xbf16>, vector<32x8xf32> -> vector<32x8xf32>
    %284 = arith.addf %272, %283 : vector<32x8xf32>
    %c0_371 = arith.constant 0 : index
    %c4_372 = arith.constant 4 : index
    %c1_373 = arith.constant 1 : index
    %c1_374 = arith.constant 1 : index
    %c0_375 = arith.constant 0 : index
    %285 = vector.load %arg1[%c0_371, %c4_372, %c1_373, %c1_374, %c0_375] : memref<1x8x11x6x3xbf16, #tpu.memory_space<vmem>>, vector<1x1x8x4x3xbf16>
    %286 = vector.shape_cast %285 : vector<1x1x8x4x3xbf16> to vector<8x4x3xbf16>
    %287 = vector.shape_cast %286 : vector<8x4x3xbf16> to vector<32x3xbf16>
    %cst_376 = arith.constant dense<0.000000e+00> : vector<32x8xf32>
    %288 = tpu.matmul %287, %279, %cst_376 {dimension_numbers = #tpu.dot_dimension_numbers<[1], [0], [0], [1], [0, 0, 1, 1], [], []>} : vector<32x3xbf16>, vector<3x8xbf16>, vector<32x8xf32> -> vector<32x8xf32>
    %289 = arith.addf %277, %288 : vector<32x8xf32>
    %c3_377 = arith.constant 3 : index
    %c3_378 = arith.constant 3 : index
    %c0_379 = arith.constant 0 : index
    %c0_380 = arith.constant 0 : index
    %290 = vector.load %arg2[%c3_377, %c3_378, %c0_379, %c0_380] : memref<7x7x3x8xbf16, #tpu.memory_space<vmem>>, vector<1x1x3x8xbf16>
    %291 = vector.shape_cast %290 : vector<1x1x3x8xbf16> to vector<3x8xbf16>
    %c0_381 = arith.constant 0 : index
    %c7_382 = arith.constant 7 : index
    %c1_383 = arith.constant 1 : index
    %c0_384 = arith.constant 0 : index
    %c0_385 = arith.constant 0 : index
    %292 = vector.load %arg1[%c0_381, %c7_382, %c1_383, %c0_384, %c0_385] : memref<1x8x11x6x3xbf16, #tpu.memory_space<vmem>>, vector<1x1x8x4x3xbf16>
    %293 = vector.shape_cast %292 : vector<1x1x8x4x3xbf16> to vector<8x4x3xbf16>
    %294 = vector.shape_cast %293 : vector<8x4x3xbf16> to vector<32x3xbf16>
    %cst_386 = arith.constant dense<0.000000e+00> : vector<32x8xf32>
    %295 = tpu.matmul %294, %291, %cst_386 {dimension_numbers = #tpu.dot_dimension_numbers<[1], [0], [0], [1], [0, 0, 1, 1], [], []>} : vector<32x3xbf16>, vector<3x8xbf16>, vector<32x8xf32> -> vector<32x8xf32>
    %296 = arith.addf %284, %295 : vector<32x8xf32>
    %c0_387 = arith.constant 0 : index
    %c5_388 = arith.constant 5 : index
    %c1_389 = arith.constant 1 : index
    %c1_390 = arith.constant 1 : index
    %c0_391 = arith.constant 0 : index
    %297 = vector.load %arg1[%c0_387, %c5_388, %c1_389, %c1_390, %c0_391] : memref<1x8x11x6x3xbf16, #tpu.memory_space<vmem>>, vector<1x1x8x4x3xbf16>
    %298 = vector.shape_cast %297 : vector<1x1x8x4x3xbf16> to vector<8x4x3xbf16>
    %299 = vector.shape_cast %298 : vector<8x4x3xbf16> to vector<32x3xbf16>
    %cst_392 = arith.constant dense<0.000000e+00> : vector<32x8xf32>
    %300 = tpu.matmul %299, %291, %cst_392 {dimension_numbers = #tpu.dot_dimension_numbers<[1], [0], [0], [1], [0, 0, 1, 1], [], []>} : vector<32x3xbf16>, vector<3x8xbf16>, vector<32x8xf32> -> vector<32x8xf32>
    %301 = arith.addf %289, %300 : vector<32x8xf32>
    %c3_393 = arith.constant 3 : index
    %c4_394 = arith.constant 4 : index
    %c0_395 = arith.constant 0 : index
    %c0_396 = arith.constant 0 : index
    %302 = vector.load %arg2[%c3_393, %c4_394, %c0_395, %c0_396] : memref<7x7x3x8xbf16, #tpu.memory_space<vmem>>, vector<1x1x3x8xbf16>
    %303 = vector.shape_cast %302 : vector<1x1x3x8xbf16> to vector<3x8xbf16>
    %c0_397 = arith.constant 0 : index
    %c4_398 = arith.constant 4 : index
    %c1_399 = arith.constant 1 : index
    %c1_400 = arith.constant 1 : index
    %c0_401 = arith.constant 0 : index
    %304 = vector.load %arg1[%c0_397, %c4_398, %c1_399, %c1_400, %c0_401] : memref<1x8x11x6x3xbf16, #tpu.memory_space<vmem>>, vector<1x1x8x4x3xbf16>
    %305 = vector.shape_cast %304 : vector<1x1x8x4x3xbf16> to vector<8x4x3xbf16>
    %306 = vector.shape_cast %305 : vector<8x4x3xbf16> to vector<32x3xbf16>
    %cst_402 = arith.constant dense<0.000000e+00> : vector<32x8xf32>
    %307 = tpu.matmul %306, %303, %cst_402 {dimension_numbers = #tpu.dot_dimension_numbers<[1], [0], [0], [1], [0, 0, 1, 1], [], []>} : vector<32x3xbf16>, vector<3x8xbf16>, vector<32x8xf32> -> vector<32x8xf32>
    %308 = arith.addf %296, %307 : vector<32x8xf32>
    %c0_403 = arith.constant 0 : index
    %c6_404 = arith.constant 6 : index
    %c1_405 = arith.constant 1 : index
    %c1_406 = arith.constant 1 : index
    %c0_407 = arith.constant 0 : index
    %309 = vector.load %arg1[%c0_403, %c6_404, %c1_405, %c1_406, %c0_407] : memref<1x8x11x6x3xbf16, #tpu.memory_space<vmem>>, vector<1x1x8x4x3xbf16>
    %310 = vector.shape_cast %309 : vector<1x1x8x4x3xbf16> to vector<8x4x3xbf16>
    %311 = vector.shape_cast %310 : vector<8x4x3xbf16> to vector<32x3xbf16>
    %cst_408 = arith.constant dense<0.000000e+00> : vector<32x8xf32>
    %312 = tpu.matmul %311, %303, %cst_408 {dimension_numbers = #tpu.dot_dimension_numbers<[1], [0], [0], [1], [0, 0, 1, 1], [], []>} : vector<32x3xbf16>, vector<3x8xbf16>, vector<32x8xf32> -> vector<32x8xf32>
    %313 = arith.addf %301, %312 : vector<32x8xf32>
    %c3_409 = arith.constant 3 : index
    %c5_410 = arith.constant 5 : index
    %c0_411 = arith.constant 0 : index
    %c0_412 = arith.constant 0 : index
    %314 = vector.load %arg2[%c3_409, %c5_410, %c0_411, %c0_412] : memref<7x7x3x8xbf16, #tpu.memory_space<vmem>>, vector<1x1x3x8xbf16>
    %315 = vector.shape_cast %314 : vector<1x1x3x8xbf16> to vector<3x8xbf16>
    %c0_413 = arith.constant 0 : index
    %c5_414 = arith.constant 5 : index
    %c1_415 = arith.constant 1 : index
    %c1_416 = arith.constant 1 : index
    %c0_417 = arith.constant 0 : index
    %316 = vector.load %arg1[%c0_413, %c5_414, %c1_415, %c1_416, %c0_417] : memref<1x8x11x6x3xbf16, #tpu.memory_space<vmem>>, vector<1x1x8x4x3xbf16>
    %317 = vector.shape_cast %316 : vector<1x1x8x4x3xbf16> to vector<8x4x3xbf16>
    %318 = vector.shape_cast %317 : vector<8x4x3xbf16> to vector<32x3xbf16>
    %cst_418 = arith.constant dense<0.000000e+00> : vector<32x8xf32>
    %319 = tpu.matmul %318, %315, %cst_418 {dimension_numbers = #tpu.dot_dimension_numbers<[1], [0], [0], [1], [0, 0, 1, 1], [], []>} : vector<32x3xbf16>, vector<3x8xbf16>, vector<32x8xf32> -> vector<32x8xf32>
    %320 = arith.addf %308, %319 : vector<32x8xf32>
    %c0_419 = arith.constant 0 : index
    %c7_420 = arith.constant 7 : index
    %c1_421 = arith.constant 1 : index
    %c1_422 = arith.constant 1 : index
    %c0_423 = arith.constant 0 : index
    %321 = vector.load %arg1[%c0_419, %c7_420, %c1_421, %c1_422, %c0_423] : memref<1x8x11x6x3xbf16, #tpu.memory_space<vmem>>, vector<1x1x8x4x3xbf16>
    %322 = vector.shape_cast %321 : vector<1x1x8x4x3xbf16> to vector<8x4x3xbf16>
    %323 = vector.shape_cast %322 : vector<8x4x3xbf16> to vector<32x3xbf16>
    %cst_424 = arith.constant dense<0.000000e+00> : vector<32x8xf32>
    %324 = tpu.matmul %323, %315, %cst_424 {dimension_numbers = #tpu.dot_dimension_numbers<[1], [0], [0], [1], [0, 0, 1, 1], [], []>} : vector<32x3xbf16>, vector<3x8xbf16>, vector<32x8xf32> -> vector<32x8xf32>
    %325 = arith.addf %313, %324 : vector<32x8xf32>
    %c3_425 = arith.constant 3 : index
    %c6_426 = arith.constant 6 : index
    %c0_427 = arith.constant 0 : index
    %c0_428 = arith.constant 0 : index
    %326 = vector.load %arg2[%c3_425, %c6_426, %c0_427, %c0_428] : memref<7x7x3x8xbf16, #tpu.memory_space<vmem>>, vector<1x1x3x8xbf16>
    %327 = vector.shape_cast %326 : vector<1x1x3x8xbf16> to vector<3x8xbf16>
    %c0_429 = arith.constant 0 : index
    %c6_430 = arith.constant 6 : index
    %c1_431 = arith.constant 1 : index
    %c1_432 = arith.constant 1 : index
    %c0_433 = arith.constant 0 : index
    %328 = vector.load %arg1[%c0_429, %c6_430, %c1_431, %c1_432, %c0_433] : memref<1x8x11x6x3xbf16, #tpu.memory_space<vmem>>, vector<1x1x8x4x3xbf16>
    %329 = vector.shape_cast %328 : vector<1x1x8x4x3xbf16> to vector<8x4x3xbf16>
    %330 = vector.shape_cast %329 : vector<8x4x3xbf16> to vector<32x3xbf16>
    %cst_434 = arith.constant dense<0.000000e+00> : vector<32x8xf32>
    %331 = tpu.matmul %330, %327, %cst_434 {dimension_numbers = #tpu.dot_dimension_numbers<[1], [0], [0], [1], [0, 0, 1, 1], [], []>} : vector<32x3xbf16>, vector<3x8xbf16>, vector<32x8xf32> -> vector<32x8xf32>
    %332 = arith.addf %320, %331 : vector<32x8xf32>
    %c0_435 = arith.constant 0 : index
    %c4_436 = arith.constant 4 : index
    %c1_437 = arith.constant 1 : index
    %c2_438 = arith.constant 2 : index
    %c0_439 = arith.constant 0 : index
    %333 = vector.load %arg1[%c0_435, %c4_436, %c1_437, %c2_438, %c0_439] : memref<1x8x11x6x3xbf16, #tpu.memory_space<vmem>>, vector<1x1x8x4x3xbf16>
    %334 = vector.shape_cast %333 : vector<1x1x8x4x3xbf16> to vector<8x4x3xbf16>
    %335 = vector.shape_cast %334 : vector<8x4x3xbf16> to vector<32x3xbf16>
    %cst_440 = arith.constant dense<0.000000e+00> : vector<32x8xf32>
    %336 = tpu.matmul %335, %327, %cst_440 {dimension_numbers = #tpu.dot_dimension_numbers<[1], [0], [0], [1], [0, 0, 1, 1], [], []>} : vector<32x3xbf16>, vector<3x8xbf16>, vector<32x8xf32> -> vector<32x8xf32>
    %337 = arith.addf %325, %336 : vector<32x8xf32>
    %c4_441 = arith.constant 4 : index
    %c0_442 = arith.constant 0 : index
    %c0_443 = arith.constant 0 : index
    %c0_444 = arith.constant 0 : index
    %338 = vector.load %arg2[%c4_441, %c0_442, %c0_443, %c0_444] : memref<7x7x3x8xbf16, #tpu.memory_space<vmem>>, vector<1x1x3x8xbf16>
    %339 = vector.shape_cast %338 : vector<1x1x3x8xbf16> to vector<3x8xbf16>
    %c0_445 = arith.constant 0 : index
    %c0_446 = arith.constant 0 : index
    %c2_447 = arith.constant 2 : index
    %c0_448 = arith.constant 0 : index
    %c0_449 = arith.constant 0 : index
    %340 = vector.load %arg1[%c0_445, %c0_446, %c2_447, %c0_448, %c0_449] : memref<1x8x11x6x3xbf16, #tpu.memory_space<vmem>>, vector<1x1x8x4x3xbf16>
    %341 = vector.shape_cast %340 : vector<1x1x8x4x3xbf16> to vector<8x4x3xbf16>
    %342 = vector.shape_cast %341 : vector<8x4x3xbf16> to vector<32x3xbf16>
    %cst_450 = arith.constant dense<0.000000e+00> : vector<32x8xf32>
    %343 = tpu.matmul %342, %339, %cst_450 {dimension_numbers = #tpu.dot_dimension_numbers<[1], [0], [0], [1], [0, 0, 1, 1], [], []>} : vector<32x3xbf16>, vector<3x8xbf16>, vector<32x8xf32> -> vector<32x8xf32>
    %344 = arith.addf %332, %343 : vector<32x8xf32>
    %c0_451 = arith.constant 0 : index
    %c2_452 = arith.constant 2 : index
    %c2_453 = arith.constant 2 : index
    %c0_454 = arith.constant 0 : index
    %c0_455 = arith.constant 0 : index
    %345 = vector.load %arg1[%c0_451, %c2_452, %c2_453, %c0_454, %c0_455] : memref<1x8x11x6x3xbf16, #tpu.memory_space<vmem>>, vector<1x1x8x4x3xbf16>
    %346 = vector.shape_cast %345 : vector<1x1x8x4x3xbf16> to vector<8x4x3xbf16>
    %347 = vector.shape_cast %346 : vector<8x4x3xbf16> to vector<32x3xbf16>
    %cst_456 = arith.constant dense<0.000000e+00> : vector<32x8xf32>
    %348 = tpu.matmul %347, %339, %cst_456 {dimension_numbers = #tpu.dot_dimension_numbers<[1], [0], [0], [1], [0, 0, 1, 1], [], []>} : vector<32x3xbf16>, vector<3x8xbf16>, vector<32x8xf32> -> vector<32x8xf32>
    %349 = arith.addf %337, %348 : vector<32x8xf32>
    %c4_457 = arith.constant 4 : index
    %c1_458 = arith.constant 1 : index
    %c0_459 = arith.constant 0 : index
    %c0_460 = arith.constant 0 : index
    %350 = vector.load %arg2[%c4_457, %c1_458, %c0_459, %c0_460] : memref<7x7x3x8xbf16, #tpu.memory_space<vmem>>, vector<1x1x3x8xbf16>
    %351 = vector.shape_cast %350 : vector<1x1x3x8xbf16> to vector<3x8xbf16>
    %c0_461 = arith.constant 0 : index
    %c1_462 = arith.constant 1 : index
    %c2_463 = arith.constant 2 : index
    %c0_464 = arith.constant 0 : index
    %c0_465 = arith.constant 0 : index
    %352 = vector.load %arg1[%c0_461, %c1_462, %c2_463, %c0_464, %c0_465] : memref<1x8x11x6x3xbf16, #tpu.memory_space<vmem>>, vector<1x1x8x4x3xbf16>
    %353 = vector.shape_cast %352 : vector<1x1x8x4x3xbf16> to vector<8x4x3xbf16>
    %354 = vector.shape_cast %353 : vector<8x4x3xbf16> to vector<32x3xbf16>
    %cst_466 = arith.constant dense<0.000000e+00> : vector<32x8xf32>
    %355 = tpu.matmul %354, %351, %cst_466 {dimension_numbers = #tpu.dot_dimension_numbers<[1], [0], [0], [1], [0, 0, 1, 1], [], []>} : vector<32x3xbf16>, vector<3x8xbf16>, vector<32x8xf32> -> vector<32x8xf32>
    %356 = arith.addf %344, %355 : vector<32x8xf32>
    %c0_467 = arith.constant 0 : index
    %c3_468 = arith.constant 3 : index
    %c2_469 = arith.constant 2 : index
    %c0_470 = arith.constant 0 : index
    %c0_471 = arith.constant 0 : index
    %357 = vector.load %arg1[%c0_467, %c3_468, %c2_469, %c0_470, %c0_471] : memref<1x8x11x6x3xbf16, #tpu.memory_space<vmem>>, vector<1x1x8x4x3xbf16>
    %358 = vector.shape_cast %357 : vector<1x1x8x4x3xbf16> to vector<8x4x3xbf16>
    %359 = vector.shape_cast %358 : vector<8x4x3xbf16> to vector<32x3xbf16>
    %cst_472 = arith.constant dense<0.000000e+00> : vector<32x8xf32>
    %360 = tpu.matmul %359, %351, %cst_472 {dimension_numbers = #tpu.dot_dimension_numbers<[1], [0], [0], [1], [0, 0, 1, 1], [], []>} : vector<32x3xbf16>, vector<3x8xbf16>, vector<32x8xf32> -> vector<32x8xf32>
    %361 = arith.addf %349, %360 : vector<32x8xf32>
    %c4_473 = arith.constant 4 : index
    %c2_474 = arith.constant 2 : index
    %c0_475 = arith.constant 0 : index
    %c0_476 = arith.constant 0 : index
    %362 = vector.load %arg2[%c4_473, %c2_474, %c0_475, %c0_476] : memref<7x7x3x8xbf16, #tpu.memory_space<vmem>>, vector<1x1x3x8xbf16>
    %363 = vector.shape_cast %362 : vector<1x1x3x8xbf16> to vector<3x8xbf16>
    %c0_477 = arith.constant 0 : index
    %c2_478 = arith.constant 2 : index
    %c2_479 = arith.constant 2 : index
    %c0_480 = arith.constant 0 : index
    %c0_481 = arith.constant 0 : index
    %364 = vector.load %arg1[%c0_477, %c2_478, %c2_479, %c0_480, %c0_481] : memref<1x8x11x6x3xbf16, #tpu.memory_space<vmem>>, vector<1x1x8x4x3xbf16>
    %365 = vector.shape_cast %364 : vector<1x1x8x4x3xbf16> to vector<8x4x3xbf16>
    %366 = vector.shape_cast %365 : vector<8x4x3xbf16> to vector<32x3xbf16>
    %cst_482 = arith.constant dense<0.000000e+00> : vector<32x8xf32>
    %367 = tpu.matmul %366, %363, %cst_482 {dimension_numbers = #tpu.dot_dimension_numbers<[1], [0], [0], [1], [0, 0, 1, 1], [], []>} : vector<32x3xbf16>, vector<3x8xbf16>, vector<32x8xf32> -> vector<32x8xf32>
    %368 = arith.addf %356, %367 : vector<32x8xf32>
    %c0_483 = arith.constant 0 : index
    %c0_484 = arith.constant 0 : index
    %c2_485 = arith.constant 2 : index
    %c1_486 = arith.constant 1 : index
    %c0_487 = arith.constant 0 : index
    %369 = vector.load %arg1[%c0_483, %c0_484, %c2_485, %c1_486, %c0_487] : memref<1x8x11x6x3xbf16, #tpu.memory_space<vmem>>, vector<1x1x8x4x3xbf16>
    %370 = vector.shape_cast %369 : vector<1x1x8x4x3xbf16> to vector<8x4x3xbf16>
    %371 = vector.shape_cast %370 : vector<8x4x3xbf16> to vector<32x3xbf16>
    %cst_488 = arith.constant dense<0.000000e+00> : vector<32x8xf32>
    %372 = tpu.matmul %371, %363, %cst_488 {dimension_numbers = #tpu.dot_dimension_numbers<[1], [0], [0], [1], [0, 0, 1, 1], [], []>} : vector<32x3xbf16>, vector<3x8xbf16>, vector<32x8xf32> -> vector<32x8xf32>
    %373 = arith.addf %361, %372 : vector<32x8xf32>
    %c4_489 = arith.constant 4 : index
    %c3_490 = arith.constant 3 : index
    %c0_491 = arith.constant 0 : index
    %c0_492 = arith.constant 0 : index
    %374 = vector.load %arg2[%c4_489, %c3_490, %c0_491, %c0_492] : memref<7x7x3x8xbf16, #tpu.memory_space<vmem>>, vector<1x1x3x8xbf16>
    %375 = vector.shape_cast %374 : vector<1x1x3x8xbf16> to vector<3x8xbf16>
    %c0_493 = arith.constant 0 : index
    %c3_494 = arith.constant 3 : index
    %c2_495 = arith.constant 2 : index
    %c0_496 = arith.constant 0 : index
    %c0_497 = arith.constant 0 : index
    %376 = vector.load %arg1[%c0_493, %c3_494, %c2_495, %c0_496, %c0_497] : memref<1x8x11x6x3xbf16, #tpu.memory_space<vmem>>, vector<1x1x8x4x3xbf16>
    %377 = vector.shape_cast %376 : vector<1x1x8x4x3xbf16> to vector<8x4x3xbf16>
    %378 = vector.shape_cast %377 : vector<8x4x3xbf16> to vector<32x3xbf16>
    %cst_498 = arith.constant dense<0.000000e+00> : vector<32x8xf32>
    %379 = tpu.matmul %378, %375, %cst_498 {dimension_numbers = #tpu.dot_dimension_numbers<[1], [0], [0], [1], [0, 0, 1, 1], [], []>} : vector<32x3xbf16>, vector<3x8xbf16>, vector<32x8xf32> -> vector<32x8xf32>
    %380 = arith.addf %368, %379 : vector<32x8xf32>
    %c0_499 = arith.constant 0 : index
    %c1_500 = arith.constant 1 : index
    %c2_501 = arith.constant 2 : index
    %c1_502 = arith.constant 1 : index
    %c0_503 = arith.constant 0 : index
    %381 = vector.load %arg1[%c0_499, %c1_500, %c2_501, %c1_502, %c0_503] : memref<1x8x11x6x3xbf16, #tpu.memory_space<vmem>>, vector<1x1x8x4x3xbf16>
    %382 = vector.shape_cast %381 : vector<1x1x8x4x3xbf16> to vector<8x4x3xbf16>
    %383 = vector.shape_cast %382 : vector<8x4x3xbf16> to vector<32x3xbf16>
    %cst_504 = arith.constant dense<0.000000e+00> : vector<32x8xf32>
    %384 = tpu.matmul %383, %375, %cst_504 {dimension_numbers = #tpu.dot_dimension_numbers<[1], [0], [0], [1], [0, 0, 1, 1], [], []>} : vector<32x3xbf16>, vector<3x8xbf16>, vector<32x8xf32> -> vector<32x8xf32>
    %385 = arith.addf %373, %384 : vector<32x8xf32>
    %c4_505 = arith.constant 4 : index
    %c4_506 = arith.constant 4 : index
    %c0_507 = arith.constant 0 : index
    %c0_508 = arith.constant 0 : index
    %386 = vector.load %arg2[%c4_505, %c4_506, %c0_507, %c0_508] : memref<7x7x3x8xbf16, #tpu.memory_space<vmem>>, vector<1x1x3x8xbf16>
    %387 = vector.shape_cast %386 : vector<1x1x3x8xbf16> to vector<3x8xbf16>
    %c0_509 = arith.constant 0 : index
    %c0_510 = arith.constant 0 : index
    %c2_511 = arith.constant 2 : index
    %c1_512 = arith.constant 1 : index
    %c0_513 = arith.constant 0 : index
    %388 = vector.load %arg1[%c0_509, %c0_510, %c2_511, %c1_512, %c0_513] : memref<1x8x11x6x3xbf16, #tpu.memory_space<vmem>>, vector<1x1x8x4x3xbf16>
    %389 = vector.shape_cast %388 : vector<1x1x8x4x3xbf16> to vector<8x4x3xbf16>
    %390 = vector.shape_cast %389 : vector<8x4x3xbf16> to vector<32x3xbf16>
    %cst_514 = arith.constant dense<0.000000e+00> : vector<32x8xf32>
    %391 = tpu.matmul %390, %387, %cst_514 {dimension_numbers = #tpu.dot_dimension_numbers<[1], [0], [0], [1], [0, 0, 1, 1], [], []>} : vector<32x3xbf16>, vector<3x8xbf16>, vector<32x8xf32> -> vector<32x8xf32>
    %392 = arith.addf %380, %391 : vector<32x8xf32>
    %c0_515 = arith.constant 0 : index
    %c2_516 = arith.constant 2 : index
    %c2_517 = arith.constant 2 : index
    %c1_518 = arith.constant 1 : index
    %c0_519 = arith.constant 0 : index
    %393 = vector.load %arg1[%c0_515, %c2_516, %c2_517, %c1_518, %c0_519] : memref<1x8x11x6x3xbf16, #tpu.memory_space<vmem>>, vector<1x1x8x4x3xbf16>
    %394 = vector.shape_cast %393 : vector<1x1x8x4x3xbf16> to vector<8x4x3xbf16>
    %395 = vector.shape_cast %394 : vector<8x4x3xbf16> to vector<32x3xbf16>
    %cst_520 = arith.constant dense<0.000000e+00> : vector<32x8xf32>
    %396 = tpu.matmul %395, %387, %cst_520 {dimension_numbers = #tpu.dot_dimension_numbers<[1], [0], [0], [1], [0, 0, 1, 1], [], []>} : vector<32x3xbf16>, vector<3x8xbf16>, vector<32x8xf32> -> vector<32x8xf32>
    %397 = arith.addf %385, %396 : vector<32x8xf32>
    %c4_521 = arith.constant 4 : index
    %c5_522 = arith.constant 5 : index
    %c0_523 = arith.constant 0 : index
    %c0_524 = arith.constant 0 : index
    %398 = vector.load %arg2[%c4_521, %c5_522, %c0_523, %c0_524] : memref<7x7x3x8xbf16, #tpu.memory_space<vmem>>, vector<1x1x3x8xbf16>
    %399 = vector.shape_cast %398 : vector<1x1x3x8xbf16> to vector<3x8xbf16>
    %c0_525 = arith.constant 0 : index
    %c1_526 = arith.constant 1 : index
    %c2_527 = arith.constant 2 : index
    %c1_528 = arith.constant 1 : index
    %c0_529 = arith.constant 0 : index
    %400 = vector.load %arg1[%c0_525, %c1_526, %c2_527, %c1_528, %c0_529] : memref<1x8x11x6x3xbf16, #tpu.memory_space<vmem>>, vector<1x1x8x4x3xbf16>
    %401 = vector.shape_cast %400 : vector<1x1x8x4x3xbf16> to vector<8x4x3xbf16>
    %402 = vector.shape_cast %401 : vector<8x4x3xbf16> to vector<32x3xbf16>
    %cst_530 = arith.constant dense<0.000000e+00> : vector<32x8xf32>
    %403 = tpu.matmul %402, %399, %cst_530 {dimension_numbers = #tpu.dot_dimension_numbers<[1], [0], [0], [1], [0, 0, 1, 1], [], []>} : vector<32x3xbf16>, vector<3x8xbf16>, vector<32x8xf32> -> vector<32x8xf32>
    %404 = arith.addf %392, %403 : vector<32x8xf32>
    %c0_531 = arith.constant 0 : index
    %c3_532 = arith.constant 3 : index
    %c2_533 = arith.constant 2 : index
    %c1_534 = arith.constant 1 : index
    %c0_535 = arith.constant 0 : index
    %405 = vector.load %arg1[%c0_531, %c3_532, %c2_533, %c1_534, %c0_535] : memref<1x8x11x6x3xbf16, #tpu.memory_space<vmem>>, vector<1x1x8x4x3xbf16>
    %406 = vector.shape_cast %405 : vector<1x1x8x4x3xbf16> to vector<8x4x3xbf16>
    %407 = vector.shape_cast %406 : vector<8x4x3xbf16> to vector<32x3xbf16>
    %cst_536 = arith.constant dense<0.000000e+00> : vector<32x8xf32>
    %408 = tpu.matmul %407, %399, %cst_536 {dimension_numbers = #tpu.dot_dimension_numbers<[1], [0], [0], [1], [0, 0, 1, 1], [], []>} : vector<32x3xbf16>, vector<3x8xbf16>, vector<32x8xf32> -> vector<32x8xf32>
    %409 = arith.addf %397, %408 : vector<32x8xf32>
    %c4_537 = arith.constant 4 : index
    %c6_538 = arith.constant 6 : index
    %c0_539 = arith.constant 0 : index
    %c0_540 = arith.constant 0 : index
    %410 = vector.load %arg2[%c4_537, %c6_538, %c0_539, %c0_540] : memref<7x7x3x8xbf16, #tpu.memory_space<vmem>>, vector<1x1x3x8xbf16>
    %411 = vector.shape_cast %410 : vector<1x1x3x8xbf16> to vector<3x8xbf16>
    %c0_541 = arith.constant 0 : index
    %c2_542 = arith.constant 2 : index
    %c2_543 = arith.constant 2 : index
    %c1_544 = arith.constant 1 : index
    %c0_545 = arith.constant 0 : index
    %412 = vector.load %arg1[%c0_541, %c2_542, %c2_543, %c1_544, %c0_545] : memref<1x8x11x6x3xbf16, #tpu.memory_space<vmem>>, vector<1x1x8x4x3xbf16>
    %413 = vector.shape_cast %412 : vector<1x1x8x4x3xbf16> to vector<8x4x3xbf16>
    %414 = vector.shape_cast %413 : vector<8x4x3xbf16> to vector<32x3xbf16>
    %cst_546 = arith.constant dense<0.000000e+00> : vector<32x8xf32>
    %415 = tpu.matmul %414, %411, %cst_546 {dimension_numbers = #tpu.dot_dimension_numbers<[1], [0], [0], [1], [0, 0, 1, 1], [], []>} : vector<32x3xbf16>, vector<3x8xbf16>, vector<32x8xf32> -> vector<32x8xf32>
    %416 = arith.addf %404, %415 : vector<32x8xf32>
    %c0_547 = arith.constant 0 : index
    %c0_548 = arith.constant 0 : index
    %c2_549 = arith.constant 2 : index
    %c2_550 = arith.constant 2 : index
    %c0_551 = arith.constant 0 : index
    %417 = vector.load %arg1[%c0_547, %c0_548, %c2_549, %c2_550, %c0_551] : memref<1x8x11x6x3xbf16, #tpu.memory_space<vmem>>, vector<1x1x8x4x3xbf16>
    %418 = vector.shape_cast %417 : vector<1x1x8x4x3xbf16> to vector<8x4x3xbf16>
    %419 = vector.shape_cast %418 : vector<8x4x3xbf16> to vector<32x3xbf16>
    %cst_552 = arith.constant dense<0.000000e+00> : vector<32x8xf32>
    %420 = tpu.matmul %419, %411, %cst_552 {dimension_numbers = #tpu.dot_dimension_numbers<[1], [0], [0], [1], [0, 0, 1, 1], [], []>} : vector<32x3xbf16>, vector<3x8xbf16>, vector<32x8xf32> -> vector<32x8xf32>
    %421 = arith.addf %409, %420 : vector<32x8xf32>
    %c5_553 = arith.constant 5 : index
    %c0_554 = arith.constant 0 : index
    %c0_555 = arith.constant 0 : index
    %c0_556 = arith.constant 0 : index
    %422 = vector.load %arg2[%c5_553, %c0_554, %c0_555, %c0_556] : memref<7x7x3x8xbf16, #tpu.memory_space<vmem>>, vector<1x1x3x8xbf16>
    %423 = vector.shape_cast %422 : vector<1x1x3x8xbf16> to vector<3x8xbf16>
    %c0_557 = arith.constant 0 : index
    %c4_558 = arith.constant 4 : index
    %c2_559 = arith.constant 2 : index
    %c0_560 = arith.constant 0 : index
    %c0_561 = arith.constant 0 : index
    %424 = vector.load %arg1[%c0_557, %c4_558, %c2_559, %c0_560, %c0_561] : memref<1x8x11x6x3xbf16, #tpu.memory_space<vmem>>, vector<1x1x8x4x3xbf16>
    %425 = vector.shape_cast %424 : vector<1x1x8x4x3xbf16> to vector<8x4x3xbf16>
    %426 = vector.shape_cast %425 : vector<8x4x3xbf16> to vector<32x3xbf16>
    %cst_562 = arith.constant dense<0.000000e+00> : vector<32x8xf32>
    %427 = tpu.matmul %426, %423, %cst_562 {dimension_numbers = #tpu.dot_dimension_numbers<[1], [0], [0], [1], [0, 0, 1, 1], [], []>} : vector<32x3xbf16>, vector<3x8xbf16>, vector<32x8xf32> -> vector<32x8xf32>
    %428 = arith.addf %416, %427 : vector<32x8xf32>
    %c0_563 = arith.constant 0 : index
    %c6_564 = arith.constant 6 : index
    %c2_565 = arith.constant 2 : index
    %c0_566 = arith.constant 0 : index
    %c0_567 = arith.constant 0 : index
    %429 = vector.load %arg1[%c0_563, %c6_564, %c2_565, %c0_566, %c0_567] : memref<1x8x11x6x3xbf16, #tpu.memory_space<vmem>>, vector<1x1x8x4x3xbf16>
    %430 = vector.shape_cast %429 : vector<1x1x8x4x3xbf16> to vector<8x4x3xbf16>
    %431 = vector.shape_cast %430 : vector<8x4x3xbf16> to vector<32x3xbf16>
    %cst_568 = arith.constant dense<0.000000e+00> : vector<32x8xf32>
    %432 = tpu.matmul %431, %423, %cst_568 {dimension_numbers = #tpu.dot_dimension_numbers<[1], [0], [0], [1], [0, 0, 1, 1], [], []>} : vector<32x3xbf16>, vector<3x8xbf16>, vector<32x8xf32> -> vector<32x8xf32>
    %433 = arith.addf %421, %432 : vector<32x8xf32>
    %c5_569 = arith.constant 5 : index
    %c1_570 = arith.constant 1 : index
    %c0_571 = arith.constant 0 : index
    %c0_572 = arith.constant 0 : index
    %434 = vector.load %arg2[%c5_569, %c1_570, %c0_571, %c0_572] : memref<7x7x3x8xbf16, #tpu.memory_space<vmem>>, vector<1x1x3x8xbf16>
    %435 = vector.shape_cast %434 : vector<1x1x3x8xbf16> to vector<3x8xbf16>
    %c0_573 = arith.constant 0 : index
    %c5_574 = arith.constant 5 : index
    %c2_575 = arith.constant 2 : index
    %c0_576 = arith.constant 0 : index
    %c0_577 = arith.constant 0 : index
    %436 = vector.load %arg1[%c0_573, %c5_574, %c2_575, %c0_576, %c0_577] : memref<1x8x11x6x3xbf16, #tpu.memory_space<vmem>>, vector<1x1x8x4x3xbf16>
    %437 = vector.shape_cast %436 : vector<1x1x8x4x3xbf16> to vector<8x4x3xbf16>
    %438 = vector.shape_cast %437 : vector<8x4x3xbf16> to vector<32x3xbf16>
    %cst_578 = arith.constant dense<0.000000e+00> : vector<32x8xf32>
    %439 = tpu.matmul %438, %435, %cst_578 {dimension_numbers = #tpu.dot_dimension_numbers<[1], [0], [0], [1], [0, 0, 1, 1], [], []>} : vector<32x3xbf16>, vector<3x8xbf16>, vector<32x8xf32> -> vector<32x8xf32>
    %440 = arith.addf %428, %439 : vector<32x8xf32>
    %c0_579 = arith.constant 0 : index
    %c7_580 = arith.constant 7 : index
    %c2_581 = arith.constant 2 : index
    %c0_582 = arith.constant 0 : index
    %c0_583 = arith.constant 0 : index
    %441 = vector.load %arg1[%c0_579, %c7_580, %c2_581, %c0_582, %c0_583] : memref<1x8x11x6x3xbf16, #tpu.memory_space<vmem>>, vector<1x1x8x4x3xbf16>
    %442 = vector.shape_cast %441 : vector<1x1x8x4x3xbf16> to vector<8x4x3xbf16>
    %443 = vector.shape_cast %442 : vector<8x4x3xbf16> to vector<32x3xbf16>
    %cst_584 = arith.constant dense<0.000000e+00> : vector<32x8xf32>
    %444 = tpu.matmul %443, %435, %cst_584 {dimension_numbers = #tpu.dot_dimension_numbers<[1], [0], [0], [1], [0, 0, 1, 1], [], []>} : vector<32x3xbf16>, vector<3x8xbf16>, vector<32x8xf32> -> vector<32x8xf32>
    %445 = arith.addf %433, %444 : vector<32x8xf32>
    %c5_585 = arith.constant 5 : index
    %c2_586 = arith.constant 2 : index
    %c0_587 = arith.constant 0 : index
    %c0_588 = arith.constant 0 : index
    %446 = vector.load %arg2[%c5_585, %c2_586, %c0_587, %c0_588] : memref<7x7x3x8xbf16, #tpu.memory_space<vmem>>, vector<1x1x3x8xbf16>
    %447 = vector.shape_cast %446 : vector<1x1x3x8xbf16> to vector<3x8xbf16>
    %c0_589 = arith.constant 0 : index
    %c6_590 = arith.constant 6 : index
    %c2_591 = arith.constant 2 : index
    %c0_592 = arith.constant 0 : index
    %c0_593 = arith.constant 0 : index
    %448 = vector.load %arg1[%c0_589, %c6_590, %c2_591, %c0_592, %c0_593] : memref<1x8x11x6x3xbf16, #tpu.memory_space<vmem>>, vector<1x1x8x4x3xbf16>
    %449 = vector.shape_cast %448 : vector<1x1x8x4x3xbf16> to vector<8x4x3xbf16>
    %450 = vector.shape_cast %449 : vector<8x4x3xbf16> to vector<32x3xbf16>
    %cst_594 = arith.constant dense<0.000000e+00> : vector<32x8xf32>
    %451 = tpu.matmul %450, %447, %cst_594 {dimension_numbers = #tpu.dot_dimension_numbers<[1], [0], [0], [1], [0, 0, 1, 1], [], []>} : vector<32x3xbf16>, vector<3x8xbf16>, vector<32x8xf32> -> vector<32x8xf32>
    %452 = arith.addf %440, %451 : vector<32x8xf32>
    %c0_595 = arith.constant 0 : index
    %c4_596 = arith.constant 4 : index
    %c2_597 = arith.constant 2 : index
    %c1_598 = arith.constant 1 : index
    %c0_599 = arith.constant 0 : index
    %453 = vector.load %arg1[%c0_595, %c4_596, %c2_597, %c1_598, %c0_599] : memref<1x8x11x6x3xbf16, #tpu.memory_space<vmem>>, vector<1x1x8x4x3xbf16>
    %454 = vector.shape_cast %453 : vector<1x1x8x4x3xbf16> to vector<8x4x3xbf16>
    %455 = vector.shape_cast %454 : vector<8x4x3xbf16> to vector<32x3xbf16>
    %cst_600 = arith.constant dense<0.000000e+00> : vector<32x8xf32>
    %456 = tpu.matmul %455, %447, %cst_600 {dimension_numbers = #tpu.dot_dimension_numbers<[1], [0], [0], [1], [0, 0, 1, 1], [], []>} : vector<32x3xbf16>, vector<3x8xbf16>, vector<32x8xf32> -> vector<32x8xf32>
    %457 = arith.addf %445, %456 : vector<32x8xf32>
    %c5_601 = arith.constant 5 : index
    %c3_602 = arith.constant 3 : index
    %c0_603 = arith.constant 0 : index
    %c0_604 = arith.constant 0 : index
    %458 = vector.load %arg2[%c5_601, %c3_602, %c0_603, %c0_604] : memref<7x7x3x8xbf16, #tpu.memory_space<vmem>>, vector<1x1x3x8xbf16>
    %459 = vector.shape_cast %458 : vector<1x1x3x8xbf16> to vector<3x8xbf16>
    %c0_605 = arith.constant 0 : index
    %c7_606 = arith.constant 7 : index
    %c2_607 = arith.constant 2 : index
    %c0_608 = arith.constant 0 : index
    %c0_609 = arith.constant 0 : index
    %460 = vector.load %arg1[%c0_605, %c7_606, %c2_607, %c0_608, %c0_609] : memref<1x8x11x6x3xbf16, #tpu.memory_space<vmem>>, vector<1x1x8x4x3xbf16>
    %461 = vector.shape_cast %460 : vector<1x1x8x4x3xbf16> to vector<8x4x3xbf16>
    %462 = vector.shape_cast %461 : vector<8x4x3xbf16> to vector<32x3xbf16>
    %cst_610 = arith.constant dense<0.000000e+00> : vector<32x8xf32>
    %463 = tpu.matmul %462, %459, %cst_610 {dimension_numbers = #tpu.dot_dimension_numbers<[1], [0], [0], [1], [0, 0, 1, 1], [], []>} : vector<32x3xbf16>, vector<3x8xbf16>, vector<32x8xf32> -> vector<32x8xf32>
    %464 = arith.addf %452, %463 : vector<32x8xf32>
    %c0_611 = arith.constant 0 : index
    %c5_612 = arith.constant 5 : index
    %c2_613 = arith.constant 2 : index
    %c1_614 = arith.constant 1 : index
    %c0_615 = arith.constant 0 : index
    %465 = vector.load %arg1[%c0_611, %c5_612, %c2_613, %c1_614, %c0_615] : memref<1x8x11x6x3xbf16, #tpu.memory_space<vmem>>, vector<1x1x8x4x3xbf16>
    %466 = vector.shape_cast %465 : vector<1x1x8x4x3xbf16> to vector<8x4x3xbf16>
    %467 = vector.shape_cast %466 : vector<8x4x3xbf16> to vector<32x3xbf16>
    %cst_616 = arith.constant dense<0.000000e+00> : vector<32x8xf32>
    %468 = tpu.matmul %467, %459, %cst_616 {dimension_numbers = #tpu.dot_dimension_numbers<[1], [0], [0], [1], [0, 0, 1, 1], [], []>} : vector<32x3xbf16>, vector<3x8xbf16>, vector<32x8xf32> -> vector<32x8xf32>
    %469 = arith.addf %457, %468 : vector<32x8xf32>
    %c5_617 = arith.constant 5 : index
    %c4_618 = arith.constant 4 : index
    %c0_619 = arith.constant 0 : index
    %c0_620 = arith.constant 0 : index
    %470 = vector.load %arg2[%c5_617, %c4_618, %c0_619, %c0_620] : memref<7x7x3x8xbf16, #tpu.memory_space<vmem>>, vector<1x1x3x8xbf16>
    %471 = vector.shape_cast %470 : vector<1x1x3x8xbf16> to vector<3x8xbf16>
    %c0_621 = arith.constant 0 : index
    %c4_622 = arith.constant 4 : index
    %c2_623 = arith.constant 2 : index
    %c1_624 = arith.constant 1 : index
    %c0_625 = arith.constant 0 : index
    %472 = vector.load %arg1[%c0_621, %c4_622, %c2_623, %c1_624, %c0_625] : memref<1x8x11x6x3xbf16, #tpu.memory_space<vmem>>, vector<1x1x8x4x3xbf16>
    %473 = vector.shape_cast %472 : vector<1x1x8x4x3xbf16> to vector<8x4x3xbf16>
    %474 = vector.shape_cast %473 : vector<8x4x3xbf16> to vector<32x3xbf16>
    %cst_626 = arith.constant dense<0.000000e+00> : vector<32x8xf32>
    %475 = tpu.matmul %474, %471, %cst_626 {dimension_numbers = #tpu.dot_dimension_numbers<[1], [0], [0], [1], [0, 0, 1, 1], [], []>} : vector<32x3xbf16>, vector<3x8xbf16>, vector<32x8xf32> -> vector<32x8xf32>
    %476 = arith.addf %464, %475 : vector<32x8xf32>
    %c0_627 = arith.constant 0 : index
    %c6_628 = arith.constant 6 : index
    %c2_629 = arith.constant 2 : index
    %c1_630 = arith.constant 1 : index
    %c0_631 = arith.constant 0 : index
    %477 = vector.load %arg1[%c0_627, %c6_628, %c2_629, %c1_630, %c0_631] : memref<1x8x11x6x3xbf16, #tpu.memory_space<vmem>>, vector<1x1x8x4x3xbf16>
    %478 = vector.shape_cast %477 : vector<1x1x8x4x3xbf16> to vector<8x4x3xbf16>
    %479 = vector.shape_cast %478 : vector<8x4x3xbf16> to vector<32x3xbf16>
    %cst_632 = arith.constant dense<0.000000e+00> : vector<32x8xf32>
    %480 = tpu.matmul %479, %471, %cst_632 {dimension_numbers = #tpu.dot_dimension_numbers<[1], [0], [0], [1], [0, 0, 1, 1], [], []>} : vector<32x3xbf16>, vector<3x8xbf16>, vector<32x8xf32> -> vector<32x8xf32>
    %481 = arith.addf %469, %480 : vector<32x8xf32>
    %c5_633 = arith.constant 5 : index
    %c5_634 = arith.constant 5 : index
    %c0_635 = arith.constant 0 : index
    %c0_636 = arith.constant 0 : index
    %482 = vector.load %arg2[%c5_633, %c5_634, %c0_635, %c0_636] : memref<7x7x3x8xbf16, #tpu.memory_space<vmem>>, vector<1x1x3x8xbf16>
    %483 = vector.shape_cast %482 : vector<1x1x3x8xbf16> to vector<3x8xbf16>
    %c0_637 = arith.constant 0 : index
    %c5_638 = arith.constant 5 : index
    %c2_639 = arith.constant 2 : index
    %c1_640 = arith.constant 1 : index
    %c0_641 = arith.constant 0 : index
    %484 = vector.load %arg1[%c0_637, %c5_638, %c2_639, %c1_640, %c0_641] : memref<1x8x11x6x3xbf16, #tpu.memory_space<vmem>>, vector<1x1x8x4x3xbf16>
    %485 = vector.shape_cast %484 : vector<1x1x8x4x3xbf16> to vector<8x4x3xbf16>
    %486 = vector.shape_cast %485 : vector<8x4x3xbf16> to vector<32x3xbf16>
    %cst_642 = arith.constant dense<0.000000e+00> : vector<32x8xf32>
    %487 = tpu.matmul %486, %483, %cst_642 {dimension_numbers = #tpu.dot_dimension_numbers<[1], [0], [0], [1], [0, 0, 1, 1], [], []>} : vector<32x3xbf16>, vector<3x8xbf16>, vector<32x8xf32> -> vector<32x8xf32>
    %488 = arith.addf %476, %487 : vector<32x8xf32>
    %c0_643 = arith.constant 0 : index
    %c7_644 = arith.constant 7 : index
    %c2_645 = arith.constant 2 : index
    %c1_646 = arith.constant 1 : index
    %c0_647 = arith.constant 0 : index
    %489 = vector.load %arg1[%c0_643, %c7_644, %c2_645, %c1_646, %c0_647] : memref<1x8x11x6x3xbf16, #tpu.memory_space<vmem>>, vector<1x1x8x4x3xbf16>
    %490 = vector.shape_cast %489 : vector<1x1x8x4x3xbf16> to vector<8x4x3xbf16>
    %491 = vector.shape_cast %490 : vector<8x4x3xbf16> to vector<32x3xbf16>
    %cst_648 = arith.constant dense<0.000000e+00> : vector<32x8xf32>
    %492 = tpu.matmul %491, %483, %cst_648 {dimension_numbers = #tpu.dot_dimension_numbers<[1], [0], [0], [1], [0, 0, 1, 1], [], []>} : vector<32x3xbf16>, vector<3x8xbf16>, vector<32x8xf32> -> vector<32x8xf32>
    %493 = arith.addf %481, %492 : vector<32x8xf32>
    %c5_649 = arith.constant 5 : index
    %c6_650 = arith.constant 6 : index
    %c0_651 = arith.constant 0 : index
    %c0_652 = arith.constant 0 : index
    %494 = vector.load %arg2[%c5_649, %c6_650, %c0_651, %c0_652] : memref<7x7x3x8xbf16, #tpu.memory_space<vmem>>, vector<1x1x3x8xbf16>
    %495 = vector.shape_cast %494 : vector<1x1x3x8xbf16> to vector<3x8xbf16>
    %c0_653 = arith.constant 0 : index
    %c6_654 = arith.constant 6 : index
    %c2_655 = arith.constant 2 : index
    %c1_656 = arith.constant 1 : index
    %c0_657 = arith.constant 0 : index
    %496 = vector.load %arg1[%c0_653, %c6_654, %c2_655, %c1_656, %c0_657] : memref<1x8x11x6x3xbf16, #tpu.memory_space<vmem>>, vector<1x1x8x4x3xbf16>
    %497 = vector.shape_cast %496 : vector<1x1x8x4x3xbf16> to vector<8x4x3xbf16>
    %498 = vector.shape_cast %497 : vector<8x4x3xbf16> to vector<32x3xbf16>
    %cst_658 = arith.constant dense<0.000000e+00> : vector<32x8xf32>
    %499 = tpu.matmul %498, %495, %cst_658 {dimension_numbers = #tpu.dot_dimension_numbers<[1], [0], [0], [1], [0, 0, 1, 1], [], []>} : vector<32x3xbf16>, vector<3x8xbf16>, vector<32x8xf32> -> vector<32x8xf32>
    %500 = arith.addf %488, %499 : vector<32x8xf32>
    %c0_659 = arith.constant 0 : index
    %c4_660 = arith.constant 4 : index
    %c2_661 = arith.constant 2 : index
    %c2_662 = arith.constant 2 : index
    %c0_663 = arith.constant 0 : index
    %501 = vector.load %arg1[%c0_659, %c4_660, %c2_661, %c2_662, %c0_663] : memref<1x8x11x6x3xbf16, #tpu.memory_space<vmem>>, vector<1x1x8x4x3xbf16>
    %502 = vector.shape_cast %501 : vector<1x1x8x4x3xbf16> to vector<8x4x3xbf16>
    %503 = vector.shape_cast %502 : vector<8x4x3xbf16> to vector<32x3xbf16>
    %cst_664 = arith.constant dense<0.000000e+00> : vector<32x8xf32>
    %504 = tpu.matmul %503, %495, %cst_664 {dimension_numbers = #tpu.dot_dimension_numbers<[1], [0], [0], [1], [0, 0, 1, 1], [], []>} : vector<32x3xbf16>, vector<3x8xbf16>, vector<32x8xf32> -> vector<32x8xf32>
    %505 = arith.addf %493, %504 : vector<32x8xf32>
    %c6_665 = arith.constant 6 : index
    %c0_666 = arith.constant 0 : index
    %c0_667 = arith.constant 0 : index
    %c0_668 = arith.constant 0 : index
    %506 = vector.load %arg2[%c6_665, %c0_666, %c0_667, %c0_668] : memref<7x7x3x8xbf16, #tpu.memory_space<vmem>>, vector<1x1x3x8xbf16>
    %507 = vector.shape_cast %506 : vector<1x1x3x8xbf16> to vector<3x8xbf16>
    %c0_669 = arith.constant 0 : index
    %c0_670 = arith.constant 0 : index
    %c3_671 = arith.constant 3 : index
    %c0_672 = arith.constant 0 : index
    %c0_673 = arith.constant 0 : index
    %508 = vector.load %arg1[%c0_669, %c0_670, %c3_671, %c0_672, %c0_673] : memref<1x8x11x6x3xbf16, #tpu.memory_space<vmem>>, vector<1x1x8x4x3xbf16>
    %509 = vector.shape_cast %508 : vector<1x1x8x4x3xbf16> to vector<8x4x3xbf16>
    %510 = vector.shape_cast %509 : vector<8x4x3xbf16> to vector<32x3xbf16>
    %cst_674 = arith.constant dense<0.000000e+00> : vector<32x8xf32>
    %511 = tpu.matmul %510, %507, %cst_674 {dimension_numbers = #tpu.dot_dimension_numbers<[1], [0], [0], [1], [0, 0, 1, 1], [], []>} : vector<32x3xbf16>, vector<3x8xbf16>, vector<32x8xf32> -> vector<32x8xf32>
    %512 = arith.addf %500, %511 : vector<32x8xf32>
    %c0_675 = arith.constant 0 : index
    %c2_676 = arith.constant 2 : index
    %c3_677 = arith.constant 3 : index
    %c0_678 = arith.constant 0 : index
    %c0_679 = arith.constant 0 : index
    %513 = vector.load %arg1[%c0_675, %c2_676, %c3_677, %c0_678, %c0_679] : memref<1x8x11x6x3xbf16, #tpu.memory_space<vmem>>, vector<1x1x8x4x3xbf16>
    %514 = vector.shape_cast %513 : vector<1x1x8x4x3xbf16> to vector<8x4x3xbf16>
    %515 = vector.shape_cast %514 : vector<8x4x3xbf16> to vector<32x3xbf16>
    %cst_680 = arith.constant dense<0.000000e+00> : vector<32x8xf32>
    %516 = tpu.matmul %515, %507, %cst_680 {dimension_numbers = #tpu.dot_dimension_numbers<[1], [0], [0], [1], [0, 0, 1, 1], [], []>} : vector<32x3xbf16>, vector<3x8xbf16>, vector<32x8xf32> -> vector<32x8xf32>
    %517 = arith.addf %505, %516 : vector<32x8xf32>
    %c6_681 = arith.constant 6 : index
    %c1_682 = arith.constant 1 : index
    %c0_683 = arith.constant 0 : index
    %c0_684 = arith.constant 0 : index
    %518 = vector.load %arg2[%c6_681, %c1_682, %c0_683, %c0_684] : memref<7x7x3x8xbf16, #tpu.memory_space<vmem>>, vector<1x1x3x8xbf16>
    %519 = vector.shape_cast %518 : vector<1x1x3x8xbf16> to vector<3x8xbf16>
    %c0_685 = arith.constant 0 : index
    %c1_686 = arith.constant 1 : index
    %c3_687 = arith.constant 3 : index
    %c0_688 = arith.constant 0 : index
    %c0_689 = arith.constant 0 : index
    %520 = vector.load %arg1[%c0_685, %c1_686, %c3_687, %c0_688, %c0_689] : memref<1x8x11x6x3xbf16, #tpu.memory_space<vmem>>, vector<1x1x8x4x3xbf16>
    %521 = vector.shape_cast %520 : vector<1x1x8x4x3xbf16> to vector<8x4x3xbf16>
    %522 = vector.shape_cast %521 : vector<8x4x3xbf16> to vector<32x3xbf16>
    %cst_690 = arith.constant dense<0.000000e+00> : vector<32x8xf32>
    %523 = tpu.matmul %522, %519, %cst_690 {dimension_numbers = #tpu.dot_dimension_numbers<[1], [0], [0], [1], [0, 0, 1, 1], [], []>} : vector<32x3xbf16>, vector<3x8xbf16>, vector<32x8xf32> -> vector<32x8xf32>
    %524 = arith.addf %512, %523 : vector<32x8xf32>
    %c0_691 = arith.constant 0 : index
    %c3_692 = arith.constant 3 : index
    %c3_693 = arith.constant 3 : index
    %c0_694 = arith.constant 0 : index
    %c0_695 = arith.constant 0 : index
    %525 = vector.load %arg1[%c0_691, %c3_692, %c3_693, %c0_694, %c0_695] : memref<1x8x11x6x3xbf16, #tpu.memory_space<vmem>>, vector<1x1x8x4x3xbf16>
    %526 = vector.shape_cast %525 : vector<1x1x8x4x3xbf16> to vector<8x4x3xbf16>
    %527 = vector.shape_cast %526 : vector<8x4x3xbf16> to vector<32x3xbf16>
    %cst_696 = arith.constant dense<0.000000e+00> : vector<32x8xf32>
    %528 = tpu.matmul %527, %519, %cst_696 {dimension_numbers = #tpu.dot_dimension_numbers<[1], [0], [0], [1], [0, 0, 1, 1], [], []>} : vector<32x3xbf16>, vector<3x8xbf16>, vector<32x8xf32> -> vector<32x8xf32>
    %529 = arith.addf %517, %528 : vector<32x8xf32>
    %c6_697 = arith.constant 6 : index
    %c2_698 = arith.constant 2 : index
    %c0_699 = arith.constant 0 : index
    %c0_700 = arith.constant 0 : index
    %530 = vector.load %arg2[%c6_697, %c2_698, %c0_699, %c0_700] : memref<7x7x3x8xbf16, #tpu.memory_space<vmem>>, vector<1x1x3x8xbf16>
    %531 = vector.shape_cast %530 : vector<1x1x3x8xbf16> to vector<3x8xbf16>
    %c0_701 = arith.constant 0 : index
    %c2_702 = arith.constant 2 : index
    %c3_703 = arith.constant 3 : index
    %c0_704 = arith.constant 0 : index
    %c0_705 = arith.constant 0 : index
    %532 = vector.load %arg1[%c0_701, %c2_702, %c3_703, %c0_704, %c0_705] : memref<1x8x11x6x3xbf16, #tpu.memory_space<vmem>>, vector<1x1x8x4x3xbf16>
    %533 = vector.shape_cast %532 : vector<1x1x8x4x3xbf16> to vector<8x4x3xbf16>
    %534 = vector.shape_cast %533 : vector<8x4x3xbf16> to vector<32x3xbf16>
    %cst_706 = arith.constant dense<0.000000e+00> : vector<32x8xf32>
    %535 = tpu.matmul %534, %531, %cst_706 {dimension_numbers = #tpu.dot_dimension_numbers<[1], [0], [0], [1], [0, 0, 1, 1], [], []>} : vector<32x3xbf16>, vector<3x8xbf16>, vector<32x8xf32> -> vector<32x8xf32>
    %536 = arith.addf %524, %535 : vector<32x8xf32>
    %c0_707 = arith.constant 0 : index
    %c0_708 = arith.constant 0 : index
    %c3_709 = arith.constant 3 : index
    %c1_710 = arith.constant 1 : index
    %c0_711 = arith.constant 0 : index
    %537 = vector.load %arg1[%c0_707, %c0_708, %c3_709, %c1_710, %c0_711] : memref<1x8x11x6x3xbf16, #tpu.memory_space<vmem>>, vector<1x1x8x4x3xbf16>
    %538 = vector.shape_cast %537 : vector<1x1x8x4x3xbf16> to vector<8x4x3xbf16>
    %539 = vector.shape_cast %538 : vector<8x4x3xbf16> to vector<32x3xbf16>
    %cst_712 = arith.constant dense<0.000000e+00> : vector<32x8xf32>
    %540 = tpu.matmul %539, %531, %cst_712 {dimension_numbers = #tpu.dot_dimension_numbers<[1], [0], [0], [1], [0, 0, 1, 1], [], []>} : vector<32x3xbf16>, vector<3x8xbf16>, vector<32x8xf32> -> vector<32x8xf32>
    %541 = arith.addf %529, %540 : vector<32x8xf32>
    %c6_713 = arith.constant 6 : index
    %c3_714 = arith.constant 3 : index
    %c0_715 = arith.constant 0 : index
    %c0_716 = arith.constant 0 : index
    %542 = vector.load %arg2[%c6_713, %c3_714, %c0_715, %c0_716] : memref<7x7x3x8xbf16, #tpu.memory_space<vmem>>, vector<1x1x3x8xbf16>
    %543 = vector.shape_cast %542 : vector<1x1x3x8xbf16> to vector<3x8xbf16>
    %c0_717 = arith.constant 0 : index
    %c3_718 = arith.constant 3 : index
    %c3_719 = arith.constant 3 : index
    %c0_720 = arith.constant 0 : index
    %c0_721 = arith.constant 0 : index
    %544 = vector.load %arg1[%c0_717, %c3_718, %c3_719, %c0_720, %c0_721] : memref<1x8x11x6x3xbf16, #tpu.memory_space<vmem>>, vector<1x1x8x4x3xbf16>
    %545 = vector.shape_cast %544 : vector<1x1x8x4x3xbf16> to vector<8x4x3xbf16>
    %546 = vector.shape_cast %545 : vector<8x4x3xbf16> to vector<32x3xbf16>
    %cst_722 = arith.constant dense<0.000000e+00> : vector<32x8xf32>
    %547 = tpu.matmul %546, %543, %cst_722 {dimension_numbers = #tpu.dot_dimension_numbers<[1], [0], [0], [1], [0, 0, 1, 1], [], []>} : vector<32x3xbf16>, vector<3x8xbf16>, vector<32x8xf32> -> vector<32x8xf32>
    %548 = arith.addf %536, %547 : vector<32x8xf32>
    %c0_723 = arith.constant 0 : index
    %c1_724 = arith.constant 1 : index
    %c3_725 = arith.constant 3 : index
    %c1_726 = arith.constant 1 : index
    %c0_727 = arith.constant 0 : index
    %549 = vector.load %arg1[%c0_723, %c1_724, %c3_725, %c1_726, %c0_727] : memref<1x8x11x6x3xbf16, #tpu.memory_space<vmem>>, vector<1x1x8x4x3xbf16>
    %550 = vector.shape_cast %549 : vector<1x1x8x4x3xbf16> to vector<8x4x3xbf16>
    %551 = vector.shape_cast %550 : vector<8x4x3xbf16> to vector<32x3xbf16>
    %cst_728 = arith.constant dense<0.000000e+00> : vector<32x8xf32>
    %552 = tpu.matmul %551, %543, %cst_728 {dimension_numbers = #tpu.dot_dimension_numbers<[1], [0], [0], [1], [0, 0, 1, 1], [], []>} : vector<32x3xbf16>, vector<3x8xbf16>, vector<32x8xf32> -> vector<32x8xf32>
    %553 = arith.addf %541, %552 : vector<32x8xf32>
    %c6_729 = arith.constant 6 : index
    %c4_730 = arith.constant 4 : index
    %c0_731 = arith.constant 0 : index
    %c0_732 = arith.constant 0 : index
    %554 = vector.load %arg2[%c6_729, %c4_730, %c0_731, %c0_732] : memref<7x7x3x8xbf16, #tpu.memory_space<vmem>>, vector<1x1x3x8xbf16>
    %555 = vector.shape_cast %554 : vector<1x1x3x8xbf16> to vector<3x8xbf16>
    %c0_733 = arith.constant 0 : index
    %c0_734 = arith.constant 0 : index
    %c3_735 = arith.constant 3 : index
    %c1_736 = arith.constant 1 : index
    %c0_737 = arith.constant 0 : index
    %556 = vector.load %arg1[%c0_733, %c0_734, %c3_735, %c1_736, %c0_737] : memref<1x8x11x6x3xbf16, #tpu.memory_space<vmem>>, vector<1x1x8x4x3xbf16>
    %557 = vector.shape_cast %556 : vector<1x1x8x4x3xbf16> to vector<8x4x3xbf16>
    %558 = vector.shape_cast %557 : vector<8x4x3xbf16> to vector<32x3xbf16>
    %cst_738 = arith.constant dense<0.000000e+00> : vector<32x8xf32>
    %559 = tpu.matmul %558, %555, %cst_738 {dimension_numbers = #tpu.dot_dimension_numbers<[1], [0], [0], [1], [0, 0, 1, 1], [], []>} : vector<32x3xbf16>, vector<3x8xbf16>, vector<32x8xf32> -> vector<32x8xf32>
    %560 = arith.addf %548, %559 : vector<32x8xf32>
    %c0_739 = arith.constant 0 : index
    %c2_740 = arith.constant 2 : index
    %c3_741 = arith.constant 3 : index
    %c1_742 = arith.constant 1 : index
    %c0_743 = arith.constant 0 : index
    %561 = vector.load %arg1[%c0_739, %c2_740, %c3_741, %c1_742, %c0_743] : memref<1x8x11x6x3xbf16, #tpu.memory_space<vmem>>, vector<1x1x8x4x3xbf16>
    %562 = vector.shape_cast %561 : vector<1x1x8x4x3xbf16> to vector<8x4x3xbf16>
    %563 = vector.shape_cast %562 : vector<8x4x3xbf16> to vector<32x3xbf16>
    %cst_744 = arith.constant dense<0.000000e+00> : vector<32x8xf32>
    %564 = tpu.matmul %563, %555, %cst_744 {dimension_numbers = #tpu.dot_dimension_numbers<[1], [0], [0], [1], [0, 0, 1, 1], [], []>} : vector<32x3xbf16>, vector<3x8xbf16>, vector<32x8xf32> -> vector<32x8xf32>
    %565 = arith.addf %553, %564 : vector<32x8xf32>
    %c6_745 = arith.constant 6 : index
    %c5_746 = arith.constant 5 : index
    %c0_747 = arith.constant 0 : index
    %c0_748 = arith.constant 0 : index
    %566 = vector.load %arg2[%c6_745, %c5_746, %c0_747, %c0_748] : memref<7x7x3x8xbf16, #tpu.memory_space<vmem>>, vector<1x1x3x8xbf16>
    %567 = vector.shape_cast %566 : vector<1x1x3x8xbf16> to vector<3x8xbf16>
    %c0_749 = arith.constant 0 : index
    %c1_750 = arith.constant 1 : index
    %c3_751 = arith.constant 3 : index
    %c1_752 = arith.constant 1 : index
    %c0_753 = arith.constant 0 : index
    %568 = vector.load %arg1[%c0_749, %c1_750, %c3_751, %c1_752, %c0_753] : memref<1x8x11x6x3xbf16, #tpu.memory_space<vmem>>, vector<1x1x8x4x3xbf16>
    %569 = vector.shape_cast %568 : vector<1x1x8x4x3xbf16> to vector<8x4x3xbf16>
    %570 = vector.shape_cast %569 : vector<8x4x3xbf16> to vector<32x3xbf16>
    %cst_754 = arith.constant dense<0.000000e+00> : vector<32x8xf32>
    %571 = tpu.matmul %570, %567, %cst_754 {dimension_numbers = #tpu.dot_dimension_numbers<[1], [0], [0], [1], [0, 0, 1, 1], [], []>} : vector<32x3xbf16>, vector<3x8xbf16>, vector<32x8xf32> -> vector<32x8xf32>
    %572 = arith.addf %560, %571 : vector<32x8xf32>
    %c0_755 = arith.constant 0 : index
    %c3_756 = arith.constant 3 : index
    %c3_757 = arith.constant 3 : index
    %c1_758 = arith.constant 1 : index
    %c0_759 = arith.constant 0 : index
    %573 = vector.load %arg1[%c0_755, %c3_756, %c3_757, %c1_758, %c0_759] : memref<1x8x11x6x3xbf16, #tpu.memory_space<vmem>>, vector<1x1x8x4x3xbf16>
    %574 = vector.shape_cast %573 : vector<1x1x8x4x3xbf16> to vector<8x4x3xbf16>
    %575 = vector.shape_cast %574 : vector<8x4x3xbf16> to vector<32x3xbf16>
    %cst_760 = arith.constant dense<0.000000e+00> : vector<32x8xf32>
    %576 = tpu.matmul %575, %567, %cst_760 {dimension_numbers = #tpu.dot_dimension_numbers<[1], [0], [0], [1], [0, 0, 1, 1], [], []>} : vector<32x3xbf16>, vector<3x8xbf16>, vector<32x8xf32> -> vector<32x8xf32>
    %577 = arith.addf %565, %576 : vector<32x8xf32>
    %c6_761 = arith.constant 6 : index
    %c6_762 = arith.constant 6 : index
    %c0_763 = arith.constant 0 : index
    %c0_764 = arith.constant 0 : index
    %578 = vector.load %arg2[%c6_761, %c6_762, %c0_763, %c0_764] : memref<7x7x3x8xbf16, #tpu.memory_space<vmem>>, vector<1x1x3x8xbf16>
    %579 = vector.shape_cast %578 : vector<1x1x3x8xbf16> to vector<3x8xbf16>
    %c0_765 = arith.constant 0 : index
    %c2_766 = arith.constant 2 : index
    %c3_767 = arith.constant 3 : index
    %c1_768 = arith.constant 1 : index
    %c0_769 = arith.constant 0 : index
    %580 = vector.load %arg1[%c0_765, %c2_766, %c3_767, %c1_768, %c0_769] : memref<1x8x11x6x3xbf16, #tpu.memory_space<vmem>>, vector<1x1x8x4x3xbf16>
    %581 = vector.shape_cast %580 : vector<1x1x8x4x3xbf16> to vector<8x4x3xbf16>
    %582 = vector.shape_cast %581 : vector<8x4x3xbf16> to vector<32x3xbf16>
    %cst_770 = arith.constant dense<0.000000e+00> : vector<32x8xf32>
    %583 = tpu.matmul %582, %579, %cst_770 {dimension_numbers = #tpu.dot_dimension_numbers<[1], [0], [0], [1], [0, 0, 1, 1], [], []>} : vector<32x3xbf16>, vector<3x8xbf16>, vector<32x8xf32> -> vector<32x8xf32>
    %584 = arith.addf %572, %583 : vector<32x8xf32>
    %c0_771 = arith.constant 0 : index
    %c0_772 = arith.constant 0 : index
    %c3_773 = arith.constant 3 : index
    %c2_774 = arith.constant 2 : index
    %c0_775 = arith.constant 0 : index
    %585 = vector.load %arg1[%c0_771, %c0_772, %c3_773, %c2_774, %c0_775] : memref<1x8x11x6x3xbf16, #tpu.memory_space<vmem>>, vector<1x1x8x4x3xbf16>
    %586 = vector.shape_cast %585 : vector<1x1x8x4x3xbf16> to vector<8x4x3xbf16>
    %587 = vector.shape_cast %586 : vector<8x4x3xbf16> to vector<32x3xbf16>
    %cst_776 = arith.constant dense<0.000000e+00> : vector<32x8xf32>
    %588 = tpu.matmul %587, %579, %cst_776 {dimension_numbers = #tpu.dot_dimension_numbers<[1], [0], [0], [1], [0, 0, 1, 1], [], []>} : vector<32x3xbf16>, vector<3x8xbf16>, vector<32x8xf32> -> vector<32x8xf32>
    %589 = arith.addf %577, %588 : vector<32x8xf32>
    %c0_777 = arith.constant 0 : index
    %c0_778 = arith.constant 0 : index
    %590 = vector.load %arg3[%c0_777, %c0_778] : memref<1x8xf32, #tpu.memory_space<vmem>>, vector<1x8xf32>
    %c0_779 = arith.constant 0 : index
    %c0_780 = arith.constant 0 : index
    %591 = vector.load %arg4[%c0_779, %c0_780] : memref<1x8xf32, #tpu.memory_space<vmem>>, vector<1x8xf32>
    %592 = vector.broadcast %590 : vector<1x8xf32> to vector<32x8xf32>
    %593 = arith.mulf %584, %592 : vector<32x8xf32>
    %594 = vector.broadcast %591 : vector<1x8xf32> to vector<32x8xf32>
    %595 = arith.addf %593, %594 : vector<32x8xf32>
    %cst_781 = arith.constant 0.000000e+00 : f32
    %596 = vector.broadcast %cst_781 : f32 to vector<32x8xf32>
    %597 = arith.maximumf %595, %596 : vector<32x8xf32>
    %598 = vector.broadcast %590 : vector<1x8xf32> to vector<32x8xf32>
    %599 = arith.mulf %589, %598 : vector<32x8xf32>
    %600 = vector.broadcast %591 : vector<1x8xf32> to vector<32x8xf32>
    %601 = arith.addf %599, %600 : vector<32x8xf32>
    %cst_782 = arith.constant 0.000000e+00 : f32
    %602 = vector.broadcast %cst_782 : f32 to vector<32x8xf32>
    %603 = arith.maximumf %601, %602 : vector<32x8xf32>
    %c0_783 = arith.constant 0 : index
    %c0_784 = arith.constant 0 : index
    %604 = vector.load %arg6[%c0_783, %c0_784] : memref<32x32xf32, #tpu.memory_space<vmem>>, vector<32x32xf32>
    %cst_785 = arith.constant dense<0.000000e+00> : vector<32x8xf32>
    %605 = tpu.matmul %604, %603, %cst_785 {dimension_numbers = #tpu.dot_dimension_numbers<[1], [0], [0], [1], [0, 0, 1, 1], [], []>} : vector<32x32xf32>, vector<32x8xf32>, vector<32x8xf32> -> vector<32x8xf32>
    %606 = arith.maximumf %597, %603 : vector<32x8xf32>
    %607 = arith.maximumf %606, %605 : vector<32x8xf32>
    %608 = vector.shape_cast %607 : vector<32x8xf32> to vector<4x2x4x8xf32>
    %609 = vector.extract_strided_slice %608 {offsets = [0, 0, 0, 0], sizes = [4, 1, 4, 8], strides = [1, 1, 1, 1]} : vector<4x2x4x8xf32> to vector<4x1x4x8xf32>
    %610 = vector.shape_cast %609 : vector<4x1x4x8xf32> to vector<4x4x8xf32>
    %611 = vector.extract_strided_slice %608 {offsets = [0, 1, 0, 0], sizes = [4, 1, 4, 8], strides = [1, 1, 1, 1]} : vector<4x2x4x8xf32> to vector<4x1x4x8xf32>
    %612 = vector.shape_cast %611 : vector<4x1x4x8xf32> to vector<4x4x8xf32>
    %cst_786 = arith.constant 0.000000e+00 : f32
    %613 = vector.broadcast %cst_786 : f32 to vector<1x4x8xf32>
    %614 = vector.extract_strided_slice %612 {offsets = [0, 0, 0], sizes = [3, 4, 8], strides = [1, 1, 1]} : vector<4x4x8xf32> to vector<3x4x8xf32>
    %615 = tpu.concatenate %613, %614 in 0 : vector<1x4x8xf32>, vector<3x4x8xf32> -> vector<4x4x8xf32>
    %616 = arith.maximumf %610, %612 : vector<4x4x8xf32>
    %617 = arith.maximumf %616, %615 : vector<4x4x8xf32>
    %c0_787 = arith.constant 0 : index
    %c0_788 = arith.constant 0 : index
    %618 = vector.load %arg7[%c0_787, %c0_788] : memref<36x16xf32, #tpu.memory_space<vmem>>, vector<36x16xf32>
    %619 = vector.shape_cast %617 : vector<4x4x8xf32> to vector<16x8xf32>
    %cst_789 = arith.constant dense<0.000000e+00> : vector<36x8xf32>
    %620 = tpu.matmul %618, %619, %cst_789 {dimension_numbers = #tpu.dot_dimension_numbers<[1], [0], [0], [1], [0, 0, 1, 1], [], []>} : vector<36x16xf32>, vector<16x8xf32>, vector<36x8xf32> -> vector<36x8xf32>
    %621 = vector.shape_cast %620 : vector<36x8xf32> to vector<6x6x8xf32>
    %622 = arith.truncf %621 : vector<6x6x8xf32> to vector<6x6x8xbf16>
    %cst_790 = arith.constant 0.000000e+00 : f32
    %623 = vector.broadcast %cst_790 : f32 to vector<16x8xf32>
    %624 = vector.extract_strided_slice %622 {offsets = [0, 0, 0], sizes = [4, 4, 8], strides = [1, 1, 1]} : vector<6x6x8xbf16> to vector<4x4x8xbf16>
    %625 = vector.shape_cast %624 : vector<4x4x8xbf16> to vector<16x8xbf16>
    %c0_791 = arith.constant 0 : index
    %c0_792 = arith.constant 0 : index
    %c0_793 = arith.constant 0 : index
    %c0_794 = arith.constant 0 : index
    %626 = vector.load %arg5[%c0_791, %c0_792, %c0_793, %c0_794] : memref<3x3x8x8xbf16, #tpu.memory_space<vmem>>, vector<1x1x8x8xbf16>
    %627 = vector.shape_cast %626 : vector<1x1x8x8xbf16> to vector<8x8xbf16>
    %cst_795 = arith.constant dense<0.000000e+00> : vector<16x8xf32>
    %628 = tpu.matmul %625, %627, %cst_795 {dimension_numbers = #tpu.dot_dimension_numbers<[1], [0], [0], [1], [0, 0, 1, 1], [], []>} : vector<16x8xbf16>, vector<8x8xbf16>, vector<16x8xf32> -> vector<16x8xf32>
    %629 = arith.addf %623, %628 : vector<16x8xf32>
    %630 = vector.extract_strided_slice %622 {offsets = [0, 1, 0], sizes = [4, 4, 8], strides = [1, 1, 1]} : vector<6x6x8xbf16> to vector<4x4x8xbf16>
    %631 = vector.shape_cast %630 : vector<4x4x8xbf16> to vector<16x8xbf16>
    %c0_796 = arith.constant 0 : index
    %c1_797 = arith.constant 1 : index
    %c0_798 = arith.constant 0 : index
    %c0_799 = arith.constant 0 : index
    %632 = vector.load %arg5[%c0_796, %c1_797, %c0_798, %c0_799] : memref<3x3x8x8xbf16, #tpu.memory_space<vmem>>, vector<1x1x8x8xbf16>
    %633 = vector.shape_cast %632 : vector<1x1x8x8xbf16> to vector<8x8xbf16>
    %cst_800 = arith.constant dense<0.000000e+00> : vector<16x8xf32>
    %634 = tpu.matmul %631, %633, %cst_800 {dimension_numbers = #tpu.dot_dimension_numbers<[1], [0], [0], [1], [0, 0, 1, 1], [], []>} : vector<16x8xbf16>, vector<8x8xbf16>, vector<16x8xf32> -> vector<16x8xf32>
    %635 = arith.addf %629, %634 : vector<16x8xf32>
    %636 = vector.extract_strided_slice %622 {offsets = [0, 2, 0], sizes = [4, 4, 8], strides = [1, 1, 1]} : vector<6x6x8xbf16> to vector<4x4x8xbf16>
    %637 = vector.shape_cast %636 : vector<4x4x8xbf16> to vector<16x8xbf16>
    %c0_801 = arith.constant 0 : index
    %c2_802 = arith.constant 2 : index
    %c0_803 = arith.constant 0 : index
    %c0_804 = arith.constant 0 : index
    %638 = vector.load %arg5[%c0_801, %c2_802, %c0_803, %c0_804] : memref<3x3x8x8xbf16, #tpu.memory_space<vmem>>, vector<1x1x8x8xbf16>
    %639 = vector.shape_cast %638 : vector<1x1x8x8xbf16> to vector<8x8xbf16>
    %cst_805 = arith.constant dense<0.000000e+00> : vector<16x8xf32>
    %640 = tpu.matmul %637, %639, %cst_805 {dimension_numbers = #tpu.dot_dimension_numbers<[1], [0], [0], [1], [0, 0, 1, 1], [], []>} : vector<16x8xbf16>, vector<8x8xbf16>, vector<16x8xf32> -> vector<16x8xf32>
    %641 = arith.addf %635, %640 : vector<16x8xf32>
    %642 = vector.extract_strided_slice %622 {offsets = [1, 0, 0], sizes = [4, 4, 8], strides = [1, 1, 1]} : vector<6x6x8xbf16> to vector<4x4x8xbf16>
    %643 = vector.shape_cast %642 : vector<4x4x8xbf16> to vector<16x8xbf16>
    %c1_806 = arith.constant 1 : index
    %c0_807 = arith.constant 0 : index
    %c0_808 = arith.constant 0 : index
    %c0_809 = arith.constant 0 : index
    %644 = vector.load %arg5[%c1_806, %c0_807, %c0_808, %c0_809] : memref<3x3x8x8xbf16, #tpu.memory_space<vmem>>, vector<1x1x8x8xbf16>
    %645 = vector.shape_cast %644 : vector<1x1x8x8xbf16> to vector<8x8xbf16>
    %cst_810 = arith.constant dense<0.000000e+00> : vector<16x8xf32>
    %646 = tpu.matmul %643, %645, %cst_810 {dimension_numbers = #tpu.dot_dimension_numbers<[1], [0], [0], [1], [0, 0, 1, 1], [], []>} : vector<16x8xbf16>, vector<8x8xbf16>, vector<16x8xf32> -> vector<16x8xf32>
    %647 = arith.addf %641, %646 : vector<16x8xf32>
    %648 = vector.extract_strided_slice %622 {offsets = [1, 1, 0], sizes = [4, 4, 8], strides = [1, 1, 1]} : vector<6x6x8xbf16> to vector<4x4x8xbf16>
    %649 = vector.shape_cast %648 : vector<4x4x8xbf16> to vector<16x8xbf16>
    %c1_811 = arith.constant 1 : index
    %c1_812 = arith.constant 1 : index
    %c0_813 = arith.constant 0 : index
    %c0_814 = arith.constant 0 : index
    %650 = vector.load %arg5[%c1_811, %c1_812, %c0_813, %c0_814] : memref<3x3x8x8xbf16, #tpu.memory_space<vmem>>, vector<1x1x8x8xbf16>
    %651 = vector.shape_cast %650 : vector<1x1x8x8xbf16> to vector<8x8xbf16>
    %cst_815 = arith.constant dense<0.000000e+00> : vector<16x8xf32>
    %652 = tpu.matmul %649, %651, %cst_815 {dimension_numbers = #tpu.dot_dimension_numbers<[1], [0], [0], [1], [0, 0, 1, 1], [], []>} : vector<16x8xbf16>, vector<8x8xbf16>, vector<16x8xf32> -> vector<16x8xf32>
    %653 = arith.addf %647, %652 : vector<16x8xf32>
    %654 = vector.extract_strided_slice %622 {offsets = [1, 2, 0], sizes = [4, 4, 8], strides = [1, 1, 1]} : vector<6x6x8xbf16> to vector<4x4x8xbf16>
    %655 = vector.shape_cast %654 : vector<4x4x8xbf16> to vector<16x8xbf16>
    %c1_816 = arith.constant 1 : index
    %c2_817 = arith.constant 2 : index
    %c0_818 = arith.constant 0 : index
    %c0_819 = arith.constant 0 : index
    %656 = vector.load %arg5[%c1_816, %c2_817, %c0_818, %c0_819] : memref<3x3x8x8xbf16, #tpu.memory_space<vmem>>, vector<1x1x8x8xbf16>
    %657 = vector.shape_cast %656 : vector<1x1x8x8xbf16> to vector<8x8xbf16>
    %cst_820 = arith.constant dense<0.000000e+00> : vector<16x8xf32>
    %658 = tpu.matmul %655, %657, %cst_820 {dimension_numbers = #tpu.dot_dimension_numbers<[1], [0], [0], [1], [0, 0, 1, 1], [], []>} : vector<16x8xbf16>, vector<8x8xbf16>, vector<16x8xf32> -> vector<16x8xf32>
    %659 = arith.addf %653, %658 : vector<16x8xf32>
    %660 = vector.extract_strided_slice %622 {offsets = [2, 0, 0], sizes = [4, 4, 8], strides = [1, 1, 1]} : vector<6x6x8xbf16> to vector<4x4x8xbf16>
    %661 = vector.shape_cast %660 : vector<4x4x8xbf16> to vector<16x8xbf16>
    %c2_821 = arith.constant 2 : index
    %c0_822 = arith.constant 0 : index
    %c0_823 = arith.constant 0 : index
    %c0_824 = arith.constant 0 : index
    %662 = vector.load %arg5[%c2_821, %c0_822, %c0_823, %c0_824] : memref<3x3x8x8xbf16, #tpu.memory_space<vmem>>, vector<1x1x8x8xbf16>
    %663 = vector.shape_cast %662 : vector<1x1x8x8xbf16> to vector<8x8xbf16>
    %cst_825 = arith.constant dense<0.000000e+00> : vector<16x8xf32>
    %664 = tpu.matmul %661, %663, %cst_825 {dimension_numbers = #tpu.dot_dimension_numbers<[1], [0], [0], [1], [0, 0, 1, 1], [], []>} : vector<16x8xbf16>, vector<8x8xbf16>, vector<16x8xf32> -> vector<16x8xf32>
    %665 = arith.addf %659, %664 : vector<16x8xf32>
    %666 = vector.extract_strided_slice %622 {offsets = [2, 1, 0], sizes = [4, 4, 8], strides = [1, 1, 1]} : vector<6x6x8xbf16> to vector<4x4x8xbf16>
    %667 = vector.shape_cast %666 : vector<4x4x8xbf16> to vector<16x8xbf16>
    %c2_826 = arith.constant 2 : index
    %c1_827 = arith.constant 1 : index
    %c0_828 = arith.constant 0 : index
    %c0_829 = arith.constant 0 : index
    %668 = vector.load %arg5[%c2_826, %c1_827, %c0_828, %c0_829] : memref<3x3x8x8xbf16, #tpu.memory_space<vmem>>, vector<1x1x8x8xbf16>
    %669 = vector.shape_cast %668 : vector<1x1x8x8xbf16> to vector<8x8xbf16>
    %cst_830 = arith.constant dense<0.000000e+00> : vector<16x8xf32>
    %670 = tpu.matmul %667, %669, %cst_830 {dimension_numbers = #tpu.dot_dimension_numbers<[1], [0], [0], [1], [0, 0, 1, 1], [], []>} : vector<16x8xbf16>, vector<8x8xbf16>, vector<16x8xf32> -> vector<16x8xf32>
    %671 = arith.addf %665, %670 : vector<16x8xf32>
    %672 = vector.extract_strided_slice %622 {offsets = [2, 2, 0], sizes = [4, 4, 8], strides = [1, 1, 1]} : vector<6x6x8xbf16> to vector<4x4x8xbf16>
    %673 = vector.shape_cast %672 : vector<4x4x8xbf16> to vector<16x8xbf16>
    %c2_831 = arith.constant 2 : index
    %c2_832 = arith.constant 2 : index
    %c0_833 = arith.constant 0 : index
    %c0_834 = arith.constant 0 : index
    %674 = vector.load %arg5[%c2_831, %c2_832, %c0_833, %c0_834] : memref<3x3x8x8xbf16, #tpu.memory_space<vmem>>, vector<1x1x8x8xbf16>
    %675 = vector.shape_cast %674 : vector<1x1x8x8xbf16> to vector<8x8xbf16>
    %cst_835 = arith.constant dense<0.000000e+00> : vector<16x8xf32>
    %676 = tpu.matmul %673, %675, %cst_835 {dimension_numbers = #tpu.dot_dimension_numbers<[1], [0], [0], [1], [0, 0, 1, 1], [], []>} : vector<16x8xbf16>, vector<8x8xbf16>, vector<16x8xf32> -> vector<16x8xf32>
    %677 = arith.addf %671, %676 : vector<16x8xf32>
    %678 = vector.shape_cast %677 : vector<16x8xf32> to vector<4x4x8xf32>
    %c0_836 = arith.constant 0 : index
    %c0_837 = arith.constant 0 : index
    %c0_838 = arith.constant 0 : index
    %c0_839 = arith.constant 0 : index
    %679 = vector.load %arg8[%c0_836, %c0_837, %c0_838, %c0_839] : memref<1x4x4x8xf32, #tpu.memory_space<vmem>>, vector<1x4x4x8xf32>
    %680 = vector.shape_cast %679 : vector<1x4x4x8xf32> to vector<4x4x8xf32>
    %681 = vector.shape_cast %678 : vector<4x4x8xf32> to vector<1x4x4x8xf32>
    tpu.vector_store %arg8[%c0_836, %c0_837, %c0_838, %c0_839], %681 {strides = array<i32>} : memref<1x4x4x8xf32, #tpu.memory_space<vmem>>, vector<1x4x4x8xf32>,
    return
  }
  func.func @transform_0(%arg0: i32) -> (i32, i32, i32, i32, i32) {
    %c0_i32 = arith.constant 0 : i32
    %c0_i32_0 = arith.constant 0 : i32
    %c0_i32_1 = arith.constant 0 : i32
    %c0_i32_2 = arith.constant 0 : i32
    %c0_i32_3 = arith.constant 0 : i32
    return %arg0, %c0_i32, %c0_i32_0, %c0_i32_1, %c0_i32_2 : i32, i32, i32, i32, i32
  }
  func.func @transform_1(%arg0: i32) -> (i32, i32, i32, i32) {
    %c0_i32 = arith.constant 0 : i32
    %c0_i32_0 = arith.constant 0 : i32
    %c0_i32_1 = arith.constant 0 : i32
    %c0_i32_2 = arith.constant 0 : i32
    %c0_i32_3 = arith.constant 0 : i32
    return %c0_i32, %c0_i32_0, %c0_i32_1, %c0_i32_2 : i32, i32, i32, i32
  }
  func.func @transform_2(%arg0: i32) -> (i32, i32) {
    %c0_i32 = arith.constant 0 : i32
    %c0_i32_0 = arith.constant 0 : i32
    %c0_i32_1 = arith.constant 0 : i32
    return %c0_i32, %c0_i32_0 : i32, i32
  }
  func.func @transform_3(%arg0: i32) -> (i32, i32) {
    %c0_i32 = arith.constant 0 : i32
    %c0_i32_0 = arith.constant 0 : i32
    %c0_i32_1 = arith.constant 0 : i32
    return %c0_i32, %c0_i32_0 : i32, i32
  }
  func.func @transform_4(%arg0: i32) -> (i32, i32, i32, i32) {
    %c0_i32 = arith.constant 0 : i32
    %c0_i32_0 = arith.constant 0 : i32
    %c0_i32_1 = arith.constant 0 : i32
    %c0_i32_2 = arith.constant 0 : i32
    %c0_i32_3 = arith.constant 0 : i32
    return %c0_i32, %c0_i32_0, %c0_i32_1, %c0_i32_2 : i32, i32, i32, i32
  }
  func.func @transform_5(%arg0: i32) -> (i32, i32) {
    %c0_i32 = arith.constant 0 : i32
    %c0_i32_0 = arith.constant 0 : i32
    %c0_i32_1 = arith.constant 0 : i32
    return %c0_i32, %c0_i32_0 : i32, i32
  }
  func.func @transform_6(%arg0: i32) -> (i32, i32) {
    %c0_i32 = arith.constant 0 : i32
    %c0_i32_0 = arith.constant 0 : i32
    %c0_i32_1 = arith.constant 0 : i32
    return %c0_i32, %c0_i32_0 : i32, i32
  }
  func.func @transform_7(%arg0: i32) -> (i32, i32, i32, i32) {
    %c0_i32 = arith.constant 0 : i32
    %c0_i32_0 = arith.constant 0 : i32
    %c0_i32_1 = arith.constant 0 : i32
    %c0_i32_2 = arith.constant 0 : i32
    return %arg0, %c0_i32, %c0_i32_0, %c0_i32_1 : i32, i32, i32, i32
  }
}

</mosaic_0001>

<bundles_post_ra>
// kernel: layer_activation_forward.1
= control target key start
LH: loop header
LB: loop body
LE: loop exit
PB: predicated region body
PF: predicated region fallthrough
CT: control target
= control target key end

     0   :  { %12 = vsyncpa [#allocation3], 0  ;;  %s22462_s0 = inlined_call_operand.vmem [shape: bf16[2,8,11,6,3], index: 0, kind: input, shape index: {}]   ;;  %s22463_s1 = inlined_call_operand.vmem [shape: bf16[7,7,3,8], index: 1, kind: input, shape index: {}]   ;;  %s22464_s2 = inlined_call_operand.vmem [shape: f32[1,8], index: 2, kind: input, shape index: {}]   ;;  %s22465_s3 = inlined_call_operand.vmem [shape: f32[1,8], index: 3, kind: input, shape index: {}]   ;;  %s22466_s4 = inlined_call_operand.vmem [shape: bf16[3,3,8,8], index: 4, kind: input, shape index: {}]   ;;  %s22467_s5 = inlined_call_operand.vmem [shape: f32[32,32], index: 5, kind: input, shape index: {}]   ;;  %s22468_s6 = inlined_call_operand.vmem [shape: f32[36,16], index: 6, kind: input, shape index: {}]   ;;  %s22469_s7 = inlined_call_operand.hbm [shape: f32[2,4,4,8], index: 7, kind: output, shape index: {}]  }
   0x1   :  { %14 = vsyncpa [#allocation3 + $0x1], 0  ;;  %s18676_s24 = smov 0   ;;  %s18678_s25 = smov 0  }
   0x2   :  { %s18680_s26 = smov 0   ;;  %s18682_s27 = smov 0  }
   0x3 LB: > { %s18697_s28 = sadd.s32 4294967295, %s18627_s27   ;;  %s16184_s29 = sadd.s32 4294967294, %s18627_s27   ;;  %s18627_s27 = sphi %s18682_s27, %s22849_s27   ;;  %s18623_s26 = sphi %s18680_s26, %s22848_s26   ;;  %s18619_s25 = sphi %s18678_s25, %s22847_s25   ;;  %s18615_s24 = sphi %s18676_s24, %s22846_s24  }
   0x4   : > { %s18701_s30 = sadd.s32 1, %s18627_s27   ;;  %s179_s8 = sadd.s32 1, %s18623_s26 }
   0x5   : > { %s176_s9 = ssub.s32 %s18627_s27, %s18701_s30  ;;  %p189_p0 = scmp.ne.s32.totalorder %s18623_s26, %s18619_s25 }
   0x6   : > { %p177_p1 = scmp.eq.s32.totalorder %s176_s9, 0  ;;  %p190_p2 = scmp.eq.s32.totalorder %s18697_s28, 1 }
   0x7   : > { %p195_p3 = scmp.ne.s32.totalorder %s18619_s25, %s18615_s24  ;;  %p196_p4 = scmp.eq.s32.totalorder %s16184_s29, 1 }
   0x8   : > { %s18712_s10 = scalar_select %p177_p1, %s18623_s26, %s179_s8  }
   0x9   : > { %p18714_p5 = por %p190_p2, %p189_p0  ;;  %p18718_p6 = por %p196_p4, %p195_p3 }
   0xa   : > { %p16187_p7 = scmp.ge.s32.totalorder %s18627_s27, 1  ;;  %p240_p8 = scmp.lt.s32.totalorder %s18627_s27, 3 }
   0xc   : > { %p241_p9 = pnand %p16187_p7, %p240_p8 }
   0xe   : > { %244 = sbr.rel (%p241_p9) target bundleno = 1758 (0x6de), region = 48 }
  0x13   : > { %v16198_v0 = vld [vmem:[%s22463_s1 + $0x2] sm:$0x3]  ;;  %vm356_vm0 = vcmask 1040384   ;;  %vm357_vm1 = vcmask 1041408   ;;  %v18629_v1 = vmov 65535   ;;  %p272_p10 = scmp.lt.s32.totalorder %s18697_s28, 1  ;;  %v320_v4 = vlaneseq }
  0x14   : > { %v358_v2 = vsel %vm356_vm0, 4294967295, %v18629_v1  ;;  %v278_v3 = vld [vmem:[%s22463_s1] sm:$0x3]  ;;  %v18630_v8 = vmov 1983009808   ;;  %vm349_vm2 = vcmask 23552  }
  0x15   : > { %v18732_v5 = vsel %vm357_vm1, %v358_v2, 0  ;;  %s273_s17 = scalar_select %p272_p10, %s18697_s28, 1  ;;  %v318_v9 = vunpack.c.l.s4 %v18630_v8  ;;  %v321_v10 = vshrl.u32 %v320_v4, 7  ;;  %v16223_v17 = vld [vmem:[%s22463_s1 + $0x4] sm:$0x3]  ;;  %vm2233_vm10 = vcmask 1042434  }
  0x16   : > { %v361_v6 = vand.u32 %v16198_v0, %v18732_v5  ;;  %v461_v7 = vand.u32 %v18732_v5, %v278_v3  ;;  %vm853_vm3 = vsmask.f32 1280  ;;  %vm854_vm4 = vsmask.f32 3336  ;;  %v16236_v31 = vld [vmem:[%s22463_s1 + $0x6] sm:$0x3]  ;;  %vm18972_vm13 = vmor %vm356_vm0, %vm2233_vm10 }
  0x17   : > { %s18297_s18 = smul.u32 352, %s273_s17  ;;  %v319_v11 = vunpack.c.0.s8 %v318_v9  ;;  %v718_v27 = vand.u32 %v16223_v17, %v18732_v5  ;;  %vm856_vm5 = vsmask.f32 5392  ;;  %v16257_v32 = vld [vmem:[%s22463_s1 + $0x8] sm:$0x3]  ;;  %v18789_v43 = vand.u32 %v16236_v31, %v18732_v5  ;;  %vm18806_vm7 = vmor %vm853_vm3, %vm854_vm4  ;;  %s269_s23 = sand.u32 1, %s18619_s25  }
  0x18   : > { %17622 = vmatprep.subr.bf16.mxu0 %v361_v6  ;;  %17628 = vmatprep.subr.bf16.mxu1 %v461_v7  ;;  %v16278_v33 = vld [vmem:[%s22463_s1 + $0xa] sm:$0x3]  ;;  %v16299_v34 = vld [vmem:[%s22463_s1 + $0xc] sm:$0x3]  ;;  %vm858_vm6 = vsmask.f32 7448  ;;  %v18792_v44 = vand.u32 %v16257_v32, %v18732_v5  ;;  %vm18821_vm8 = vmor %vm18806_vm7, %vm856_vm5 }
  0x19   : > { %17623 = vmatpush3.bf16.msra.mxu0 %v361_v6  ;;  %17629 = vmatpush3.bf16.msra.mxu1 %v461_v7  ;;  %s18740_s21 = scalar_lea.vmem %s22462_s0, %s18297_s18  ;;  %v18742_v12 = vsub.s32 %v319_v11, %v321_v10  ;;  %v16320_v38 = vld [vmem:[%s22463_s1 + $0xe] sm:$0x3]  ;;  %v18795_v45 = vand.u32 %v16278_v33, %v18732_v5  ;;  %v18798_v46 = vand.u32 %v16299_v34, %v18732_v5  ;;  %vm18833_vm9 = vmor %vm18821_vm8, %vm858_vm6  ;;  %vm2235_vm11 = vcmask 1044484   ;;  %s16188_s29 = sshll.u32 %s269_s23, 4 }
  0x1a   : > { %17634 = vmatprep.subr.bf16.mxu0 %v361_v6  ;;  %17640 = vmatprep.subr.bf16.mxu1 %v461_v7  ;;  %v18455_v13 = vld.sshfl [vmem:[%s18740_s21 + $0x2c] sm:$0xf pattern:$0x76325410]  ;;  %v18812_v55 = vand.u32 %v16320_v38, %v18732_v5  ;;  %vm2237_vm12 = vcmask 1046534   ;;  %vm2236_vm14 = vmor %vm18972_vm13, %vm2235_vm11  ;;  %vm14916_vm0 = vcmask 261120  }
  0x1b   : > { %22480 = vst [vmem:[#allocation5_spill] sm:$0xff] %v18742_v12  ;;  %v18456_v14 = vld.sshfl [vmem:[%s18740_s21 + $0x34] sm:$0xf pattern:$0x76325410]  ;;  %vm18990_vm15 = vmor %vm2236_vm14, %vm2237_vm12  ;;  %vm18632_vm1 = vmmov 0  }
  0x1c   : > { %v18457_v15 = vld.sshfl [vmem:[%s18740_s21] sm:$0xf pattern:$0x76325410]  ;;  %v331_v18 = vcombine.low %v18455_v13, %v18456_v14  ;;  %v22485_v13 = vmov 0  ;;  %vm15466_vm3 = vcmask 1043456  }
  0x1d   : > { %v18458_v16 = vld.sshfl [vmem:[%s18740_s21 + $0x8] sm:$0xf pattern:$0x76325410]  ;;  %v22486_v13 = vsel %vm18833_vm9, 4294967295, %v22485_v13  ;;  %vm15462_vm4 = vcmask 64512  }
  0x1e   : > { %v18459_v19 = vld.sshfl [vmem:[%s18740_s21 + $0x3c] sm:$0xf pattern:$0x76325410]  ;;  %17624 = vmatprep.mubr.msk.bf16.mxu0 %vm349_vm2, %v331_v18  ;;  %v436_v21 = vcombine.low %v18457_v15, %v18458_v16  ;;  %22487 = vst [vmem:[#allocation6_spill] sm:$0xff] %v22486_v13  ;;  %vm16103_vm5 = vcmask 60416  }
  0x1f   : > { %v18460_v20 = vld.sshfl [vmem:[%s18740_s21 + $0x44] sm:$0xf pattern:$0x76325410]  ;;  %s17294_s9 = sshll.u32 %s18697_s28, 8  ;;  %s22422_s28 = scalar_lea.sflag [#allocation3], %s269_s23 }
  0x20   : > { %v18461_v22 = vld.sshfl [vmem:[%s18740_s21 + $0x10] sm:$0xf pattern:$0x76325410]  ;;  %17630 = vmatprep.mubr.msk.bf16.mxu1 %vm349_vm2, %v436_v21  ;;  %v348_v24 = vcombine.low %v18459_v19, %v18460_v20  ;;  %s22416_s15 = scalar_lea.hbm %s22469_s7, %s17294_s9  ;;  %s18633_s17 = smov [#allocation2]  }
  0x21   : > { %v18462_v23 = vld.sshfl [vmem:[%s18740_s21 + $0x18] sm:$0xf pattern:$0x76325410]  ;;  %s18571_s18 = sshll.u32 %s18633_s17, 4  ;;  %s18572_s18 = int_to_ptr.vmem [resolvable:$false] %s18571_s18 }
  0x22   : > { %v18463_v25 = vld.sshfl [vmem:[%s18740_s21 + $0x84] sm:$0xf pattern:$0x76325410]  ;;  %17625 = vmatmul.mubr.msk.bf16.vlgmr.msra.gmra.mxu0 %vm349_vm2, %v348_v24  ;;  %v453_v28 = vcombine.low %v18461_v22, %v18462_v23  ;;  %s18573_s19 = scalar_lea.vmem %s18572_s18, 512 }
  0x23   : > { %v18464_v26 = vld.sshfl [vmem:[%s18740_s21 + $0x8c] sm:$0xf pattern:$0x76325410]  ;;  %17635 = vmatpush3.bf16.msra.mxu0 %v361_v6 }
  0x24   : > { %v18465_v29 = vld.sshfl [vmem:[%s18740_s21 + $0x58] sm:$0xf pattern:$0x76325410]  ;;  %17631 = vmatmul.mubr.msk.bf16.vlgmr.msra.gmra.mxu1 %vm349_vm2, %v453_v28  ;;  %v18776_v35 = vcombine.low %v18463_v25, %v18464_v26  ;;  %17646 = vmatprep.subr.bf16.mxu0 %v718_v27 }
  0x25   : > { %v18466_v30 = vld.sshfl [vmem:[%s18740_s21 + $0x60] sm:$0xf pattern:$0x76325410]  ;;  %17641 = vmatpush3.bf16.msra.mxu1 %v461_v7 }
  0x26   : > { %v18467_v36 = vld.sshfl [vmem:[%s18740_s21 + $0x94] sm:$0xf pattern:$0x76325410]  ;;  %17636 = vmatprep.mubr.msk.bf16.mxu0 %vm349_vm2, %v18776_v35  ;;  %v642_v39 = vcombine.low %v18465_v29, %v18466_v30  ;;  %17652 = vmatprep.subr.bf16.mxu1 %v718_v27 }
  0x27   : > { %v18468_v37 = vld.sshfl [vmem:[%s18740_s21 + $0x9c] sm:$0xf pattern:$0x76325410] }
  0x28   : > { %v18469_v40 = vld.sshfl [vmem:[%s18740_s21 + $0x68] sm:$0xf pattern:$0x76325410]  ;;  %17642 = vmatprep.mubr.msk.bf16.mxu1 %vm349_vm2, %v642_v39  ;;  %v18801_v47 = vcombine.low %v18467_v36, %v18468_v37 }
  0x29   : > { %v18470_v41 = vld.sshfl [vmem:[%s18740_s21 + $0x70] sm:$0xf pattern:$0x76325410] }
  0x2a   : > { %v16226_v42 = vld.sshfl [vmem:[%s18740_s21] sm:$0x13 pattern:$0x76325410]  ;;  %17637 = vmatmul.mubr.msk.bf16.vlgmr.msra.gmra.mxu0 %vm349_vm2, %v18801_v47  ;;  %v659_v56 = vcombine.low %v18469_v40, %v18470_v41 }
  0x2b   : > { %v16227_v48 = vld.sshfl [vmem:[%s18740_s21 + $0x4] sm:$0x13 pattern:$0x76325410]  ;;  %v796_v49 = vcombine.high %v16226_v42, %v16226_v42  ;;  %v861_v53 = vshrl.u32 %v16226_v42, 16  ;;  %v864_v54 = vshll.u32 %v16226_v42, 16  ;;  %17647 = vmatpush3.bf16.msra.mxu0 %v718_v27  ;;  %17648 = vmatprep.mubr.msk.bf16.mxu0 %vm349_vm2, %v642_v39 }
  0x2c   : > { %v16228_v51 = vld.sshfl [vmem:[%s18740_s21 + $0x8] sm:$0x13 pattern:$0x76325410]  ;;  %v804_v52 = vcombine.high %v16227_v48, %v16227_v48  ;;  %v875_v60 = vshrl.u32 %v16227_v48, 16  ;;  %v878_v1 = vshll.u32 %v16227_v48, 16  ;;  %17643 = vmatmul.mubr.msk.bf16.vlgmr.msra.gmra.mxu1 %vm349_vm2, %v659_v56  ;;  %17658 = vmatprep.subr.bf16.mxu0 %v18789_v43 }
  0x2d   : > { %v16229_v57 = vld.sshfl [vmem:[%s18740_s21 + $0xc] sm:$0x13 pattern:$0x76325410]  ;;  %v812_v58 = vcombine.high %v16228_v51, %v16228_v51  ;;  %v870_v59 = vshll.u32 %v796_v49, 16  ;;  %v863_v63 = vrot.slane %v861_v53, 6  ;;  %17653 = vmatpush3.bf16.msra.mxu1 %v718_v27 }
  0x2e   : > { %v820_v61 = vcombine.high %v16229_v57, %v16229_v57  ;;  %v866_v0 = vrot.slane %v864_v54, 7  ;;  %v877_v3 = vrot.slane %v875_v60, 6  ;;  %v884_v4 = vshll.u32 %v804_v52, 16  ;;  %17664 = vmatprep.subr.bf16.mxu1 %v18789_v43 }
  0x2f   : > { %v872_v2 = vrot.slane %v870_v59, 7  ;;  %v889_v6 = vshrl.u32 %v16228_v51, 16  ;;  %v880_v8 = vrot.slane %v878_v1, 7  ;;  %v892_v9 = vshll.u32 %v16228_v51, 16 }
  0x30   : > { %v867_v7 = vor.u32 %v866_v0, %v863_v63  ;;  %v898_v10 = vshll.u32 %v812_v58, 16  ;;  %v18828_v11 = vld.sshfl [vmem:[%s18740_s21 + $0xb0] sm:$0xf pattern:$0x76325410]  ;;  %v886_v14 = vrot.slane %v884_v4, 7 }
  0x31   : > { %v891_v15 = vrot.slane %v889_v6, 6  ;;  %v903_v16 = vshrl.u32 %v16229_v57, 16  ;;  %v906_v17 = vshll.u32 %v16229_v57, 16  ;;  %v881_v20 = vor.u32 %v880_v8, %v877_v3 }
  0x32   : > { %v18839_v18 = vld.sshfl [vmem:[%s18740_s21 + $0xb8] sm:$0xf pattern:$0x76325410]  ;;  %v868_v19 = vrot.slane %v867_v7, 2  ;;  %v894_v21 = vrot.slane %v892_v9, 7  ;;  %17649 = vmatmul.mubr.msk.bf16.vlgmr.msra.gmra.mxu0 %vm349_vm2, %v659_v56 }
  0x33   : > { %v900_v22 = vrot.slane %v898_v10, 7  ;;  %v905_v23 = vrot.slane %v903_v16, 6  ;;  %v908_v24 = vrot.slane %v906_v17, 7  ;;  %v912_v25 = vshll.u32 %v820_v61, 16  ;;  %17659 = vmatpush3.bf16.msra.mxu0 %v18789_v43  ;;  %17660 = vmatprep.mubr.msk.bf16.mxu0 %vm349_vm2, %v18776_v35 }
  0x34   : > { %v873_v26 = vsel %vm18833_vm9, %v868_v19, %v872_v2  ;;  %v882_v27 = vrot.slane %v881_v20, 2  ;;  %v895_v28 = vor.u32 %v894_v21, %v891_v15  ;;  %v16230_v29 = vld.sshfl [vmem:[%s18740_s21 + $0x10] sm:$0x13 pattern:$0x76325410]  ;;  %17670 = vmatprep.subr.bf16.mxu0 %v18792_v44 }
  0x35   : > { %v909_v30 = vor.u32 %v908_v24, %v905_v23  ;;  %v914_v31 = vrot.slane %v912_v25, 7  ;;  %v16231_v32 = vld.sshfl [vmem:[%s18740_s21 + $0x14] sm:$0x13 pattern:$0x76325410]  ;;  %v828_v33 = vcombine.high %v16230_v29, %v16230_v29  ;;  %v917_v34 = vshrl.u32 %v16230_v29, 16 }
  0x36   : > { %v887_v36 = vsel %vm18833_vm9, %v882_v27, %v886_v14  ;;  %v896_v37 = vrot.slane %v895_v28, 2  ;;  %v16232_v38 = vld.sshfl [vmem:[%s18740_s21 + $0x18] sm:$0x13 pattern:$0x76325410]  ;;  %v836_v39 = vcombine.high %v16231_v32, %v16231_v32  ;;  %v920_v40 = vshll.u32 %v16230_v29, 16 }
  0x37   : > { %v910_v41 = vrot.slane %v909_v30, 2  ;;  %v972_v42 = vcombine.low %v873_v26, %v887_v36  ;;  %v16233_v48 = vld.sshfl [vmem:[%s18740_s21 + $0x1c] sm:$0x13 pattern:$0x76325410]  ;;  %v844_v49 = vcombine.high %v16232_v38, %v16232_v38  ;;  %v919_v50 = vrot.slane %v917_v34, 6 }
  0x38   : > { %v901_v51 = vsel %vm18833_vm9, %v896_v37, %v900_v22  ;;  %v852_v52 = vcombine.high %v16233_v48, %v16233_v48  ;;  %v922_v53 = vrot.slane %v920_v40, 7  ;;  %v926_v54 = vshll.u32 %v828_v33, 16  ;;  %v16247_v15 = vld.sshfl [vmem:[%s18740_s21 + $0x2c] sm:$0x13 pattern:$0x76325410] }
  0x39   : > { %v915_v56 = vsel %vm18833_vm9, %v910_v41, %v914_v31  ;;  %v980_v57 = vrot.slane %v972_v42, %v18742_v12  ;;  %v931_v58 = vshrl.u32 %v16231_v32, 16  ;;  %v934_v35 = vshll.u32 %v16231_v32, 16  ;;  %v16248_v16 = vld.sshfl [vmem:[%s18740_s21 + $0x30] sm:$0x13 pattern:$0x76325410] }
  0x3a   : > { %v973_v59 = vcombine.low %v901_v51, %v915_v56  ;;  %v923_v60 = vor.u32 %v922_v53, %v919_v50  ;;  %v928_v61 = vrot.slane %v926_v54, 7  ;;  %v940_v62 = vshll.u32 %v836_v39, 16  ;;  %17661 = vmatmul.mubr.msk.bf16.vlgmr.msra.gmra.mxu0 %vm349_vm2, %v18801_v47  ;;  %v16249_v22 = vld.sshfl [vmem:[%s18740_s21 + $0x34] sm:$0x13 pattern:$0x76325410] }
  0x3b   : > { %v933_v63 = vrot.slane %v931_v58, 6  ;;  %v936_v0 = vrot.slane %v934_v35, 7  ;;  %v945_v1 = vshrl.u32 %v16232_v38, 16  ;;  %v948_v2 = vshll.u32 %v16232_v38, 16  ;;  %17671 = vmatpush3.bf16.msra.mxu0 %v18792_v44 }
  0x3c   : > { %v987_v3 = vrot.slane %v973_v59, %v18742_v12  ;;  %v924_v4 = vrot.slane %v923_v60, 2  ;;  %v942_v6 = vrot.slane %v940_v62, 7  ;;  %v954_v7 = vshll.u32 %v844_v49, 16  ;;  %17682 = vmatprep.subr.bf16.mxu0 %v18795_v45 }
  0x3d   : > { %v937_v8 = vor.u32 %v936_v0, %v933_v63  ;;  %v947_v9 = vrot.slane %v945_v1, 6  ;;  %v950_v10 = vrot.slane %v948_v2, 7  ;;  %v959_v14 = vshrl.u32 %v16233_v48, 16 }
  0x3e   : > { %v988_v17 = vcombine.low %v980_v57, %v987_v3  ;;  %v929_v19 = vsel %vm18833_vm9, %v924_v4, %v928_v61  ;;  %v956_v20 = vrot.slane %v954_v7, 7  ;;  %v962_v21 = vshll.u32 %v16233_v48, 16  ;;  %v16250_v28 = vld.sshfl [vmem:[%s18740_s21 + $0x38] sm:$0x13 pattern:$0x76325410] }
  0x3f   : > { %v938_v23 = vrot.slane %v937_v8, 2  ;;  %v951_v24 = vor.u32 %v950_v10, %v947_v9  ;;  %v961_v25 = vrot.slane %v959_v14, 6  ;;  %v968_v26 = vshll.u32 %v852_v52, 16 }
  0x40   : > { %17654 = vmatprep.mubr.msk.bf16.mxu1 %vm349_vm2, %v988_v17  ;;  %v964_v27 = vrot.slane %v962_v21, 7  ;;  %v1146_v47 = vcombine.high %v16247_v15, %v16247_v15  ;;  %v1154_v29 = vcombine.high %v16248_v16, %v16248_v16  ;;  %v1162_v30 = vcombine.high %v16249_v22, %v16249_v22  ;;  %17672 = vmatprep.mubr.msk.bf16.mxu0 %vm349_vm2, %v988_v17 }
  0x41   : > { %v943_v31 = vsel %vm18833_vm9, %v938_v23, %v942_v6  ;;  %v952_v32 = vrot.slane %v951_v24, 2  ;;  %v970_v33 = vrot.slane %v968_v26, 7  ;;  %v1170_v34 = vcombine.high %v16250_v28, %v16250_v28  ;;  %v16251_v6 = vld.sshfl [vmem:[%s18740_s21 + $0x3c] sm:$0x13 pattern:$0x76325410] }
  0x42   : > { %v965_v36 = vor.u32 %v964_v27, %v961_v25  ;;  %v989_v37 = vcombine.low %v929_v19, %v943_v31  ;;  %v1204_v38 = vshrl.u32 %v16247_v15, 16  ;;  %v1207_v39 = vshll.u32 %v16247_v15, 16  ;;  %v16252_v19 = vld.sshfl [vmem:[%s18740_s21 + $0x40] sm:$0x13 pattern:$0x76325410] }
  0x43   : > { %v957_v40 = vsel %vm18833_vm9, %v952_v32, %v956_v20  ;;  %v1213_v41 = vshll.u32 %v1146_v47, 16  ;;  %v1218_v42 = vshrl.u32 %v16248_v16, 16  ;;  %v1221_v48 = vshll.u32 %v16248_v16, 16 }
  0x44   : > { %v966_v49 = vrot.slane %v965_v36, 2  ;;  %v997_v50 = vrot.slane %v989_v37, %v18742_v12  ;;  %v1206_v51 = vrot.slane %v1204_v38, 6  ;;  %v1209_v52 = vrot.slane %v1207_v39, 7 }
  0x45   : > { %v1215_v53 = vrot.slane %v1213_v41, 7  ;;  %v1220_v54 = vrot.slane %v1218_v42, 6  ;;  %v1223_v56 = vrot.slane %v1221_v48, 7  ;;  %v1227_v57 = vshll.u32 %v1154_v29, 16 }
  0x46   : > { %v971_v58 = vsel %vm18833_vm9, %v966_v49, %v970_v33  ;;  %v1210_v35 = vor.u32 %v1209_v52, %v1206_v51  ;;  %v1232_v59 = vshrl.u32 %v16249_v22, 16  ;;  %v1235_v60 = vshll.u32 %v16249_v22, 16  ;;  %v16253_v23 = vld.sshfl [vmem:[%s18740_s21 + $0x44] sm:$0x13 pattern:$0x76325410] }
  0x47   : > { %v990_v61 = vcombine.low %v957_v40, %v971_v58  ;;  %v1224_v62 = vor.u32 %v1223_v56, %v1220_v54  ;;  %v1229_v63 = vrot.slane %v1227_v57, 7  ;;  %v1241_v0 = vshll.u32 %v1162_v30, 16  ;;  %v16254_v47 = vld.sshfl [vmem:[%s18740_s21 + $0x48] sm:$0x13 pattern:$0x76325410] }
  0x48   : > { %v1211_v1 = vrot.slane %v1210_v35, 2  ;;  %v1234_v2 = vrot.slane %v1232_v59, 6  ;;  %v1237_v3 = vrot.slane %v1235_v60, 7  ;;  %v1246_v4 = vshrl.u32 %v16250_v28, 16 }
  0x49   : > { %v1004_v7 = vrot.slane %v990_v61, %v18742_v12  ;;  %v1225_v8 = vrot.slane %v1224_v62, 2  ;;  %v1243_v9 = vrot.slane %v1241_v0, 7  ;;  %v1249_v10 = vshll.u32 %v16250_v28, 16 }
  0x4a   : > { %v1216_v14 = vsel %vm18833_vm9, %v1211_v1, %v1215_v53  ;;  %v1238_v15 = vor.u32 %v1237_v3, %v1234_v2  ;;  %v1248_v16 = vrot.slane %v1246_v4, 6  ;;  %v1255_v17 = vshll.u32 %v1170_v34, 16  ;;  %v16268_v2 = vld.sshfl [vmem:[%s18740_s21 + $0x58] sm:$0x13 pattern:$0x76325410] }
  0x4b   : > { %v1005_v20 = vcombine.low %v997_v50, %v1004_v7  ;;  %v1230_v21 = vsel %vm18833_vm9, %v1225_v8, %v1229_v63  ;;  %v1251_v22 = vrot.slane %v1249_v10, 7  ;;  %v1178_v24 = vcombine.high %v16251_v6, %v16251_v6  ;;  %v16269_v3 = vld.sshfl [vmem:[%s18740_s21 + $0x5c] sm:$0x13 pattern:$0x76325410] }
  0x4c   : > { %v1239_v25 = vrot.slane %v1238_v15, 2  ;;  %v1257_v26 = vrot.slane %v1255_v17, 7  ;;  %v1315_v27 = vcombine.low %v1216_v14, %v1230_v21  ;;  %v1186_v29 = vcombine.high %v16252_v19, %v16252_v19 }
  0x4d   : > { %17655 = vmatmul.mubr.msk.bf16.vlgmr.msra.gmra.mxu1 %vm349_vm2, %v1005_v20  ;;  %v1252_v28 = vor.u32 %v1251_v22, %v1248_v16  ;;  %v1194_v30 = vcombine.high %v16253_v23, %v16253_v23  ;;  %v1202_v31 = vcombine.high %v16254_v47, %v16254_v47  ;;  %v1260_v32 = vshrl.u32 %v16251_v6, 16  ;;  %17673 = vmatmul.mubr.msk.bf16.vlgmr.msra.gmra.mxu0 %vm349_vm2, %v1005_v20  ;;  %v16270_v16 = vld.sshfl [vmem:[%s18740_s21 + $0x60] sm:$0x13 pattern:$0x76325410] }
  0x4e   : > { %17665 = vmatpush3.bf16.msra.mxu1 %v18789_v43  ;;  %v1244_v33 = vsel %vm18833_vm9, %v1239_v25, %v1243_v9  ;;  %v1323_v34 = vrot.slane %v1315_v27, %v18742_v12  ;;  %v1263_v36 = vshll.u32 %v16251_v6, 16  ;;  %v1269_v37 = vshll.u32 %v1178_v24, 16  ;;  %17683 = vmatpush3.bf16.msra.mxu0 %v18795_v45  ;;  %v16271_v20 = vld.sshfl [vmem:[%s18740_s21 + $0x64] sm:$0x13 pattern:$0x76325410] }
  0x4f   : > { %v1253_v38 = vrot.slane %v1252_v28, 2  ;;  %v1262_v39 = vrot.slane %v1260_v32, 6  ;;  %v1274_v40 = vshrl.u32 %v16252_v19, 16  ;;  %v1277_v41 = vshll.u32 %v16252_v19, 16  ;;  %17676 = vmatprep.subr.bf16.mxu1 %v18792_v44  ;;  %17694 = vmatprep.subr.bf16.mxu0 %v18798_v46 }
  0x50   : > { %v1265_v42 = vrot.slane %v1263_v36, 7  ;;  %v1271_v48 = vrot.slane %v1269_v37, 7  ;;  %v1283_v43 = vshll.u32 %v1186_v29, 16  ;;  %v1288_v49 = vshrl.u32 %v16253_v23, 16 }
  0x51   : > { %v1258_v50 = vsel %vm18833_vm9, %v1253_v38, %v1257_v26  ;;  %v1276_v51 = vrot.slane %v1274_v40, 6  ;;  %v1279_v52 = vrot.slane %v1277_v41, 7  ;;  %v1291_v53 = vshll.u32 %v16253_v23, 16 }
  0x52   : > { %v1316_v54 = vcombine.low %v1244_v33, %v1258_v50  ;;  %v1266_v56 = vor.u32 %v1265_v42, %v1262_v39  ;;  %v1285_v57 = vrot.slane %v1283_v43, 7  ;;  %v1290_v58 = vrot.slane %v1288_v49, 6 }
  0x53   : > { %v1280_v35 = vor.u32 %v1279_v52, %v1276_v51  ;;  %v1293_v59 = vrot.slane %v1291_v53, 7  ;;  %v1297_v60 = vshll.u32 %v1194_v30, 16  ;;  %v1302_v61 = vshrl.u32 %v16254_v47, 16 }
  0x54   : > { %v1330_v62 = vrot.slane %v1316_v54, %v18742_v12  ;;  %v1267_v63 = vrot.slane %v1266_v56, 2  ;;  %v1305_v0 = vshll.u32 %v16254_v47, 16  ;;  %v1311_v1 = vshll.u32 %v1202_v31, 16 }
  0x55   : > { %v1281_v4 = vrot.slane %v1280_v35, 2  ;;  %v1294_v6 = vor.u32 %v1293_v59, %v1290_v58  ;;  %v1299_v7 = vrot.slane %v1297_v60, 7  ;;  %v1304_v8 = vrot.slane %v1302_v61, 6 }
  0x56   : > { %v1331_v9 = vcombine.low %v1323_v34, %v1330_v62  ;;  %v1272_v10 = vsel %vm18833_vm9, %v1267_v63, %v1271_v48  ;;  %v1307_v14 = vrot.slane %v1305_v0, 7  ;;  %v1313_v15 = vrot.slane %v1311_v1, 7  ;;  %v16272_v59 = vld.sshfl [vmem:[%s18740_s21 + $0x68] sm:$0x13 pattern:$0x76325410] }
  0x57   : > { %v1286_v17 = vsel %vm18833_vm9, %v1281_v4, %v1285_v57  ;;  %v1295_v19 = vrot.slane %v1294_v6, 2  ;;  %v1489_v21 = vcombine.high %v16268_v2, %v16268_v2  ;;  %v1497_v22 = vcombine.high %v16269_v3, %v16269_v3  ;;  %v16273_v4 = vld.sshfl [vmem:[%s18740_s21 + $0x6c] sm:$0x13 pattern:$0x76325410] }
  0x58   : > { %17666 = vmatprep.mubr.msk.bf16.mxu1 %vm349_vm2, %v1331_v9  ;;  %v1308_v23 = vor.u32 %v1307_v14, %v1304_v8  ;;  %v1332_v24 = vcombine.low %v1272_v10, %v1286_v17  ;;  %v1505_v25 = vcombine.high %v16270_v16, %v16270_v16  ;;  %v1513_v26 = vcombine.high %v16271_v20, %v16271_v20  ;;  %v16274_v8 = vld.sshfl [vmem:[%s18740_s21 + $0x70] sm:$0x13 pattern:$0x76325410] }
  0x59   : > { %v1300_v27 = vsel %vm18833_vm9, %v1295_v19, %v1299_v7  ;;  %v1547_v47 = vshrl.u32 %v16268_v2, 16  ;;  %v1550_v29 = vshll.u32 %v16268_v2, 16  ;;  %v1556_v28 = vshll.u32 %v1489_v21, 16  ;;  %17684 = vmatprep.mubr.msk.bf16.mxu0 %vm349_vm2, %v1331_v9 }
  0x5a   : > { %v1309_v30 = vrot.slane %v1308_v23, 2  ;;  %v1340_v31 = vrot.slane %v1332_v24, %v18742_v12  ;;  %v1561_v32 = vshrl.u32 %v16269_v3, 16  ;;  %v1564_v33 = vshll.u32 %v16269_v3, 16 }
  0x5b   : > { %v1549_v34 = vrot.slane %v1547_v47, 6  ;;  %v1552_v36 = vrot.slane %v1550_v29, 7  ;;  %v1558_v37 = vrot.slane %v1556_v28, 7  ;;  %v1570_v38 = vshll.u32 %v1497_v22, 16 }
  0x5c   : > { %v1314_v39 = vsel %vm18833_vm9, %v1309_v30, %v1313_v15  ;;  %v1563_v40 = vrot.slane %v1561_v32, 6  ;;  %v1566_v41 = vrot.slane %v1564_v33, 7  ;;  %v1575_v42 = vshrl.u32 %v16270_v16, 16 }
  0x5d   : > { %v1333_v48 = vcombine.low %v1300_v27, %v1314_v39  ;;  %v1553_v43 = vor.u32 %v1552_v36, %v1549_v34  ;;  %v1572_v49 = vrot.slane %v1570_v38, 7  ;;  %v1578_v50 = vshll.u32 %v16270_v16, 16  ;;  %v16275_v17 = vld.sshfl [vmem:[%s18740_s21 + $0x74] sm:$0x13 pattern:$0x76325410] }
  0x5e   : > { %v1567_v51 = vor.u32 %v1566_v41, %v1563_v40  ;;  %v1577_v52 = vrot.slane %v1575_v42, 6  ;;  %v1584_v53 = vshll.u32 %v1505_v25, 16  ;;  %v1589_v54 = vshrl.u32 %v16271_v20, 16 }
  0x5f   : > { %v1347_v56 = vrot.slane %v1333_v48, %v18742_v12  ;;  %v1554_v57 = vrot.slane %v1553_v43, 2  ;;  %v1580_v58 = vrot.slane %v1578_v50, 7  ;;  %v1592_v35 = vshll.u32 %v16271_v20, 16 }
  0x60   : > { %v1568_v60 = vrot.slane %v1567_v51, 2  ;;  %v1586_v61 = vrot.slane %v1584_v53, 7  ;;  %v1591_v62 = vrot.slane %v1589_v54, 6  ;;  %v1598_v63 = vshll.u32 %v1513_v26, 16 }
  0x61   : > { %v1348_v0 = vcombine.low %v1340_v31, %v1347_v56  ;;  %v1559_v1 = vsel %vm18833_vm9, %v1554_v57, %v1558_v37  ;;  %v1581_v2 = vor.u32 %v1580_v58, %v1577_v52  ;;  %v1594_v3 = vrot.slane %v1592_v35, 7  ;;  %v16289_v51 = vld.sshfl [vmem:[%s18740_s21 + $0x84] sm:$0x13 pattern:$0x76325410] }
  0x62   : > { %v1573_v6 = vsel %vm18833_vm9, %v1568_v60, %v1572_v49  ;;  %v1600_v7 = vrot.slane %v1598_v63, 7  ;;  %v1521_v9 = vcombine.high %v16272_v59, %v16272_v59  ;;  %v1529_v10 = vcombine.high %v16273_v4, %v16273_v4  ;;  %v16290_v52 = vld.sshfl [vmem:[%s18740_s21 + $0x88] sm:$0x13 pattern:$0x76325410] }
  0x63   : > { %17667 = vmatmul.mubr.msk.bf16.vlgmr.msra.gmra.mxu1 %vm349_vm2, %v1348_v0  ;;  %v1582_v14 = vrot.slane %v1581_v2, 2  ;;  %v1595_v15 = vor.u32 %v1594_v3, %v1591_v62  ;;  %v1658_v16 = vcombine.low %v1559_v1, %v1573_v6  ;;  %v1537_v19 = vcombine.high %v16274_v8, %v16274_v8  ;;  %17685 = vmatmul.mubr.msk.bf16.vlgmr.msra.gmra.mxu0 %vm349_vm2, %v1348_v0  ;;  %v16292_v0 = vld.sshfl [vmem:[%s18740_s21 + $0x90] sm:$0x13 pattern:$0x76325410] }
  0x64   : > { %17677 = vmatpush3.bf16.msra.mxu1 %v18792_v44  ;;  %v1545_v20 = vcombine.high %v16275_v17, %v16275_v17  ;;  %v1603_v21 = vshrl.u32 %v16272_v59, 16  ;;  %v1606_v22 = vshll.u32 %v16272_v59, 16  ;;  %v1612_v23 = vshll.u32 %v1521_v9, 16  ;;  %17695 = vmatpush3.bf16.msra.mxu0 %v18798_v46 }
  0x65   : > { %v1587_v24 = vsel %vm18833_vm9, %v1582_v14, %v1586_v61  ;;  %v1596_v25 = vrot.slane %v1595_v15, 2  ;;  %v1666_v26 = vrot.slane %v1658_v16, %v18742_v12  ;;  %v1617_v27 = vshrl.u32 %v16273_v4, 16  ;;  %17688 = vmatprep.subr.bf16.mxu1 %v18795_v45  ;;  %17706 = vmatprep.subr.bf16.mxu0 %v18812_v55  ;;  %v16291_v61 = vld.sshfl [vmem:[%s18740_s21 + $0x8c] sm:$0x13 pattern:$0x76325410] }
  0x66   : > { %v1605_v47 = vrot.slane %v1603_v21, 6  ;;  %v1608_v29 = vrot.slane %v1606_v22, 7  ;;  %v1614_v44 = vrot.slane %v1612_v23, 7  ;;  %v1620_v28 = vshll.u32 %v16273_v4, 16 }
  0x67   : > { %v1601_v30 = vsel %vm18833_vm9, %v1596_v25, %v1600_v7  ;;  %v1619_v31 = vrot.slane %v1617_v27, 6  ;;  %v1626_v32 = vshll.u32 %v1529_v10, 16  ;;  %v1631_v33 = vshrl.u32 %v16274_v8, 16 }
  0x68   : > { %v1659_v34 = vcombine.low %v1587_v24, %v1601_v30  ;;  %v1609_v36 = vor.u32 %v1608_v29, %v1605_v47  ;;  %v1622_v37 = vrot.slane %v1620_v28, 7  ;;  %v1634_v38 = vshll.u32 %v16274_v8, 16 }
  0x69   : > { %v1628_v39 = vrot.slane %v1626_v32, 7  ;;  %v1633_v40 = vrot.slane %v1631_v33, 6  ;;  %v1640_v41 = vshll.u32 %v1537_v19, 16  ;;  %v1645_v42 = vshrl.u32 %v16275_v17, 16 }
  0x6a   : > { %v1673_v48 = vrot.slane %v1659_v34, %v18742_v12  ;;  %v1610_v43 = vrot.slane %v1609_v36, 2  ;;  %v1623_v49 = vor.u32 %v1622_v37, %v1619_v31  ;;  %v1636_v50 = vrot.slane %v1634_v38, 7 }
  0x6b   : > { %v1642_v53 = vrot.slane %v1640_v41, 7  ;;  %v1647_v54 = vrot.slane %v1645_v42, 6  ;;  %v1648_v56 = vshll.u32 %v16275_v17, 16  ;;  %v1654_v57 = vshll.u32 %v1545_v20, 16 }
  0x6c   : > { %v1674_v58 = vcombine.low %v1666_v26, %v1673_v48  ;;  %v1615_v35 = vsel %vm18833_vm9, %v1610_v43, %v1614_v44  ;;  %v1624_v59 = vrot.slane %v1623_v49, 2  ;;  %v1637_v60 = vor.u32 %v1636_v50, %v1633_v40  ;;  %v16294_v43 = vld.sshfl [vmem:[%s18740_s21 + $0x98] sm:$0x13 pattern:$0x76325410] }
  0x6d   : > { %v1650_v62 = vrot.slane %v1648_v56, 7  ;;  %v1656_v63 = vrot.slane %v1654_v57, 7  ;;  %v1832_v1 = vcombine.high %v16289_v51, %v16289_v51  ;;  %v1840_v2 = vcombine.high %v16290_v52, %v16290_v52 }
  0x6e   : > { %17678 = vmatprep.mubr.msk.bf16.mxu1 %vm349_vm2, %v1674_v58  ;;  %v1629_v3 = vsel %vm18833_vm9, %v1624_v59, %v1628_v39  ;;  %v1638_v4 = vrot.slane %v1637_v60, 2  ;;  %v1848_v6 = vcombine.high %v16291_v61, %v16291_v61  ;;  %v1856_v7 = vcombine.high %v16292_v0, %v16292_v0  ;;  %17696 = vmatprep.mubr.msk.bf16.mxu0 %vm349_vm2, %v1674_v58  ;;  %v16293_v39 = vld.sshfl [vmem:[%s18740_s21 + $0x94] sm:$0x13 pattern:$0x76325410] }
  0x6f   : > { %v1651_v8 = vor.u32 %v1650_v62, %v1647_v54  ;;  %v1675_v9 = vcombine.low %v1615_v35, %v1629_v3  ;;  %v1890_v10 = vshrl.u32 %v16289_v51, 16  ;;  %v1893_v14 = vshll.u32 %v16289_v51, 16  ;;  %v16296_v58 = vld.sshfl [vmem:[%s18740_s21 + $0xa0] sm:$0x13 pattern:$0x76325410] }
  0x70   : > { %v1643_v15 = vsel %vm18833_vm9, %v1638_v4, %v1642_v53  ;;  %v1899_v16 = vshll.u32 %v1832_v1, 16  ;;  %v1904_v17 = vshrl.u32 %v16290_v52, 16  ;;  %v1907_v19 = vshll.u32 %v16290_v52, 16 }
  0x71   : > { %v1652_v20 = vrot.slane %v1651_v8, 2  ;;  %v1683_v21 = vrot.slane %v1675_v9, %v18742_v12  ;;  %v1892_v22 = vrot.slane %v1890_v10, 6  ;;  %v1895_v23 = vrot.slane %v1893_v14, 7 }
  0x72   : > { %v1901_v24 = vrot.slane %v1899_v16, 7  ;;  %v1906_v25 = vrot.slane %v1904_v17, 6  ;;  %v1909_v26 = vrot.slane %v1907_v19, 7  ;;  %v1913_v27 = vshll.u32 %v1840_v2, 16 }
  0x73   : > { %v1657_v47 = vsel %vm18833_vm9, %v1652_v20, %v1656_v63  ;;  %v1896_v29 = vor.u32 %v1895_v23, %v1892_v22  ;;  %v1918_v44 = vshrl.u32 %v16291_v61, 16  ;;  %v1921_v28 = vshll.u32 %v16291_v61, 16  ;;  %v16295_v53 = vld.sshfl [vmem:[%s18740_s21 + $0x9c] sm:$0x13 pattern:$0x76325410] }
  0x74   : > { %v1676_v30 = vcombine.low %v1643_v15, %v1657_v47  ;;  %v1910_v31 = vor.u32 %v1909_v26, %v1906_v25  ;;  %v1915_v32 = vrot.slane %v1913_v27, 7  ;;  %v1927_v33 = vshll.u32 %v1848_v6, 16  ;;  %v16302_v47 = vld.sshfl [vmem:[%s18740_s21] sm:$0x12 pattern:$0x76325410] }
  0x75   : > { %v1897_v34 = vrot.slane %v1896_v29, 2  ;;  %v1920_v36 = vrot.slane %v1918_v44, 6  ;;  %v1923_v37 = vrot.slane %v1921_v28, 7  ;;  %v1932_v38 = vshrl.u32 %v16292_v0, 16 }
  0x76   : > { %v1690_v40 = vrot.slane %v1676_v30, %v18742_v12  ;;  %v1911_v41 = vrot.slane %v1910_v31, 2  ;;  %v1929_v42 = vrot.slane %v1927_v33, 7  ;;  %v1935_v48 = vshll.u32 %v16292_v0, 16 }
  0x77   : > { %v1902_v49 = vsel %vm18833_vm9, %v1897_v34, %v1901_v24  ;;  %v1924_v50 = vor.u32 %v1923_v37, %v1920_v36  ;;  %v1934_v51 = vrot.slane %v1932_v38, 6  ;;  %v1941_v52 = vshll.u32 %v1856_v7, 16  ;;  %v16303_v29 = vld.sshfl [vmem:[%s18740_s21 + $0x4] sm:$0x12 pattern:$0x76325410] }
  0x78   : > { %v1691_v54 = vcombine.low %v1683_v21, %v1690_v40  ;;  %v1916_v56 = vsel %vm18833_vm9, %v1911_v41, %v1915_v32  ;;  %v1937_v57 = vrot.slane %v1935_v48, 7  ;;  %v1864_v35 = vcombine.high %v16293_v39, %v16293_v39  ;;  %v16304_v32 = vld.sshfl [vmem:[%s18740_s21 + $0x8] sm:$0x12 pattern:$0x76325410] }
  0x79   : > { %v1925_v59 = vrot.slane %v1924_v50, 2  ;;  %v1943_v60 = vrot.slane %v1941_v52, 7  ;;  %v2001_v61 = vcombine.low %v1902_v49, %v1916_v56  ;;  %v1872_v62 = vcombine.high %v16294_v43, %v16294_v43  ;;  %v16305_v33 = vld.sshfl [vmem:[%s18740_s21 + $0xc] sm:$0x12 pattern:$0x76325410] }
  0x7a   : > { %17679 = vmatmul.mubr.msk.bf16.vlgmr.msra.gmra.mxu1 %vm349_vm2, %v1691_v54  ;;  %v1938_v63 = vor.u32 %v1937_v57, %v1934_v51  ;;  %v1880_v0 = vcombine.high %v16295_v53, %v16295_v53  ;;  %v1888_v1 = vcombine.high %v16296_v58, %v16296_v58  ;;  %v1946_v2 = vshrl.u32 %v16293_v39, 16  ;;  %17697 = vmatmul.mubr.msk.bf16.vlgmr.msra.gmra.mxu0 %vm349_vm2, %v1691_v54  ;;  %v16306_v56 = vld.sshfl [vmem:[%s18740_s21 + $0x10] sm:$0x12 pattern:$0x76325410] }
  0x7b   : > { %17689 = vmatpush3.bf16.msra.mxu1 %v18795_v45  ;;  %v1930_v3 = vsel %vm18833_vm9, %v1925_v59, %v1929_v42  ;;  %v2009_v4 = vrot.slane %v2001_v61, %v18742_v12  ;;  %v1949_v6 = vshll.u32 %v16293_v39, 16  ;;  %v1955_v7 = vshll.u32 %v1864_v35, 16  ;;  %17707 = vmatpush3.bf16.msra.mxu0 %v18812_v55  ;;  %v16307_v61 = vld.sshfl [vmem:[%s18740_s21 + $0x14] sm:$0x12 pattern:$0x76325410] }
  0x7c   : > { %v1939_v8 = vrot.slane %v1938_v63, 2  ;;  %v1948_v9 = vrot.slane %v1946_v2, 6  ;;  %v1960_v10 = vshrl.u32 %v16294_v43, 16  ;;  %v1963_v14 = vshll.u32 %v16294_v43, 16  ;;  %17700 = vmatprep.subr.bf16.mxu1 %v18798_v46 }
  0x7d   : > { %v1951_v15 = vrot.slane %v1949_v6, 7  ;;  %v1957_v16 = vrot.slane %v1955_v7, 7  ;;  %v1969_v45 = vshll.u32 %v1872_v62, 16  ;;  %v1974_v17 = vshrl.u32 %v16295_v53, 16 }
  0x7e   : > { %v1944_v19 = vsel %vm18833_vm9, %v1939_v8, %v1943_v60  ;;  %v1962_v20 = vrot.slane %v1960_v10, 6  ;;  %v1965_v21 = vrot.slane %v1963_v14, 7  ;;  %v1977_v22 = vshll.u32 %v16295_v53, 16 }
  0x7f   : > { %v2002_v24 = vcombine.low %v1930_v3, %v1944_v19  ;;  %v1952_v25 = vor.u32 %v1951_v15, %v1948_v9  ;;  %v1971_v26 = vrot.slane %v1969_v45, 7  ;;  %v1976_v27 = vrot.slane %v1974_v17, 6  ;;  %v16308_v2 = vld.sshfl [vmem:[%s18740_s21 + $0x18] sm:$0x12 pattern:$0x76325410] }
  0x80   : > { %v1966_v44 = vor.u32 %v1965_v21, %v1962_v20  ;;  %v1979_v28 = vrot.slane %v1977_v22, 7  ;;  %v1983_v30 = vshll.u32 %v1880_v0, 16  ;;  %v1988_v31 = vshrl.u32 %v16296_v58, 16 }
  0x81   : > { %v2016_v34 = vrot.slane %v2002_v24, %v18742_v12  ;;  %v1953_v36 = vrot.slane %v1952_v25, 2  ;;  %v1991_v37 = vshll.u32 %v16296_v58, 16  ;;  %v1997_v38 = vshll.u32 %v1888_v1, 16 }
  0x82   : > { %v1967_v39 = vrot.slane %v1966_v44, 2  ;;  %v1980_v40 = vor.u32 %v1979_v28, %v1976_v27  ;;  %v1985_v41 = vrot.slane %v1983_v30, 7  ;;  %v1990_v42 = vrot.slane %v1988_v31, 6 }
  0x83   : > { %v2017_v48 = vcombine.low %v2009_v4, %v2016_v34  ;;  %v1958_v43 = vsel %vm18833_vm9, %v1953_v36, %v1957_v16  ;;  %v1993_v49 = vrot.slane %v1991_v37, 7  ;;  %v1999_v50 = vrot.slane %v1997_v38, 7  ;;  %v16309_v3 = vld.sshfl [vmem:[%s18740_s21 + $0x1c] sm:$0x12 pattern:$0x76325410] }
  0x84   : > { %v1972_v51 = vsel %vm18833_vm9, %v1967_v39, %v1971_v26  ;;  %v1981_v52 = vrot.slane %v1980_v40, 2  ;;  %v2175_v53 = vcombine.high %v16302_v47, %v16302_v47  ;;  %v2183_v54 = vcombine.high %v16303_v29, %v16303_v29  ;;  %v18473_v24 = vld.sshfl [vmem:[%s18740_s21 + $0x108] sm:$0xf pattern:$0x76325410] }
  0x85   : > { %v22490_v57 = vmov 0  ;;  %17690 = vmatprep.mubr.msk.bf16.mxu1 %vm349_vm2, %v2017_v48  ;;  %v1994_v58 = vor.u32 %v1993_v49, %v1990_v42  ;;  %v2018_v35 = vcombine.low %v1958_v43, %v1972_v51  ;;  %v2191_v59 = vcombine.high %v16304_v32, %v16304_v32  ;;  %v18475_v44 = vld.sshfl [vmem:[%s18740_s21 + $0xc0] sm:$0xf pattern:$0x76325410] }
  0x86   : > { %v22491_v57 = vsel %vm18990_vm15, 4294967295, %v22490_v57  ;;  %v2199_v60 = vcombine.high %v16305_v33, %v16305_v33  ;;  %v1986_v62 = vsel %vm18833_vm9, %v1981_v52, %v1985_v41  ;;  %v16310_v63 = vrot.slane %v16302_v47, 9  ;;  %v18477_v34 = vld.sshfl [vmem:[%s18740_s21 + $0x118] sm:$0xf pattern:$0x76325410] }
  0x87   : > { %22492 = vst [vmem:[#allocation7_spill] sm:$0xff] %v22491_v57  ;;  %v2241_v0 = vrot.slane %v2175_v53, 7  ;;  %v16311_v1 = vrot.slane %v16303_v29, 9  ;;  %v1995_v4 = vrot.slane %v1994_v58, 2  ;;  %v2026_v6 = vrot.slane %v2018_v35, %v18742_v12  ;;  %v16341_v49 = vld [vmem:[%s22463_s1 + $0x10] sm:$0x3] }
  0x88   : > { %v2245_v7 = vrot.slane %v2183_v54, 7  ;;  %v16312_v8 = vrot.slane %v16304_v32, 9  ;;  %v2249_v10 = vrot.slane %v2191_v59, 7  ;;  %v16313_v14 = vrot.slane %v16305_v33, 9 }
  0x89   : > { %v2242_v9 = vsel %vm18990_vm15, %v16310_v63, %v2241_v0  ;;  %v2253_v15 = vrot.slane %v2199_v60, 7  ;;  %v2000_v16 = vsel %vm18833_vm9, %v1995_v4, %v1999_v50  ;;  %v2207_v17 = vcombine.high %v16306_v56, %v16306_v56  ;;  %v18474_v29 = vld.sshfl [vmem:[%s18740_s21 + $0x110] sm:$0xf pattern:$0x76325410] }
  0x8a   : > { %v2246_v45 = vsel %vm18990_vm15, %v16311_v1, %v2245_v7  ;;  %v2215_v19 = vcombine.high %v16307_v61, %v16307_v61  ;;  %v2019_v20 = vcombine.low %v1986_v62, %v2000_v16  ;;  %v2250_v21 = vsel %vm18990_vm15, %v16312_v8, %v2249_v10  ;;  %v18476_v33 = vld.sshfl [vmem:[%s18740_s21 + $0xc8] sm:$0xf pattern:$0x76325410]  ;;  %v16362_v8 = vld [vmem:[%s22463_s1 + $0x12] sm:$0x3] }
  0x8b   : > { %v2254_v22 = vsel %vm18990_vm15, %v16313_v14, %v2253_v15  ;;  %v2271_v23 = vcombine.low %v2242_v9, %v2246_v45  ;;  %v2223_v26 = vcombine.high %v16308_v2, %v16308_v2  ;;  %v2231_v27 = vcombine.high %v16309_v3, %v16309_v3  ;;  %v18478_v40 = vld.sshfl [vmem:[%s18740_s21 + $0x120] sm:$0xf pattern:$0x76325410] }
  0x8c   : > { %v2272_v25 = vcombine.low %v2250_v21, %v2254_v22  ;;  %v16314_v47 = vrot.slane %v16306_v56, 9  ;;  %v2033_v28 = vrot.slane %v2019_v20, %v18742_v12  ;;  %v2257_v31 = vrot.slane %v2207_v17, 7  ;;  %v16373_v50 = vld.sshfl [vmem:[%s18740_s21 + $0xb0] sm:$0x13 pattern:$0x76325410] }
  0x8d   : > { %v2279_v30 = vrot.slane %v2271_v23, %v18742_v12  ;;  %v16315_v32 = vrot.slane %v16307_v61, 9  ;;  %v2261_v37 = vrot.slane %v2215_v19, 7  ;;  %v16316_v38 = vrot.slane %v16308_v2, 9 }
  0x8e   : > { %v2286_v36 = vrot.slane %v2272_v25, %v18742_v12  ;;  %v2265_v39 = vrot.slane %v2223_v26, 7  ;;  %v2034_v41 = vcombine.low %v2026_v6, %v2033_v28  ;;  %v2258_v42 = vsel %vm18990_vm15, %v16314_v47, %v2257_v31  ;;  %v18479_v56 = vld.sshfl [vmem:[%s18740_s21 + $0xdc] sm:$0xf pattern:$0x76325410] }
  0x8f   : > { %v16317_v48 = vrot.slane %v16309_v3, 9  ;;  %v2269_v43 = vrot.slane %v2231_v27, 7  ;;  %v2262_v52 = vsel %vm18990_vm15, %v16315_v32, %v2261_v37  ;;  %v2399_v54 = vcombine.low %v18828_v11, %v18839_v18  ;;  %v18480_v58 = vld.sshfl [vmem:[%s18740_s21 + $0xe4] sm:$0xf pattern:$0x76325410] }
  0x90   : > { %v2287_v51 = vcombine.low %v2279_v30, %v2286_v36  ;;  %v2266_v53 = vsel %vm18990_vm15, %v16316_v38, %v2265_v39  ;;  %17691 = vmatmul.mubr.msk.bf16.vlgmr.msra.gmra.mxu1 %vm349_vm2, %v2034_v41  ;;  %v2288_v59 = vcombine.low %v2258_v42, %v2262_v52  ;;  %v18481_v60 = vld.sshfl [vmem:[%s18740_s21 + $0x134] sm:$0xf pattern:$0x76325410]  ;;  %v2953_v11 = vshrl.u32 %v16373_v50, 16 }
  0x91   : > { %v2270_v35 = vsel %vm18990_vm15, %v16317_v48, %v2269_v43  ;;  %v18482_v61 = vld.sshfl [vmem:[%s18740_s21 + $0x13c] sm:$0xf pattern:$0x76325410]  ;;  %17701 = vmatpush3.bf16.msra.mxu1 %v18798_v46  ;;  %17708 = vmatprep.mubr.msk.bf16.mxu0 %vm349_vm2, %v2399_v54  ;;  %v2512_v0 = vcombine.low %v18473_v24, %v18474_v29  ;;  %v2956_v3 = vshll.u32 %v16373_v50, 16  ;;  %v2416_v46 = vcombine.low %v18475_v44, %v18476_v33 }
  0x92   : > { %17702 = vmatprep.mubr.msk.bf16.mxu1 %vm349_vm2, %v2287_v51  ;;  %v2289_v62 = vcombine.low %v2266_v53, %v2270_v35  ;;  %v18483_v63 = vld.sshfl [vmem:[%s18740_s21 + $0xec] sm:$0xf pattern:$0x76325410]  ;;  %v2296_v18 = vrot.slane %v2288_v59, %v18742_v12  ;;  %17712 = vmatprep.subr.bf16.mxu1 %v18812_v55  ;;  %v19049_v6 = vand.u32 %v16341_v49, %v18732_v5  ;;  %v2955_v15 = vrot.slane %v2953_v11, 6 }
  0x93   : > { %v18484_v1 = vld.sshfl [vmem:[%s18740_s21 + $0xf4] sm:$0xf pattern:$0x76325410]  ;;  %17709 = vmatmul.mubr.msk.bf16.vlgmr.msra.gmra.mxu0 %vm349_vm2, %v2416_v46  ;;  %v19056_v10 = vcombine.low %v18477_v34, %v18478_v40  ;;  %v2624_v16 = vcombine.low %v18479_v56, %v18480_v58  ;;  %v19061_v45 = vcombine.low %v18481_v60, %v18482_v61  ;;  %v19065_v19 = vand.u32 %v16362_v8, %v18732_v5 }
  0x94   : > { %v18485_v2 = vld.sshfl [vmem:[%s18740_s21 + $0x144] sm:$0xf pattern:$0x76325410]  ;;  %v2303_v4 = vrot.slane %v2289_v62, %v18742_v12  ;;  %17718 = vmatprep.subr.bf16.mxu0 %v19049_v6  ;;  %v2895_v21 = vcombine.high %v16373_v50, %v16373_v50  ;;  %v2641_v23 = vcombine.low %v18483_v63, %v18484_v1  ;;  %v2958_v26 = vrot.slane %v2956_v3, 7 }
  0x95   : > { %v18486_v7 = vld.sshfl [vmem:[%s18740_s21 + $0x14c] sm:$0xf pattern:$0x76325410]  ;;  %17719 = vmatpush3.bf16.msra.mxu0 %v19049_v6  ;;  %17720 = vmatprep.mubr.msk.bf16.mxu0 %vm349_vm2, %v2624_v16 }
  0x96   : > { %v2304_v9 = vcombine.low %v2296_v18, %v2303_v4  ;;  %v16374_v14 = vld.sshfl [vmem:[%s18740_s21 + $0xb4] sm:$0x13 pattern:$0x76325410]  ;;  %v19072_v27 = vcombine.low %v18485_v2, %v18486_v7  ;;  %v2962_v47 = vshll.u32 %v2895_v21, 16  ;;  %17730 = vmatprep.subr.bf16.mxu0 %v19065_v19  ;;  %v2959_v28 = vor.u32 %v2958_v26, %v2955_v15 }
  0x97   : > { %v16375_v17 = vld.sshfl [vmem:[%s18740_s21 + $0xb8] sm:$0x13 pattern:$0x76325410]  ;;  %v2903_v22 = vcombine.high %v16374_v14, %v16374_v14  ;;  %v2967_v29 = vshrl.u32 %v16374_v14, 16  ;;  %v2970_v44 = vshll.u32 %v16374_v14, 16 }
  0x98   : > { %v16376_v20 = vld.sshfl [vmem:[%s18740_s21 + $0xbc] sm:$0x13 pattern:$0x76325410]  ;;  %17703 = vmatmul.mubr.msk.bf16.vlgmr.msra.gmra.mxu1 %vm349_vm2, %v2304_v9  ;;  %v2911_v24 = vcombine.high %v16375_v17, %v16375_v17  ;;  %v2981_v31 = vshrl.u32 %v16375_v17, 16  ;;  %v2984_v32 = vshll.u32 %v16375_v17, 16 }
  0x99   : > { %v2919_v25 = vcombine.high %v16376_v20, %v16376_v20  ;;  %17713 = vmatpush3.bf16.msra.mxu1 %v18812_v55  ;;  %17714 = vmatprep.mubr.msk.bf16.mxu1 %vm349_vm2, %v2512_v0  ;;  %v2976_v30 = vshll.u32 %v2903_v22, 16  ;;  %v2964_v33 = vrot.slane %v2962_v47, 7  ;;  %v2969_v55 = vrot.slane %v2967_v29, 6 }
  0x9a   : > { %17724 = vmatprep.subr.bf16.mxu1 %v19049_v6  ;;  %v2972_v34 = vrot.slane %v2970_v44, 7  ;;  %v2990_v36 = vshll.u32 %v2911_v24, 16  ;;  %v16377_v37 = vld.sshfl [vmem:[%s18740_s21 + $0xc0] sm:$0x13 pattern:$0x76325410] }
  0x9b   : > { %v2960_v38 = vrot.slane %v2959_v28, 2  ;;  %v2978_v39 = vrot.slane %v2976_v30, 7  ;;  %v2983_v40 = vrot.slane %v2981_v31, 6  ;;  %v2986_v41 = vrot.slane %v2984_v32, 7  ;;  %17721 = vmatmul.mubr.msk.bf16.vlgmr.msra.gmra.mxu0 %vm349_vm2, %v2641_v23 }
  0x9c   : > { %v16378_v42 = vld.sshfl [vmem:[%s18740_s21 + $0xc4] sm:$0x13 pattern:$0x76325410]  ;;  %v2973_v48 = vor.u32 %v2972_v34, %v2969_v55  ;;  %v2992_v43 = vrot.slane %v2990_v36, 7  ;;  %v2995_v49 = vshrl.u32 %v16376_v20, 16  ;;  %17731 = vmatpush3.bf16.msra.mxu0 %v19065_v19  ;;  %17732 = vmatprep.mubr.msk.bf16.mxu0 %vm349_vm2, %v2512_v0  ;;  %v2927_v58 = vcombine.high %v16377_v37, %v16377_v37 }
  0x9d   : > { %v2998_v50 = vshll.u32 %v16376_v20, 16  ;;  %v16379_v51 = vld.sshfl [vmem:[%s18740_s21 + $0xc8] sm:$0x13 pattern:$0x76325410]  ;;  %v2965_v52 = vsel %vm18833_vm9, %v2960_v38, %v2964_v33  ;;  %v2987_v53 = vor.u32 %v2986_v41, %v2983_v40  ;;  %v3004_v54 = vshll.u32 %v2919_v25, 16 }
  0x9e   : > { %v16380_v56 = vld.sshfl [vmem:[%s18740_s21 + $0xcc] sm:$0x13 pattern:$0x76325410]  ;;  %v2974_v35 = vrot.slane %v2973_v48, 2  ;;  %v2997_v59 = vrot.slane %v2995_v49, 6  ;;  %v2935_v61 = vcombine.high %v16378_v42, %v16378_v42  ;;  %v2943_v11 = vcombine.high %v16379_v51, %v16379_v51 }
  0x9f   : > { %v3000_v60 = vrot.slane %v2998_v50, 7  ;;  %v2988_v62 = vrot.slane %v2987_v53, 2  ;;  %v3006_v63 = vrot.slane %v3004_v54, 7  ;;  %v2951_v18 = vcombine.high %v16380_v56, %v16380_v56  ;;  %v16383_v33 = vld [vmem:[%s22463_s1 + $0x14] sm:$0x3] }
  0xa0   : > { %17715 = vmatmul.mubr.msk.bf16.vlgmr.msra.gmra.mxu1 %vm349_vm2, %v19056_v10  ;;  %v2979_v0 = vsel %vm18833_vm9, %v2974_v35, %v2978_v39  ;;  %v3009_v2 = vshrl.u32 %v16377_v37, 16  ;;  %v3012_v3 = vshll.u32 %v16377_v37, 16  ;;  %v3018_v7 = vshll.u32 %v2927_v58, 16 }
  0xa1   : > { %17725 = vmatpush3.bf16.msra.mxu1 %v19049_v6  ;;  %17726 = vmatprep.mubr.msk.bf16.mxu1 %vm349_vm2, %v19061_v45  ;;  %v3001_v1 = vor.u32 %v3000_v60, %v2997_v59  ;;  %v2993_v4 = vsel %vm18833_vm9, %v2988_v62, %v2992_v43  ;;  %v3064_v46 = vcombine.low %v2965_v52, %v2979_v0  ;;  %v3023_v8 = vshrl.u32 %v16378_v42, 16  ;;  %v16394_v37 = vld.sshfl [vmem:[%s18740_s21 + $0xdc] sm:$0x13 pattern:$0x76325410] }
  0xa2   : > { %17736 = vmatprep.subr.bf16.mxu1 %v19065_v19  ;;  %v3011_v14 = vrot.slane %v3009_v2, 6  ;;  %v3014_v6 = vrot.slane %v3012_v3, 7  ;;  %v3026_v15 = vshll.u32 %v16378_v42, 16  ;;  %v3020_v17 = vrot.slane %v3018_v7, 7 }
  0xa3   : > { %v3002_v9 = vrot.slane %v3001_v1, 2  ;;  %v3072_v16 = vrot.slane %v3064_v46, %v18742_v12  ;;  %v3025_v20 = vrot.slane %v3023_v8, 6  ;;  %v3032_v21 = vshll.u32 %v2935_v61, 16  ;;  %17733 = vmatmul.mubr.msk.bf16.vlgmr.msra.gmra.mxu0 %vm349_vm2, %v19056_v10 }
  0xa4   : > { %v3015_v23 = vor.u32 %v3014_v6, %v3011_v14  ;;  %v3028_v24 = vrot.slane %v3026_v15, 7  ;;  %v3037_v25 = vshrl.u32 %v16379_v51, 16  ;;  %v3040_v29 = vshll.u32 %v16379_v51, 16  ;;  %17744 = vmatprep.mubr.msk.bf16.mxu0 %vm349_vm2, %v19061_v45 }
  0xa5   : > { %v3007_v22 = vsel %vm18833_vm9, %v3002_v9, %v3006_v63  ;;  %v3034_v47 = vrot.slane %v3032_v21, 7  ;;  %v3046_v44 = vshll.u32 %v2943_v11, 16  ;;  %v3051_v32 = vshrl.u32 %v16380_v56, 16 }
  0xa6   : > { %v3065_v26 = vcombine.low %v2993_v4, %v3007_v22  ;;  %v3016_v28 = vrot.slane %v3015_v23, 2  ;;  %v3029_v30 = vor.u32 %v3028_v24, %v3025_v20  ;;  %v3039_v31 = vrot.slane %v3037_v25, 6  ;;  %v16395_v49 = vld.sshfl [vmem:[%s18740_s21 + $0xe0] sm:$0x13 pattern:$0x76325410] }
  0xa7   : > { %v3042_v55 = vrot.slane %v3040_v29, 7  ;;  %v3048_v34 = vrot.slane %v3046_v44, 7  ;;  %v3054_v36 = vshll.u32 %v16380_v56, 16  ;;  %v3053_v39 = vrot.slane %v3051_v32, 6 }
  0xa8   : > { %17727 = vmatmul.mubr.msk.bf16.vlgmr.msra.gmra.mxu1 %vm349_vm2, %v19072_v27  ;;  %v3079_v10 = vrot.slane %v3065_v26, %v18742_v12  ;;  %v3021_v45 = vsel %vm18833_vm9, %v3016_v28, %v3020_v17  ;;  %v3030_v38 = vrot.slane %v3029_v30, 2  ;;  %v3060_v40 = vshll.u32 %v2951_v18, 16  ;;  %v16396_v52 = vld.sshfl [vmem:[%s18740_s21 + $0xe4] sm:$0x13 pattern:$0x76325410] }
  0xa9   : > { %17737 = vmatpush3.bf16.msra.mxu1 %v19065_v19  ;;  %v3043_v42 = vor.u32 %v3042_v55, %v3039_v31  ;;  %v3056_v48 = vrot.slane %v3054_v36, 7  ;;  %v19113_v43 = vand.u32 %v16383_v33, %v18732_v5  ;;  %v3238_v19 = vcombine.high %v16394_v37, %v16394_v37  ;;  %v16397_v35 = vld.sshfl [vmem:[%s18740_s21 + $0xe8] sm:$0x13 pattern:$0x76325410] }
  0xaa   : > { %v3080_v41 = vcombine.low %v3072_v16, %v3079_v10  ;;  %v3035_v50 = vsel %vm18833_vm9, %v3030_v38, %v3034_v47  ;;  %v3062_v51 = vrot.slane %v3060_v40, 7  ;;  %v3246_v53 = vcombine.high %v16395_v49, %v16395_v49  ;;  %v16398_v29 = vld.sshfl [vmem:[%s18740_s21 + $0xec] sm:$0x13 pattern:$0x76325410] }
  0xab   : > { %v3044_v54 = vrot.slane %v3043_v42, 2  ;;  %v3057_v56 = vor.u32 %v3056_v48, %v3053_v39  ;;  %v3081_v58 = vcombine.low %v3021_v45, %v3035_v50  ;;  %17742 = vmatprep.subr.bf16.mxu0 %v19113_v43  ;;  %v3254_v59 = vcombine.high %v16396_v52, %v16396_v52  ;;  %17748 = vmatprep.subr.bf16.mxu1 %v19113_v43  ;;  %v16399_v44 = vld.sshfl [vmem:[%s18740_s21 + $0xf0] sm:$0x13 pattern:$0x76325410] }
  0xac   : > { %17738 = vmatprep.mubr.msk.bf16.mxu1 %vm349_vm2, %v3080_v41  ;;  %17743 = vmatpush3.bf16.msra.mxu0 %v19113_v43  ;;  %v3262_v60 = vcombine.high %v16397_v35, %v16397_v35  ;;  %v3296_v61 = vshrl.u32 %v16394_v37, 16  ;;  %v3299_v62 = vshll.u32 %v16394_v37, 16  ;;  %v3305_v63 = vshll.u32 %v3238_v19, 16 }
  0xad   : > { %v3049_v11 = vsel %vm18833_vm9, %v3044_v54, %v3048_v34  ;;  %v3058_v18 = vrot.slane %v3057_v56, 2  ;;  %v3089_v0 = vrot.slane %v3081_v58, %v18742_v12  ;;  %v3310_v1 = vshrl.u32 %v16395_v49, 16  ;;  %v16400_v34 = vld.sshfl [vmem:[%s18740_s21 + $0xf4] sm:$0x13 pattern:$0x76325410] }
  0xae   : > { %v3298_v2 = vrot.slane %v3296_v61, 6  ;;  %v3301_v3 = vrot.slane %v3299_v62, 7  ;;  %v3307_v4 = vrot.slane %v3305_v63, 7  ;;  %v3313_v46 = vshll.u32 %v16395_v49, 16 }
  0xaf   : > { %v3063_v7 = vsel %vm18833_vm9, %v3058_v18, %v3062_v51  ;;  %v3312_v8 = vrot.slane %v3310_v1, 6  ;;  %v3319_v9 = vshll.u32 %v3246_v53, 16  ;;  %v3324_v14 = vshrl.u32 %v16396_v52, 16  ;;  %17745 = vmatmul.mubr.msk.bf16.vlgmr.msra.gmra.mxu0 %vm349_vm2, %v19072_v27 }
  0xb0   : > { %v3082_v6 = vcombine.low %v3049_v11, %v3063_v7  ;;  %v3302_v15 = vor.u32 %v3301_v3, %v3298_v2  ;;  %v3315_v16 = vrot.slane %v3313_v46, 7  ;;  %v3327_v17 = vshll.u32 %v16396_v52, 16  ;;  %17756 = vmatprep.mubr.msk.bf16.mxu0 %vm349_vm2, %v3080_v41  ;;  %v16401_v45 = vld.sshfl [vmem:[%s18740_s21 + $0xf8] sm:$0x13 pattern:$0x76325410] }
  0xb1   : > { %v3321_v20 = vrot.slane %v3319_v9, 7  ;;  %v3326_v21 = vrot.slane %v3324_v14, 6  ;;  %v3333_v22 = vshll.u32 %v3254_v59, 16  ;;  %v3338_v23 = vshrl.u32 %v16397_v35, 16  ;;  %v16404_v7 = vld [vmem:[%s22463_s1 + $0x16] sm:$0x3] }
  0xb2   : > { %v3096_v24 = vrot.slane %v3082_v6, %v18742_v12  ;;  %v3303_v25 = vrot.slane %v3302_v15, 2  ;;  %v3316_v26 = vor.u32 %v3315_v16, %v3312_v8  ;;  %v3329_v47 = vrot.slane %v3327_v17, 7 }
  0xb3   : > { %v3335_v27 = vrot.slane %v3333_v22, 7  ;;  %v3340_v28 = vrot.slane %v3338_v23, 6  ;;  %v3341_v30 = vshll.u32 %v16397_v35, 16  ;;  %v3347_v31 = vshll.u32 %v3262_v60, 16 }
  0xb4   : > { %v19135_v32 = vcombine.low %v3089_v0, %v3096_v24  ;;  %v3308_v33 = vsel %vm18833_vm9, %v3303_v25, %v3307_v4  ;;  %v3317_v10 = vrot.slane %v3316_v26, 2  ;;  %v3330_v55 = vor.u32 %v3329_v47, %v3326_v21  ;;  %v16415_v25 = vld.sshfl [vmem:[%s18740_s21 + $0x108] sm:$0x13 pattern:$0x76325410] }
  0xb5   : > { %v3343_v36 = vrot.slane %v3341_v30, 7  ;;  %v3349_v37 = vrot.slane %v3347_v31, 7  ;;  %v3270_v38 = vcombine.high %v16398_v29, %v16398_v29  ;;  %v3278_v39 = vcombine.high %v16399_v44, %v16399_v44 }
  0xb6   : > { %17739 = vmatmul.mubr.msk.bf16.vlgmr.msra.gmra.mxu1 %vm349_vm2, %v19135_v32  ;;  %v3322_v40 = vsel %vm18833_vm9, %v3317_v10, %v3321_v20  ;;  %v3331_v41 = vrot.slane %v3330_v55, 2  ;;  %v3286_v42 = vcombine.high %v16400_v34, %v16400_v34  ;;  %v3294_v48 = vcombine.high %v16401_v45, %v16401_v45 }
  0xb7   : > { %17749 = vmatpush3.bf16.msra.mxu1 %v19113_v43  ;;  %v3344_v49 = vor.u32 %v3343_v36, %v3340_v28  ;;  %v3407_v50 = vcombine.low %v3308_v33, %v3322_v40  ;;  %v3352_v51 = vshrl.u32 %v16398_v29, 16  ;;  %v3355_v52 = vshll.u32 %v16398_v29, 16  ;;  %v16417_v33 = vld.sshfl [vmem:[%s18740_s21 + $0x110] sm:$0x13 pattern:$0x76325410] }
  0xb8   : > { %v3336_v19 = vsel %vm18833_vm9, %v3331_v41, %v3335_v27  ;;  %v3361_v53 = vshll.u32 %v3270_v38, 16  ;;  %v3366_v54 = vshrl.u32 %v16399_v44, 16  ;;  %v3369_v56 = vshll.u32 %v16399_v44, 16 }
  0xb9   : > { %v3345_v58 = vrot.slane %v3344_v49, 2  ;;  %v3415_v35 = vrot.slane %v3407_v50, %v18742_v12  ;;  %v3354_v59 = vrot.slane %v3352_v51, 6  ;;  %v3357_v60 = vrot.slane %v3355_v52, 7 }
  0xba   : > { %v3363_v61 = vrot.slane %v3361_v53, 7  ;;  %v3368_v62 = vrot.slane %v3366_v54, 6  ;;  %v3371_v63 = vrot.slane %v3369_v56, 7  ;;  %v3375_v11 = vshll.u32 %v3278_v39, 16 }
  0xbb   : > { %v3350_v43 = vsel %vm18833_vm9, %v3345_v58, %v3349_v37  ;;  %v3358_v18 = vor.u32 %v3357_v60, %v3354_v59  ;;  %v3380_v0 = vshrl.u32 %v16400_v34, 16  ;;  %v3383_v1 = vshll.u32 %v16400_v34, 16  ;;  %v16416_v27 = vld.sshfl [vmem:[%s18740_s21 + $0x10c] sm:$0x13 pattern:$0x76325410] }
  0xbc   : > { %v3408_v2 = vcombine.low %v3336_v19, %v3350_v43  ;;  %v3372_v3 = vor.u32 %v3371_v63, %v3368_v62  ;;  %v3377_v4 = vrot.slane %v3375_v11, 7  ;;  %v3389_v46 = vshll.u32 %v3286_v42, 16  ;;  %v16418_v34 = vld.sshfl [vmem:[%s18740_s21 + $0x114] sm:$0x13 pattern:$0x76325410] }
  0xbd   : > { %v3359_v8 = vrot.slane %v3358_v18, 2  ;;  %v3382_v9 = vrot.slane %v3380_v0, 6  ;;  %v3385_v14 = vrot.slane %v3383_v1, 7  ;;  %v3394_v6 = vshrl.u32 %v16401_v45, 16 }
  0xbe   : > { %v3422_v15 = vrot.slane %v3408_v2, %v18742_v12  ;;  %v3373_v16 = vrot.slane %v3372_v3, 2  ;;  %v3391_v17 = vrot.slane %v3389_v46, 7  ;;  %v3397_v20 = vshll.u32 %v16401_v45, 16 }
  0xbf   : > { %v3364_v21 = vsel %vm18833_vm9, %v3359_v8, %v3363_v61  ;;  %v3386_v22 = vor.u32 %v3385_v14, %v3382_v9  ;;  %v3396_v23 = vrot.slane %v3394_v6, 6  ;;  %v3403_v24 = vshll.u32 %v3294_v48, 16  ;;  %v16420_v46 = vld.sshfl [vmem:[%s18740_s21 + $0x11c] sm:$0x13 pattern:$0x76325410] }
  0xc0   : > { %v3423_v26 = vcombine.low %v3415_v35, %v3422_v15  ;;  %v3378_v47 = vsel %vm18833_vm9, %v3373_v16, %v3377_v4  ;;  %v3399_v29 = vrot.slane %v3397_v20, 7  ;;  %v19161_v44 = vand.u32 %v16404_v7, %v18732_v5  ;;  %v16419_v4 = vld.sshfl [vmem:[%s18740_s21 + $0x118] sm:$0x13 pattern:$0x76325410] }
  0xc1   : > { %v3387_v28 = vrot.slane %v3386_v22, 2  ;;  %v3405_v30 = vrot.slane %v3403_v24, 7  ;;  %v3424_v31 = vcombine.low %v3364_v21, %v3378_v47  ;;  %v3581_v10 = vcombine.high %v16415_v25, %v16415_v25  ;;  %v16421_v14 = vld.sshfl [vmem:[%s18740_s21 + $0x120] sm:$0x13 pattern:$0x76325410] }
  0xc2   : > { %17750 = vmatprep.mubr.msk.bf16.mxu1 %vm349_vm2, %v3423_v26  ;;  %v3400_v55 = vor.u32 %v3399_v29, %v3396_v23  ;;  %17754 = vmatprep.subr.bf16.mxu0 %v19161_v44  ;;  %v3589_v36 = vcombine.high %v16416_v27, %v16416_v27  ;;  %v3597_v37 = vcombine.high %v16417_v33, %v16417_v33  ;;  %v3639_v45 = vshrl.u32 %v16415_v25, 16  ;;  %v16422_v22 = vld.sshfl [vmem:[%s18740_s21 + $0x124] sm:$0x13 pattern:$0x76325410] }
  0xc3   : > { %v3392_v38 = vsel %vm18833_vm9, %v3387_v28, %v3391_v17  ;;  %v3432_v39 = vrot.slane %v3424_v31, %v18742_v12  ;;  %17760 = vmatprep.subr.bf16.mxu1 %v19161_v44  ;;  %17755 = vmatpush3.bf16.msra.mxu0 %v19161_v44  ;;  %v3605_v40 = vcombine.high %v16418_v34, %v16418_v34  ;;  %v3642_v41 = vshll.u32 %v16415_v25, 16 }
  0xc4   : > { %v3401_v42 = vrot.slane %v3400_v55, 2  ;;  %v3641_v48 = vrot.slane %v3639_v45, 6  ;;  %v3648_v49 = vshll.u32 %v3581_v10, 16  ;;  %v3653_v50 = vshrl.u32 %v16416_v27, 16 }
  0xc5   : > { %v3644_v51 = vrot.slane %v3642_v41, 7  ;;  %v3656_v52 = vshll.u32 %v16416_v27, 16  ;;  %v3662_v19 = vshll.u32 %v3589_v36, 16  ;;  %v3667_v53 = vshrl.u32 %v16417_v33, 16 }
  0xc6   : > { %v3406_v54 = vsel %vm18833_vm9, %v3401_v42, %v3405_v30  ;;  %v3650_v56 = vrot.slane %v3648_v49, 7  ;;  %v3655_v58 = vrot.slane %v3653_v50, 6  ;;  %v3670_v35 = vshll.u32 %v16417_v33, 16  ;;  %17757 = vmatmul.mubr.msk.bf16.vlgmr.msra.gmra.mxu0 %vm349_vm2, %v19135_v32 }
  0xc7   : > { %v3425_v59 = vcombine.low %v3392_v38, %v3406_v54  ;;  %v3645_v60 = vor.u32 %v3644_v51, %v3641_v48  ;;  %v3658_v61 = vrot.slane %v3656_v52, 7  ;;  %v3664_v62 = vrot.slane %v3662_v19, 7  ;;  %17768 = vmatprep.mubr.msk.bf16.mxu0 %vm349_vm2, %v3423_v26  ;;  %v16425_v51 = vld [vmem:[%s22463_s1 + $0x18] sm:$0x3] }
  0xc8   : > { %v3669_v63 = vrot.slane %v3667_v53, 6  ;;  %v3672_v11 = vrot.slane %v3670_v35, 7  ;;  %v3676_v43 = vshll.u32 %v3597_v37, 16  ;;  %v3681_v18 = vshrl.u32 %v16418_v34, 16 }
  0xc9   : > { %v3439_v0 = vrot.slane %v3425_v59, %v18742_v12  ;;  %v3646_v1 = vrot.slane %v3645_v60, 2  ;;  %v3659_v2 = vor.u32 %v3658_v61, %v3655_v58  ;;  %v3684_v3 = vshll.u32 %v16418_v34, 16  ;;  %v16436_v60 = vld.sshfl [vmem:[%s18740_s21 + $0x134] sm:$0x13 pattern:$0x76325410] }
  0xca   : > { %v3673_v32 = vor.u32 %v3672_v11, %v3669_v63  ;;  %v3678_v7 = vrot.slane %v3676_v43, 7  ;;  %v3683_v8 = vrot.slane %v3681_v18, 6  ;;  %v3690_v9 = vshll.u32 %v3605_v40, 16 }
  0xcb   : > { %v19182_v6 = vcombine.low %v3432_v39, %v3439_v0  ;;  %v3651_v15 = vsel %vm18833_vm9, %v3646_v1, %v3650_v56  ;;  %v3660_v16 = vrot.slane %v3659_v2, 2  ;;  %v3686_v17 = vrot.slane %v3684_v3, 7  ;;  %v16437_v2 = vld.sshfl [vmem:[%s18740_s21 + $0x138] sm:$0x13 pattern:$0x76325410] }
  0xcc   : > { %v3674_v20 = vrot.slane %v3673_v32, 2  ;;  %v3692_v21 = vrot.slane %v3690_v9, 7  ;;  %v3613_v23 = vcombine.high %v16419_v4, %v16419_v4  ;;  %v3621_v24 = vcombine.high %v16420_v46, %v16420_v46  ;;  %v16438_v32 = vld.sshfl [vmem:[%s18740_s21 + $0x13c] sm:$0x13 pattern:$0x76325410] }
  0xcd   : > { %17751 = vmatmul.mubr.msk.bf16.vlgmr.msra.gmra.mxu1 %vm349_vm2, %v19182_v6  ;;  %v3665_v25 = vsel %vm18833_vm9, %v3660_v16, %v3664_v62  ;;  %v3687_v26 = vor.u32 %v3686_v17, %v3683_v8  ;;  %v3629_v47 = vcombine.high %v16421_v14, %v16421_v14  ;;  %v3637_v29 = vcombine.high %v16422_v22, %v16422_v22 }
  0xce   : > { %17761 = vmatpush3.bf16.msra.mxu1 %v19161_v44  ;;  %v3679_v27 = vsel %vm18833_vm9, %v3674_v20, %v3678_v7  ;;  %v3750_v28 = vcombine.low %v3651_v15, %v3665_v25  ;;  %v3695_v30 = vshrl.u32 %v16419_v4, 16  ;;  %v3698_v31 = vshll.u32 %v16419_v4, 16  ;;  %v16439_v15 = vld.sshfl [vmem:[%s18740_s21 + $0x140] sm:$0x13 pattern:$0x76325410] }
  0xcf   : > { %v3688_v33 = vrot.slane %v3687_v26, 2  ;;  %v3704_v10 = vshll.u32 %v3613_v23, 16  ;;  %v3709_v55 = vshrl.u32 %v16420_v46, 16  ;;  %v3712_v34 = vshll.u32 %v16420_v46, 16 }
  0xd0   : > { %v3758_v36 = vrot.slane %v3750_v28, %v18742_v12  ;;  %v3697_v37 = vrot.slane %v3695_v30, 6  ;;  %v3700_v45 = vrot.slane %v3698_v31, 7  ;;  %v3718_v38 = vshll.u32 %v3621_v24, 16 }
  0xd1   : > { %v3693_v39 = vsel %vm18833_vm9, %v3688_v33, %v3692_v21  ;;  %v3706_v40 = vrot.slane %v3704_v10, 7  ;;  %v3711_v44 = vrot.slane %v3709_v55, 6  ;;  %v3714_v41 = vrot.slane %v3712_v34, 7 }
  0xd2   : > { %v3751_v42 = vcombine.low %v3679_v27, %v3693_v39  ;;  %v3701_v48 = vor.u32 %v3700_v45, %v3697_v37  ;;  %v3720_v49 = vrot.slane %v3718_v38, 7  ;;  %v3723_v50 = vshrl.u32 %v16421_v14, 16 }
  0xd3   : > { %v3715_v52 = vor.u32 %v3714_v41, %v3711_v44  ;;  %v3726_v19 = vshll.u32 %v16421_v14, 16  ;;  %v3732_v53 = vshll.u32 %v3629_v47, 16  ;;  %v3737_v54 = vshrl.u32 %v16422_v22, 16 }
  0xd4   : > { %v3765_v56 = vrot.slane %v3751_v42, %v18742_v12  ;;  %v3702_v58 = vrot.slane %v3701_v48, 2  ;;  %v3725_v35 = vrot.slane %v3723_v50, 6  ;;  %v3740_v59 = vshll.u32 %v16422_v22, 16 }
  0xd5   : > { %v3716_v61 = vrot.slane %v3715_v52, 2  ;;  %v3728_v62 = vrot.slane %v3726_v19, 7  ;;  %v3734_v63 = vrot.slane %v3732_v53, 7  ;;  %v3739_v11 = vrot.slane %v3737_v54, 6 }
  0xd6   : > { %v3766_v43 = vcombine.low %v3758_v36, %v3765_v56  ;;  %v3707_v18 = vsel %vm18833_vm9, %v3702_v58, %v3706_v40  ;;  %v3742_v0 = vrot.slane %v3740_v59, 7  ;;  %v3746_v1 = vshll.u32 %v3637_v29, 16  ;;  %v16441_v53 = vld.sshfl [vmem:[%s18740_s21 + $0x148] sm:$0x13 pattern:$0x76325410] }
  0xd7   : > { %v3721_v3 = vsel %vm18833_vm9, %v3716_v61, %v3720_v49  ;;  %v3729_v4 = vor.u32 %v3728_v62, %v3725_v35  ;;  %v19208_v46 = vand.u32 %v16425_v51, %v18732_v5  ;;  %v3924_v7 = vcombine.high %v16436_v60, %v16436_v60  ;;  %v16440_v49 = vld.sshfl [vmem:[%s18740_s21 + $0x144] sm:$0x13 pattern:$0x76325410] }
  0xd8   : > { %17762 = vmatprep.mubr.msk.bf16.mxu1 %vm349_vm2, %v3766_v43  ;;  %v3743_v8 = vor.u32 %v3742_v0, %v3739_v11  ;;  %v3748_v9 = vrot.slane %v3746_v1, 7  ;;  %v3767_v14 = vcombine.low %v3707_v18, %v3721_v3  ;;  %v3932_v16 = vcombine.high %v16437_v2, %v16437_v2  ;;  %v16442_v61 = vld.sshfl [vmem:[%s18740_s21 + $0x14c] sm:$0x13 pattern:$0x76325410] }
  0xd9   : > { %v3730_v17 = vrot.slane %v3729_v4, 2  ;;  %17766 = vmatprep.subr.bf16.mxu0 %v19208_v46  ;;  %17772 = vmatprep.subr.bf16.mxu1 %v19208_v46  ;;  %v3940_v20 = vcombine.high %v16438_v32, %v16438_v32  ;;  %v3948_v21 = vcombine.high %v16439_v15, %v16439_v15  ;;  %v3982_v22 = vshrl.u32 %v16436_v60, 16 }
  0xda   : > { %v3744_v23 = vrot.slane %v3743_v8, 2  ;;  %v3775_v24 = vrot.slane %v3767_v14, %v18742_v12  ;;  %17767 = vmatpush3.bf16.msra.mxu0 %v19208_v46  ;;  %v3985_v25 = vshll.u32 %v16436_v60, 16  ;;  %v3991_v26 = vshll.u32 %v3924_v7, 16 }
  0xdb   : > { %v3735_v47 = vsel %vm18833_vm9, %v3730_v17, %v3734_v63  ;;  %v3984_v29 = vrot.slane %v3982_v22, 6  ;;  %v3996_v27 = vshrl.u32 %v16437_v2, 16  ;;  %v3999_v28 = vshll.u32 %v16437_v2, 16 }
  0xdc   : > { %v3749_v30 = vsel %vm18833_vm9, %v3744_v23, %v3748_v9  ;;  %v3987_v31 = vrot.slane %v3985_v25, 7  ;;  %v3993_v33 = vrot.slane %v3991_v26, 7  ;;  %v4005_v10 = vshll.u32 %v3932_v16, 16 }
  0xdd   : > { %v3768_v55 = vcombine.low %v3735_v47, %v3749_v30  ;;  %v3998_v34 = vrot.slane %v3996_v27, 6  ;;  %v4001_v36 = vrot.slane %v3999_v28, 7  ;;  %v4010_v37 = vshrl.u32 %v16438_v32, 16  ;;  %17769 = vmatmul.mubr.msk.bf16.vlgmr.msra.gmra.mxu0 %vm349_vm2, %v19182_v6  ;;  %v16446_v47 = vld [vmem:[%s22463_s1 + $0x1a] sm:$0x3] }
  0xde   : > { %v3988_v45 = vor.u32 %v3987_v31, %v3984_v29  ;;  %v4007_v38 = vrot.slane %v4005_v10, 7  ;;  %v4013_v39 = vshll.u32 %v16438_v32, 16  ;;  %v4019_v40 = vshll.u32 %v3940_v20, 16  ;;  %17780 = vmatprep.mubr.msk.bf16.mxu0 %vm349_vm2, %v3766_v43 }
  0xdf   : > { %v3782_v44 = vrot.slane %v3768_v55, %v18742_v12  ;;  %v4002_v41 = vor.u32 %v4001_v36, %v3998_v34  ;;  %v4012_v42 = vrot.slane %v4010_v37, 6  ;;  %v4024_v48 = vshrl.u32 %v16439_v15, 16  ;;  %v16443_v43 = vld.sshfl [vmem:[%s18740_s21 + $0x150] sm:$0x13 pattern:$0x76325410] }
  0xe0   : > { %v3989_v50 = vrot.slane %v3988_v45, 2  ;;  %v4015_v51 = vrot.slane %v4013_v39, 7  ;;  %v4021_v52 = vrot.slane %v4019_v40, 7  ;;  %v4027_v19 = vshll.u32 %v16439_v15, 16 }
  0xe1   : > { %v19227_v6 = vcombine.low %v3775_v24, %v3782_v44  ;;  %v4003_v54 = vrot.slane %v4002_v41, 2  ;;  %v4026_v56 = vrot.slane %v4024_v48, 6  ;;  %v4033_v58 = vshll.u32 %v3948_v21, 16 }
  0xe2   : > { %v3994_v35 = vsel %vm18833_vm9, %v3989_v50, %v3993_v33  ;;  %v4016_v59 = vor.u32 %v4015_v51, %v4012_v42  ;;  %v4029_v60 = vrot.slane %v4027_v19, 7  ;;  %v3956_v62 = vcombine.high %v16440_v49, %v16440_v49  ;;  %v16457_v31 = vld.sshfl [vmem:[%s18740_s21 + $0xb0] sm:$0x12 pattern:$0x76325410] }
  0xe3   : > { %17763 = vmatmul.mubr.msk.bf16.vlgmr.msra.gmra.mxu1 %vm349_vm2, %v19227_v6  ;;  %v4008_v63 = vsel %vm18833_vm9, %v4003_v54, %v4007_v38  ;;  %v4035_v11 = vrot.slane %v4033_v58, 7  ;;  %v3964_v18 = vcombine.high %v16441_v53, %v16441_v53  ;;  %v3972_v0 = vcombine.high %v16442_v61, %v16442_v61  ;;  %v16458_v36 = vld.sshfl [vmem:[%s18740_s21 + $0xb4] sm:$0x12 pattern:$0x76325410] }
  0xe4   : > { %17773 = vmatpush3.bf16.msra.mxu1 %v19208_v46  ;;  %v4017_v1 = vrot.slane %v4016_v59, 2  ;;  %v4030_v2 = vor.u32 %v4029_v60, %v4026_v56  ;;  %v4093_v3 = vcombine.low %v3994_v35, %v4008_v63  ;;  %v3980_v4 = vcombine.high %v16443_v43, %v16443_v43  ;;  %v16459_v37 = vld.sshfl [vmem:[%s18740_s21 + $0xb8] sm:$0x12 pattern:$0x76325410] }
  0xe5   : > { %v4038_v32 = vshrl.u32 %v16440_v49, 16  ;;  %v4041_v7 = vshll.u32 %v16440_v49, 16  ;;  %v4047_v8 = vshll.u32 %v3956_v62, 16  ;;  %v4052_v9 = vshrl.u32 %v16441_v53, 16 }
  0xe6   : > { %v4022_v14 = vsel %vm18833_vm9, %v4017_v1, %v4021_v52  ;;  %v4031_v15 = vrot.slane %v4030_v2, 2  ;;  %v4101_v16 = vrot.slane %v4093_v3, %v18742_v12  ;;  %v4055_v17 = vshll.u32 %v16441_v53, 16  ;;  %v16460_v19 = vld.sshfl [vmem:[%s18740_s21 + $0xbc] sm:$0x12 pattern:$0x76325410] }
  0xe7   : > { %v4040_v20 = vrot.slane %v4038_v32, 6  ;;  %v4043_v21 = vrot.slane %v4041_v7, 7  ;;  %v4049_v22 = vrot.slane %v4047_v8, 7  ;;  %v4054_v46 = vrot.slane %v4052_v9, 6 }
  0xe8   : > { %v4036_v23 = vsel %vm18833_vm9, %v4031_v15, %v4035_v11  ;;  %v4057_v24 = vrot.slane %v4055_v17, 7  ;;  %v4061_v25 = vshll.u32 %v3964_v18, 16  ;;  %v4066_v26 = vshrl.u32 %v16442_v61, 16 }
  0xe9   : > { %v4094_v29 = vcombine.low %v4022_v14, %v4036_v23  ;;  %v4044_v27 = vor.u32 %v4043_v21, %v4040_v20  ;;  %v4069_v28 = vshll.u32 %v16442_v61, 16  ;;  %v4075_v30 = vshll.u32 %v3972_v0, 16  ;;  %v16461_v35 = vld.sshfl [vmem:[%s18740_s21 + $0xc0] sm:$0x12 pattern:$0x76325410] }
  0xea   : > { %v4058_v33 = vor.u32 %v4057_v24, %v4054_v46  ;;  %v4063_v10 = vrot.slane %v4061_v25, 7  ;;  %v4068_v55 = vrot.slane %v4066_v26, 6  ;;  %v4080_v34 = vshrl.u32 %v16443_v43, 16 }
  0xeb   : > { %v4108_v45 = vrot.slane %v4094_v29, %v18742_v12  ;;  %v4045_v38 = vrot.slane %v4044_v27, 2  ;;  %v4071_v39 = vrot.slane %v4069_v28, 7  ;;  %v4077_v40 = vrot.slane %v4075_v30, 7 }
  0xec   : > { %v4059_v44 = vrot.slane %v4058_v33, 2  ;;  %v4082_v41 = vrot.slane %v4080_v34, 6  ;;  %v4083_v42 = vshll.u32 %v16443_v43, 16  ;;  %v4089_v48 = vshll.u32 %v3980_v4, 16 }
  0xed   : > { %v4109_v49 = vcombine.low %v4101_v16, %v4108_v45  ;;  %v4050_v50 = vsel %vm18833_vm9, %v4045_v38, %v4049_v22  ;;  %v4072_v51 = vor.u32 %v4071_v39, %v4068_v55  ;;  %v19253_v52 = vand.u32 %v16446_v47, %v18732_v5  ;;  %v16462_v63 = vld.sshfl [vmem:[%s18740_s21 + $0xc4] sm:$0x12 pattern:$0x76325410] }
  0xee   : > { %v4064_v53 = vsel %vm18833_vm9, %v4059_v44, %v4063_v10  ;;  %v4085_v54 = vrot.slane %v4083_v42, 7  ;;  %v4091_v56 = vrot.slane %v4089_v48, 7  ;;  %v4267_v58 = vcombine.high %v16457_v31, %v16457_v31  ;;  %v16463_v1 = vld.sshfl [vmem:[%s18740_s21 + $0xc8] sm:$0x12 pattern:$0x76325410] }
  0xef   : > { %17774 = vmatprep.mubr.msk.bf16.mxu1 %vm349_vm2, %v4109_v49  ;;  %v4073_v59 = vrot.slane %v4072_v51, 2  ;;  %v4110_v60 = vcombine.low %v4050_v50, %v4064_v53  ;;  %17778 = vmatprep.subr.bf16.mxu0 %v19253_v52  ;;  %v4275_v61 = vcombine.high %v16458_v36, %v16458_v36  ;;  %v4283_v62 = vcombine.high %v16459_v37, %v16459_v37  ;;  %v16464_v7 = vld.sshfl [vmem:[%s18740_s21 + $0xcc] sm:$0x12 pattern:$0x76325410] }
  0xf0   : > { %v4086_v11 = vor.u32 %v4085_v54, %v4082_v41  ;;  %17784 = vmatprep.subr.bf16.mxu1 %v19253_v52  ;;  %17779 = vmatpush3.bf16.msra.mxu0 %v19253_v52  ;;  %v4291_v43 = vcombine.high %v16460_v19, %v16460_v19  ;;  %v16465_v18 = vrot.slane %v16457_v31, 9  ;;  %v4326_v0 = vrot.slane %v4267_v58, 7  ;;  %v18487_v27 = vld.sshfl [vmem:[%s18740_s21 + $0x4] sm:$0xf pattern:$0x76325410] }
  0xf1   : > { %v4078_v2 = vsel %vm18833_vm9, %v4073_v59, %v4077_v40  ;;  %v4118_v3 = vrot.slane %v4110_v60, %v18742_v12  ;;  %v16466_v4 = vrot.slane %v16458_v36, 9  ;;  %v4330_v32 = vrot.slane %v4275_v61, 7  ;;  %v18488_v10 = vld.sshfl [vmem:[%s18740_s21 + $0xc] sm:$0xf pattern:$0x76325410] }
  0xf2   : > { %v4087_v8 = vrot.slane %v4086_v11, 2  ;;  %v4327_v9 = vsel %vm18990_vm15, %v16465_v18, %v4326_v0  ;;  %v16467_v14 = vrot.slane %v16459_v37, 9  ;;  %v4334_v15 = vrot.slane %v4283_v62, 7  ;;  %v16496_v60 = vld [vmem:[%s22463_s1 + $0x1e] sm:$0x3] }
  0xf3   : > { %v4331_v16 = vsel %vm18990_vm15, %v16466_v4, %v4330_v32  ;;  %v16468_v17 = vrot.slane %v16460_v19, 9  ;;  %v4338_v20 = vrot.slane %v4291_v43, 7  ;;  %17781 = vmatmul.mubr.msk.bf16.vlgmr.msra.gmra.mxu0 %vm349_vm2, %v19227_v6  ;;  %v4299_v21 = vcombine.high %v16461_v35, %v16461_v35  ;;  %v16475_v6 = vld [vmem:[%s22463_s1 + $0x1c] sm:$0x3] }
  0xf4   : > { %v4092_v22 = vsel %vm18833_vm9, %v4087_v8, %v4091_v56  ;;  %v4335_v46 = vsel %vm18990_vm15, %v16467_v14, %v4334_v15  ;;  %v4356_v23 = vcombine.low %v4327_v9, %v4331_v16  ;;  %v4307_v24 = vcombine.high %v16462_v63, %v16462_v63  ;;  %v18489_v55 = vld.sshfl [vmem:[%s18740_s21 + $0x5c] sm:$0xf pattern:$0x76325410] }
  0xf5   : > { %v4111_v25 = vcombine.low %v4078_v2, %v4092_v22  ;;  %v4339_v26 = vsel %vm18990_vm15, %v16468_v17, %v4338_v20  ;;  %v4315_v47 = vcombine.high %v16463_v1, %v16463_v1  ;;  %v4323_v29 = vcombine.high %v16464_v7, %v16464_v7  ;;  %v18490_v38 = vld.sshfl [vmem:[%s18740_s21 + $0x64] sm:$0xf pattern:$0x76325410]  ;;  %v16517_v17 = vld [vmem:[%s22463_s1 + $0x20] sm:$0x3] }
  0xf6   : > { %v4357_v28 = vcombine.low %v4335_v46, %v4339_v26  ;;  %v4364_v30 = vrot.slane %v4356_v23, %v18742_v12  ;;  %v16469_v31 = vrot.slane %v16461_v35, 9  ;;  %v4342_v33 = vrot.slane %v4299_v21, 7  ;;  %v19294_v42 = vld.sshfl [vmem:[%s18740_s21 + $0x4] sm:$0x13 pattern:$0x76325410] }
  0xf7   : > { %v4125_v34 = vrot.slane %v4111_v25, %v18742_v12  ;;  %v16470_v36 = vrot.slane %v16462_v63, 9  ;;  %v4346_v37 = vrot.slane %v4307_v24, 7  ;;  %v16471_v45 = vrot.slane %v16463_v1, 9 }
  0xf8   : > { %v4371_v39 = vrot.slane %v4357_v28, %v18742_v12  ;;  %v4343_v40 = vsel %vm18990_vm15, %v16469_v31, %v4342_v33  ;;  %v4350_v44 = vrot.slane %v4315_v47, 7  ;;  %v16472_v41 = vrot.slane %v16464_v7, 9  ;;  %v18491_v19 = vld.sshfl [vmem:[%s18740_s21 + $0x14] sm:$0xf pattern:$0x76325410] }
  0xf9   : > { %v4126_v48 = vcombine.low %v4118_v3, %v4125_v34  ;;  %v4347_v49 = vsel %vm18990_vm15, %v16470_v36, %v4346_v37  ;;  %v4354_v50 = vrot.slane %v4323_v29, 7  ;;  %v4509_v51 = vand.u32 %v16475_v6, %v18732_v5  ;;  %v18492_v53 = vld.sshfl [vmem:[%s18740_s21 + $0x1c] sm:$0xf pattern:$0x76325410] }
  0xfa   : > { %v4372_v54 = vcombine.low %v4364_v30, %v4371_v39  ;;  %v4351_v56 = vsel %vm18990_vm15, %v16471_v45, %v4350_v44  ;;  %v4373_v58 = vcombine.low %v4343_v40, %v4347_v49  ;;  %v18493_v35 = vld.sshfl [vmem:[%s18740_s21 + $0x6c] sm:$0xf pattern:$0x76325410]  ;;  %v5038_v11 = vshrl.u32 %v19294_v42, 16 }
  0xfb   : > { %v18494_v59 = vld.sshfl [vmem:[%s18740_s21 + $0x74] sm:$0xf pattern:$0x76325410]  ;;  %17775 = vmatmul.mubr.msk.bf16.vlgmr.msra.gmra.mxu1 %vm349_vm2, %v4126_v48  ;;  %v4355_v61 = vsel %vm18990_vm15, %v16472_v41, %v4354_v50  ;;  %17790 = vmatprep.subr.bf16.mxu0 %v4509_v51  ;;  %v5041_v2 = vshll.u32 %v19294_v42, 16  ;;  %v4484_v3 = vcombine.low %v18487_v27, %v18488_v10  ;;  %v4501_v15 = vcombine.low %v18491_v19, %v18492_v53 }
  0xfc   : > { %v18495_v62 = vld.sshfl [vmem:[%s18740_s21 + $0x30] sm:$0xf pattern:$0x76325410]  ;;  %17785 = vmatpush3.bf16.msra.mxu1 %v19253_v52  ;;  %17786 = vmatprep.mubr.msk.bf16.mxu1 %vm349_vm2, %v4372_v54  ;;  %v4374_v43 = vcombine.low %v4351_v56, %v4355_v61  ;;  %v4381_v18 = vrot.slane %v4373_v58, %v18742_v12  ;;  %v5040_v7 = vrot.slane %v5038_v11, 6  ;;  %v4597_v52 = vcombine.low %v18489_v55, %v18490_v38 }
  0xfd   : > { %v18496_v63 = vld.sshfl [vmem:[%s18740_s21 + $0x38] sm:$0xf pattern:$0x76325410]  ;;  %17796 = vmatprep.subr.bf16.mxu1 %v4509_v51  ;;  %17791 = vmatpush3.bf16.msra.mxu0 %v4509_v51  ;;  %v19327_v16 = vand.u32 %v16496_v60, %v18732_v5  ;;  %v19332_v21 = vcombine.low %v18493_v35, %v18494_v59  ;;  %v5043_v23 = vrot.slane %v5041_v2, 7  ;;  %v19341_v25 = vand.u32 %v16517_v17, %v18732_v5 }
  0xfe   : > { %v18497_v0 = vld.sshfl [vmem:[%s18740_s21 + $0x88] sm:$0xf pattern:$0x76325410]  ;;  %v4388_v8 = vrot.slane %v4374_v43, %v18742_v12  ;;  %17792 = vmatprep.mubr.msk.bf16.mxu0 %vm349_vm2, %v4484_v3  ;;  %v4709_v46 = vcombine.low %v18495_v62, %v18496_v63  ;;  %v4980_v6 = vcombine.high %v19294_v42, %v19294_v42 }
  0xff   : > { %v18498_v1 = vld.sshfl [vmem:[%s18740_s21 + $0x90] sm:$0xf pattern:$0x76325410]  ;;  %17802 = vmatprep.subr.bf16.mxu0 %v19327_v16  ;;  %v5044_v55 = vor.u32 %v5043_v23, %v5040_v7 }
 0x100   : > { %v18499_v4 = vld.sshfl [vmem:[%s18740_s21 + $0x40] sm:$0xf pattern:$0x76325410]  ;;  %v4389_v20 = vcombine.low %v4381_v18, %v4388_v8  ;;  %17793 = vmatmul.mubr.msk.bf16.vlgmr.msra.gmra.mxu0 %vm349_vm2, %v4501_v15  ;;  %v19338_v24 = vcombine.low %v18497_v0, %v18498_v1  ;;  %v5047_v34 = vshll.u32 %v4980_v6, 16 }
 0x101   : > { %v18500_v32 = vld.sshfl [vmem:[%s18740_s21 + $0x48] sm:$0xf pattern:$0x76325410]  ;;  %17803 = vmatpush3.bf16.msra.mxu0 %v19327_v16  ;;  %17804 = vmatprep.mubr.msk.bf16.mxu0 %vm349_vm2, %v4709_v46  ;;  %v5045_v44 = vrot.slane %v5044_v55, 2 }
 0x102   : > { %v18501_v9 = vld.sshfl [vmem:[%s18740_s21 + $0x98] sm:$0xf pattern:$0x76325410]  ;;  %v4726_v47 = vcombine.low %v18499_v4, %v18500_v32  ;;  %17814 = vmatprep.subr.bf16.mxu0 %v19341_v25  ;;  %v5049_v41 = vrot.slane %v5047_v34, 7 }
 0x103   : > { %v18502_v14 = vld.sshfl [vmem:[%s18740_s21 + $0xa0] sm:$0xf pattern:$0x76325410]  ;;  %17787 = vmatmul.mubr.msk.bf16.vlgmr.msra.gmra.mxu1 %vm349_vm2, %v4389_v20  ;;  %v16538_v55 = vld [vmem:[%s22463_s1 + $0x22] sm:$0x3] }
 0x104   : > { %v16529_v22 = vld.sshfl [vmem:[%s18740_s21 + $0x8] sm:$0x13 pattern:$0x76325410]  ;;  %17797 = vmatpush3.bf16.msra.mxu1 %v4509_v51  ;;  %17798 = vmatprep.mubr.msk.bf16.mxu1 %vm349_vm2, %v4597_v52  ;;  %v19350_v30 = vcombine.low %v18501_v9, %v18502_v14  ;;  %v5050_v58 = vsel %vm18833_vm9, %v5045_v44, %v5049_v41 }
 0x105   : > { %v16530_v26 = vld.sshfl [vmem:[%s18740_s21 + $0xc] sm:$0x13 pattern:$0x76325410]  ;;  %v4988_v27 = vcombine.high %v16529_v22, %v16529_v22  ;;  %v5052_v28 = vshrl.u32 %v16529_v22, 16  ;;  %v5055_v10 = vshll.u32 %v16529_v22, 16  ;;  %17808 = vmatprep.subr.bf16.mxu1 %v19327_v16 }
 0x106   : > { %v16531_v29 = vld.sshfl [vmem:[%s18740_s21 + $0x10] sm:$0x13 pattern:$0x76325410]  ;;  %v4996_v31 = vcombine.high %v16530_v26, %v16530_v26  ;;  %v5066_v38 = vshrl.u32 %v16530_v26, 16  ;;  %v5069_v39 = vshll.u32 %v16530_v26, 16 }
 0x107   : > { %v5004_v33 = vcombine.high %v16531_v29, %v16531_v29  ;;  %v5054_v36 = vrot.slane %v5052_v28, 6  ;;  %v5061_v37 = vshll.u32 %v4988_v27, 16  ;;  %v5057_v45 = vrot.slane %v5055_v10, 7 }
 0x108   : > { %v5075_v40 = vshll.u32 %v4996_v31, 16  ;;  %v5080_v48 = vshrl.u32 %v16531_v29, 16  ;;  %v16532_v49 = vld.sshfl [vmem:[%s18740_s21 + $0x14] sm:$0x13 pattern:$0x76325410]  ;;  %17805 = vmatmul.mubr.msk.bf16.vlgmr.msra.gmra.mxu0 %vm349_vm2, %v4726_v47 }
 0x109   : > { %v5063_v42 = vrot.slane %v5061_v37, 7  ;;  %v16533_v50 = vld.sshfl [vmem:[%s18740_s21 + $0x18] sm:$0x13 pattern:$0x76325410]  ;;  %v5058_v51 = vor.u32 %v5057_v45, %v5054_v36  ;;  %v5068_v19 = vrot.slane %v5066_v38, 6  ;;  %17815 = vmatpush3.bf16.msra.mxu0 %v19341_v25  ;;  %17816 = vmatprep.mubr.msk.bf16.mxu0 %vm349_vm2, %v4597_v52  ;;  %v5012_v11 = vcombine.high %v16532_v49, %v16532_v49 }
 0x10a   : > { %v5071_v53 = vrot.slane %v5069_v39, 7  ;;  %v5077_v54 = vrot.slane %v5075_v40, 7  ;;  %v16534_v56 = vld.sshfl [vmem:[%s18740_s21 + $0x1c] sm:$0x13 pattern:$0x76325410]  ;;  %v5020_v43 = vcombine.high %v16533_v50, %v16533_v50 }
 0x10b   : > { %v5082_v35 = vrot.slane %v5080_v48, 6  ;;  %v5083_v59 = vshll.u32 %v16531_v29, 16  ;;  %v5089_v60 = vshll.u32 %v5004_v33, 16  ;;  %v5059_v61 = vrot.slane %v5058_v51, 2  ;;  %17799 = vmatmul.mubr.msk.bf16.vlgmr.msra.gmra.mxu1 %vm349_vm2, %v19332_v21 }
 0x10c   : > { %v5072_v62 = vor.u32 %v5071_v53, %v5068_v19  ;;  %v16535_v63 = vld.sshfl [vmem:[%s18740_s21 + $0x20] sm:$0x13 pattern:$0x76325410]  ;;  %v5028_v1 = vcombine.high %v16534_v56, %v16534_v56  ;;  %17809 = vmatpush3.bf16.msra.mxu1 %v19327_v16  ;;  %17810 = vmatprep.mubr.msk.bf16.mxu1 %vm349_vm2, %v19338_v24  ;;  %v5094_v32 = vshrl.u32 %v16532_v49, 16  ;;  %v5097_v7 = vshll.u32 %v16532_v49, 16 }
 0x10d   : > { %v5085_v18 = vrot.slane %v5083_v59, 7  ;;  %v5091_v0 = vrot.slane %v5089_v60, 7  ;;  %v5036_v2 = vcombine.high %v16535_v63, %v16535_v63  ;;  %v5064_v3 = vsel %vm18833_vm9, %v5059_v61, %v5063_v42  ;;  %17820 = vmatprep.subr.bf16.mxu1 %v19341_v25  ;;  %v16549_v38 = vld.sshfl [vmem:[%s18740_s21 + $0x30] sm:$0x13 pattern:$0x76325410] }
 0x10e   : > { %v5073_v4 = vrot.slane %v5072_v62, 2  ;;  %v5149_v52 = vcombine.low %v5050_v58, %v5064_v3  ;;  %v5103_v9 = vshll.u32 %v5012_v11, 16  ;;  %v5108_v14 = vshrl.u32 %v16533_v50, 16 }
 0x10f   : > { %v5086_v8 = vor.u32 %v5085_v18, %v5082_v35  ;;  %v5096_v17 = vrot.slane %v5094_v32, 6  ;;  %v5099_v16 = vrot.slane %v5097_v7, 7  ;;  %v5111_v20 = vshll.u32 %v16533_v50, 16 }
 0x110   : > { %v5078_v15 = vsel %vm18833_vm9, %v5073_v4, %v5077_v54  ;;  %v5157_v46 = vrot.slane %v5149_v52, %v18742_v12  ;;  %v5105_v23 = vrot.slane %v5103_v9, 7  ;;  %v5110_v26 = vrot.slane %v5108_v14, 6  ;;  %17817 = vmatmul.mubr.msk.bf16.vlgmr.msra.gmra.mxu0 %vm349_vm2, %v19332_v21  ;;  %v16550_v41 = vld.sshfl [vmem:[%s18740_s21 + $0x34] sm:$0x13 pattern:$0x76325410] }
 0x111   : > { %v5087_v22 = vrot.slane %v5086_v8, 2  ;;  %v5100_v47 = vor.u32 %v5099_v16, %v5096_v17  ;;  %v5113_v29 = vrot.slane %v5111_v20, 7  ;;  %v5117_v6 = vshll.u32 %v5020_v43, 16  ;;  %17828 = vmatprep.mubr.msk.bf16.mxu0 %vm349_vm2, %v19338_v24 }
 0x112   : > { %v5122_v27 = vshrl.u32 %v16534_v56, 16  ;;  %v5125_v31 = vshll.u32 %v16534_v56, 16  ;;  %v5131_v33 = vshll.u32 %v5028_v1, 16  ;;  %v5136_v10 = vshrl.u32 %v16535_v63, 16 }
 0x113   : > { %v5092_v28 = vsel %vm18833_vm9, %v5087_v22, %v5091_v0  ;;  %v5101_v36 = vrot.slane %v5100_v47, 2  ;;  %v5114_v37 = vor.u32 %v5113_v29, %v5110_v26  ;;  %v5119_v45 = vrot.slane %v5117_v6, 7  ;;  %17811 = vmatmul.mubr.msk.bf16.vlgmr.msra.gmra.mxu1 %vm349_vm2, %v19350_v30  ;;  %v16551_v24 = vld.sshfl [vmem:[%s18740_s21 + $0x38] sm:$0x13 pattern:$0x76325410] }
 0x114   : > { %v5150_v34 = vcombine.low %v5078_v15, %v5092_v28  ;;  %v5124_v21 = vrot.slane %v5122_v27, 6  ;;  %v5127_v39 = vrot.slane %v5125_v31, 7  ;;  %v5133_v40 = vrot.slane %v5131_v33, 7  ;;  %17821 = vmatpush3.bf16.msra.mxu1 %v19341_v25 }
 0x115   : > { %v5138_v44 = vrot.slane %v5136_v10, 6  ;;  %v5106_v48 = vsel %vm18833_vm9, %v5101_v36, %v5105_v23  ;;  %v5115_v49 = vrot.slane %v5114_v37, 2  ;;  %v5139_v50 = vshll.u32 %v16535_v63, 16 }
 0x116   : > { %v5164_v42 = vrot.slane %v5150_v34, %v18742_v12  ;;  %v5128_v51 = vor.u32 %v5127_v39, %v5124_v21  ;;  %v5145_v19 = vshll.u32 %v5036_v2, 16  ;;  %v19393_v53 = vand.u32 %v16538_v55, %v18732_v5  ;;  %v16552_v62 = vld.sshfl [vmem:[%s18740_s21 + $0x3c] sm:$0x13 pattern:$0x76325410] }
 0x117   : > { %v5323_v54 = vcombine.high %v16549_v38, %v16549_v38  ;;  %v5120_v58 = vsel %vm18833_vm9, %v5115_v49, %v5119_v45  ;;  %v5141_v25 = vrot.slane %v5139_v50, 7  ;;  %v5331_v35 = vcombine.high %v16550_v41, %v16550_v41  ;;  %v16553_v33 = vld.sshfl [vmem:[%s18740_s21 + $0x40] sm:$0x13 pattern:$0x76325410] }
 0x118   : > { %v5165_v56 = vcombine.low %v5157_v46, %v5164_v42  ;;  %v5129_v59 = vrot.slane %v5128_v51, 2  ;;  %v5147_v60 = vrot.slane %v5145_v19, 7  ;;  %v5166_v61 = vcombine.low %v5106_v48, %v5120_v58  ;;  %17826 = vmatprep.subr.bf16.mxu0 %v19393_v53  ;;  %17832 = vmatprep.subr.bf16.mxu1 %v19393_v53  ;;  %v16554_v21 = vld.sshfl [vmem:[%s18740_s21 + $0x44] sm:$0x13 pattern:$0x76325410] }
 0x119   : > { %v5339_v63 = vcombine.high %v16551_v24, %v16551_v24  ;;  %v5142_v11 = vor.u32 %v5141_v25, %v5138_v44  ;;  %17827 = vmatpush3.bf16.msra.mxu0 %v19393_v53  ;;  %v5347_v43 = vcombine.high %v16552_v62, %v16552_v62  ;;  %v5381_v18 = vshrl.u32 %v16549_v38, 16  ;;  %v16556_v50 = vld.sshfl [vmem:[%s18740_s21 + $0x4c] sm:$0x13 pattern:$0x76325410] }
 0x11a   : > { %17822 = vmatprep.mubr.msk.bf16.mxu1 %vm349_vm2, %v5165_v56  ;;  %v5384_v0 = vshll.u32 %v16549_v38, 16  ;;  %v5134_v1 = vsel %vm18833_vm9, %v5129_v59, %v5133_v40  ;;  %v5174_v2 = vrot.slane %v5166_v61, %v18742_v12  ;;  %v5390_v3 = vshll.u32 %v5323_v54, 16 }
 0x11b   : > { %v5395_v4 = vshrl.u32 %v16550_v41, 16  ;;  %v5143_v32 = vrot.slane %v5142_v11, 2  ;;  %v5383_v7 = vrot.slane %v5381_v18, 6  ;;  %v5398_v52 = vshll.u32 %v16550_v41, 16 }
 0x11c   : > { %v5386_v8 = vrot.slane %v5384_v0, 7  ;;  %v5392_v9 = vrot.slane %v5390_v3, 7  ;;  %v5404_v15 = vshll.u32 %v5331_v35, 16  ;;  %v5409_v17 = vshrl.u32 %v16551_v24, 16  ;;  %17829 = vmatmul.mubr.msk.bf16.vlgmr.msra.gmra.mxu0 %vm349_vm2, %v19350_v30 }
 0x11d   : > { %v5397_v14 = vrot.slane %v5395_v4, 6  ;;  %v5148_v16 = vsel %vm18833_vm9, %v5143_v32, %v5147_v60  ;;  %v5400_v22 = vrot.slane %v5398_v52, 7  ;;  %v5412_v46 = vshll.u32 %v16551_v24, 16  ;;  %17840 = vmatprep.mubr.msk.bf16.mxu0 %vm349_vm2, %v5165_v56 }
 0x11e   : > { %v5387_v20 = vor.u32 %v5386_v8, %v5383_v7  ;;  %v5167_v23 = vcombine.low %v5134_v1, %v5148_v16  ;;  %v5406_v26 = vrot.slane %v5404_v15, 7  ;;  %v5411_v47 = vrot.slane %v5409_v17, 6  ;;  %v16555_v41 = vld.sshfl [vmem:[%s18740_s21 + $0x48] sm:$0x13 pattern:$0x76325410] }
 0x11f   : > { %v5418_v29 = vshll.u32 %v5339_v63, 16  ;;  %v5401_v27 = vor.u32 %v5400_v22, %v5397_v14  ;;  %v5414_v28 = vrot.slane %v5412_v46, 7  ;;  %v5423_v31 = vshrl.u32 %v16552_v62, 16 }
 0x120   : > { %v5388_v6 = vrot.slane %v5387_v20, 2  ;;  %v5181_v30 = vrot.slane %v5167_v23, %v18742_v12  ;;  %v5426_v55 = vshll.u32 %v16552_v62, 16  ;;  %v5432_v34 = vshll.u32 %v5347_v43, 16 }
 0x121   : > { %v5420_v10 = vrot.slane %v5418_v29, 7  ;;  %v5402_v37 = vrot.slane %v5401_v27, 2  ;;  %v5415_v45 = vor.u32 %v5414_v28, %v5411_v47  ;;  %v5425_v38 = vrot.slane %v5423_v31, 6 }
 0x122   : > { %v5393_v36 = vsel %vm18833_vm9, %v5388_v6, %v5392_v9  ;;  %v19415_v39 = vcombine.low %v5174_v2, %v5181_v30  ;;  %v5428_v40 = vrot.slane %v5426_v55, 7  ;;  %v5434_v44 = vrot.slane %v5432_v34, 7  ;;  %v16559_v9 = vld [vmem:[%s22463_s1 + $0x24] sm:$0x3] }
 0x123   : > { %v5355_v42 = vcombine.high %v16553_v33, %v16553_v33  ;;  %v5407_v48 = vsel %vm18833_vm9, %v5402_v37, %v5406_v26  ;;  %v5416_v49 = vrot.slane %v5415_v45, 2  ;;  %v5363_v24 = vcombine.high %v16554_v21, %v16554_v21  ;;  %v16570_v20 = vld.sshfl [vmem:[%s18740_s21 + $0x5c] sm:$0x13 pattern:$0x76325410] }
 0x124   : > { %v5371_v51 = vcombine.high %v16555_v41, %v16555_v41  ;;  %17823 = vmatmul.mubr.msk.bf16.vlgmr.msra.gmra.mxu1 %vm349_vm2, %v19415_v39  ;;  %v5429_v19 = vor.u32 %v5428_v40, %v5425_v38  ;;  %v5492_v54 = vcombine.low %v5393_v36, %v5407_v48  ;;  %v5379_v56 = vcombine.high %v16556_v50, %v16556_v50  ;;  %v16572_v37 = vld.sshfl [vmem:[%s18740_s21 + $0x64] sm:$0x13 pattern:$0x76325410] }
 0x125   : > { %v5437_v58 = vshrl.u32 %v16553_v33, 16  ;;  %17833 = vmatpush3.bf16.msra.mxu1 %v19393_v53  ;;  %v5421_v25 = vsel %vm18833_vm9, %v5416_v49, %v5420_v10  ;;  %v5440_v35 = vshll.u32 %v16553_v33, 16  ;;  %v5446_v59 = vshll.u32 %v5355_v42, 16 }
 0x126   : > { %v5451_v60 = vshrl.u32 %v16554_v21, 16  ;;  %v5430_v61 = vrot.slane %v5429_v19, 2  ;;  %v5500_v62 = vrot.slane %v5492_v54, %v18742_v12  ;;  %v5454_v11 = vshll.u32 %v16554_v21, 16 }
 0x127   : > { %v5439_v63 = vrot.slane %v5437_v58, 6  ;;  %v5442_v43 = vrot.slane %v5440_v35, 7  ;;  %v5448_v18 = vrot.slane %v5446_v59, 7  ;;  %v5460_v1 = vshll.u32 %v5363_v24, 16 }
 0x128   : > { %v5453_v0 = vrot.slane %v5451_v60, 6  ;;  %v5435_v2 = vsel %vm18833_vm9, %v5430_v61, %v5434_v44  ;;  %v5456_v53 = vrot.slane %v5454_v11, 7  ;;  %v5465_v3 = vshrl.u32 %v16555_v41, 16 }
 0x129   : > { %v5468_v4 = vshll.u32 %v16555_v41, 16  ;;  %v5493_v32 = vcombine.low %v5421_v25, %v5435_v2  ;;  %v5443_v7 = vor.u32 %v5442_v43, %v5439_v63  ;;  %v5462_v8 = vrot.slane %v5460_v1, 7  ;;  %v16571_v10 = vld.sshfl [vmem:[%s18740_s21 + $0x60] sm:$0x13 pattern:$0x76325410] }
 0x12a   : > { %v5474_v52 = vshll.u32 %v5371_v51, 16  ;;  %v5457_v14 = vor.u32 %v5456_v53, %v5453_v0  ;;  %v5467_v15 = vrot.slane %v5465_v3, 6  ;;  %v5479_v16 = vshrl.u32 %v16556_v50, 16 }
 0x12b   : > { %v5470_v17 = vrot.slane %v5468_v4, 7  ;;  %v5507_v22 = vrot.slane %v5493_v32, %v18742_v12  ;;  %v5444_v46 = vrot.slane %v5443_v7, 2  ;;  %v5482_v26 = vshll.u32 %v16556_v50, 16 }
 0x12c   : > { %v5476_v23 = vrot.slane %v5474_v52, 7  ;;  %v5458_v47 = vrot.slane %v5457_v14, 2  ;;  %v5481_v6 = vrot.slane %v5479_v16, 6  ;;  %v5488_v27 = vshll.u32 %v5379_v56, 16 }
 0x12d   : > { %v5471_v29 = vor.u32 %v5470_v17, %v5467_v15  ;;  %v5508_v28 = vcombine.low %v5500_v62, %v5507_v22  ;;  %v5449_v31 = vsel %vm18833_vm9, %v5444_v46, %v5448_v18  ;;  %v5484_v33 = vrot.slane %v5482_v26, 7  ;;  %v16573_v40 = vld.sshfl [vmem:[%s18740_s21 + $0x68] sm:$0x13 pattern:$0x76325410] }
 0x12e   : > { %v19437_v30 = vand.u32 %v16559_v9, %v18732_v5  ;;  %v5463_v55 = vsel %vm18833_vm9, %v5458_v47, %v5462_v8  ;;  %v5490_v36 = vrot.slane %v5488_v27, 7  ;;  %v5666_v45 = vcombine.high %v16570_v20, %v16570_v20  ;;  %v16574_v8 = vld.sshfl [vmem:[%s18740_s21 + $0x6c] sm:$0x13 pattern:$0x76325410] }
 0x12f   : > { %v5472_v34 = vrot.slane %v5471_v29, 2  ;;  %17834 = vmatprep.mubr.msk.bf16.mxu1 %vm349_vm2, %v5508_v28  ;;  %v5485_v38 = vor.u32 %v5484_v33, %v5481_v6  ;;  %v5509_v21 = vcombine.low %v5449_v31, %v5463_v55  ;;  %v5674_v44 = vcombine.high %v16571_v10, %v16571_v10  ;;  %v16575_v15 = vld.sshfl [vmem:[%s18740_s21 + $0x70] sm:$0x13 pattern:$0x76325410] }
 0x130   : > { %17838 = vmatprep.subr.bf16.mxu0 %v19437_v30  ;;  %v5724_v41 = vshrl.u32 %v16570_v20, 16  ;;  %17844 = vmatprep.subr.bf16.mxu1 %v19437_v30  ;;  %v5682_v48 = vcombine.high %v16572_v37, %v16572_v37  ;;  %v5690_v49 = vcombine.high %v16573_v40, %v16573_v40  ;;  %v5727_v50 = vshll.u32 %v16570_v20, 16  ;;  %v16576_v17 = vld.sshfl [vmem:[%s18740_s21 + $0x74] sm:$0x13 pattern:$0x76325410] }
 0x131   : > { %v5477_v42 = vsel %vm18833_vm9, %v5472_v34, %v5476_v23  ;;  %17839 = vmatpush3.bf16.msra.mxu0 %v19437_v30  ;;  %v5486_v24 = vrot.slane %v5485_v38, 2  ;;  %v5517_v51 = vrot.slane %v5509_v21, %v18742_v12  ;;  %v5733_v54 = vshll.u32 %v5666_v45, 16  ;;  %v16577_v23 = vld.sshfl [vmem:[%s18740_s21 + $0x78] sm:$0x13 pattern:$0x76325410] }
 0x132   : > { %v5726_v19 = vrot.slane %v5724_v41, 6  ;;  %v5729_v56 = vrot.slane %v5727_v50, 7  ;;  %v5738_v58 = vshrl.u32 %v16571_v10, 16  ;;  %v5741_v25 = vshll.u32 %v16571_v10, 16 }
 0x133   : > { %v5747_v35 = vshll.u32 %v5674_v44, 16  ;;  %v5491_v59 = vsel %vm18833_vm9, %v5486_v24, %v5490_v36  ;;  %v5735_v60 = vrot.slane %v5733_v54, 7  ;;  %v5752_v61 = vshrl.u32 %v16572_v37, 16 }
 0x134   : > { %v5755_v62 = vshll.u32 %v16572_v37, 16  ;;  %17841 = vmatmul.mubr.msk.bf16.vlgmr.msra.gmra.mxu0 %vm349_vm2, %v19415_v39  ;;  %v5510_v63 = vcombine.low %v5477_v42, %v5491_v59  ;;  %v5730_v11 = vor.u32 %v5729_v56, %v5726_v19  ;;  %v5740_v43 = vrot.slane %v5738_v58, 6  ;;  %v16580_v59 = vld [vmem:[%s22463_s1 + $0x26] sm:$0x3] }
 0x135   : > { %v5743_v18 = vrot.slane %v5741_v25, 7  ;;  %17852 = vmatprep.mubr.msk.bf16.mxu0 %vm349_vm2, %v5508_v28  ;;  %v5749_v0 = vrot.slane %v5747_v35, 7  ;;  %v5754_v1 = vrot.slane %v5752_v61, 6  ;;  %v5761_v53 = vshll.u32 %v5682_v48, 16 }
 0x136   : > { %v5757_v2 = vrot.slane %v5755_v62, 7  ;;  %v5524_v3 = vrot.slane %v5510_v63, %v18742_v12  ;;  %v5731_v4 = vrot.slane %v5730_v11, 2  ;;  %v5766_v7 = vshrl.u32 %v16573_v40, 16 }
 0x137   : > { %v5744_v32 = vor.u32 %v5743_v18, %v5740_v43  ;;  %v5763_v52 = vrot.slane %v5761_v53, 7  ;;  %v5769_v9 = vshll.u32 %v16573_v40, 16  ;;  %v5775_v14 = vshll.u32 %v5690_v49, 16 }
 0x138   : > { %v5758_v39 = vor.u32 %v5757_v2, %v5754_v1  ;;  %v19460_v16 = vcombine.low %v5517_v51, %v5524_v3  ;;  %v5736_v20 = vsel %vm18833_vm9, %v5731_v4, %v5735_v60  ;;  %v5768_v46 = vrot.slane %v5766_v7, 6  ;;  %v16591_v11 = vld.sshfl [vmem:[%s18740_s21 + $0x88] sm:$0x13 pattern:$0x76325410] }
 0x139   : > { %v5745_v22 = vrot.slane %v5744_v32, 2  ;;  %v5771_v47 = vrot.slane %v5769_v9, 7  ;;  %v5777_v29 = vrot.slane %v5775_v14, 7  ;;  %v5698_v6 = vcombine.high %v16574_v8, %v16574_v8 }
 0x13a   : > { %v5759_v26 = vrot.slane %v5758_v39, 2  ;;  %17835 = vmatmul.mubr.msk.bf16.vlgmr.msra.gmra.mxu1 %vm349_vm2, %v19460_v16  ;;  %v5706_v28 = vcombine.high %v16575_v15, %v16575_v15  ;;  %v5714_v31 = vcombine.high %v16576_v17, %v16576_v17  ;;  %v5722_v33 = vcombine.high %v16577_v23, %v16577_v23 }
 0x13b   : > { %v5750_v27 = vsel %vm18833_vm9, %v5745_v22, %v5749_v0  ;;  %17845 = vmatpush3.bf16.msra.mxu1 %v19437_v30  ;;  %v5772_v55 = vor.u32 %v5771_v47, %v5768_v46  ;;  %v5780_v36 = vshrl.u32 %v16574_v8, 16  ;;  %v5783_v37 = vshll.u32 %v16574_v8, 16  ;;  %v16594_v22 = vld.sshfl [vmem:[%s18740_s21 + $0x94] sm:$0x13 pattern:$0x76325410] }
 0x13c   : > { %v5764_v10 = vsel %vm18833_vm9, %v5759_v26, %v5763_v52  ;;  %v5835_v34 = vcombine.low %v5736_v20, %v5750_v27  ;;  %v5789_v45 = vshll.u32 %v5698_v6, 16  ;;  %v5794_v38 = vshrl.u32 %v16575_v15, 16  ;;  %v16592_v52 = vld.sshfl [vmem:[%s18740_s21 + $0x8c] sm:$0x13 pattern:$0x76325410] }
 0x13d   : > { %v5797_v21 = vshll.u32 %v16575_v15, 16  ;;  %v5773_v40 = vrot.slane %v5772_v55, 2  ;;  %v5782_v41 = vrot.slane %v5780_v36, 6  ;;  %v5803_v42 = vshll.u32 %v5706_v28, 16 }
 0x13e   : > { %v5843_v44 = vrot.slane %v5835_v34, %v18742_v12  ;;  %v5785_v48 = vrot.slane %v5783_v37, 7  ;;  %v5791_v49 = vrot.slane %v5789_v45, 7  ;;  %v5796_v50 = vrot.slane %v5794_v38, 6 }
 0x13f   : > { %v5799_v30 = vrot.slane %v5797_v21, 7  ;;  %v5778_v24 = vsel %vm18833_vm9, %v5773_v40, %v5777_v29  ;;  %v5805_v51 = vrot.slane %v5803_v42, 7  ;;  %v5808_v19 = vshrl.u32 %v16576_v17, 16 }
 0x140   : > { %v5811_v54 = vshll.u32 %v16576_v17, 16  ;;  %v5836_v56 = vcombine.low %v5764_v10, %v5778_v24  ;;  %v5786_v58 = vor.u32 %v5785_v48, %v5782_v41  ;;  %v5817_v35 = vshll.u32 %v5714_v31, 16  ;;  %v16593_v20 = vld.sshfl [vmem:[%s18740_s21 + $0x90] sm:$0x13 pattern:$0x76325410] }
 0x141   : > { %v5800_v25 = vor.u32 %v5799_v30, %v5796_v50  ;;  %v5810_v60 = vrot.slane %v5808_v19, 6  ;;  %v5822_v62 = vshrl.u32 %v16577_v23, 16  ;;  %v5825_v63 = vshll.u32 %v16577_v23, 16 }
 0x142   : > { %v5813_v61 = vrot.slane %v5811_v54, 7  ;;  %v5850_v43 = vrot.slane %v5836_v56, %v18742_v12  ;;  %v5787_v18 = vrot.slane %v5786_v58, 2  ;;  %v5819_v1 = vrot.slane %v5817_v35, 7 }
 0x143   : > { %v5801_v0 = vrot.slane %v5800_v25, 2  ;;  %v5824_v53 = vrot.slane %v5822_v62, 6  ;;  %v5827_v3 = vrot.slane %v5825_v63, 7  ;;  %v5831_v4 = vshll.u32 %v5722_v33, 16 }
 0x144   : > { %v5814_v2 = vor.u32 %v5813_v61, %v5810_v60  ;;  %v5851_v32 = vcombine.low %v5843_v44, %v5850_v43  ;;  %v5792_v7 = vsel %vm18833_vm9, %v5787_v18, %v5791_v49  ;;  %v19485_v39 = vand.u32 %v16580_v59, %v18732_v5  ;;  %v16595_v25 = vld.sshfl [vmem:[%s18740_s21 + $0x98] sm:$0x13 pattern:$0x76325410] }
 0x145   : > { %v5806_v8 = vsel %vm18833_vm9, %v5801_v0, %v5805_v51  ;;  %v5828_v14 = vor.u32 %v5827_v3, %v5824_v53  ;;  %v5833_v15 = vrot.slane %v5831_v4, 7  ;;  %v6009_v46 = vcombine.high %v16591_v11, %v16591_v11  ;;  %v16596_v35 = vld.sshfl [vmem:[%s18740_s21 + $0x9c] sm:$0x13 pattern:$0x76325410] }
 0x146   : > { %v5815_v9 = vrot.slane %v5814_v2, 2  ;;  %v5852_v17 = vcombine.low %v5792_v7, %v5806_v8  ;;  %17846 = vmatprep.mubr.msk.bf16.mxu1 %vm349_vm2, %v5851_v32  ;;  %17850 = vmatprep.subr.bf16.mxu0 %v19485_v39  ;;  %v6017_v23 = vcombine.high %v16592_v52, %v16592_v52  ;;  %v6025_v26 = vcombine.high %v16593_v20, %v16593_v20 }
 0x147   : > { %v6067_v47 = vshrl.u32 %v16591_v11, 16  ;;  %v5829_v6 = vrot.slane %v5828_v14, 2  ;;  %17856 = vmatprep.subr.bf16.mxu1 %v19485_v39  ;;  %17851 = vmatpush3.bf16.msra.mxu0 %v19485_v39  ;;  %v6033_v28 = vcombine.high %v16594_v22, %v16594_v22  ;;  %v6070_v33 = vshll.u32 %v16591_v11, 16 }
 0x148   : > { %v5820_v29 = vsel %vm18833_vm9, %v5815_v9, %v5819_v1  ;;  %v5860_v27 = vrot.slane %v5852_v17, %v18742_v12  ;;  %v6076_v10 = vshll.u32 %v6009_v46, 16  ;;  %v6081_v55 = vshrl.u32 %v16592_v52, 16  ;;  %v16598_v1 = vld.sshfl [vmem:[%s18740_s21 + $0xa4] sm:$0x13 pattern:$0x76325410]  ;;  %v19518_v9 = vpop.f32.mrf.mxu1 }
 0x149   : > { %v6069_v31 = vrot.slane %v6067_v47, 6  ;;  %v5834_v34 = vsel %vm18833_vm9, %v5829_v6, %v5833_v15  ;;  %v6084_v36 = vshll.u32 %v16592_v52, 16  ;;  %v6090_v37 = vshll.u32 %v6017_v23, 16  ;;  %v19516_v52 = vpop.f32.mrf.mxu0 }
 0x14a   : > { %v6095_v45 = vshrl.u32 %v16593_v20, 16  ;;  %v5853_v38 = vcombine.low %v5820_v29, %v5834_v34  ;;  %v6072_v21 = vrot.slane %v6070_v33, 7  ;;  %v6078_v40 = vrot.slane %v6076_v10, 7  ;;  %17853 = vmatmul.mubr.msk.bf16.vlgmr.msra.gmra.mxu0 %vm349_vm2, %v19460_v16 }
 0x14b   : > { %v6083_v44 = vrot.slane %v6081_v55, 6  ;;  %v6086_v41 = vrot.slane %v6084_v36, 7  ;;  %v6092_v42 = vrot.slane %v6090_v37, 7  ;;  %v6098_v49 = vshll.u32 %v16593_v20, 16  ;;  %17864 = vmatprep.mubr.msk.bf16.mxu0 %vm349_vm2, %v5851_v32  ;;  %v19525_v10 = vpop.f32.mrf.mxu0  ;;  %v19527_v55 = vpop.f32.mrf.mxu1 }
 0x14c   : > { %v6097_v48 = vrot.slane %v6095_v45, 6  ;;  %v5867_v50 = vrot.slane %v5853_v38, %v18742_v12  ;;  %v6073_v30 = vor.u32 %v6072_v21, %v6069_v31  ;;  %v6104_v24 = vshll.u32 %v6025_v26, 16  ;;  %v16597_v16 = vld.sshfl [vmem:[%s18740_s21 + $0xa0] sm:$0x13 pattern:$0x76325410] }
 0x14d   : > { %v6109_v51 = vshrl.u32 %v16594_v22, 16  ;;  %v6087_v19 = vor.u32 %v6086_v41, %v6083_v44  ;;  %v6100_v54 = vrot.slane %v6098_v49, 7  ;;  %v6112_v56 = vshll.u32 %v16594_v22, 16 }
 0x14e   : > { %v6118_v58 = vshll.u32 %v6033_v28, 16  ;;  %v19506_v59 = vcombine.low %v5860_v27, %v5867_v50  ;;  %v6074_v60 = vrot.slane %v6073_v30, 2  ;;  %v6106_v61 = vrot.slane %v6104_v24, 7 }
 0x14f   : > { %v6111_v62 = vrot.slane %v6109_v51, 6  ;;  %v6088_v63 = vrot.slane %v6087_v19, 2  ;;  %v6101_v11 = vor.u32 %v6100_v54, %v6097_v48  ;;  %v6114_v43 = vrot.slane %v6112_v56, 7 }
 0x150   : > { %v6120_v18 = vrot.slane %v6118_v58, 7  ;;  %17847 = vmatmul.mubr.msk.bf16.vlgmr.msra.gmra.mxu1 %vm349_vm2, %v19506_v59  ;;  %v6079_v0 = vsel %vm18833_vm9, %v6074_v60, %v6078_v40  ;;  %v6041_v2 = vcombine.high %v16595_v25, %v16595_v25  ;;  %v6049_v53 = vcombine.high %v16596_v35, %v16596_v35  ;;  %v16612_v38 = vld.sshfl [vmem:[%s18740_s21 + $0x4] sm:$0x12 pattern:$0x76325410] }
 0x151   : > { %v6057_v3 = vcombine.high %v16597_v16, %v16597_v16  ;;  %17857 = vmatpush3.bf16.msra.mxu1 %v19485_v39  ;;  %v6093_v4 = vsel %vm18833_vm9, %v6088_v63, %v6092_v42  ;;  %v6102_v32 = vrot.slane %v6101_v11, 2  ;;  %v6115_v7 = vor.u32 %v6114_v43, %v6111_v62  ;;  %v16601_v42 = vld [vmem:[%s22463_s1 + $0x28] sm:$0x3] }
 0x152   : > { %v6065_v8 = vcombine.high %v16598_v1, %v16598_v1  ;;  %v6178_v14 = vcombine.low %v6079_v0, %v6093_v4  ;;  %v6123_v15 = vshrl.u32 %v16595_v25, 16  ;;  %v6126_v17 = vshll.u32 %v16595_v25, 16  ;;  %v16613_v48 = vld.sshfl [vmem:[%s18740_s21 + $0x8] sm:$0x12 pattern:$0x76325410]  ;;  %v19536_v25 = vpop.f32.mrf.mxu0 }
 0x153   : > { %v6132_v20 = vshll.u32 %v6041_v2, 16  ;;  %v6107_v22 = vsel %vm18833_vm9, %v6102_v32, %v6106_v61  ;;  %v6116_v46 = vrot.slane %v6115_v7, 2  ;;  %v6137_v23 = vshrl.u32 %v16596_v35, 16 }
 0x154   : > { %v6140_v39 = vshll.u32 %v16596_v35, 16  ;;  %v6186_v26 = vrot.slane %v6178_v14, %v18742_v12  ;;  %v6125_v47 = vrot.slane %v6123_v15, 6  ;;  %v6128_v29 = vrot.slane %v6126_v17, 7  ;;  %v19538_v35 = vpop.f32.mrf.mxu1  ;;  %v19553_v17 = vpop.f32.mrf.mxu0 }
 0x155   : > { %v6134_v6 = vrot.slane %v6132_v20, 7  ;;  %v6121_v27 = vsel %vm18833_vm9, %v6116_v46, %v6120_v18  ;;  %v6139_v28 = vrot.slane %v6137_v23, 6  ;;  %v6146_v33 = vshll.u32 %v6049_v53, 16 }
 0x156   : > { %v6142_v31 = vrot.slane %v6140_v39, 7  ;;  %v6179_v34 = vcombine.low %v6107_v22, %v6121_v27  ;;  %v6129_v36 = vor.u32 %v6128_v29, %v6125_v47  ;;  %v6151_v37 = vshrl.u32 %v16597_v16, 16  ;;  %v16614_v51 = vld.sshfl [vmem:[%s18740_s21 + $0xc] sm:$0x12 pattern:$0x76325410]  ;;  %v19555_v20 = vpop.f32.mrf.mxu1 }
 0x157   : > { %v6154_v45 = vshll.u32 %v16597_v16, 16  ;;  %v6148_v40 = vrot.slane %v6146_v33, 7  ;;  %v6160_v44 = vshll.u32 %v6057_v3, 16  ;;  %v6165_v41 = vshrl.u32 %v16598_v1, 16 }
 0x158   : > { %v6143_v21 = vor.u32 %v6142_v31, %v6139_v28  ;;  %v6193_v49 = vrot.slane %v6179_v34, %v18742_v12  ;;  %v6130_v50 = vrot.slane %v6129_v36, 2  ;;  %v6153_v30 = vrot.slane %v6151_v37, 6  ;;  %v16615_v63 = vld.sshfl [vmem:[%s18740_s21 + $0x10] sm:$0x12 pattern:$0x76325410] }
 0x159   : > { %v6156_v24 = vrot.slane %v6154_v45, 7  ;;  %v6162_v54 = vrot.slane %v6160_v44, 7  ;;  %v6167_v56 = vrot.slane %v6165_v41, 6  ;;  %v6168_v58 = vshll.u32 %v16598_v1, 16  ;;  %v19575_v44 = vpop.f32.mrf.mxu1 }
 0x15a   : > { %v6144_v19 = vrot.slane %v6143_v21, 2  ;;  %v6194_v16 = vcombine.low %v6186_v26, %v6193_v49  ;;  %v6135_v60 = vsel %vm18833_vm9, %v6130_v50, %v6134_v6  ;;  %v6174_v62 = vshll.u32 %v6065_v8, 16  ;;  %v16616_v4 = vld.sshfl [vmem:[%s18740_s21 + $0x14] sm:$0x12 pattern:$0x76325410] }
 0x15b   : > { %v6157_v61 = vor.u32 %v6156_v24, %v6153_v30  ;;  %v6170_v43 = vrot.slane %v6168_v58, 7  ;;  %v19546_v18 = vand.u32 %v16601_v42, %v18732_v5  ;;  %v6352_v0 = vcombine.high %v16612_v38, %v16612_v38  ;;  %v16617_v15 = vld.sshfl [vmem:[%s18740_s21 + $0x18] sm:$0x12 pattern:$0x76325410] }
 0x15c   : > { %v6149_v11 = vsel %vm18833_vm9, %v6144_v19, %v6148_v40  ;;  %17858 = vmatprep.mubr.msk.bf16.mxu1 %vm349_vm2, %v6194_v16  ;;  %v6176_v2 = vrot.slane %v6174_v62, 7  ;;  %v6360_v3 = vcombine.high %v16613_v48, %v16613_v48  ;;  %v6368_v7 = vcombine.high %v16614_v51, %v16614_v51  ;;  %v16618_v26 = vld.sshfl [vmem:[%s18740_s21 + $0x1c] sm:$0x12 pattern:$0x76325410]  ;;  %v19573_v40 = vpop.f32.mrf.mxu0 }
 0x15d   : > { %v6158_v1 = vrot.slane %v6157_v61, 2  ;;  %v6195_v53 = vcombine.low %v6135_v60, %v6149_v11  ;;  %v6171_v32 = vor.u32 %v6170_v43, %v6167_v56  ;;  %17862 = vmatprep.subr.bf16.mxu0 %v19546_v18  ;;  %17868 = vmatprep.subr.bf16.mxu1 %v19546_v18  ;;  %v6376_v8 = vcombine.high %v16615_v63, %v16615_v63  ;;  %v16619_v34 = vld.sshfl [vmem:[%s18740_s21 + $0x20] sm:$0x12 pattern:$0x76325410] }
 0x15e   : > { %v16620_v14 = vrot.slane %v16612_v38, 9  ;;  %17863 = vmatpush3.bf16.msra.mxu0 %v19546_v18  ;;  %v6411_v23 = vrot.slane %v6352_v0, 7  ;;  %v16621_v39 = vrot.slane %v16613_v48, 9  ;;  %v6415_v29 = vrot.slane %v6360_v3, 7  ;;  %v16630_v50 = vld [vmem:[%s22463_s1 + $0x2a] sm:$0x3]  ;;  %v19595_v3 = vpop.f32.mrf.mxu1 }
 0x15f   : > { %v6163_v22 = vsel %vm18833_vm9, %v6158_v1, %v6162_v54  ;;  %v6203_v46 = vrot.slane %v6195_v53, %v18742_v12  ;;  %v6172_v47 = vrot.slane %v6171_v32, 2  ;;  %v16622_v6 = vrot.slane %v16614_v51, 9  ;;  %v18503_v19 = vld.sshfl [vmem:[%s18740_s21 + $0xb4] sm:$0xf pattern:$0x76325410]  ;;  %v19593_v53 = vpop.f32.mrf.mxu0 }
 0x160   : > { %v6419_v27 = vrot.slane %v6368_v7, 7  ;;  %v6412_v28 = vsel %vm18990_vm15, %v16620_v14, %v6411_v23  ;;  %v16623_v31 = vrot.slane %v16615_v63, 9  ;;  %v6423_v33 = vrot.slane %v6376_v8, 7 }
 0x161   : > { %v6384_v36 = vcombine.high %v16616_v4, %v16616_v4  ;;  %v6177_v37 = vsel %vm18833_vm9, %v6172_v47, %v6176_v2  ;;  %v6416_v45 = vsel %vm18990_vm15, %v16621_v39, %v6415_v29  ;;  %17865 = vmatmul.mubr.msk.bf16.vlgmr.msra.gmra.mxu0 %vm349_vm2, %v19506_v59  ;;  %v6392_v21 = vcombine.high %v16617_v15, %v16617_v15  ;;  %v18504_v54 = vld.sshfl [vmem:[%s18740_s21 + $0xbc] sm:$0xf pattern:$0x76325410]  ;;  %v16651_v29 = vld [vmem:[%s22463_s1 + $0x2c] sm:$0x3] }
 0x162   : > { %v6420_v38 = vsel %vm18990_vm15, %v16622_v6, %v6419_v27  ;;  %v6196_v41 = vcombine.low %v6163_v22, %v6177_v37  ;;  %v6424_v42 = vsel %vm18990_vm15, %v16623_v31, %v6423_v33  ;;  %v6441_v48 = vcombine.low %v6412_v28, %v6416_v45  ;;  %v18505_v61 = vld.sshfl [vmem:[%s18740_s21 + $0x10c] sm:$0xf pattern:$0x76325410]  ;;  %v19621_v37 = vpop.f32.mrf.mxu0  ;;  %v19623_v45 = vpop.f32.mrf.mxu1 }
 0x163   : > { %v6400_v49 = vcombine.high %v16618_v26, %v16618_v26  ;;  %v6442_v30 = vcombine.low %v6420_v38, %v6424_v42  ;;  %v6408_v59 = vcombine.high %v16619_v34, %v16619_v34  ;;  %v16624_v24 = vrot.slane %v16616_v4, 9  ;;  %v18506_v62 = vld.sshfl [vmem:[%s18740_s21 + $0x114] sm:$0xf pattern:$0x76325410] }
 0x164   : > { %v6427_v51 = vrot.slane %v6384_v36, 7  ;;  %v6210_v56 = vrot.slane %v6196_v41, %v18742_v12  ;;  %v6449_v58 = vrot.slane %v6441_v48, %v18742_v12  ;;  %v16625_v16 = vrot.slane %v16617_v15, 9  ;;  %v18507_v1 = vld.sshfl [vmem:[%s18740_s21 + $0xc4] sm:$0xf pattern:$0x76325410] }
 0x165   : > { %v6431_v60 = vrot.slane %v6392_v21, 7  ;;  %v6456_v63 = vrot.slane %v6442_v30, %v18742_v12  ;;  %v16626_v43 = vrot.slane %v16618_v26, 9  ;;  %v6435_v0 = vrot.slane %v6400_v49, 7 }
 0x166   : > { %v6428_v11 = vsel %vm18990_vm15, %v16624_v24, %v6427_v51  ;;  %v18508_v2 = vld.sshfl [vmem:[%s18740_s21 + $0xcc] sm:$0xf pattern:$0x76325410]  ;;  %v6211_v4 = vcombine.low %v6203_v46, %v6210_v56  ;;  %v16627_v7 = vrot.slane %v16619_v34, 9  ;;  %v6439_v8 = vrot.slane %v6408_v59, 7  ;;  %v19646_v56 = vpop.f32.mrf.mxu1 }
 0x167   : > { %v6432_v32 = vsel %vm18990_vm15, %v16625_v16, %v6431_v60  ;;  %v19600_v14 = vld.sshfl [vmem:[%s18740_s21 + $0xb4] sm:$0x13 pattern:$0x76325410]  ;;  %v6457_v15 = vcombine.low %v6449_v58, %v6456_v63  ;;  %v6436_v22 = vsel %vm18990_vm15, %v16626_v43, %v6435_v0  ;;  %v6594_v39 = vand.u32 %v16630_v50, %v18732_v5  ;;  %v16672_v24 = vld [vmem:[%s22463_s1 + $0x2e] sm:$0x3] }
 0x168   : > { %v6458_v23 = vcombine.low %v6428_v11, %v6432_v32  ;;  %v18509_v26 = vld.sshfl [vmem:[%s18740_s21 + $0x11c] sm:$0xf pattern:$0x76325410]  ;;  %17859 = vmatmul.mubr.msk.bf16.vlgmr.msra.gmra.mxu1 %vm349_vm2, %v6211_v4  ;;  %v6440_v46 = vsel %vm18990_vm15, %v16627_v7, %v6439_v8  ;;  %v7123_v36 = vshrl.u32 %v19600_v14, 16  ;;  %v6569_v38 = vcombine.low %v18503_v19, %v18504_v54  ;;  %v19644_v54 = vpop.f32.mrf.mxu0 }
 0x169   : > { %v18510_v47 = vld.sshfl [vmem:[%s18740_s21 + $0x124] sm:$0xf pattern:$0x76325410]  ;;  %17869 = vmatpush3.bf16.msra.mxu1 %v19546_v18  ;;  %17870 = vmatprep.mubr.msk.bf16.mxu1 %vm349_vm2, %v6457_v15  ;;  %v6459_v28 = vcombine.low %v6436_v22, %v6440_v46  ;;  %v7126_v41 = vshll.u32 %v19600_v14, 16  ;;  %v19631_v48 = vcombine.low %v18505_v61, %v18506_v62  ;;  %v6586_v30 = vcombine.low %v18507_v1, %v18508_v2  ;;  %v19670_v22 = vpop.f32.mrf.mxu1 }
 0x16a   : > { %v18511_v6 = vld.sshfl [vmem:[%s18740_s21 + $0xe0] sm:$0xf pattern:$0x76325410]  ;;  %v6466_v31 = vrot.slane %v6458_v23, %v18742_v12  ;;  %17874 = vmatprep.subr.bf16.mxu0 %v6594_v39  ;;  %17880 = vmatprep.subr.bf16.mxu1 %v6594_v39  ;;  %v19637_v59 = vand.u32 %v16651_v29, %v18732_v5  ;;  %v19642_v19 = vcombine.low %v18509_v26, %v18510_v47  ;;  %v7125_v60 = vrot.slane %v7123_v36, 6  ;;  %v19668_v15 = vpop.f32.mrf.mxu0 }
 0x16b   : > { %v18512_v27 = vld.sshfl [vmem:[%s18740_s21 + $0xe8] sm:$0xf pattern:$0x76325410]  ;;  %v6473_v42 = vrot.slane %v6459_v28, %v18742_v12  ;;  %17875 = vmatpush3.bf16.msra.mxu0 %v6594_v39  ;;  %17876 = vmatprep.mubr.msk.bf16.mxu0 %vm349_vm2, %v6569_v38  ;;  %v19655_v62 = vand.u32 %v16672_v24, %v18732_v5  ;;  %v7065_v0 = vcombine.high %v19600_v14, %v19600_v14  ;;  %v7128_v2 = vrot.slane %v7126_v41, 7 }
 0x16c   : > { %v18513_v33 = vld.sshfl [vmem:[%s18740_s21 + $0x138] sm:$0xf pattern:$0x76325410]  ;;  %17886 = vmatprep.subr.bf16.mxu0 %v19637_v59  ;;  %v6794_v58 = vcombine.low %v18511_v6, %v18512_v27 }
 0x16d   : > { %v18514_v34 = vld.sshfl [vmem:[%s18740_s21 + $0x140] sm:$0xf pattern:$0x76325410]  ;;  %v6474_v51 = vcombine.low %v6466_v31, %v6473_v42  ;;  %v7129_v14 = vor.u32 %v7128_v2, %v7125_v60  ;;  %v7132_v23 = vshll.u32 %v7065_v0, 16  ;;  %v19676_v42 = vpop.f32.mrf.mxu0 }
 0x16e   : > { %v19626_v21 = vld.sshfl [vmem:[%s18740_s21 + $0xf0] sm:$0xf pattern:$0x76325410]  ;;  %17877 = vmatmul.mubr.msk.bf16.vlgmr.msra.gmra.mxu0 %vm349_vm2, %v6586_v30  ;;  %v19652_v61 = vcombine.low %v18513_v33, %v18514_v34 }
 0x16f   : > { %v18516_v18 = vld.sshfl [vmem:[%s18740_s21 + $0xf8] sm:$0xf pattern:$0x76325410]  ;;  %17887 = vmatpush3.bf16.msra.mxu0 %v19637_v59  ;;  %17888 = vmatprep.mubr.msk.bf16.mxu0 %vm349_vm2, %v6794_v58  ;;  %v7130_v27 = vrot.slane %v7129_v14, 2  ;;  %v7134_v28 = vrot.slane %v7132_v23, 7  ;;  %v19697_v23 = vpop.f32.mrf.mxu0 }
 0x170   : > { %v18517_v49 = vld.sshfl [vmem:[%s18740_s21 + $0x148] sm:$0xf pattern:$0x76325410]  ;;  %17871 = vmatmul.mubr.msk.bf16.vlgmr.msra.gmra.mxu1 %vm349_vm2, %v6474_v51  ;;  %v6811_v11 = vcombine.low %v19626_v21, %v18516_v18  ;;  %17898 = vmatprep.subr.bf16.mxu0 %v19655_v62 }
 0x171   : > { %v18518_v50 = vld.sshfl [vmem:[%s18740_s21 + $0x150] sm:$0xf pattern:$0x76325410]  ;;  %17881 = vmatpush3.bf16.msra.mxu1 %v6594_v39  ;;  %17882 = vmatprep.mubr.msk.bf16.mxu1 %vm349_vm2, %v19631_v48 }
 0x172   : > { %v16684_v16 = vld.sshfl [vmem:[%s18740_s21 + $0xb8] sm:$0x13 pattern:$0x76325410]  ;;  %v19666_v4 = vcombine.low %v18517_v49, %v18518_v50  ;;  %17892 = vmatprep.subr.bf16.mxu1 %v19637_v59  ;;  %v19678_v49 = vpop.f32.mrf.mxu1  ;;  %v7135_v50 = vsel %vm18833_vm9, %v7130_v27, %v7134_v28 }
 0x173   : > { %v16685_v63 = vld.sshfl [vmem:[%s18740_s21 + $0xbc] sm:$0x13 pattern:$0x76325410]  ;;  %v7073_v1 = vcombine.high %v16684_v16, %v16684_v16  ;;  %v7137_v8 = vshrl.u32 %v16684_v16, 16  ;;  %v7140_v39 = vshll.u32 %v16684_v16, 16 }
 0x174   : > { %v16686_v43 = vld.sshfl [vmem:[%s18740_s21 + $0xc0] sm:$0x13 pattern:$0x76325410]  ;;  %v7081_v32 = vcombine.high %v16685_v63, %v16685_v63  ;;  %v7151_v46 = vshrl.u32 %v16685_v63, 16  ;;  %v7154_v29 = vshll.u32 %v16685_v63, 16 }
 0x175   : > { %v7089_v7 = vcombine.high %v16686_v43, %v16686_v43  ;;  %v7146_v26 = vshll.u32 %v7073_v1, 16  ;;  %v7139_v47 = vrot.slane %v7137_v8, 6  ;;  %v7142_v31 = vrot.slane %v7140_v39, 7  ;;  %v19699_v39 = vpop.f32.mrf.mxu1 }
 0x176   : > { %v7160_v6 = vshll.u32 %v7081_v32, 16  ;;  %v16687_v34 = vld.sshfl [vmem:[%s18740_s21 + $0xc4] sm:$0x13 pattern:$0x76325410]  ;;  %v7153_v38 = vrot.slane %v7151_v46, 6  ;;  %17889 = vmatmul.mubr.msk.bf16.vlgmr.msra.gmra.mxu0 %vm349_vm2, %v6811_v11 }
 0x177   : > { %v7148_v33 = vrot.slane %v7146_v26, 7  ;;  %v16688_v36 = vld.sshfl [vmem:[%s18740_s21 + $0xc8] sm:$0x13 pattern:$0x76325410]  ;;  %v7156_v21 = vrot.slane %v7154_v29, 7  ;;  %v7143_v30 = vor.u32 %v7142_v31, %v7139_v47  ;;  %17899 = vmatpush3.bf16.msra.mxu0 %v19655_v62  ;;  %17900 = vmatprep.mubr.msk.bf16.mxu0 %vm349_vm2, %v19631_v48  ;;  %v7097_v0 = vcombine.high %v16687_v34, %v16687_v34 }
 0x178   : > { %v7162_v18 = vrot.slane %v7160_v6, 7  ;;  %v7165_v41 = vshrl.u32 %v16686_v43, 16  ;;  %v7168_v24 = vshll.u32 %v16686_v43, 16  ;;  %v7174_v51 = vshll.u32 %v7089_v7, 16  ;;  %17883 = vmatmul.mubr.msk.bf16.vlgmr.msra.gmra.mxu1 %vm349_vm2, %v19642_v19 }
 0x179   : > { %v16689_v58 = vld.sshfl [vmem:[%s18740_s21 + $0xcc] sm:$0x13 pattern:$0x76325410]  ;;  %v7157_v16 = vor.u32 %v7156_v21, %v7153_v38  ;;  %v7105_v1 = vcombine.high %v16688_v36, %v16688_v36  ;;  %v7144_v11 = vrot.slane %v7143_v30, 2  ;;  %17893 = vmatpush3.bf16.msra.mxu1 %v19637_v59  ;;  %17894 = vmatprep.mubr.msk.bf16.mxu1 %vm349_vm2, %v19652_v61  ;;  %v7179_v8 = vshrl.u32 %v16687_v34, 16 }
 0x17a   : > { %v7167_v60 = vrot.slane %v7165_v41, 6  ;;  %v19688_v63 = vld.sshfl [vmem:[%s18740_s21 + $0xd0] sm:$0x13 pattern:$0x76325410]  ;;  %v7170_v2 = vrot.slane %v7168_v24, 7  ;;  %v7113_v43 = vcombine.high %v16689_v58, %v16689_v58  ;;  %17904 = vmatprep.subr.bf16.mxu1 %v19655_v62 }
 0x17b   : > { %v7176_v32 = vrot.slane %v7174_v51, 7  ;;  %v7158_v7 = vrot.slane %v7157_v16, 2  ;;  %v7121_v48 = vcombine.high %v19688_v63, %v19688_v63  ;;  %v7182_v14 = vshll.u32 %v16687_v34, 16  ;;  %v19710_v16 = vpop.f32.mrf.mxu0 }
 0x17c   : > { %v7149_v26 = vsel %vm18833_vm9, %v7144_v11, %v7148_v33  ;;  %v7171_v47 = vor.u32 %v7170_v2, %v7167_v60  ;;  %v7188_v59 = vshll.u32 %v7097_v0, 16  ;;  %v7193_v46 = vshrl.u32 %v16688_v36, 16  ;;  %v16693_v33 = vld [vmem:[%s22463_s1 + $0x30] sm:$0x3]  ;;  %v19712_v60 = vpop.f32.mrf.mxu1 }
 0x17d   : > { %v7163_v29 = vsel %vm18833_vm9, %v7158_v7, %v7162_v18  ;;  %v7234_v6 = vcombine.low %v7135_v50, %v7149_v26  ;;  %v7181_v27 = vrot.slane %v7179_v8, 6  ;;  %v7184_v28 = vrot.slane %v7182_v14, 7 }
 0x17e   : > { %v7172_v31 = vrot.slane %v7171_v47, 2  ;;  %v7190_v34 = vrot.slane %v7188_v59, 7  ;;  %v7195_v38 = vrot.slane %v7193_v46, 6  ;;  %v7196_v21 = vshll.u32 %v16688_v36, 16  ;;  %17901 = vmatmul.mubr.msk.bf16.vlgmr.msra.gmra.mxu0 %vm349_vm2, %v19642_v19  ;;  %v19729_v59 = vpop.f32.mrf.mxu0  ;;  %v19731_v46 = vpop.f32.mrf.mxu1 }
 0x17f   : > { %v7242_v41 = vrot.slane %v7234_v6, %v18742_v12  ;;  %v7185_v30 = vor.u32 %v7184_v28, %v7181_v27  ;;  %v7202_v24 = vshll.u32 %v7105_v1, 16  ;;  %v7207_v51 = vshrl.u32 %v16689_v58, 16  ;;  %17912 = vmatprep.mubr.msk.bf16.mxu0 %vm349_vm2, %v19652_v61  ;;  %v16704_v47 = vld.sshfl [vmem:[%s18740_s21 + $0xe0] sm:$0x13 pattern:$0x76325410] }
 0x180   : > { %v7177_v18 = vsel %vm18833_vm9, %v7172_v31, %v7176_v32  ;;  %v7198_v36 = vrot.slane %v7196_v21, 7  ;;  %v7210_v50 = vshll.u32 %v16689_v58, 16  ;;  %v7216_v0 = vshll.u32 %v7113_v43, 16  ;;  %17895 = vmatmul.mubr.msk.bf16.vlgmr.msra.gmra.mxu1 %vm349_vm2, %v19666_v4 }
 0x181   : > { %v7235_v1 = vcombine.low %v7163_v29, %v7177_v18  ;;  %v7186_v11 = vrot.slane %v7185_v30, 2  ;;  %v7204_v2 = vrot.slane %v7202_v24, 7  ;;  %v7209_v7 = vrot.slane %v7207_v51, 6  ;;  %17905 = vmatpush3.bf16.msra.mxu1 %v19655_v62 }
 0x182   : > { %v7199_v8 = vor.u32 %v7198_v36, %v7195_v38  ;;  %v7212_v32 = vrot.slane %v7210_v50, 7  ;;  %v7218_v14 = vrot.slane %v7216_v0, 7  ;;  %v7221_v19 = vshrl.u32 %v19688_v63, 16  ;;  %v19745_v0 = vpop.f32.mrf.mxu0 }
 0x183   : > { %v7249_v58 = vrot.slane %v7235_v1, %v18742_v12  ;;  %v7191_v43 = vsel %vm18833_vm9, %v7186_v11, %v7190_v34  ;;  %v7224_v26 = vshll.u32 %v19688_v63, 16  ;;  %v7230_v61 = vshll.u32 %v7121_v48, 16  ;;  %v16705_v28 = vld.sshfl [vmem:[%s18740_s21 + $0xe4] sm:$0x13 pattern:$0x76325410]  ;;  %v19747_v1 = vpop.f32.mrf.mxu1 }
 0x184   : > { %v7200_v29 = vrot.slane %v7199_v8, 2  ;;  %v7213_v6 = vor.u32 %v7212_v32, %v7209_v7  ;;  %v7223_v27 = vrot.slane %v7221_v19, 6  ;;  %v19734_v62 = vand.u32 %v16693_v33, %v18732_v5  ;;  %v16706_v34 = vld.sshfl [vmem:[%s18740_s21 + $0xe8] sm:$0x13 pattern:$0x76325410] }
 0x185   : > { %v7250_v31 = vcombine.low %v7242_v41, %v7249_v58  ;;  %v7226_v38 = vrot.slane %v7224_v26, 7  ;;  %v7232_v21 = vrot.slane %v7230_v61, 7  ;;  %v7408_v30 = vcombine.high %v16704_v47, %v16704_v47  ;;  %v16707_v24 = vld.sshfl [vmem:[%s18740_s21 + $0xec] sm:$0x13 pattern:$0x76325410] }
 0x186   : > { %v7205_v63 = vsel %vm18833_vm9, %v7200_v29, %v7204_v2  ;;  %v7214_v48 = vrot.slane %v7213_v6, 2  ;;  %17910 = vmatprep.subr.bf16.mxu0 %v19734_v62  ;;  %17916 = vmatprep.subr.bf16.mxu1 %v19734_v62  ;;  %v7416_v51 = vcombine.high %v16705_v28, %v16705_v28  ;;  %v7424_v18 = vcombine.high %v16706_v34, %v16706_v34 }
 0x187   : > { %17906 = vmatprep.mubr.msk.bf16.mxu1 %vm349_vm2, %v7250_v31  ;;  %v7227_v33 = vor.u32 %v7226_v38, %v7223_v27  ;;  %v7251_v36 = vcombine.low %v7191_v43, %v7205_v63  ;;  %17911 = vmatpush3.bf16.msra.mxu0 %v19734_v62  ;;  %v7432_v41 = vcombine.high %v16707_v24, %v16707_v24  ;;  %v7466_v50 = vshrl.u32 %v16704_v47, 16  ;;  %v19759_v63 = vpop.f32.mrf.mxu1 }
 0x188   : > { %v7219_v11 = vsel %vm18833_vm9, %v7214_v48, %v7218_v14  ;;  %v7469_v2 = vshll.u32 %v16704_v47, 16  ;;  %v7475_v7 = vshll.u32 %v7408_v30, 16  ;;  %v7480_v8 = vshrl.u32 %v16705_v28, 16  ;;  %v19757_v30 = vpop.f32.mrf.mxu0  ;;  %22494 = vst [vmem:[#allocation9_spill] sm:$0xff] %v19759_v63 }
 0x189   : > { %v7228_v32 = vrot.slane %v7227_v33, 2  ;;  %v7259_v19 = vrot.slane %v7251_v36, %v18742_v12  ;;  %v7468_v58 = vrot.slane %v7466_v50, 6  ;;  %v7483_v26 = vshll.u32 %v16705_v28, 16  ;;  %22493 = vst [vmem:[#allocation8_spill] sm:$0xff] %v19757_v30 }
 0x18a   : > { %v7471_v43 = vrot.slane %v7469_v2, 7  ;;  %v7477_v61 = vrot.slane %v7475_v7, 7  ;;  %v7482_v29 = vrot.slane %v7480_v8, 6  ;;  %v7489_v6 = vshll.u32 %v7416_v51, 16  ;;  %17913 = vmatmul.mubr.msk.bf16.vlgmr.msra.gmra.mxu0 %vm349_vm2, %v19666_v4 }
 0x18b   : > { %v7233_v27 = vsel %vm18833_vm9, %v7228_v32, %v7232_v21  ;;  %v7485_v38 = vrot.slane %v7483_v26, 7  ;;  %v7494_v14 = vshrl.u32 %v16706_v34, 16  ;;  %v7497_v47 = vshll.u32 %v16706_v34, 16  ;;  %17924 = vmatprep.mubr.msk.bf16.mxu0 %vm349_vm2, %v7250_v31 }
 0x18c   : > { %v7252_v28 = vcombine.low %v7219_v11, %v7233_v27  ;;  %v7472_v48 = vor.u32 %v7471_v43, %v7468_v58  ;;  %v7491_v33 = vrot.slane %v7489_v6, 7  ;;  %v7503_v51 = vshll.u32 %v7424_v18, 16  ;;  %v16708_v31 = vld.sshfl [vmem:[%s18740_s21 + $0xf0] sm:$0x13 pattern:$0x76325410]  ;;  %v19763_v11 = vpop.f32.mrf.mxu0  ;;  %v19765_v18 = vpop.f32.mrf.mxu1 }
 0x18d   : > { %v7486_v36 = vor.u32 %v7485_v38, %v7482_v29  ;;  %v7496_v50 = vrot.slane %v7494_v14, 6  ;;  %v7499_v4 = vrot.slane %v7497_v47, 7  ;;  %v7508_v2 = vshrl.u32 %v16707_v24, 16 }
 0x18e   : > { %v7266_v21 = vrot.slane %v7252_v28, %v18742_v12  ;;  %v7473_v7 = vrot.slane %v7472_v48, 2  ;;  %v7505_v34 = vrot.slane %v7503_v51, 7  ;;  %v7511_v8 = vshll.u32 %v16707_v24, 16 }
 0x18f   : > { %v7487_v32 = vrot.slane %v7486_v36, 2  ;;  %v7500_v26 = vor.u32 %v7499_v4, %v7496_v50  ;;  %v7510_v30 = vrot.slane %v7508_v2, 6  ;;  %v7517_v63 = vshll.u32 %v7432_v41, 16  ;;  %v19785_v50 = vpop.f32.mrf.mxu0 }
 0x190   : > { %v19767_v58 = vcombine.low %v7259_v19, %v7266_v21  ;;  %v7478_v43 = vsel %vm18833_vm9, %v7473_v7, %v7477_v61  ;;  %v7513_v29 = vrot.slane %v7511_v8, 7  ;;  %v19773_v24 = vadd.f32 %v19518_v9, %v19516_v52  ;;  %v16709_v6 = vld.sshfl [vmem:[%s18740_s21 + $0xf4] sm:$0x13 pattern:$0x76325410]  ;;  %22495 = vst [vmem:[#allocation10_spill] sm:$0xff] %v19785_v50 }
 0x191   : > { %v7492_v27 = vsel %vm18833_vm9, %v7487_v32, %v7491_v33  ;;  %v7501_v41 = vrot.slane %v7500_v26, 2  ;;  %v7519_v38 = vrot.slane %v7517_v63, 7  ;;  %v16710_v14 = vld.sshfl [vmem:[%s18740_s21 + $0xf8] sm:$0x13 pattern:$0x76325410]  ;;  %v7440_v47 = vcombine.high %v16708_v31, %v16708_v31  ;;  %v19787_v63 = vpop.f32.mrf.mxu1 }
 0x192   : > { %17907 = vmatmul.mubr.msk.bf16.vlgmr.msra.gmra.mxu1 %vm349_vm2, %v19767_v58  ;;  %v7514_v19 = vor.u32 %v7513_v29, %v7510_v30  ;;  %v7577_v28 = vcombine.low %v7478_v43, %v7492_v27  ;;  %v16711_v48 = vld.sshfl [vmem:[%s18740_s21 + $0xfc] sm:$0x13 pattern:$0x76325410]  ;;  %v7448_v61 = vcombine.high %v16709_v6, %v16709_v6  ;;  %v7456_v51 = vcombine.high %v16710_v14, %v16710_v14 }
 0x193   : > { %17917 = vmatpush3.bf16.msra.mxu1 %v19734_v62  ;;  %v7506_v52 = vsel %vm18833_vm9, %v7501_v41, %v7505_v34  ;;  %v7464_v9 = vcombine.high %v16711_v48, %v16711_v48  ;;  %v7522_v36 = vshrl.u32 %v16708_v31, 16  ;;  %v7525_v33 = vshll.u32 %v16708_v31, 16 }
 0x194   : > { %v7515_v4 = vrot.slane %v7514_v19, 2  ;;  %v7585_v2 = vrot.slane %v7577_v28, %v18742_v12  ;;  %v7531_v30 = vshll.u32 %v7440_v47, 16  ;;  %v7536_v21 = vshrl.u32 %v16709_v6, 16  ;;  %v19792_v19 = vpop.f32.mrf.mxu0  ;;  %v19794_v28 = vpop.f32.mrf.mxu1 }
 0x195   : > { %v7524_v7 = vrot.slane %v7522_v36, 6  ;;  %v7527_v8 = vrot.slane %v7525_v33, 7  ;;  %v7539_v32 = vshll.u32 %v16709_v6, 16  ;;  %v7545_v26 = vshll.u32 %v7448_v61, 16 }
 0x196   : > { %v7520_v62 = vsel %vm18833_vm9, %v7515_v4, %v7519_v38  ;;  %v7533_v34 = vrot.slane %v7531_v30, 7  ;;  %v7538_v43 = vrot.slane %v7536_v21, 6  ;;  %v7550_v29 = vshrl.u32 %v16710_v14, 16 }
 0x197   : > { %v7578_v31 = vcombine.low %v7506_v52, %v7520_v62  ;;  %v7528_v27 = vor.u32 %v7527_v8, %v7524_v7  ;;  %v7541_v41 = vrot.slane %v7539_v32, 7  ;;  %v7547_v50 = vrot.slane %v7545_v26, 7  ;;  %v16714_v52 = vld [vmem:[%s22463_s1 + $0x32] sm:$0x3] }
 0x198   : > { %v7552_v47 = vrot.slane %v7550_v29, 6  ;;  %v7553_v36 = vshll.u32 %v16710_v14, 16  ;;  %v7559_v33 = vshll.u32 %v7456_v51, 16  ;;  %v7564_v6 = vshrl.u32 %v16711_v48, 16 }
 0x199   : > { %v7592_v61 = vrot.slane %v7578_v31, %v18742_v12  ;;  %v7529_v38 = vrot.slane %v7528_v27, 2  ;;  %v7542_v4 = vor.u32 %v7541_v41, %v7538_v43  ;;  %v7567_v30 = vshll.u32 %v16711_v48, 16  ;;  %v16725_v26 = vld.sshfl [vmem:[%s18740_s21 + $0x10c] sm:$0x13 pattern:$0x76325410]  ;;  %v19804_v43 = vpop.f32.mrf.mxu0  ;;  %v19806_v48 = vpop.f32.mrf.mxu1 }
 0x19a   : > { %v7555_v21 = vrot.slane %v7553_v36, 7  ;;  %v7561_v7 = vrot.slane %v7559_v33, 7  ;;  %v7566_v8 = vrot.slane %v7564_v6, 6  ;;  %v7573_v32 = vshll.u32 %v7464_v9, 16  ;;  %22496 = vst [vmem:[#allocation11_spill] sm:$0xff] %v19804_v43  ;;  %22497 = vst [vmem:[#allocation12_spill] sm:$0xff] %v19806_v48 }
 0x19b   : > { %v7593_v62 = vcombine.low %v7585_v2, %v7592_v61  ;;  %v7534_v14 = vsel %vm18833_vm9, %v7529_v38, %v7533_v34  ;;  %v7543_v51 = vrot.slane %v7542_v4, 2  ;;  %v7569_v29 = vrot.slane %v7567_v30, 7  ;;  %v16726_v31 = vld.sshfl [vmem:[%s18740_s21 + $0x110] sm:$0x13 pattern:$0x76325410] }
 0x19c   : > { %v7556_v27 = vor.u32 %v7555_v21, %v7552_v47  ;;  %v7575_v41 = vrot.slane %v7573_v32, 7  ;;  %v19810_v36 = vadd.f32 %v19527_v55, %v19525_v10  ;;  %v19814_v9 = vadd.f32 %v19538_v35, %v19536_v25  ;;  %v16727_v2 = vld.sshfl [vmem:[%s18740_s21 + $0x114] sm:$0x13 pattern:$0x76325410]  ;;  %v19830_v21 = vpop.f32.mrf.mxu0 }
 0x19d   : > { %17918 = vmatprep.mubr.msk.bf16.mxu1 %vm349_vm2, %v7593_v62  ;;  %v7548_v34 = vsel %vm18833_vm9, %v7543_v51, %v7547_v50  ;;  %v7570_v33 = vor.u32 %v7569_v29, %v7566_v8  ;;  %v19821_v6 = vand.u32 %v16714_v52, %v18732_v5  ;;  %v19825_v47 = vadd.f32 %v19555_v20, %v19553_v17  ;;  %v16728_v10 = vld.sshfl [vmem:[%s18740_s21 + $0x118] sm:$0x13 pattern:$0x76325410]  ;;  %v19832_v52 = vpop.f32.mrf.mxu1 }
 0x19e   : > { %v7557_v55 = vrot.slane %v7556_v27, 2  ;;  %v7594_v61 = vcombine.low %v7534_v14, %v7548_v34  ;;  %v7751_v38 = vcombine.high %v16725_v26, %v16725_v26  ;;  %v7759_v25 = vcombine.high %v16726_v31, %v16726_v31  ;;  %22498 = vst [vmem:[#allocation13_spill] sm:$0xff] %v19830_v21  ;;  %22499 = vst [vmem:[#allocation14_spill] sm:$0xff] %v19832_v52 }
 0x19f   : > { %v7571_v35 = vrot.slane %v7570_v33, 2  ;;  %17922 = vmatprep.subr.bf16.mxu0 %v19821_v6  ;;  %17928 = vmatprep.subr.bf16.mxu1 %v19821_v6  ;;  %v7767_v4 = vcombine.high %v16727_v2, %v16727_v2  ;;  %v7775_v50 = vcombine.high %v16728_v10, %v16728_v10  ;;  %v7809_v30 = vshrl.u32 %v16725_v26, 16 }
 0x1a0   : > { %v7562_v17 = vsel %vm18833_vm9, %v7557_v55, %v7561_v7  ;;  %v7602_v20 = vrot.slane %v7594_v61, %v18742_v12  ;;  %17923 = vmatpush3.bf16.msra.mxu0 %v19821_v6  ;;  %v7812_v8 = vshll.u32 %v16725_v26, 16  ;;  %v7818_v32 = vshll.u32 %v7751_v38, 16  ;;  %v19842_v26 = vpop.f32.mrf.mxu0  ;;  %v19844_v61 = vpop.f32.mrf.mxu1 }
 0x1a1   : > { %v7576_v14 = vsel %vm18833_vm9, %v7571_v35, %v7575_v41  ;;  %v7811_v51 = vrot.slane %v7809_v30, 6  ;;  %v7823_v29 = vshrl.u32 %v16726_v31, 16  ;;  %v7826_v27 = vshll.u32 %v16726_v31, 16  ;;  %22500 = vst [vmem:[#allocation15_spill] sm:$0xff] %v19844_v61 }
 0x1a2   : > { %v7595_v34 = vcombine.low %v7562_v17, %v7576_v14  ;;  %v7814_v33 = vrot.slane %v7812_v8, 7  ;;  %v7820_v21 = vrot.slane %v7818_v32, 7  ;;  %v7832_v48 = vshll.u32 %v7759_v25, 16 }
 0x1a3   : > { %v7825_v52 = vrot.slane %v7823_v29, 6  ;;  %v7828_v43 = vrot.slane %v7826_v27, 7  ;;  %v7837_v7 = vshrl.u32 %v16727_v2, 16  ;;  %v7840_v55 = vshll.u32 %v16727_v2, 16  ;;  %17925 = vmatmul.mubr.msk.bf16.vlgmr.msra.gmra.mxu0 %vm349_vm2, %v19767_v58 }
 0x1a4   : > { %v7609_v41 = vrot.slane %v7595_v34, %v18742_v12  ;;  %v7815_v31 = vor.u32 %v7814_v33, %v7811_v51  ;;  %v7834_v38 = vrot.slane %v7832_v48, 7  ;;  %v7846_v35 = vshll.u32 %v7767_v4, 16  ;;  %17936 = vmatprep.mubr.msk.bf16.mxu0 %vm349_vm2, %v7593_v62  ;;  %v16729_v8 = vld.sshfl [vmem:[%s18740_s21 + $0x11c] sm:$0x13 pattern:$0x76325410]  ;;  %v19853_v33 = vpop.f32.mrf.mxu0  ;;  %v19855_v62 = vpop.f32.mrf.mxu1 }
 0x1a5   : > { %v7829_v25 = vor.u32 %v7828_v43, %v7825_v52  ;;  %v7839_v30 = vrot.slane %v7837_v7, 6  ;;  %v7842_v17 = vrot.slane %v7840_v55, 7  ;;  %v7851_v2 = vshrl.u32 %v16728_v10, 16  ;;  %22501 = vst [vmem:[#allocation16_spill] sm:$0xff] %v19853_v33  ;;  %22502 = vst [vmem:[#allocation17_spill] sm:$0xff] %v19855_v62 }
 0x1a6   : > { %v19849_v32 = vcombine.low %v7602_v20, %v7609_v41  ;;  %v7816_v58 = vrot.slane %v7815_v31, 2  ;;  %v7848_v14 = vrot.slane %v7846_v35, 7  ;;  %v7854_v29 = vshll.u32 %v16728_v10, 16 }
 0x1a7   : > { %v16730_v27 = vld.sshfl [vmem:[%s18740_s21 + $0x120] sm:$0x13 pattern:$0x76325410]  ;;  %v7830_v61 = vrot.slane %v7829_v25, 2  ;;  %v7843_v34 = vor.u32 %v7842_v17, %v7839_v30  ;;  %v7853_v51 = vrot.slane %v7851_v2, 6  ;;  %v19863_v10 = vadd.f32 %v19575_v44, %v19573_v40 }
 0x1a8   : > { %v7860_v48 = vshll.u32 %v7775_v50, 16  ;;  %v16731_v4 = vld.sshfl [vmem:[%s18740_s21 + $0x124] sm:$0x13 pattern:$0x76325410]  ;;  %17919 = vmatmul.mubr.msk.bf16.vlgmr.msra.gmra.mxu1 %vm349_vm2, %v19849_v32  ;;  %v7821_v43 = vsel %vm18833_vm9, %v7816_v58, %v7820_v21  ;;  %v7856_v52 = vrot.slane %v7854_v29, 7  ;;  %v7783_v7 = vcombine.high %v16729_v8, %v16729_v8  ;;  %v19871_v58 = vpop.f32.mrf.mxu0  ;;  %v19873_v29 = vpop.f32.mrf.mxu1 }
 0x1a9   : > { %v16732_v20 = vld.sshfl [vmem:[%s18740_s21 + $0x128] sm:$0x13 pattern:$0x76325410]  ;;  %17929 = vmatpush3.bf16.msra.mxu1 %v19821_v6  ;;  %v7835_v50 = vsel %vm18833_vm9, %v7830_v61, %v7834_v38  ;;  %v7844_v55 = vrot.slane %v7843_v34, 2  ;;  %v7791_v31 = vcombine.high %v16730_v27, %v16730_v27  ;;  %v7799_v30 = vcombine.high %v16731_v4, %v16731_v4  ;;  %22503 = vst [vmem:[#allocation18_spill] sm:$0xff] %v19871_v58 }
 0x1aa   : > { %v7862_v41 = vrot.slane %v7860_v48, 7  ;;  %v7857_v35 = vor.u32 %v7856_v52, %v7853_v51  ;;  %v7920_v25 = vcombine.low %v7821_v43, %v7835_v50  ;;  %v7807_v17 = vcombine.high %v16732_v20, %v16732_v20  ;;  %22504 = vst [vmem:[#allocation19_spill] sm:$0xff] %v19873_v29  ;;  %v19878_v29 = vpop.f32.mrf.mxu0 }
 0x1ab   : > { %v7849_v21 = vsel %vm18833_vm9, %v7844_v55, %v7848_v14  ;;  %v7865_v2 = vshrl.u32 %v16729_v8, 16  ;;  %v7868_v40 = vshll.u32 %v16729_v8, 16  ;;  %v7874_v44 = vshll.u32 %v7783_v7, 16 }
 0x1ac   : > { %v7858_v6 = vrot.slane %v7857_v35, 2  ;;  %v7928_v61 = vrot.slane %v7920_v25, %v18742_v12  ;;  %v7879_v38 = vshrl.u32 %v16730_v27, 16  ;;  %v7882_v34 = vshll.u32 %v16730_v27, 16  ;;  %v19880_v35 = vpop.f32.mrf.mxu1 }
 0x1ad   : > { %v7867_v48 = vrot.slane %v7865_v2, 6  ;;  %v7870_v51 = vrot.slane %v7868_v40, 7  ;;  %v7876_v43 = vrot.slane %v7874_v44, 7  ;;  %v7888_v52 = vshll.u32 %v7791_v31, 16 }
 0x1ae   : > { %v7863_v50 = vsel %vm18833_vm9, %v7858_v6, %v7862_v41  ;;  %v7881_v14 = vrot.slane %v7879_v38, 6  ;;  %v7884_v55 = vrot.slane %v7882_v34, 7  ;;  %v7893_v8 = vshrl.u32 %v16731_v4, 16  ;;  %v16735_v41 = vld [vmem:[%s22463_s1 + $0x34] sm:$0x3] }
 0x1af   : > { %v7921_v7 = vcombine.low %v7849_v21, %v7863_v50  ;;  %v7871_v62 = vor.u32 %v7870_v51, %v7867_v48  ;;  %v7890_v58 = vrot.slane %v7888_v52, 7  ;;  %v7896_v33 = vshll.u32 %v16731_v4, 16 }
 0x1b0   : > { %v7885_v25 = vor.u32 %v7884_v55, %v7881_v14  ;;  %v7895_v27 = vrot.slane %v7893_v8, 6  ;;  %v7902_v2 = vshll.u32 %v7799_v30, 16  ;;  %v7907_v40 = vshrl.u32 %v16732_v20, 16  ;;  %v19889_v55 = vpop.f32.mrf.mxu0  ;;  %v19891_v8 = vpop.f32.mrf.mxu1 }
 0x1b1   : > { %v7935_v31 = vrot.slane %v7921_v7, %v18742_v12  ;;  %v7872_v44 = vrot.slane %v7871_v62, 2  ;;  %v7898_v21 = vrot.slane %v7896_v33, 7  ;;  %v7910_v6 = vshll.u32 %v16732_v20, 16  ;;  %22505 = vst [vmem:[#allocation20_spill] sm:$0xff] %v19889_v55  ;;  %22506 = vst [vmem:[#allocation21_spill] sm:$0xff] %v19891_v8 }
 0x1b2   : > { %v7886_v4 = vrot.slane %v7885_v25, 2  ;;  %v7904_v38 = vrot.slane %v7902_v2, 7  ;;  %v7909_v34 = vrot.slane %v7907_v40, 6  ;;  %v7916_v48 = vshll.u32 %v7807_v17, 16 }
 0x1b3   : > { %v7936_v51 = vcombine.low %v7928_v61, %v7935_v31  ;;  %v7877_v52 = vsel %vm18833_vm9, %v7872_v44, %v7876_v43  ;;  %v7899_v30 = vor.u32 %v7898_v21, %v7895_v27  ;;  %v7912_v50 = vrot.slane %v7910_v6, 7  ;;  %v16746_v14 = vld.sshfl [vmem:[%s18740_s21 + $0x138] sm:$0x13 pattern:$0x76325410]  ;;  %v19915_v6 = vpop.f32.mrf.mxu0 }
 0x1b4   : > { %v7891_v33 = vsel %vm18833_vm9, %v7886_v4, %v7890_v58  ;;  %v7918_v62 = vrot.slane %v7916_v48, 7  ;;  %v19897_v20 = vadd.f32 %v19595_v3, %v19593_v53  ;;  %v19901_v17 = vadd.f32 %v19623_v45, %v19621_v37  ;;  %v16747_v61 = vld.sshfl [vmem:[%s18740_s21 + $0x13c] sm:$0x13 pattern:$0x76325410]  ;;  %22507 = vst [vmem:[#allocation22_spill] sm:$0xff] %v19915_v6 }
 0x1b5   : > { %17930 = vmatprep.mubr.msk.bf16.mxu1 %vm349_vm2, %v7936_v51  ;;  %v7900_v43 = vrot.slane %v7899_v30, 2  ;;  %v7913_v7 = vor.u32 %v7912_v50, %v7909_v34  ;;  %v7937_v25 = vcombine.low %v7877_v52, %v7891_v33  ;;  %v8016_v27 = vand.u32 %v16735_v41, %v18732_v5  ;;  %v16748_v2 = vld.sshfl [vmem:[%s18740_s21 + $0x140] sm:$0x13 pattern:$0x76325410]  ;;  %v19917_v41 = vpop.f32.mrf.mxu1 }
 0x1b6   : > { %v19909_v58 = vadd.f32 %v19646_v56, %v19644_v54  ;;  %v16749_v40 = vld.sshfl [vmem:[%s18740_s21 + $0x144] sm:$0x13 pattern:$0x76325410]  ;;  %v8094_v53 = vcombine.high %v16746_v14, %v16746_v14  ;;  %v8102_v3 = vcombine.high %v16747_v61, %v16747_v61  ;;  %v8110_v31 = vcombine.high %v16748_v2, %v16748_v2 }
 0x1b7   : > { %v7905_v37 = vsel %vm18833_vm9, %v7900_v43, %v7904_v38  ;;  %v7914_v45 = vrot.slane %v7913_v7, 2  ;;  %v7945_v44 = vrot.slane %v7937_v25, %v18742_v12  ;;  %17934 = vmatprep.subr.bf16.mxu0 %v8016_v27  ;;  %17940 = vmatprep.subr.bf16.mxu1 %v8016_v27  ;;  %v8118_v21 = vcombine.high %v16749_v40, %v16749_v40 }
 0x1b8   : > { %17935 = vmatpush3.bf16.msra.mxu0 %v8016_v27  ;;  %v8152_v54 = vshrl.u32 %v16746_v14, 16  ;;  %v8155_v56 = vshll.u32 %v16746_v14, 16  ;;  %v8161_v4 = vshll.u32 %v8094_v53, 16  ;;  %v8166_v34 = vshrl.u32 %v16747_v61, 16  ;;  %v19923_v14 = vpop.f32.mrf.mxu0  ;;  %v19925_v53 = vpop.f32.mrf.mxu1  ;;  %v22527_v57 = vld [vmem:[#allocation21_spill] sm:$0xff] }
 0x1b9   : > { %v7919_v48 = vsel %vm18833_vm9, %v7914_v45, %v7918_v62  ;;  %v8169_v52 = vshll.u32 %v16747_v61, 16  ;;  %v8175_v38 = vshll.u32 %v8102_v3, 16  ;;  %v8180_v30 = vshrl.u32 %v16748_v2, 16  ;;  %22508 = vst [vmem:[#allocation23_spill] sm:$0xff] %v19925_v53 }
 0x1ba   : > { %v7938_v50 = vcombine.low %v7905_v37, %v7919_v48  ;;  %v8154_v33 = vrot.slane %v8152_v54, 6  ;;  %v8157_v43 = vrot.slane %v8155_v56, 7  ;;  %v8163_v7 = vrot.slane %v8161_v4, 7 }
 0x1bb   : > { %v8168_v25 = vrot.slane %v8166_v34, 6  ;;  %v8171_v8 = vrot.slane %v8169_v52, 7  ;;  %v8177_v6 = vrot.slane %v8175_v38, 7  ;;  %v8182_v55 = vrot.slane %v8180_v30, 6  ;;  %17937 = vmatmul.mubr.msk.bf16.vlgmr.msra.gmra.mxu0 %vm349_vm2, %v19849_v32 }
 0x1bc   : > { %v7952_v62 = vrot.slane %v7938_v50, %v18742_v12  ;;  %v8158_v61 = vor.u32 %v8157_v43, %v8154_v33  ;;  %v8183_v3 = vshll.u32 %v16748_v2, 16  ;;  %v8189_v37 = vshll.u32 %v8110_v31, 16  ;;  %17948 = vmatprep.mubr.msk.bf16.mxu0 %vm349_vm2, %v7936_v51  ;;  %v16750_v38 = vld.sshfl [vmem:[%s18740_s21 + $0x148] sm:$0x13 pattern:$0x76325410]  ;;  %v19933_v31 = vpop.f32.mrf.mxu0  ;;  %v19935_v51 = vpop.f32.mrf.mxu1 }
 0x1bd   : > { %v8172_v45 = vor.u32 %v8171_v8, %v8168_v25  ;;  %v8194_v54 = vshrl.u32 %v16749_v40, 16  ;;  %v8197_v56 = vshll.u32 %v16749_v40, 16  ;;  %v8203_v4 = vshll.u32 %v8118_v21, 16  ;;  %22509 = vst [vmem:[#allocation24_spill] sm:$0xff] %v19935_v51 }
 0x1be   : > { %v19929_v34 = vcombine.low %v7945_v44, %v7952_v62  ;;  %v8159_v32 = vrot.slane %v8158_v61, 2  ;;  %v8185_v48 = vrot.slane %v8183_v3, 7  ;;  %v8191_v52 = vrot.slane %v8189_v37, 7 }
 0x1bf   : > { %v16751_v30 = vld.sshfl [vmem:[%s18740_s21 + $0x14c] sm:$0x13 pattern:$0x76325410]  ;;  %v8173_v53 = vrot.slane %v8172_v45, 2  ;;  %v8196_v50 = vrot.slane %v8194_v54, 6  ;;  %v19943_v44 = vadd.f32 %v19668_v15, %v19773_v24  ;;  %v19947_v21 = vadd.f32 %v19670_v22, %v19863_v10  ;;  %v19955_v22 = vpop.f32.mrf.mxu1 }
 0x1c0   : > { %v8199_v33 = vrot.slane %v8197_v56, 7  ;;  %v8205_v2 = vrot.slane %v8203_v4, 7  ;;  %17931 = vmatmul.mubr.msk.bf16.vlgmr.msra.gmra.mxu1 %vm349_vm2, %v19929_v34  ;;  %v8164_v8 = vsel %vm18833_vm9, %v8159_v32, %v8163_v7  ;;  %v8186_v40 = vor.u32 %v8185_v48, %v8182_v55  ;;  %v16752_v43 = vld.sshfl [vmem:[%s18740_s21 + $0x150] sm:$0x13 pattern:$0x76325410]  ;;  %v19953_v32 = vpop.f32.mrf.mxu0 }
 0x1c1   : > { %17941 = vmatpush3.bf16.msra.mxu1 %v8016_v27  ;;  %v8178_v25 = vsel %vm18833_vm9, %v8173_v53, %v8177_v6  ;;  %v16753_v61 = vld.sshfl [vmem:[%s18740_s21 + $0x154] sm:$0x13 pattern:$0x76325410]  ;;  %v8126_v3 = vcombine.high %v16750_v38, %v16750_v38  ;;  %v8134_v37 = vcombine.high %v16751_v30, %v16751_v30  ;;  %v8142_v55 = vcombine.high %v16752_v43, %v16752_v43 }
 0x1c2   : > { %v8200_v62 = vor.u32 %v8199_v33, %v8196_v50  ;;  %v8187_v45 = vrot.slane %v8186_v40, 2  ;;  %v8263_v7 = vcombine.low %v8164_v8, %v8178_v25  ;;  %v8150_v54 = vcombine.high %v16753_v61, %v16753_v61  ;;  %22510 = vst [vmem:[#allocation25_spill] sm:$0xff] %v19953_v32  ;;  %22511 = vst [vmem:[#allocation26_spill] sm:$0xff] %v19955_v22 }
 0x1c3   : > { %v8208_v15 = vshrl.u32 %v16750_v38, 16  ;;  %v8211_v24 = vshll.u32 %v16750_v38, 16  ;;  %v8217_v4 = vshll.u32 %v8126_v3, 16  ;;  %v8222_v6 = vshrl.u32 %v16751_v30, 16 }
 0x1c4   : > { %v8201_v56 = vrot.slane %v8200_v62, 2  ;;  %v8192_v10 = vsel %vm18833_vm9, %v8187_v45, %v8191_v52  ;;  %v8271_v27 = vrot.slane %v8263_v7, %v18742_v12  ;;  %v8225_v53 = vshll.u32 %v16751_v30, 16  ;;  %v19962_v52 = vpop.f32.mrf.mxu0  ;;  %v19964_v45 = vpop.f32.mrf.mxu1 }
 0x1c5   : > { %v8210_v50 = vrot.slane %v8208_v15, 6  ;;  %v8213_v33 = vrot.slane %v8211_v24, 7  ;;  %v8219_v8 = vrot.slane %v8217_v4, 7  ;;  %v8224_v38 = vrot.slane %v8222_v6, 6 }
 0x1c6   : > { %v8206_v48 = vsel %vm18833_vm9, %v8201_v56, %v8205_v2  ;;  %v8227_v25 = vrot.slane %v8225_v53, 7  ;;  %v8231_v62 = vshll.u32 %v8134_v37, 16  ;;  %v8236_v32 = vshrl.u32 %v16752_v43, 16 }
 0x1c7   : > { %v8264_v40 = vcombine.low %v8192_v10, %v8206_v48  ;;  %v8214_v3 = vor.u32 %v8213_v33, %v8210_v50  ;;  %v8239_v22 = vshll.u32 %v16752_v43, 16  ;;  %v8245_v51 = vshll.u32 %v8142_v55, 16  ;;  %v16756_v55 = vld [vmem:[%s22463_s1 + $0x36] sm:$0x3] }
 0x1c8   : > { %v8228_v7 = vor.u32 %v8227_v25, %v8224_v38  ;;  %v8233_v2 = vrot.slane %v8231_v62, 7  ;;  %v8250_v56 = vshrl.u32 %v16753_v61, 16  ;;  %v8238_v24 = vrot.slane %v8236_v32, 6 }
 0x1c9   : > { %v8278_v30 = vrot.slane %v8264_v40, %v18742_v12  ;;  %v8215_v15 = vrot.slane %v8214_v3, 2  ;;  %v8241_v4 = vrot.slane %v8239_v22, 7  ;;  %v8247_v10 = vrot.slane %v8245_v51, 7  ;;  %v19978_v22 = vpop.f32.mrf.mxu0 }
 0x1ca   : > { %v8229_v6 = vrot.slane %v8228_v7, 2  ;;  %v8252_v53 = vrot.slane %v8250_v56, 6  ;;  %v8253_v43 = vshll.u32 %v16753_v61, 16  ;;  %v8259_v40 = vshll.u32 %v8150_v54, 16 }
 0x1cb   : > { %v8279_v37 = vcombine.low %v8271_v27, %v8278_v30  ;;  %v16767_v48 = vld.sshfl [vmem:[%s18740_s21 + $0xb4] sm:$0x12 pattern:$0x76325410]  ;;  %v8220_v50 = vsel %vm18833_vm9, %v8215_v15, %v8219_v8  ;;  %v8242_v33 = vor.u32 %v8241_v4, %v8238_v24  ;;  %v19975_v32 = vadd.f32 %v19676_v42, %v19810_v36  ;;  %v19980_v27 = vpop.f32.mrf.mxu1  ;;  %v20013_v56 = vpop.f32.mrf.mxu0 }
 0x1cc   : > { %v16768_v51 = vld.sshfl [vmem:[%s18740_s21 + $0xb8] sm:$0x12 pattern:$0x76325410]  ;;  %v8234_v61 = vsel %vm18833_vm9, %v8229_v6, %v8233_v2  ;;  %v8255_v38 = vrot.slane %v8253_v43, 7  ;;  %v19987_v8 = vadd.f32 %v19678_v49, %v19897_v20  ;;  %v19991_v54 = vadd.f32 %v19697_v23, %v19814_v9 }
 0x1cd   : > { %17942 = vmatprep.mubr.msk.bf16.mxu1 %vm349_vm2, %v8279_v37  ;;  %v16769_v42 = vld.sshfl [vmem:[%s18740_s21 + $0xbc] sm:$0x12 pattern:$0x76325410]  ;;  %v8243_v36 = vrot.slane %v8242_v33, 2  ;;  %v8261_v25 = vrot.slane %v8259_v40, 7  ;;  %v8280_v62 = vcombine.low %v8220_v50, %v8234_v61  ;;  %v19996_v3 = vadd.f32 %v19699_v39, %v19901_v17  ;;  %v20015_v15 = vpop.f32.mrf.mxu1 }
 0x1ce   : > { %v16770_v30 = vld.sshfl [vmem:[%s18740_s21 + $0xc0] sm:$0x12 pattern:$0x76325410]  ;;  %v8256_v7 = vor.u32 %v8255_v38, %v8252_v53  ;;  %v20000_v2 = vand.u32 %v16756_v55, %v18732_v5  ;;  %v20004_v49 = vadd.f32 %v19710_v16, %v19825_v47  ;;  %v20008_v23 = vadd.f32 %v19712_v60, %v19909_v58 }
 0x1cf   : > { %v8248_v9 = vsel %vm18833_vm9, %v8243_v36, %v8247_v10  ;;  %v8288_v39 = vrot.slane %v8280_v62, %v18742_v12  ;;  %v8437_v20 = vcombine.high %v16767_v48, %v16767_v48  ;;  %v8445_v17 = vcombine.high %v16768_v51, %v16768_v51  ;;  %v16771_v58 = vld.sshfl [vmem:[%s18740_s21 + $0xc4] sm:$0x12 pattern:$0x76325410]  ;;  %v20036_v62 = vpop.f32.mrf.mxu1 }
 0x1d0   : > { %v8257_v24 = vrot.slane %v8256_v7, 2  ;;  %17946 = vmatprep.subr.bf16.mxu0 %v20000_v2  ;;  %17952 = vmatprep.subr.bf16.mxu1 %v20000_v2  ;;  %v8453_v16 = vcombine.high %v16769_v42, %v16769_v42  ;;  %v8461_v60 = vcombine.high %v16770_v30, %v16770_v30  ;;  %v16775_v47 = vrot.slane %v16767_v48, 9  ;;  %v16772_v4 = vld.sshfl [vmem:[%s18740_s21 + $0xc8] sm:$0x12 pattern:$0x76325410] }
 0x1d1   : > { %17947 = vmatpush3.bf16.msra.mxu0 %v20000_v2  ;;  %v8496_v10 = vrot.slane %v8437_v20, 7  ;;  %v16776_v37 = vrot.slane %v16768_v51, 9  ;;  %v8500_v6 = vrot.slane %v8445_v17, 7  ;;  %v16777_v53 = vrot.slane %v16769_v42, 9  ;;  %v20034_v42 = vpop.f32.mrf.mxu0 }
 0x1d2   : > { %v16773_v43 = vld.sshfl [vmem:[%s18740_s21 + $0xcc] sm:$0x12 pattern:$0x76325410]  ;;  %v8262_v55 = vsel %vm18833_vm9, %v8257_v24, %v8261_v25  ;;  %v8504_v50 = vrot.slane %v8453_v16, 7  ;;  %v16778_v33 = vrot.slane %v16770_v30, 9  ;;  %v20031_v36 = vadd.f32 %v19729_v59, %v19943_v44 }
 0x1d3   : > { %v8508_v40 = vrot.slane %v8461_v60, 7  ;;  %v8281_v61 = vcombine.low %v8248_v9, %v8262_v55  ;;  %v8497_v48 = vsel %vm18990_vm15, %v16775_v47, %v8496_v10  ;;  %v8501_v38 = vsel %vm18990_vm15, %v16776_v37, %v8500_v6  ;;  %v16774_v51 = vld.sshfl [vmem:[%s18740_s21 + $0xd0] sm:$0x12 pattern:$0x76325410] }
 0x1d4   : > { %v8505_v25 = vsel %vm18990_vm15, %v16777_v53, %v8504_v50  ;;  %v8526_v7 = vcombine.low %v8497_v48, %v8501_v38  ;;  %v1406_v9 = vadd.f32 %v19731_v46, %v19947_v21  ;;  %17949 = vmatmul.mubr.msk.bf16.vlgmr.msra.gmra.mxu0 %vm349_vm2, %v19929_v34  ;;  %v8469_v20 = vcombine.high %v16771_v58, %v16771_v58  ;;  %v16785_v34 = vld [vmem:[%s22463_s1 + $0x38] sm:$0x3]  ;;  %v20052_v21 = vpop.f32.mrf.mxu0  ;;  %v20054_v53 = vpop.f32.mrf.mxu1  ;;  %v18520_v38 = vld.sshfl [vmem:[%s18740_s21 + $0x10] sm:$0xf pattern:$0x76325410] }
 0x1d5   : > { %v8509_v30 = vsel %vm18990_vm15, %v16778_v33, %v8508_v40  ;;  %v8295_v59 = vrot.slane %v8281_v61, %v18742_v12  ;;  %v8477_v17 = vcombine.high %v16772_v4, %v16772_v4  ;;  %v8485_v16 = vcombine.high %v16773_v43, %v16773_v43 }
 0x1d6   : > { %v8527_v44 = vcombine.low %v8505_v25, %v8509_v30  ;;  %v8534_v24 = vrot.slane %v8526_v7, %v18742_v12  ;;  %v8493_v60 = vcombine.high %v16774_v51, %v16774_v51  ;;  %v16779_v47 = vrot.slane %v16771_v58, 9  ;;  %v18519_v58 = vld.sshfl [vmem:[%s18740_s21 + $0x8] sm:$0xf pattern:$0x76325410]  ;;  %v22512_v7 = vld [vmem:[#allocation8_spill] sm:$0xff] }
 0x1d7   : > { %v8296_v10 = vcombine.low %v8288_v39, %v8295_v59  ;;  %v8512_v6 = vrot.slane %v8469_v20, 7  ;;  %v16780_v46 = vrot.slane %v16772_v4, 9  ;;  %v8516_v55 = vrot.slane %v8477_v17, 7  ;;  %v22513_v20 = vld [vmem:[#allocation9_spill] sm:$0xff] }
 0x1d8   : > { %v8541_v37 = vrot.slane %v8527_v44, %v18742_v12  ;;  %v16781_v50 = vrot.slane %v16773_v43, 9  ;;  %v8520_v33 = vrot.slane %v8485_v16, 7  ;;  %v16782_v39 = vrot.slane %v16774_v51, 9 }
 0x1d9   : > { %17943 = vmatmul.mubr.msk.bf16.vlgmr.msra.gmra.mxu1 %vm349_vm2, %v8296_v10  ;;  %v8513_v4 = vsel %vm18990_vm15, %v16779_v47, %v8512_v6  ;;  %v8524_v61 = vrot.slane %v8493_v60, 7  ;;  %v1119_v48 = vadd.f32 %v19745_v0, %v19975_v32  ;;  %v18521_v43 = vld.sshfl [vmem:[%s18740_s21 + $0x60] sm:$0xf pattern:$0x76325410]  ;;  %v8517_v51 = vsel %vm18990_vm15, %v16780_v46, %v8516_v55  ;;  %v20086_v60 = vpop.f32.mrf.mxu0  ;;  %v22514_v55 = vld [vmem:[#allocation10_spill] sm:$0xff] }
 0x1da   : > { %v8542_v40 = vcombine.low %v8534_v24, %v8541_v37  ;;  %17953 = vmatpush3.bf16.msra.mxu1 %v20000_v2  ;;  %v8521_v25 = vsel %vm18990_vm15, %v16781_v50, %v8520_v33  ;;  %v1404_v30 = vadd.f32 %v19747_v1, %v19987_v8  ;;  %v1122_v59 = vadd.f32 %v22512_v7, %v19991_v54  ;;  %v18522_v0 = vld.sshfl [vmem:[%s18740_s21 + $0x68] sm:$0xf pattern:$0x76325410]  ;;  %v20088_v54 = vpop.f32.mrf.mxu1  ;;  %v22516_v7 = vld [vmem:[#allocation12_spill] sm:$0xff] }
 0x1db   : > { %v20075_v32 = vld.sshfl [vmem:[%s18740_s21 + $0x8] sm:$0x13 pattern:$0x76325410]  ;;  %v8525_v2 = vsel %vm18990_vm15, %v16782_v39, %v8524_v61  ;;  %v8543_v44 = vcombine.low %v8513_v4, %v8517_v51  ;;  %v1407_v17 = vadd.f32 %v22513_v20, %v19996_v3  ;;  %v8679_v24 = vand.u32 %v16785_v34, %v18732_v5 }
 0x1dc   : > { %17954 = vmatprep.mubr.msk.bf16.mxu1 %vm349_vm2, %v8542_v40  ;;  %v18523_v16 = vld.sshfl [vmem:[%s18740_s21 + $0x18] sm:$0xf pattern:$0x76325410]  ;;  %v8544_v47 = vcombine.low %v8521_v25, %v8525_v2  ;;  %v1120_v10 = vadd.f32 %v19763_v11, %v20004_v49  ;;  %v1405_v37 = vadd.f32 %v19765_v18, %v20008_v23  ;;  %v9208_v46 = vshrl.u32 %v20075_v32, 16  ;;  %v20107_v40 = vpop.f32.mrf.mxu0  ;;  %v20109_v4 = vpop.f32.mrf.mxu1 }
 0x1dd   : > { %v18524_v1 = vld.sshfl [vmem:[%s18740_s21 + $0x20] sm:$0xf pattern:$0x76325410]  ;;  %v8551_v6 = vrot.slane %v8543_v44, %v18742_v12  ;;  %17958 = vmatprep.subr.bf16.mxu0 %v8679_v24  ;;  %17964 = vmatprep.subr.bf16.mxu1 %v8679_v24  ;;  %v1464_v50 = vadd.f32 %v22514_v55, %v20031_v36  ;;  %v1749_v33 = vadd.f32 %v19787_v63, %v1406_v9  ;;  %v16806_v11 = vld [vmem:[%s22463_s1 + $0x3a] sm:$0x3] }
 0x1de   : > { %v18525_v8 = vld.sshfl [vmem:[%s18740_s21 + $0x70] sm:$0xf pattern:$0x76325410]  ;;  %v8558_v34 = vrot.slane %v8544_v47, %v18742_v12  ;;  %17959 = vmatpush3.bf16.msra.mxu0 %v8679_v24  ;;  %v8654_v18 = vcombine.low %v18519_v58, %v18520_v38  ;;  %v20111_v51 = vcombine.low %v18521_v43, %v18522_v0  ;;  %v1462_v63 = vadd.f32 %v19792_v19, %v1119_v48  ;;  %v22517_v48 = vld [vmem:[#allocation13_spill] sm:$0xff] }
 0x1df   : > { %v18526_v3 = vld.sshfl [vmem:[%s18740_s21 + $0x78] sm:$0xf pattern:$0x76325410]  ;;  %v8671_v9 = vcombine.low %v18523_v16, %v18524_v1  ;;  %v1747_v58 = vadd.f32 %v19794_v28, %v1404_v30  ;;  %v22515_v38 = vld [vmem:[#allocation11_spill] sm:$0xff]  ;;  %v1750_v2 = vadd.f32 %v22516_v7, %v1407_v17  ;;  %v8904_v19 = vand.u32 %v16806_v11, %v18732_v5  ;;  %v20132_v30 = vpop.f32.mrf.mxu0 }
 0x1e0   : > { %v18527_v49 = vld.sshfl [vmem:[%s18740_s21 + $0x34] sm:$0xf pattern:$0x76325410]  ;;  %v8559_v61 = vcombine.low %v8551_v6, %v8558_v34  ;;  %17960 = vmatprep.mubr.msk.bf16.mxu0 %vm349_vm2, %v8654_v18  ;;  %v1465_v25 = vadd.f32 %v22515_v38, %v1122_v59  ;;  %v20123_v43 = vcombine.low %v18525_v8, %v18526_v3  ;;  %v1463_v0 = vadd.f32 %v22517_v48, %v1120_v10  ;;  %v22518_v6 = vld [vmem:[#allocation14_spill] sm:$0xff]  ;;  %v20134_v59 = vpop.f32.mrf.mxu1 }
 0x1e1   : > { %v18528_v23 = vld.sshfl [vmem:[%s18740_s21 + $0x3c] sm:$0xf pattern:$0x76325410]  ;;  %v1748_v34 = vadd.f32 %v22518_v6, %v1405_v37  ;;  %v9210_v28 = vrot.slane %v9208_v46, 6  ;;  %17961 = vmatmul.mubr.msk.bf16.vlgmr.msra.gmra.mxu0 %vm349_vm2, %v8671_v9  ;;  %17970 = vmatprep.subr.bf16.mxu0 %v8904_v19  ;;  %v1807_v17 = vadd.f32 %v19842_v26, %v1464_v50  ;;  %v22519_v8 = vld [vmem:[#allocation15_spill] sm:$0xff]  ;;  %v20159_v7 = vpop.f32.mrf.mxu0 }
 0x1e2   : > { %v18529_v39 = vld.sshfl [vmem:[%s18740_s21 + $0x8c] sm:$0xf pattern:$0x76325410]  ;;  %17955 = vmatmul.mubr.msk.bf16.vlgmr.msra.gmra.mxu1 %vm349_vm2, %v8559_v61  ;;  %v2092_v10 = vadd.f32 %v22519_v8, %v1749_v33  ;;  %v9211_v37 = vshll.u32 %v20075_v32, 16  ;;  %17971 = vmatpush3.bf16.msra.mxu0 %v8904_v19  ;;  %v22520_v11 = vld [vmem:[#allocation16_spill] sm:$0xff] }
 0x1e3   : > { %v18530_v36 = vld.sshfl [vmem:[%s18740_s21 + $0x94] sm:$0xf pattern:$0x76325410]  ;;  %17965 = vmatpush3.bf16.msra.mxu1 %v8679_v24  ;;  %17966 = vmatprep.mubr.msk.bf16.mxu1 %vm349_vm2, %v20111_v51  ;;  %v8879_v24 = vcombine.low %v18527_v49, %v18528_v23  ;;  %v16827_v3 = vld [vmem:[%s22463_s1 + $0x3c] sm:$0x3]  ;;  %v20146_v18 = vadd.f32 %v22520_v11, %v1462_v63 }
 0x1e4   : > { %v18531_v44 = vld.sshfl [vmem:[%s18740_s21 + $0x44] sm:$0xf pattern:$0x76325410]  ;;  %17976 = vmatprep.subr.bf16.mxu1 %v8904_v19  ;;  %v20143_v55 = vcombine.low %v18529_v39, %v18530_v36  ;;  %v22523_v49 = vld [vmem:[#allocation19_spill] sm:$0xff]  ;;  %v20161_v39 = vpop.f32.mrf.mxu1  ;;  %v9072_v63 = vand.u32 %v16827_v3, %v18732_v5 }
 0x1e5   : > { %v18532_v20 = vld.sshfl [vmem:[%s18740_s21 + $0x4c] sm:$0xf pattern:$0x76325410]  ;;  %17972 = vmatprep.mubr.msk.bf16.mxu0 %vm349_vm2, %v8879_v24  ;;  %v22521_v50 = vld [vmem:[#allocation17_spill] sm:$0xff]  ;;  %v20156_v23 = vadd.f32 %v22523_v49, %v1750_v2  ;;  %v9150_v2 = vcombine.high %v20075_v32, %v20075_v32 }
 0x1e6   : > { %v18533_v47 = vld.sshfl [vmem:[%s18740_s21 + $0x9c] sm:$0xf pattern:$0x76325410]  ;;  %v8896_v26 = vcombine.low %v18531_v44, %v18532_v20  ;;  %v20150_v33 = vadd.f32 %v22521_v50, %v1747_v58  ;;  %v22522_v61 = vld [vmem:[#allocation18_spill] sm:$0xff]  ;;  %v20167_v44 = vadd.f32 %v19878_v29, %v1463_v0  ;;  %v20170_v58 = vadd.f32 %v19880_v35, %v1748_v34  ;;  %17982 = vmatprep.subr.bf16.mxu0 %v9072_v63  ;;  %v20179_v34 = vpop.f32.mrf.mxu0  ;;  %v20181_v3 = vpop.f32.mrf.mxu1 }
 0x1e7   : > { %v18534_v16 = vld.sshfl [vmem:[%s18740_s21 + $0xa4] sm:$0xf pattern:$0x76325410]  ;;  %v20153_v9 = vadd.f32 %v22522_v61, %v1465_v25  ;;  %v9217_v29 = vshll.u32 %v9150_v2, 16  ;;  %22524 = vst [vmem:[#allocation8_spill] sm:$0xff] %v20179_v34 }
 0x1e8   : > { %v16839_v1 = vld.sshfl [vmem:[%s18740_s21 + $0xc] sm:$0x13 pattern:$0x76325410]  ;;  %v20163_v36 = vcombine.low %v18533_v47, %v18534_v16  ;;  %v9213_v47 = vrot.slane %v9211_v37, 7  ;;  %22525 = vst [vmem:[#allocation9_spill] sm:$0xff] %v20181_v3  ;;  %v20191_v3 = vadd.f32 %v22527_v57, %v2092_v10 }
 0x1e9   : > { %v9222_v46 = vshrl.u32 %v16839_v1, 16  ;;  %v16840_v38 = vld.sshfl [vmem:[%s18740_s21 + $0x10] sm:$0x13 pattern:$0x76325410]  ;;  %v9158_v20 = vcombine.high %v16839_v1, %v16839_v1  ;;  %v9225_v8 = vshll.u32 %v16839_v1, 16  ;;  %17973 = vmatmul.mubr.msk.bf16.vlgmr.msra.gmra.mxu0 %vm349_vm2, %v8896_v26 }
 0x1ea   : > { %v16841_v25 = vld.sshfl [vmem:[%s18740_s21 + $0x14] sm:$0x13 pattern:$0x76325410]  ;;  %v9166_v48 = vcombine.high %v16840_v38, %v16840_v38  ;;  %17967 = vmatmul.mubr.msk.bf16.vlgmr.msra.gmra.mxu1 %vm349_vm2, %v20123_v43  ;;  %v9236_v24 = vshrl.u32 %v16840_v38, 16  ;;  %v9239_v0 = vshll.u32 %v16840_v38, 16  ;;  %v9214_v37 = vor.u32 %v9213_v47, %v9210_v28  ;;  %17983 = vmatpush3.bf16.msra.mxu0 %v9072_v63 }
 0x1eb   : > { %v9174_v6 = vcombine.high %v16841_v25, %v16841_v25  ;;  %v9224_v16 = vrot.slane %v9222_v46, 6  ;;  %17977 = vmatpush3.bf16.msra.mxu1 %v8904_v19  ;;  %17978 = vmatprep.mubr.msk.bf16.mxu1 %vm349_vm2, %v20143_v55  ;;  %v9231_v35 = vshll.u32 %v9158_v20, 16  ;;  %v9227_v46 = vrot.slane %v9225_v8, 7  ;;  %v22526_v8 = vld [vmem:[#allocation20_spill] sm:$0xff] }
 0x1ec   : > { %v9245_v32 = vshll.u32 %v9166_v48, 16  ;;  %17988 = vmatprep.subr.bf16.mxu1 %v9072_v63  ;;  %v9238_v1 = vrot.slane %v9236_v24, 6  ;;  %v9250_v11 = vshrl.u32 %v16841_v25, 16  ;;  %17984 = vmatprep.mubr.msk.bf16.mxu0 %vm349_vm2, %v20111_v51  ;;  %v9219_v19 = vrot.slane %v9217_v29, 7  ;;  %v20194_v29 = vpop.f32.mrf.mxu0 }
 0x1ed   : > { %v9233_v50 = vrot.slane %v9231_v35, 7  ;;  %v9241_v61 = vrot.slane %v9239_v0, 7  ;;  %v16842_v38 = vld.sshfl [vmem:[%s18740_s21 + $0x18] sm:$0x13 pattern:$0x76325410]  ;;  %v9228_v20 = vor.u32 %v9227_v46, %v9224_v16  ;;  %v20188_v24 = vadd.f32 %v22526_v8, %v1807_v17  ;;  %v20196_v35 = vpop.f32.mrf.mxu1 }
 0x1ee   : > { %v9247_v49 = vrot.slane %v9245_v32, 7  ;;  %v9215_v2 = vrot.slane %v9214_v37, 2  ;;  %v9252_v48 = vrot.slane %v9250_v11, 6  ;;  %v9253_v26 = vshll.u32 %v16841_v25, 16  ;;  %22528 = vst [vmem:[#allocation10_spill] sm:$0xff] %v20194_v29  ;;  %22529 = vst [vmem:[#allocation11_spill] sm:$0xff] %v20196_v35 }
 0x1ef   : > { %v9242_v28 = vor.u32 %v9241_v61, %v9238_v1  ;;  %v9259_v47 = vshll.u32 %v9174_v6, 16  ;;  %v16843_v51 = vld.sshfl [vmem:[%s18740_s21 + $0x1c] sm:$0x13 pattern:$0x76325410]  ;;  %v9229_v16 = vrot.slane %v9228_v20, 2  ;;  %v9182_v25 = vcombine.high %v16842_v38, %v16842_v38 }
 0x1f0   : > { %v9220_v0 = vsel %vm18833_vm9, %v9215_v2, %v9219_v19  ;;  %v9255_v32 = vrot.slane %v9253_v26, 7  ;;  %v16844_v37 = vld.sshfl [vmem:[%s18740_s21 + $0x20] sm:$0x13 pattern:$0x76325410]  ;;  %v9190_v17 = vcombine.high %v16843_v51, %v16843_v51  ;;  %v9264_v8 = vshrl.u32 %v16842_v38, 16 }
 0x1f1   : > { %v9243_v46 = vrot.slane %v9242_v28, 2  ;;  %v9261_v6 = vrot.slane %v9259_v47, 7  ;;  %v16845_v1 = vld.sshfl [vmem:[%s18740_s21 + $0x24] sm:$0x13 pattern:$0x76325410]  ;;  %v9198_v11 = vcombine.high %v16844_v37, %v16844_v37  ;;  %v9234_v57 = vsel %vm18833_vm9, %v9229_v16, %v9233_v50  ;;  %v20208_v28 = vpop.f32.mrf.mxu0  ;;  %v20210_v47 = vpop.f32.mrf.mxu1  ;;  %17985 = vmatmul.mubr.msk.bf16.vlgmr.msra.gmra.mxu0 %vm349_vm2, %v20123_v43 }
 0x1f2   : > { %17979 = vmatmul.mubr.msk.bf16.vlgmr.msra.gmra.mxu1 %vm349_vm2, %v20163_v36  ;;  %v9256_v10 = vor.u32 %v9255_v32, %v9252_v48  ;;  %v9206_v61 = vcombine.high %v16845_v1, %v16845_v1  ;;  %v9319_v2 = vcombine.low %v9220_v0, %v9234_v57  ;;  %v9267_v20 = vshll.u32 %v16842_v38, 16  ;;  %22530 = vst [vmem:[#allocation12_spill] sm:$0xff] %v20208_v28 }
 0x1f3   : > { %17989 = vmatpush3.bf16.msra.mxu1 %v9072_v63  ;;  %v9248_v19 = vsel %vm18833_vm9, %v9243_v46, %v9247_v49  ;;  %v9273_v26 = vshll.u32 %v9182_v25, 16  ;;  %22531 = vst [vmem:[#allocation13_spill] sm:$0xff] %v20210_v47  ;;  %v9266_v29 = vrot.slane %v9264_v8, 6  ;;  %v9278_v50 = vshrl.u32 %v16843_v51, 16  ;;  %17996 = vmatprep.mubr.msk.bf16.mxu0 %vm349_vm2, %v20143_v55  ;;  %v20219_v8 = vpop.f32.mrf.mxu0 }
 0x1f4   : > { %v9257_v35 = vrot.slane %v9256_v10, 2  ;;  %v9281_v48 = vshll.u32 %v16843_v51, 16  ;;  %v9327_v16 = vrot.slane %v9319_v2, %v18742_v12  ;;  %v9269_v63 = vrot.slane %v9267_v20, 7  ;;  %v20221_v51 = vpop.f32.mrf.mxu1 }
 0x1f5   : > { %v9275_v32 = vrot.slane %v9273_v26, 7  ;;  %v9287_v34 = vshll.u32 %v9190_v17, 16  ;;  %v9280_v38 = vrot.slane %v9278_v50, 6  ;;  %v9292_v25 = vshrl.u32 %v16844_v37, 16 }
 0x1f6   : > { %v9262_v49 = vsel %vm18833_vm9, %v9257_v35, %v9261_v6  ;;  %v9283_v0 = vrot.slane %v9281_v48, 7  ;;  %v9270_v57 = vor.u32 %v9269_v63, %v9266_v29  ;;  %v9295_v10 = vshll.u32 %v16844_v37, 16 }
 0x1f7   : > { %v9320_v46 = vcombine.low %v9248_v19, %v9262_v49  ;;  %v9289_v43 = vrot.slane %v9287_v34, 7  ;;  %v9294_v20 = vrot.slane %v9292_v25, 6  ;;  %v9301_v17 = vshll.u32 %v9198_v11, 16  ;;  %v16848_v11 = vld [vmem:[%s22463_s1 + $0x3e] sm:$0x3]  ;;  %v20229_v49 = vpop.f32.mrf.mxu0 }
 0x1f8   : > { %v9284_v2 = vor.u32 %v9283_v0, %v9280_v38  ;;  %v9306_v26 = vshrl.u32 %v16845_v1, 16  ;;  %v9271_v47 = vrot.slane %v9270_v57, 2  ;;  %v9297_v28 = vrot.slane %v9295_v10, 7  ;;  %v20231_v38 = vpop.f32.mrf.mxu1  ;;  %v22534_v10 = vld [vmem:[#allocation23_spill] sm:$0xff] }
 0x1f9   : > { %v9334_v55 = vrot.slane %v9320_v46, %v18742_v12  ;;  %v9309_v35 = vshll.u32 %v16845_v1, 16  ;;  %v9303_v50 = vrot.slane %v9301_v17, 7  ;;  %v9315_v29 = vshll.u32 %v9206_v61, 16  ;;  %22532 = vst [vmem:[#allocation14_spill] sm:$0xff] %v20231_v38 }
 0x1fa   : > { %v9285_v6 = vrot.slane %v9284_v2, 2  ;;  %v9308_v19 = vrot.slane %v9306_v26, 6  ;;  %v9276_v37 = vsel %vm18833_vm9, %v9271_v47, %v9275_v32  ;;  %v9298_v48 = vor.u32 %v9297_v28, %v9294_v20  ;;  %v16859_v47 = vld.sshfl [vmem:[%s18740_s21 + $0x34] sm:$0x13 pattern:$0x76325410] }
 0x1fb   : > { %v9335_v34 = vcombine.low %v9327_v16, %v9334_v55  ;;  %v9311_v63 = vrot.slane %v9309_v35, 7  ;;  %v9317_v61 = vrot.slane %v9315_v29, 7  ;;  %v22533_v16 = vld [vmem:[#allocation22_spill] sm:$0xff]  ;;  %v20241_v28 = vadd.f32 %v19917_v41, %v20150_v33  ;;  %v22535_v33 = vld [vmem:[#allocation24_spill] sm:$0xff]  ;;  %v20268_v35 = vpop.f32.mrf.mxu0 }
 0x1fc   : > { %v9290_v1 = vsel %vm18833_vm9, %v9285_v6, %v9289_v43  ;;  %v20237_v0 = vadd.f32 %v22533_v16, %v20146_v18  ;;  %v9299_v32 = vrot.slane %v9298_v48, 2  ;;  %v20247_v57 = vadd.f32 %v19923_v14, %v20153_v9  ;;  %v16860_v43 = vld.sshfl [vmem:[%s18740_s21 + $0x38] sm:$0x13 pattern:$0x76325410]  ;;  %22536 = vst [vmem:[#allocation15_spill] sm:$0xff] %v20268_v35  ;;  %v20270_v6 = vpop.f32.mrf.mxu1 }
 0x1fd   : > { %17990 = vmatprep.mubr.msk.bf16.mxu1 %vm349_vm2, %v9335_v34  ;;  %v9312_v25 = vor.u32 %v9311_v63, %v9308_v19  ;;  %v9336_v46 = vcombine.low %v9276_v37, %v9290_v1  ;;  %v20252_v18 = vadd.f32 %v22534_v10, %v20156_v23  ;;  %v9415_v2 = vand.u32 %v16848_v11, %v18732_v5  ;;  %v16861_v17 = vld.sshfl [vmem:[%s18740_s21 + $0x3c] sm:$0x13 pattern:$0x76325410] }
 0x1fe   : > { %v20257_v41 = vadd.f32 %v19933_v31, %v20167_v44  ;;  %v20261_v20 = vadd.f32 %v22535_v33, %v20170_v58  ;;  %v9304_v14 = vsel %vm18833_vm9, %v9299_v32, %v9303_v50  ;;  %v16862_v55 = vld.sshfl [vmem:[%s18740_s21 + $0x40] sm:$0x13 pattern:$0x76325410]  ;;  %v9493_v23 = vcombine.high %v16859_v47, %v16859_v47  ;;  %22537 = vst [vmem:[#allocation16_spill] sm:$0xff] %v20270_v6  ;;  %v20274_v33 = vpop.f32.mrf.mxu0  ;;  %v20276_v6 = vpop.f32.mrf.mxu1 }
 0x1ff   : > { %v9313_v9 = vrot.slane %v9312_v25, 2  ;;  %v9344_v26 = vrot.slane %v9336_v46, %v18742_v12  ;;  %17994 = vmatprep.subr.bf16.mxu0 %v9415_v2  ;;  %18000 = vmatprep.subr.bf16.mxu1 %v9415_v2  ;;  %v9501_v31 = vcombine.high %v16860_v43, %v16860_v43  ;;  %v9509_v44 = vcombine.high %v16861_v17, %v16861_v17 }
 0x200   : > { %v9517_v19 = vcombine.high %v16862_v55, %v16862_v55  ;;  %v9551_v58 = vshrl.u32 %v16859_v47, 16  ;;  %17995 = vmatpush3.bf16.msra.mxu0 %v9415_v2  ;;  %v9554_v50 = vshll.u32 %v16859_v47, 16  ;;  %v9560_v37 = vshll.u32 %v9493_v23, 16  ;;  %22538 = vst [vmem:[#allocation17_spill] sm:$0xff] %v20274_v33  ;;  %22539 = vst [vmem:[#allocation18_spill] sm:$0xff] %v20276_v6  ;;  %v20285_v6 = vpop.f32.mrf.mxu0 }
 0x201   : > { %v9318_v29 = vsel %vm18833_vm9, %v9313_v9, %v9317_v61  ;;  %v9565_v48 = vshrl.u32 %v16860_v43, 16  ;;  %v9568_v1 = vshll.u32 %v16860_v43, 16  ;;  %v9574_v16 = vshll.u32 %v9501_v31, 16  ;;  %22540 = vst [vmem:[#allocation19_spill] sm:$0xff] %v20285_v6 }
 0x202   : > { %v9337_v63 = vcombine.low %v9304_v14, %v9318_v29  ;;  %v9553_v11 = vrot.slane %v9551_v58, 6  ;;  %v9556_v32 = vrot.slane %v9554_v50, 7  ;;  %v9562_v25 = vrot.slane %v9560_v37, 7 }
 0x203   : > { %v9567_v46 = vrot.slane %v9565_v48, 6  ;;  %v9579_v10 = vshrl.u32 %v16861_v17, 16  ;;  %v9570_v61 = vrot.slane %v9568_v1, 7  ;;  %v9576_v9 = vrot.slane %v9574_v16, 7  ;;  %17997 = vmatmul.mubr.msk.bf16.vlgmr.msra.gmra.mxu0 %vm349_vm2, %v20163_v36  ;;  %v20287_v36 = vpop.f32.mrf.mxu1 }
 0x204   : > { %v9351_v35 = vrot.slane %v9337_v63, %v18742_v12  ;;  %v9582_v47 = vshll.u32 %v16861_v17, 16  ;;  %v9557_v14 = vor.u32 %v9556_v32, %v9553_v11  ;;  %v9588_v23 = vshll.u32 %v9509_v44, 16  ;;  %18008 = vmatprep.mubr.msk.bf16.mxu0 %vm349_vm2, %v9335_v34  ;;  %v16863_v48 = vld.sshfl [vmem:[%s18740_s21 + $0x44] sm:$0x13 pattern:$0x76325410] }
 0x205   : > { %v9581_v43 = vrot.slane %v9579_v10, 6  ;;  %v9593_v31 = vshrl.u32 %v16862_v55, 16  ;;  %v9571_v29 = vor.u32 %v9570_v61, %v9567_v46  ;;  %v9596_v37 = vshll.u32 %v16862_v55, 16  ;;  %22541 = vst [vmem:[#allocation20_spill] sm:$0xff] %v20287_v36  ;;  %v22542_v44 = vld [vmem:[#allocation25_spill] sm:$0xff]  ;;  %v22543_v46 = vld [vmem:[#allocation26_spill] sm:$0xff] }
 0x206   : > { %v20282_v58 = vcombine.low %v9344_v26, %v9351_v35  ;;  %v9584_v50 = vrot.slane %v9582_v47, 7  ;;  %v9558_v63 = vrot.slane %v9557_v14, 2  ;;  %v9590_v1 = vrot.slane %v9588_v23, 7 }
 0x207   : > { %v9595_v17 = vrot.slane %v9593_v31, 6  ;;  %v9602_v16 = vshll.u32 %v9517_v19, 16  ;;  %v9572_v34 = vrot.slane %v9571_v29, 2  ;;  %v9598_v35 = vrot.slane %v9596_v37, 7 }
 0x208   : > { %17991 = vmatmul.mubr.msk.bf16.vlgmr.msra.gmra.mxu1 %vm349_vm2, %v20282_v58  ;;  %v9585_v26 = vor.u32 %v9584_v50, %v9581_v43  ;;  %v20293_v55 = vadd.f32 %v22542_v44, %v20188_v24  ;;  %v16864_v11 = vld.sshfl [vmem:[%s18740_s21 + $0x48] sm:$0x13 pattern:$0x76325410]  ;;  %v9563_v19 = vsel %vm18833_vm9, %v9558_v63, %v9562_v25  ;;  %v20300_v10 = vadd.f32 %v22543_v46, %v20191_v3  ;;  %v20306_v44 = vpop.f32.mrf.mxu0  ;;  %v20308_v25 = vpop.f32.mrf.mxu1 }
 0x209   : > { %18001 = vmatpush3.bf16.msra.mxu1 %v9415_v2  ;;  %v9604_v32 = vrot.slane %v9602_v16, 7  ;;  %v16865_v61 = vld.sshfl [vmem:[%s18740_s21 + $0x4c] sm:$0x13 pattern:$0x76325410]  ;;  %v9525_v47 = vcombine.high %v16863_v48, %v16863_v48  ;;  %v9577_v14 = vsel %vm18833_vm9, %v9572_v34, %v9576_v9  ;;  %v9599_v23 = vor.u32 %v9598_v35, %v9595_v17  ;;  %22544 = vst [vmem:[#allocation21_spill] sm:$0xff] %v20306_v44 }
 0x20a   : > { %v9586_v43 = vrot.slane %v9585_v26, 2  ;;  %v16866_v31 = vld.sshfl [vmem:[%s18740_s21 + $0x50] sm:$0x13 pattern:$0x76325410]  ;;  %v9533_v24 = vcombine.high %v16864_v11, %v16864_v11  ;;  %v9662_v29 = vcombine.low %v9563_v19, %v9577_v14  ;;  %v9541_v50 = vcombine.high %v16865_v61, %v16865_v61  ;;  %22545 = vst [vmem:[#allocation22_spill] sm:$0xff] %v20308_v25  ;;  %v20315_v38 = vpop.f32.mrf.mxu0 }
 0x20b   : > { %v9549_v2 = vcombine.high %v16866_v31, %v16866_v31  ;;  %v9607_v37 = vshrl.u32 %v16863_v48, 16  ;;  %v9600_v63 = vrot.slane %v9599_v23, 2  ;;  %v9610_v16 = vshll.u32 %v16863_v48, 16 }
 0x20c   : > { %v9591_v3 = vsel %vm18833_vm9, %v9586_v43, %v9590_v1  ;;  %v9616_v46 = vshll.u32 %v9525_v47, 16  ;;  %v9670_v9 = vrot.slane %v9662_v29, %v18742_v12  ;;  %v9621_v17 = vshrl.u32 %v16864_v11, 16  ;;  %v20317_v1 = vpop.f32.mrf.mxu1 }
 0x20d   : > { %v9609_v34 = vrot.slane %v9607_v37, 6  ;;  %v9624_v26 = vshll.u32 %v16864_v11, 16  ;;  %v9605_v35 = vsel %vm18833_vm9, %v9600_v63, %v9604_v32  ;;  %v9612_v19 = vrot.slane %v9610_v16, 7  ;;  %22546 = vst [vmem:[#allocation23_spill] sm:$0xff] %v20317_v1  ;;  %v20322_v1 = vpop.f32.mrf.mxu0 }
 0x20e   : > { %v9618_v14 = vrot.slane %v9616_v46, 7  ;;  %v9630_v36 = vshll.u32 %v9533_v24, 16  ;;  %v9663_v44 = vcombine.low %v9591_v3, %v9605_v35  ;;  %v9623_v6 = vrot.slane %v9621_v17, 6 }
 0x20f   : > { %v9626_v25 = vrot.slane %v9624_v26, 7  ;;  %v9635_v33 = vshrl.u32 %v16865_v61, 16  ;;  %v9613_v48 = vor.u32 %v9612_v19, %v9609_v34  ;;  %v9638_v43 = vshll.u32 %v16865_v61, 16 }
 0x210   : > { %v9632_v47 = vrot.slane %v9630_v36, 7  ;;  %v9644_v23 = vshll.u32 %v9541_v50, 16  ;;  %v9677_v11 = vrot.slane %v9663_v44, %v18742_v12  ;;  %v9649_v32 = vshrl.u32 %v16866_v31, 16  ;;  %v20324_v36 = vpop.f32.mrf.mxu1 }
 0x211   : > { %v9627_v29 = vor.u32 %v9626_v25, %v9623_v6  ;;  %v9637_v37 = vrot.slane %v9635_v33, 6  ;;  %v9614_v63 = vrot.slane %v9613_v48, 2  ;;  %v9640_v16 = vrot.slane %v9638_v43, 7  ;;  %v20363_v43 = vpop.f32.mrf.mxu0 }
 0x212   : > { %v9646_v24 = vrot.slane %v9644_v23, 7  ;;  %v9652_v3 = vshll.u32 %v16866_v31, 16  ;;  %v20320_v46 = vcombine.low %v9670_v9, %v9677_v11  ;;  %v9651_v26 = vrot.slane %v9649_v32, 6  ;;  %v16869_v31 = vld [vmem:[%s22463_s1 + $0x40] sm:$0x3]  ;;  %v20365_v23 = vpop.f32.mrf.mxu1 }
 0x213   : > { %v9628_v17 = vrot.slane %v9627_v29, 2  ;;  %v9658_v35 = vshll.u32 %v9549_v2, 16  ;;  %v9619_v6 = vsel %vm18833_vm9, %v9614_v63, %v9618_v14  ;;  %v9641_v33 = vor.u32 %v9640_v16, %v9637_v37  ;;  %v16881_v48 = vld.sshfl [vmem:[%s18740_s21 + $0x64] sm:$0x13 pattern:$0x76325410] }
 0x214   : > { %v9654_v61 = vrot.slane %v9652_v3, 7  ;;  %v20330_v50 = vadd.f32 %v19962_v52, %v20237_v0  ;;  %18002 = vmatprep.mubr.msk.bf16.mxu1 %vm349_vm2, %v20320_v46  ;;  %v20341_v25 = vadd.f32 %v19964_v45, %v20241_v28  ;;  %v20345_v52 = vadd.f32 %v19978_v22, %v20247_v57  ;;  %v16880_v0 = vld.sshfl [vmem:[%s18740_s21 + $0x60] sm:$0x13 pattern:$0x76325410] }
 0x215   : > { %v9633_v2 = vsel %vm18833_vm9, %v9628_v17, %v9632_v47  ;;  %v9660_v44 = vrot.slane %v9658_v35, 7  ;;  %v9642_v9 = vrot.slane %v9641_v33, 2  ;;  %v20350_v14 = vadd.f32 %v19980_v27, %v20252_v18  ;;  %v16882_v28 = vld.sshfl [vmem:[%s18740_s21 + $0x68] sm:$0x13 pattern:$0x76325410]  ;;  %v20375_v33 = vpop.f32.mrf.mxu1 }
 0x216   : > { %v9655_v34 = vor.u32 %v9654_v61, %v9651_v26  ;;  %v9679_v19 = vcombine.low %v9619_v6, %v9633_v2  ;;  %v9758_v47 = vand.u32 %v16869_v31, %v18732_v5  ;;  %v20356_v45 = vadd.f32 %v20013_v56, %v20257_v41  ;;  %v16883_v29 = vld.sshfl [vmem:[%s18740_s21 + $0x6c] sm:$0x13 pattern:$0x76325410]  ;;  %v20373_v6 = vpop.f32.mrf.mxu0 }
 0x217   : > { %v20360_v22 = vadd.f32 %v20015_v15, %v20261_v20  ;;  %v9836_v57 = vcombine.high %v16880_v0, %v16880_v0  ;;  %v9647_v27 = vsel %vm18833_vm9, %v9642_v9, %v9646_v24  ;;  %v9844_v37 = vcombine.high %v16881_v48, %v16881_v48 }
 0x218   : > { %v9656_v18 = vrot.slane %v9655_v34, 2  ;;  %v9687_v11 = vrot.slane %v9679_v19, %v18742_v12  ;;  %18006 = vmatprep.subr.bf16.mxu0 %v9758_v47  ;;  %18012 = vmatprep.subr.bf16.mxu1 %v9758_v47  ;;  %v9852_v56 = vcombine.high %v16882_v28, %v16882_v28  ;;  %v9860_v41 = vcombine.high %v16883_v29, %v16883_v29 }
 0x219   : > { %v9894_v15 = vshrl.u32 %v16880_v0, 16  ;;  %v9897_v20 = vshll.u32 %v16880_v0, 16  ;;  %18007 = vmatpush3.bf16.msra.mxu0 %v9758_v47  ;;  %v9903_v63 = vshll.u32 %v9836_v57, 16  ;;  %v9908_v16 = vshrl.u32 %v16881_v48, 16 }
 0x21a   : > { %v9661_v32 = vsel %vm18833_vm9, %v9656_v18, %v9660_v44  ;;  %v9911_v3 = vshll.u32 %v16881_v48, 16  ;;  %v9917_v35 = vshll.u32 %v9844_v37, 16  ;;  %v9922_v0 = vshrl.u32 %v16882_v28, 16 }
 0x21b   : > { %v9680_v17 = vcombine.low %v9647_v27, %v9661_v32  ;;  %v9896_v24 = vrot.slane %v9894_v15, 6  ;;  %v9899_v26 = vrot.slane %v9897_v20, 7  ;;  %v9905_v61 = vrot.slane %v9903_v63, 7 }
 0x21c   : > { %v9910_v31 = vrot.slane %v9908_v16, 6  ;;  %v9913_v2 = vrot.slane %v9911_v3, 7  ;;  %v9919_v34 = vrot.slane %v9917_v35, 7  ;;  %v9925_v19 = vshll.u32 %v16882_v28, 16  ;;  %18009 = vmatmul.mubr.msk.bf16.vlgmr.msra.gmra.mxu0 %vm349_vm2, %v20282_v58  ;;  %v20385_v16 = vpop.f32.mrf.mxu0  ;;  %v20387_v28 = vpop.f32.mrf.mxu1 }
 0x21d   : > { %v9694_v9 = vrot.slane %v9680_v17, %v18742_v12  ;;  %v9900_v44 = vor.u32 %v9899_v26, %v9896_v24  ;;  %v9924_v57 = vrot.slane %v9922_v0, 6  ;;  %v9931_v27 = vshll.u32 %v9852_v56, 16  ;;  %18020 = vmatprep.mubr.msk.bf16.mxu0 %vm349_vm2, %v20320_v46  ;;  %v16884_v63 = vld.sshfl [vmem:[%s18740_s21 + $0x70] sm:$0x13 pattern:$0x76325410] }
 0x21e   : > { %v9914_v48 = vor.u32 %v9913_v2, %v9910_v31  ;;  %v9936_v18 = vshrl.u32 %v16883_v29, 16  ;;  %v9927_v20 = vrot.slane %v9925_v19, 7  ;;  %v9939_v32 = vshll.u32 %v16883_v29, 16  ;;  %22547 = vst [vmem:[#allocation24_spill] sm:$0xff] %v20385_v16  ;;  %22548 = vst [vmem:[#allocation25_spill] sm:$0xff] %v20387_v28 }
 0x21f   : > { %v20382_v37 = vcombine.low %v9687_v11, %v9694_v9  ;;  %v9901_v15 = vrot.slane %v9900_v44, 2  ;;  %v9933_v3 = vrot.slane %v9931_v27, 7  ;;  %v9945_v56 = vshll.u32 %v9860_v41, 16 }
 0x220   : > { %v9915_v58 = vrot.slane %v9914_v48, 2  ;;  %v9938_v17 = vrot.slane %v9936_v18, 6  ;;  %v9928_v11 = vor.u32 %v9927_v20, %v9924_v57  ;;  %v9941_v24 = vrot.slane %v9939_v32, 7  ;;  %v20406_v57 = vpop.f32.mrf.mxu0 }
 0x221   : > { %18003 = vmatmul.mubr.msk.bf16.vlgmr.msra.gmra.mxu1 %vm349_vm2, %v20382_v37  ;;  %v9906_v46 = vsel %vm18833_vm9, %v9901_v15, %v9905_v61  ;;  %v20395_v29 = vadd.f32 %v20034_v42, %v20293_v55  ;;  %v16885_v26 = vld.sshfl [vmem:[%s18740_s21 + $0x74] sm:$0x13 pattern:$0x76325410]  ;;  %v9947_v31 = vrot.slane %v9945_v56, 7  ;;  %v20402_v41 = vadd.f32 %v20036_v62, %v20300_v10  ;;  %22549 = vst [vmem:[#allocation26_spill] sm:$0xff] %v20406_v57  ;;  %v20408_v42 = vpop.f32.mrf.mxu1 }
 0x222   : > { %18013 = vmatpush3.bf16.msra.mxu1 %v9758_v47  ;;  %v9920_v35 = vsel %vm18833_vm9, %v9915_v58, %v9919_v34  ;;  %v16886_v2 = vld.sshfl [vmem:[%s18740_s21 + $0x78] sm:$0x13 pattern:$0x76325410]  ;;  %v9868_v0 = vcombine.high %v16884_v63, %v16884_v63  ;;  %v9929_v9 = vrot.slane %v9928_v11, 2  ;;  %v9942_v61 = vor.u32 %v9941_v24, %v9938_v17  ;;  %22550 = vst [vmem:[#allocation27_spill] sm:$0xff] %v20408_v42 }
 0x223   : > { %v10005_v44 = vcombine.low %v9906_v46, %v9920_v35  ;;  %v16887_v19 = vld.sshfl [vmem:[%s18740_s21 + $0x7c] sm:$0x13 pattern:$0x76325410]  ;;  %v9876_v48 = vcombine.high %v16885_v26, %v16885_v26  ;;  %v9884_v55 = vcombine.high %v16886_v2, %v16886_v2  ;;  %v9950_v27 = vshrl.u32 %v16884_v63, 16  ;;  %v20415_v35 = vpop.f32.mrf.mxu0 }
 0x224   : > { %v9892_v47 = vcombine.high %v16887_v19, %v16887_v19  ;;  %v9953_v34 = vshll.u32 %v16884_v63, 16  ;;  %v9934_v18 = vsel %vm18833_vm9, %v9929_v9, %v9933_v3  ;;  %v9943_v62 = vrot.slane %v9942_v61, 2  ;;  %22551 = vst [vmem:[#allocation28_spill] sm:$0xff] %v20415_v35  ;;  %v20417_v63 = vpop.f32.mrf.mxu1 }
 0x225   : > { %v10013_v10 = vrot.slane %v10005_v44, %v18742_v12  ;;  %v9959_v15 = vshll.u32 %v9868_v0, 16  ;;  %v9952_v20 = vrot.slane %v9950_v27, 6  ;;  %v9964_v58 = vshrl.u32 %v16885_v26, 16  ;;  %v20420_v35 = vpop.f32.mrf.mxu0 }
 0x226   : > { %v9955_v32 = vrot.slane %v9953_v34, 7  ;;  %v9967_v17 = vshll.u32 %v16885_v26, 16  ;;  %v9948_v56 = vsel %vm18833_vm9, %v9943_v62, %v9947_v31  ;;  %v9973_v11 = vshll.u32 %v9876_v48, 16 }
 0x227   : > { %v9961_v46 = vrot.slane %v9959_v15, 7  ;;  %v9978_v24 = vshrl.u32 %v16886_v2, 16  ;;  %v10006_v42 = vcombine.low %v9934_v18, %v9948_v56  ;;  %v9966_v9 = vrot.slane %v9964_v58, 6  ;;  %v20422_v18 = vpop.f32.mrf.mxu1 }
 0x228   : > { %v9956_v3 = vor.u32 %v9955_v32, %v9952_v20  ;;  %v9969_v61 = vrot.slane %v9967_v17, 7  ;;  %v9975_v44 = vrot.slane %v9973_v11, 7  ;;  %v9981_v27 = vshll.u32 %v16886_v2, 16 }
 0x229   : > { %v9980_v0 = vrot.slane %v9978_v24, 6  ;;  %v9987_v34 = vshll.u32 %v9884_v55, 16  ;;  %v10020_v26 = vrot.slane %v10006_v42, %v18742_v12  ;;  %v9992_v31 = vshrl.u32 %v16887_v19, 16  ;;  %v16890_v42 = vld [vmem:[%s22463_s1 + $0x42] sm:$0x3] }
 0x22a   : > { %v9957_v57 = vrot.slane %v9956_v3, 2  ;;  %v9970_v28 = vor.u32 %v9969_v61, %v9966_v9  ;;  %v9983_v62 = vrot.slane %v9981_v27, 7  ;;  %v9995_v15 = vshll.u32 %v16887_v19, 16  ;;  %v20451_v3 = vpop.f32.mrf.mxu0 }
 0x22b   : > { %v9989_v48 = vrot.slane %v9987_v34, 7  ;;  %v10001_v16 = vshll.u32 %v9892_v47, 16  ;;  %v10021_v20 = vcombine.low %v10013_v10, %v10020_v26  ;;  %v9994_v55 = vrot.slane %v9992_v31, 6 }
 0x22c   : > { %v9962_v32 = vsel %vm18833_vm9, %v9957_v57, %v9961_v46  ;;  %v9971_v2 = vrot.slane %v9970_v28, 2  ;;  %v9984_v58 = vor.u32 %v9983_v62, %v9980_v0  ;;  %v9997_v17 = vrot.slane %v9995_v15, 7  ;;  %v16902_v24 = vld.sshfl [vmem:[%s18740_s21 + $0x90] sm:$0x13 pattern:$0x76325410]  ;;  %v20470_v15 = vpop.f32.mrf.mxu0 }
 0x22d   : > { %v10003_v19 = vrot.slane %v10001_v16, 7  ;;  %v20431_v47 = vadd.f32 %v20052_v21, %v20330_v50  ;;  %18014 = vmatprep.mubr.msk.bf16.mxu1 %vm349_vm2, %v10021_v20  ;;  %v20438_v28 = vadd.f32 %v20054_v53, %v20341_v25  ;;  %v20442_v10 = vadd.f32 %v20086_v60, %v20345_v52  ;;  %v16901_v21 = vld.sshfl [vmem:[%s18740_s21 + $0x8c] sm:$0x13 pattern:$0x76325410]  ;;  %v20453_v53 = vpop.f32.mrf.mxu1 }
 0x22e   : > { %v9976_v57 = vsel %vm18833_vm9, %v9971_v2, %v9975_v44  ;;  %v20446_v16 = vadd.f32 %v20088_v54, %v20350_v14  ;;  %v9985_v50 = vrot.slane %v9984_v58, 2  ;;  %v9998_v56 = vor.u32 %v9997_v17, %v9994_v55  ;;  %v16903_v25 = vld.sshfl [vmem:[%s18740_s21 + $0x94] sm:$0x13 pattern:$0x76325410] }
 0x22f   : > { %v10022_v46 = vcombine.low %v9962_v32, %v9976_v57  ;;  %v10101_v11 = vand.u32 %v16890_v42, %v18732_v5  ;;  %v20457_v60 = vadd.f32 %v20107_v40, %v20356_v45  ;;  %v20461_v54 = vadd.f32 %v20109_v4, %v20360_v22  ;;  %v16904_v0 = vld.sshfl [vmem:[%s18740_s21 + $0x98] sm:$0x13 pattern:$0x76325410] }
 0x230   : > { %v10179_v52 = vcombine.high %v16901_v21, %v16901_v21  ;;  %v10187_v14 = vcombine.high %v16902_v24, %v16902_v24  ;;  %v9990_v9 = vsel %vm18833_vm9, %v9985_v50, %v9989_v48  ;;  %v9999_v61 = vrot.slane %v9998_v56, 2  ;;  %v20472_v48 = vpop.f32.mrf.mxu1 }
 0x231   : > { %v10030_v44 = vrot.slane %v10022_v46, %v18742_v12  ;;  %18018 = vmatprep.subr.bf16.mxu0 %v10101_v11  ;;  %18024 = vmatprep.subr.bf16.mxu1 %v10101_v11  ;;  %v10195_v27 = vcombine.high %v16903_v25, %v16903_v25  ;;  %v10203_v40 = vcombine.high %v16904_v0, %v16904_v0  ;;  %v10237_v45 = vshrl.u32 %v16901_v21, 16 }
 0x232   : > { %18019 = vmatpush3.bf16.msra.mxu0 %v10101_v11  ;;  %v10240_v34 = vshll.u32 %v16901_v21, 16  ;;  %v10246_v26 = vshll.u32 %v10179_v52, 16  ;;  %v10004_v4 = vsel %vm18833_vm9, %v9999_v61, %v10003_v19  ;;  %v10251_v22 = vshrl.u32 %v16902_v24, 16  ;;  %v20478_v61 = vpop.f32.mrf.mxu0 }
 0x233   : > { %v10254_v31 = vshll.u32 %v16902_v24, 16  ;;  %v10260_v62 = vshll.u32 %v10187_v14, 16  ;;  %v10023_v32 = vcombine.low %v9990_v9, %v10004_v4  ;;  %v10239_v2 = vrot.slane %v10237_v45, 6  ;;  %v20480_v45 = vpop.f32.mrf.mxu1 }
 0x234   : > { %v10242_v55 = vrot.slane %v10240_v34, 7  ;;  %v10248_v42 = vrot.slane %v10246_v26, 7  ;;  %v10253_v58 = vrot.slane %v10251_v22, 6  ;;  %v10265_v50 = vshrl.u32 %v16903_v25, 16 }
 0x235   : > { %v10256_v17 = vrot.slane %v10254_v31, 7  ;;  %v10262_v57 = vrot.slane %v10260_v62, 7  ;;  %18021 = vmatmul.mubr.msk.bf16.vlgmr.msra.gmra.mxu0 %vm349_vm2, %v20382_v37  ;;  %v10037_v19 = vrot.slane %v10023_v32, %v18742_v12  ;;  %v10268_v56 = vshll.u32 %v16903_v25, 16 }
 0x236   : > { %v10243_v21 = vor.u32 %v10242_v55, %v10239_v2  ;;  %v10274_v46 = vshll.u32 %v10195_v27, 16  ;;  %18032 = vmatprep.mubr.msk.bf16.mxu0 %vm349_vm2, %v10021_v20  ;;  %v10267_v52 = vrot.slane %v10265_v50, 6  ;;  %v10279_v14 = vshrl.u32 %v16904_v0, 16 }
 0x237   : > { %v10257_v24 = vor.u32 %v10256_v17, %v10253_v58  ;;  %v10282_v9 = vshll.u32 %v16904_v0, 16  ;;  %v20482_v34 = vcombine.low %v10030_v44, %v10037_v19  ;;  %v10270_v26 = vrot.slane %v10268_v56, 7  ;;  %v16905_v22 = vld.sshfl [vmem:[%s18740_s21 + $0x9c] sm:$0x13 pattern:$0x76325410]  ;;  %v20501_v19 = vpop.f32.mrf.mxu0 }
 0x238   : > { %v10244_v37 = vrot.slane %v10243_v21, 2  ;;  %v10276_v4 = vrot.slane %v10274_v46, 7  ;;  %v10281_v27 = vrot.slane %v10279_v14, 6  ;;  %v10288_v20 = vshll.u32 %v10203_v40, 16 }
 0x239   : > { %v10258_v25 = vrot.slane %v10257_v24, 2  ;;  %v10284_v31 = vrot.slane %v10282_v9, 7  ;;  %18015 = vmatmul.mubr.msk.bf16.vlgmr.msra.gmra.mxu1 %vm349_vm2, %v20482_v34  ;;  %v10271_v62 = vor.u32 %v10270_v26, %v10267_v52  ;;  %v20491_v44 = vadd.f32 %v20132_v30, %v20395_v29  ;;  %v16906_v2 = vld.sshfl [vmem:[%s18740_s21 + $0xa0] sm:$0x13 pattern:$0x76325410] }
 0x23a   : > { %v10249_v0 = vsel %vm18833_vm9, %v10244_v37, %v10248_v42  ;;  %v20495_v32 = vadd.f32 %v20134_v59, %v20402_v41  ;;  %18025 = vmatpush3.bf16.msra.mxu1 %v10101_v11  ;;  %v10290_v58 = vrot.slane %v10288_v20, 7  ;;  %v16907_v17 = vld.sshfl [vmem:[%s18740_s21 + $0xa4] sm:$0x13 pattern:$0x76325410]  ;;  %v10211_v50 = vcombine.high %v16905_v22, %v16905_v22  ;;  %v20503_v42 = vpop.f32.mrf.mxu1 }
 0x23b   : > { %v10263_v40 = vsel %vm18833_vm9, %v10258_v25, %v10262_v57  ;;  %v10285_v55 = vor.u32 %v10284_v31, %v10281_v27  ;;  %22552 = vst [vmem:[#allocation29_spill] sm:$0xff] %v20503_v42  ;;  %v10272_v21 = vrot.slane %v10271_v62, 2  ;;  %v16908_v29 = vld.sshfl [vmem:[%s18740_s21 + $0xa8] sm:$0x13 pattern:$0x76325410]  ;;  %v10219_v56 = vcombine.high %v16906_v2, %v16906_v2  ;;  %v20511_v31 = vpop.f32.mrf.mxu0 }
 0x23c   : > { %v10348_v30 = vcombine.low %v10249_v0, %v10263_v40  ;;  %v10227_v46 = vcombine.high %v16907_v17, %v16907_v17  ;;  %v10235_v41 = vcombine.high %v16908_v29, %v16908_v29  ;;  %v10293_v24 = vshrl.u32 %v16905_v22, 16  ;;  %22553 = vst [vmem:[#allocation30_spill] sm:$0xff] %v20511_v31  ;;  %v20513_v20 = vpop.f32.mrf.mxu1 }
 0x23d   : > { %v10286_v59 = vrot.slane %v10285_v55, 2  ;;  %v10296_v11 = vshll.u32 %v16905_v22, 16  ;;  %v10277_v57 = vsel %vm18833_vm9, %v10272_v21, %v10276_v4  ;;  %v10302_v14 = vshll.u32 %v10211_v50, 16  ;;  %22554 = vst [vmem:[#allocation31_spill] sm:$0xff] %v20513_v20  ;;  %v20516_v20 = vpop.f32.mrf.mxu0 }
 0x23e   : > { %v10356_v52 = vrot.slane %v10348_v30, %v18742_v12  ;;  %v10307_v9 = vshrl.u32 %v16906_v2, 16  ;;  %v10295_v26 = vrot.slane %v10293_v24, 6  ;;  %v10310_v27 = vshll.u32 %v16906_v2, 16 }
 0x23f   : > { %v10291_v37 = vsel %vm18833_vm9, %v10286_v59, %v10290_v58  ;;  %v10298_v25 = vrot.slane %v10296_v11, 7  ;;  %v10304_v62 = vrot.slane %v10302_v14, 7  ;;  %v10316_v40 = vshll.u32 %v10219_v56, 16 }
 0x240   : > { %v10349_v0 = vcombine.low %v10277_v57, %v10291_v37  ;;  %v10309_v22 = vrot.slane %v10307_v9, 6  ;;  %v10312_v4 = vrot.slane %v10310_v27, 7  ;;  %v10321_v21 = vshrl.u32 %v16907_v17, 16  ;;  %v20518_v57 = vpop.f32.mrf.mxu1 }
 0x241   : > { %v10299_v55 = vor.u32 %v10298_v25, %v10295_v26  ;;  %v10324_v50 = vshll.u32 %v16907_v17, 16  ;;  %v10318_v58 = vrot.slane %v10316_v40, 7  ;;  %v10330_v59 = vshll.u32 %v10227_v46, 16 }
 0x242   : > { %v10363_v30 = vrot.slane %v10349_v0, %v18742_v12  ;;  %v10335_v24 = vshrl.u32 %v16908_v29, 16  ;;  %v10313_v11 = vor.u32 %v10312_v4, %v10309_v22  ;;  %v10323_v31 = vrot.slane %v10321_v21, 6  ;;  %v16922_v17 = vld.sshfl [vmem:[%s18740_s21 + $0x8] sm:$0x12 pattern:$0x76325410] }
 0x243   : > { %v10300_v2 = vrot.slane %v10299_v55, 2  ;;  %v10326_v42 = vrot.slane %v10324_v50, 7  ;;  %v10332_v14 = vrot.slane %v10330_v59, 7  ;;  %v10338_v37 = vshll.u32 %v16908_v29, 16  ;;  %v16911_v22 = vld [vmem:[%s22463_s1 + $0x44] sm:$0x3] }
 0x244   : > { %v10364_v56 = vcombine.low %v10356_v52, %v10363_v30  ;;  %v10337_v9 = vrot.slane %v10335_v24, 6  ;;  %v16923_v26 = vld.sshfl [vmem:[%s18740_s21 + $0xc] sm:$0x12 pattern:$0x76325410]  ;;  %v10314_v25 = vrot.slane %v10313_v11, 2  ;;  %v20530_v40 = vadd.f32 %v20159_v7, %v20431_v47  ;;  %v20548_v47 = vpop.f32.mrf.mxu0 }
 0x245   : > { %v10305_v46 = vsel %vm18833_vm9, %v10300_v2, %v10304_v62  ;;  %v10327_v27 = vor.u32 %v10326_v42, %v10323_v31  ;;  %v10344_v0 = vshll.u32 %v10235_v41, 16  ;;  %v10340_v52 = vrot.slane %v10338_v37, 7  ;;  %v22555_v62 = vld [vmem:[#allocation8_spill] sm:$0xff]  ;;  %v22556_v21 = vld [vmem:[#allocation9_spill] sm:$0xff]  ;;  %v22560_v24 = vld [vmem:[#allocation11_spill] sm:$0xff] }
 0x246   : > { %18026 = vmatprep.mubr.msk.bf16.mxu1 %vm349_vm2, %v10364_v56  ;;  %v20534_v29 = vadd.f32 %v20161_v39, %v20438_v28  ;;  %v20538_v55 = vadd.f32 %v22555_v62, %v20442_v10  ;;  %v16924_v42 = vld.sshfl [vmem:[%s18740_s21 + $0x10] sm:$0x12 pattern:$0x76325410]  ;;  %v10319_v41 = vsel %vm18833_vm9, %v10314_v25, %v10318_v58  ;;  %v20545_v50 = vadd.f32 %v22556_v21, %v20446_v16  ;;  %v20550_v39 = vpop.f32.mrf.mxu1  ;;  %v22559_v58 = vld [vmem:[#allocation10_spill] sm:$0xff]  ;;  %v20572_v62 = vpop.f32.mrf.mxu0 }
 0x247   : > { %v10328_v31 = vrot.slane %v10327_v27, 2  ;;  %v10346_v4 = vrot.slane %v10344_v0, 7  ;;  %v16925_v7 = vld.sshfl [vmem:[%s18740_s21 + $0x14] sm:$0x12 pattern:$0x76325410]  ;;  %v10341_v28 = vor.u32 %v10340_v52, %v10337_v9  ;;  %v10365_v10 = vcombine.low %v10305_v46, %v10319_v41 }
 0x248   : > { %22557 = vst [vmem:[#allocation8_spill] sm:$0xff] %v20548_v47  ;;  %22558 = vst [vmem:[#allocation9_spill] sm:$0xff] %v20550_v39  ;;  %v20553_v30 = vand.u32 %v16911_v22, %v18732_v5  ;;  %v20557_v59 = vadd.f32 %v22559_v58, %v20457_v60  ;;  %v20563_v2 = vadd.f32 %v22560_v24, %v20461_v54  ;;  %v16926_v25 = vld.sshfl [vmem:[%s18740_s21 + $0x18] sm:$0x12 pattern:$0x76325410]  ;;  %v20574_v41 = vpop.f32.mrf.mxu1 }
 0x249   : > { %v10333_v16 = vsel %vm18833_vm9, %v10328_v31, %v10332_v14  ;;  %v10522_v11 = vcombine.high %v16922_v17, %v16922_v17  ;;  %v10530_v56 = vcombine.high %v16923_v26, %v16923_v26  ;;  %v10342_v37 = vrot.slane %v10341_v28, 2  ;;  %v16927_v27 = vld.sshfl [vmem:[%s18740_s21 + $0x1c] sm:$0x12 pattern:$0x76325410]  ;;  %22561 = vst [vmem:[#allocation10_spill] sm:$0xff] %v20572_v62 }
 0x24a   : > { %v10373_v9 = vrot.slane %v10365_v10, %v18742_v12  ;;  %18030 = vmatprep.subr.bf16.mxu0 %v20553_v30  ;;  %18036 = vmatprep.subr.bf16.mxu1 %v20553_v30  ;;  %v10538_v46 = vcombine.high %v16924_v42, %v16924_v42  ;;  %v10546_v60 = vcombine.high %v16925_v7, %v16925_v7  ;;  %v16930_v14 = vrot.slane %v16922_v17, 9  ;;  %v16928_v52 = vld.sshfl [vmem:[%s18740_s21 + $0x20] sm:$0x12 pattern:$0x76325410] }
 0x24b   : > { %18031 = vmatpush3.bf16.msra.mxu0 %v20553_v30  ;;  %v10581_v54 = vrot.slane %v10522_v11, 7  ;;  %v16931_v0 = vrot.slane %v16923_v26, 9  ;;  %v10585_v22 = vrot.slane %v10530_v56, 7  ;;  %22562 = vst [vmem:[#allocation11_spill] sm:$0xff] %v20574_v41  ;;  %v10347_v31 = vsel %vm18833_vm9, %v10342_v37, %v10346_v4  ;;  %v22564_v41 = vld [vmem:[#allocation12_spill] sm:$0xff] }
 0x24c   : > { %v16932_v21 = vrot.slane %v16924_v42, 9  ;;  %v10589_v28 = vrot.slane %v10538_v46, 7  ;;  %v16933_v10 = vrot.slane %v16925_v7, 9  ;;  %v10366_v58 = vcombine.low %v10333_v16, %v10347_v31  ;;  %v22565_v42 = vld [vmem:[#allocation13_spill] sm:$0xff] }
 0x24d   : > { %v10582_v39 = vsel %vm18990_vm15, %v16930_v14, %v10581_v54  ;;  %v10586_v17 = vsel %vm18990_vm15, %v16931_v0, %v10585_v22  ;;  %v10593_v26 = vrot.slane %v10546_v60, 7  ;;  %v16929_v11 = vld.sshfl [vmem:[%s18740_s21 + $0x24] sm:$0x12 pattern:$0x76325410]  ;;  %v3213_v47 = vadd.f32 %v22564_v41, %v20491_v44  ;;  %v20594_v60 = vpop.f32.mrf.mxu0 }
 0x24e   : > { %v10590_v56 = vsel %vm18990_vm15, %v16932_v21, %v10589_v28  ;;  %v10611_v62 = vcombine.low %v10582_v39, %v10586_v17  ;;  %v3498_v4 = vadd.f32 %v22565_v42, %v20495_v32  ;;  %18033 = vmatmul.mubr.msk.bf16.vlgmr.msra.gmra.mxu0 %vm349_vm2, %v20482_v34  ;;  %v10380_v7 = vrot.slane %v10366_v58, %v18742_v12  ;;  %v20596_v39 = vpop.f32.mrf.mxu1  ;;  %v16940_v31 = vld [vmem:[%s22463_s1 + $0x46] sm:$0x3]  ;;  %v18535_v17 = vld.sshfl [vmem:[%s18740_s21 + $0xb8] sm:$0xf pattern:$0x76325410] }
 0x24f   : > { %v10594_v16 = vsel %vm18990_vm15, %v16933_v10, %v10593_v26  ;;  %v10554_v37 = vcombine.high %v16926_v25, %v16926_v25  ;;  %v10562_v46 = vcombine.high %v16927_v27, %v16927_v27  ;;  %v10570_v54 = vcombine.high %v16928_v52, %v16928_v52  ;;  %v18536_v26 = vld.sshfl [vmem:[%s18740_s21 + $0xc0] sm:$0xf pattern:$0x76325410]  ;;  %v20611_v42 = vpop.f32.mrf.mxu0 }
 0x250   : > { %v10612_v14 = vcombine.low %v10590_v56, %v10594_v16  ;;  %v10619_v44 = vrot.slane %v10611_v62, %v18742_v12  ;;  %v10578_v32 = vcombine.high %v16929_v11, %v16929_v11  ;;  %v10381_v0 = vcombine.low %v10373_v9, %v10380_v7  ;;  %v18537_v56 = vld.sshfl [vmem:[%s18740_s21 + $0x110] sm:$0xf pattern:$0x76325410] }
 0x251   : > { %v16934_v34 = vrot.slane %v16926_v25, 9  ;;  %v10597_v22 = vrot.slane %v10554_v37, 7  ;;  %v16935_v41 = vrot.slane %v16927_v27, 9  ;;  %v10601_v28 = vrot.slane %v10562_v46, 7 }
 0x252   : > { %v10626_v21 = vrot.slane %v10612_v14, %v18742_v12  ;;  %v16936_v10 = vrot.slane %v16928_v52, 9  ;;  %v10605_v58 = vrot.slane %v10570_v54, 7  ;;  %18027 = vmatmul.mubr.msk.bf16.vlgmr.msra.gmra.mxu1 %vm349_vm2, %v10381_v0  ;;  %v16937_v25 = vrot.slane %v16929_v11, 9  ;;  %v20613_v52 = vpop.f32.mrf.mxu1 }
 0x253   : > { %v10598_v9 = vsel %vm18990_vm15, %v16934_v34, %v10597_v22  ;;  %v10609_v62 = vrot.slane %v10578_v32, 7  ;;  %v3211_v27 = vadd.f32 %v20219_v8, %v20530_v40  ;;  %18037 = vmatpush3.bf16.msra.mxu1 %v20553_v30  ;;  %v10602_v16 = vsel %vm18990_vm15, %v16935_v41, %v10601_v28  ;;  %v18538_v40 = vld.sshfl [vmem:[%s18740_s21 + $0x118] sm:$0xf pattern:$0x76325410]  ;;  %v20643_v28 = vpop.f32.mrf.mxu0 }
 0x254   : > { %v10627_v7 = vcombine.low %v10619_v44, %v10626_v21  ;;  %v10606_v11 = vsel %vm18990_vm15, %v16936_v10, %v10605_v58  ;;  %v3496_v8 = vadd.f32 %v20221_v51, %v20534_v29  ;;  %v18539_v37 = vld.sshfl [vmem:[%s18740_s21 + $0xc8] sm:$0xf pattern:$0x76325410]  ;;  %v10628_v14 = vcombine.low %v10598_v9, %v10602_v16  ;;  %v22567_v29 = vld [vmem:[#allocation15_spill] sm:$0xff]  ;;  %v22568_v41 = vld [vmem:[#allocation16_spill] sm:$0xff]  ;;  %v20645_v10 = vpop.f32.mrf.mxu1 }
 0x255   : > { %v10610_v46 = vsel %vm18990_vm15, %v16937_v25, %v10609_v62  ;;  %v3214_v30 = vadd.f32 %v20229_v49, %v20538_v55  ;;  %v22566_v44 = vld [vmem:[#allocation14_spill] sm:$0xff]  ;;  %v18540_v32 = vld.sshfl [vmem:[%s18740_s21 + $0xd0] sm:$0xf pattern:$0x76325410]  ;;  %v10764_v51 = vand.u32 %v16940_v31, %v18732_v5  ;;  %v3212_v22 = vadd.f32 %v22567_v29, %v20557_v59  ;;  %22569 = vst [vmem:[#allocation12_spill] sm:$0xff] %v20643_v28  ;;  %v20667_v28 = vpop.f32.mrf.mxu0 }
 0x256   : > { %v3499_v54 = vadd.f32 %v22566_v44, %v20545_v50  ;;  %v20632_v0 = vld.sshfl [vmem:[%s18740_s21 + $0xb8] sm:$0x13 pattern:$0x76325410]  ;;  %18038 = vmatprep.mubr.msk.bf16.mxu1 %vm349_vm2, %v10627_v7  ;;  %v10629_v34 = vcombine.low %v10606_v11, %v10610_v46  ;;  %v3497_v21 = vadd.f32 %v22568_v41, %v20563_v2  ;;  %v10636_v50 = vrot.slane %v10628_v14, %v18742_v12  ;;  %v22571_v59 = vld [vmem:[#allocation17_spill] sm:$0xff]  ;;  %v22572_v25 = vld [vmem:[#allocation18_spill] sm:$0xff] }
 0x257   : > { %v18541_v49 = vld.sshfl [vmem:[%s18740_s21 + $0x120] sm:$0xf pattern:$0x76325410]  ;;  %22570 = vst [vmem:[#allocation13_spill] sm:$0xff] %v20645_v10  ;;  %18042 = vmatprep.subr.bf16.mxu0 %v10764_v51  ;;  %18048 = vmatprep.subr.bf16.mxu1 %v10764_v51  ;;  %v3556_v58 = vadd.f32 %v22571_v59, %v3213_v47  ;;  %v11293_v9 = vshrl.u32 %v20632_v0, 16  ;;  %v10739_v2 = vcombine.low %v18535_v17, %v18536_v26 }
 0x258   : > { %v18542_v55 = vld.sshfl [vmem:[%s18740_s21 + $0x128] sm:$0xf pattern:$0x76325410]  ;;  %v10643_v31 = vrot.slane %v10629_v34, %v18742_v12  ;;  %18043 = vmatpush3.bf16.msra.mxu0 %v10764_v51  ;;  %v3841_v62 = vadd.f32 %v22572_v25, %v3498_v4  ;;  %v20656_v14 = vcombine.low %v18537_v56, %v18538_v40  ;;  %v10756_v34 = vcombine.low %v18539_v37, %v18540_v32  ;;  %v22573_v17 = vld [vmem:[#allocation19_spill] sm:$0xff]  ;;  %v22574_v29 = vld [vmem:[#allocation20_spill] sm:$0xff]  ;;  %v20669_v56 = vpop.f32.mrf.mxu1 }
 0x259   : > { %v16961_v7 = vld [vmem:[%s22463_s1 + $0x48] sm:$0x3]  ;;  %v18544_v11 = vld.sshfl [vmem:[%s18740_s21 + $0xec] sm:$0xf pattern:$0x76325410]  ;;  %18044 = vmatprep.mubr.msk.bf16.mxu0 %vm349_vm2, %v10739_v2  ;;  %v3554_v26 = vadd.f32 %v22573_v17, %v3211_v27  ;;  %v3839_v4 = vadd.f32 %v22574_v29, %v3496_v8  ;;  %v20672_v40 = vcombine.low %v18541_v49, %v18542_v55  ;;  %v3555_v27 = vadd.f32 %v20315_v38, %v3212_v22  ;;  %v20691_v55 = vpop.f32.mrf.mxu0 }
 0x25a   : > { %v18543_v16 = vld.sshfl [vmem:[%s18740_s21 + $0xe4] sm:$0xf pattern:$0x76325410]  ;;  %v10644_v46 = vcombine.low %v10636_v50, %v10643_v31  ;;  %v10989_v37 = vand.u32 %v16961_v7, %v18732_v5  ;;  %v11295_v17 = vrot.slane %v11293_v9, 6  ;;  %v20684_v49 = vadd.f32 %v20322_v1, %v3556_v58  ;;  %v20693_v9 = vpop.f32.mrf.mxu1 }
 0x25b   : > { %v18545_v44 = vld.sshfl [vmem:[%s18740_s21 + $0x13c] sm:$0xf pattern:$0x76325410]  ;;  %v22576_v50 = vld [vmem:[#allocation22_spill] sm:$0xff]  ;;  %18045 = vmatmul.mubr.msk.bf16.vlgmr.msra.gmra.mxu0 %vm349_vm2, %v10756_v34  ;;  %v10964_v38 = vcombine.low %v18543_v16, %v18544_v11  ;;  %v20699_v58 = vadd.f32 %v20363_v43, %v3554_v26  ;;  %v20702_v7 = vadd.f32 %v20365_v23, %v3839_v4 }
 0x25c   : > { %v18546_v47 = vld.sshfl [vmem:[%s18740_s21 + $0x144] sm:$0xf pattern:$0x76325410]  ;;  %18039 = vmatmul.mubr.msk.bf16.vlgmr.msra.gmra.mxu1 %vm349_vm2, %v10644_v46  ;;  %v3842_v31 = vadd.f32 %v22576_v50, %v3499_v54  ;;  %18054 = vmatprep.subr.bf16.mxu0 %v10989_v37  ;;  %v11296_v54 = vshll.u32 %v20632_v0, 16 }
 0x25d   : > { %v22575_v41 = vld [vmem:[#allocation21_spill] sm:$0xff]  ;;  %v18547_v25 = vld.sshfl [vmem:[%s18740_s21 + $0xf4] sm:$0xf pattern:$0x76325410]  ;;  %18049 = vmatpush3.bf16.msra.mxu1 %v10764_v51  ;;  %18050 = vmatprep.mubr.msk.bf16.mxu1 %vm349_vm2, %v20656_v14  ;;  %v4184_v51 = vadd.f32 %v20324_v36, %v3841_v62  ;;  %v20695_v1 = vcombine.low %v18545_v44, %v18546_v47 }
 0x25e   : > { %v3557_v59 = vadd.f32 %v22575_v41, %v3214_v30  ;;  %v18548_v24 = vld.sshfl [vmem:[%s18740_s21 + $0xfc] sm:$0xf pattern:$0x76325410]  ;;  %v22577_v30 = vld [vmem:[#allocation23_spill] sm:$0xff]  ;;  %18060 = vmatprep.subr.bf16.mxu1 %v10989_v37  ;;  %18055 = vmatpush3.bf16.msra.mxu0 %v10989_v37  ;;  %v20708_v62 = vadd.f32 %v20375_v33, %v3842_v31  ;;  %v20723_v33 = vpop.f32.mrf.mxu0  ;;  %v11298_v41 = vrot.slane %v11296_v54, 7 }
 0x25f   : > { %v18549_v10 = vld.sshfl [vmem:[%s18740_s21 + $0x14c] sm:$0xf pattern:$0x76325410]  ;;  %v3840_v2 = vadd.f32 %v22577_v30, %v3497_v21  ;;  %v16982_v22 = vld [vmem:[%s22463_s1 + $0x4a] sm:$0x3]  ;;  %18056 = vmatprep.mubr.msk.bf16.mxu0 %vm349_vm2, %v10964_v38  ;;  %v10981_v16 = vcombine.low %v18547_v25, %v18548_v24  ;;  %v20725_v24 = vpop.f32.mrf.mxu1 }
 0x260   : > { %v18550_v8 = vld.sshfl [vmem:[%s18740_s21 + $0x154] sm:$0xf pattern:$0x76325410]  ;;  %v20705_v36 = vadd.f32 %v20373_v6, %v3557_v59  ;;  %v11157_v46 = vand.u32 %v16982_v22, %v18732_v5  ;;  %v22579_v43 = vld [vmem:[#allocation25_spill] sm:$0xff]  ;;  %v11235_v6 = vcombine.high %v20632_v0, %v20632_v0  ;;  %22580 = vst [vmem:[#allocation14_spill] sm:$0xff] %v20723_v33 }
 0x261   : > { %v16994_v32 = vld.sshfl [vmem:[%s18740_s21 + $0xbc] sm:$0x13 pattern:$0x76325410]  ;;  %v20710_v11 = vcombine.low %v18549_v10, %v18550_v8  ;;  %v20718_v26 = vadd.f32 %v22579_v43, %v3840_v2  ;;  %22581 = vst [vmem:[#allocation15_spill] sm:$0xff] %v20725_v24  ;;  %v11299_v8 = vor.u32 %v11298_v41, %v11295_v17 }
 0x262   : > { %v11307_v21 = vshrl.u32 %v16994_v32, 16  ;;  %v22578_v44 = vld [vmem:[#allocation24_spill] sm:$0xff]  ;;  %v16995_v34 = vld.sshfl [vmem:[%s18740_s21 + $0xc0] sm:$0x13 pattern:$0x76325410]  ;;  %v11243_v29 = vcombine.high %v16994_v32, %v16994_v32  ;;  %18066 = vmatprep.subr.bf16.mxu0 %v11157_v46 }
 0x263   : > { %v20714_v47 = vadd.f32 %v22578_v44, %v3555_v27  ;;  %v16996_v23 = vld.sshfl [vmem:[%s18740_s21 + $0xc4] sm:$0x13 pattern:$0x76325410]  ;;  %v11251_v4 = vcombine.high %v16995_v34, %v16995_v34  ;;  %v11310_v25 = vshll.u32 %v16994_v32, 16  ;;  %v11302_v50 = vshll.u32 %v11235_v6, 16  ;;  %18057 = vmatmul.mubr.msk.bf16.vlgmr.msra.gmra.mxu0 %vm349_vm2, %v10981_v16  ;;  %v20735_v44 = vpop.f32.mrf.mxu0  ;;  %v20737_v16 = vpop.f32.mrf.mxu1 }
 0x264   : > { %18051 = vmatmul.mubr.msk.bf16.vlgmr.msra.gmra.mxu1 %vm349_vm2, %v20672_v40  ;;  %v11259_v10 = vcombine.high %v16996_v23, %v16996_v23  ;;  %v11309_v59 = vrot.slane %v11307_v21, 6  ;;  %v11316_v0 = vshll.u32 %v11243_v29, 16  ;;  %v11321_v31 = vshrl.u32 %v16995_v34, 16  ;;  %18067 = vmatpush3.bf16.msra.mxu0 %v11157_v46  ;;  %22582 = vst [vmem:[#allocation16_spill] sm:$0xff] %v20735_v44  ;;  %22583 = vst [vmem:[#allocation17_spill] sm:$0xff] %v20737_v16  ;;  %v22585_v44 = vld [vmem:[#allocation27_spill] sm:$0xff] }
 0x265   : > { %18061 = vmatpush3.bf16.msra.mxu1 %v10989_v37  ;;  %18062 = vmatprep.mubr.msk.bf16.mxu1 %vm349_vm2, %v20695_v1  ;;  %v11324_v27 = vshll.u32 %v16995_v34, 16  ;;  %v11312_v30 = vrot.slane %v11310_v25, 7  ;;  %v11330_v2 = vshll.u32 %v11251_v4, 16  ;;  %v11335_v38 = vshrl.u32 %v16996_v23, 16 }
 0x266   : > { %18072 = vmatprep.subr.bf16.mxu1 %v11157_v46  ;;  %18068 = vmatprep.mubr.msk.bf16.mxu0 %vm349_vm2, %v20656_v14  ;;  %v11304_v37 = vrot.slane %v11302_v50, 7  ;;  %v11318_v32 = vrot.slane %v11316_v0, 7  ;;  %v11323_v54 = vrot.slane %v11321_v31, 6  ;;  %v11300_v17 = vrot.slane %v11299_v8, 2  ;;  %v22584_v14 = vld [vmem:[#allocation26_spill] sm:$0xff] }
 0x267   : > { %v11326_v22 = vrot.slane %v11324_v27, 7  ;;  %v16997_v21 = vld.sshfl [vmem:[%s18740_s21 + $0xc8] sm:$0x13 pattern:$0x76325410]  ;;  %v11313_v34 = vor.u32 %v11312_v30, %v11309_v59  ;;  %v11332_v43 = vrot.slane %v11330_v2, 7  ;;  %v20742_v50 = vadd.f32 %v22584_v14, %v20684_v49 }
 0x268   : > { %v11337_v6 = vrot.slane %v11335_v38, 6  ;;  %v16998_v29 = vld.sshfl [vmem:[%s18740_s21 + $0xcc] sm:$0x13 pattern:$0x76325410]  ;;  %v11338_v41 = vshll.u32 %v16996_v23, 16  ;;  %v11305_v31 = vsel %vm18833_vm9, %v11300_v17, %v11304_v37  ;;  %v20748_v24 = vadd.f32 %v22585_v44, %v4184_v51  ;;  %v20751_v23 = vpop.f32.mrf.mxu0 }
 0x269   : > { %v11327_v4 = vor.u32 %v11326_v22, %v11323_v54  ;;  %v11344_v25 = vshll.u32 %v11259_v10, 16  ;;  %v16999_v0 = vld.sshfl [vmem:[%s18740_s21 + $0xd0] sm:$0x13 pattern:$0x76325410]  ;;  %v11314_v27 = vrot.slane %v11313_v34, 2  ;;  %v11267_v59 = vcombine.high %v16997_v21, %v16997_v21  ;;  %v20753_v10 = vpop.f32.mrf.mxu1 }
 0x26a   : > { %v17000_v8 = vld.sshfl [vmem:[%s18740_s21 + $0xd4] sm:$0x13 pattern:$0x76325410]  ;;  %v11340_v2 = vrot.slane %v11338_v41, 7  ;;  %v11275_v54 = vcombine.high %v16998_v29, %v16998_v29  ;;  %22586 = vst [vmem:[#allocation18_spill] sm:$0xff] %v20751_v23  ;;  %v11283_v37 = vcombine.high %v16999_v0, %v16999_v0 }
 0x26b   : > { %v11328_v30 = vrot.slane %v11327_v4, 2  ;;  %v11346_v38 = vrot.slane %v11344_v25, 7  ;;  %22587 = vst [vmem:[#allocation19_spill] sm:$0xff] %v20753_v10  ;;  %v11319_v49 = vsel %vm18833_vm9, %v11314_v27, %v11318_v32  ;;  %v11291_v22 = vcombine.high %v17000_v8, %v17000_v8  ;;  %18069 = vmatmul.mubr.msk.bf16.vlgmr.msra.gmra.mxu0 %vm349_vm2, %v20672_v40 }
 0x26c   : > { %18063 = vmatmul.mubr.msk.bf16.vlgmr.msra.gmra.mxu1 %vm349_vm2, %v20710_v11  ;;  %v11349_v51 = vshrl.u32 %v16997_v21, 16  ;;  %v11341_v17 = vor.u32 %v11340_v2, %v11337_v6  ;;  %v11404_v34 = vcombine.low %v11305_v31, %v11319_v49  ;;  %v11352_v4 = vshll.u32 %v16997_v21, 16  ;;  %18080 = vmatprep.mubr.msk.bf16.mxu0 %vm349_vm2, %v20695_v1 }
 0x26d   : > { %18073 = vmatpush3.bf16.msra.mxu1 %v11157_v46  ;;  %v11333_v44 = vsel %vm18833_vm9, %v11328_v30, %v11332_v43  ;;  %v11358_v25 = vshll.u32 %v11267_v59, 16  ;;  %v11363_v14 = vshrl.u32 %v16998_v29, 16  ;;  %v11366_v10 = vshll.u32 %v16998_v29, 16  ;;  %v20766_v46 = vpop.f32.mrf.mxu0  ;;  %v20768_v43 = vpop.f32.mrf.mxu1 }
 0x26e   : > { %v11351_v41 = vrot.slane %v11349_v51, 6  ;;  %v11342_v23 = vrot.slane %v11341_v17, 2  ;;  %v11412_v32 = vrot.slane %v11404_v34, %v18742_v12  ;;  %v11354_v27 = vrot.slane %v11352_v4, 7  ;;  %22588 = vst [vmem:[#allocation20_spill] sm:$0xff] %v20766_v46 }
 0x26f   : > { %v11372_v16 = vshll.u32 %v11275_v54, 16  ;;  %v11360_v21 = vrot.slane %v11358_v25, 7  ;;  %v11365_v6 = vrot.slane %v11363_v14, 6  ;;  %v11368_v31 = vrot.slane %v11366_v10, 7  ;;  %v20772_v33 = vpop.f32.mrf.mxu0  ;;  %v20774_v25 = vpop.f32.mrf.mxu1 }
 0x270   : > { %v11377_v40 = vshrl.u32 %v16999_v0, 16  ;;  %v11347_v59 = vsel %vm18833_vm9, %v11342_v23, %v11346_v38  ;;  %v11355_v29 = vor.u32 %v11354_v27, %v11351_v41  ;;  %v11380_v2 = vshll.u32 %v16999_v0, 16 }
 0x271   : > { %v11374_v30 = vrot.slane %v11372_v16, 7  ;;  %v11405_v49 = vcombine.low %v11333_v44, %v11347_v59  ;;  %v11369_v51 = vor.u32 %v11368_v31, %v11365_v6  ;;  %v11386_v17 = vshll.u32 %v11283_v37, 16  ;;  %v22589_v31 = vld [vmem:[#allocation28_spill] sm:$0xff] }
 0x272   : > { %v11379_v54 = vrot.slane %v11377_v40, 6  ;;  %v11356_v34 = vrot.slane %v11355_v29, 2  ;;  %v11382_v1 = vrot.slane %v11380_v2, 7  ;;  %v11391_v4 = vshrl.u32 %v17000_v8, 16  ;;  %v20795_v2 = vpop.f32.mrf.mxu1 }
 0x273   : > { %v11394_v46 = vshll.u32 %v17000_v8, 16  ;;  %v11419_v10 = vrot.slane %v11405_v49, %v18742_v12  ;;  %v11370_v14 = vrot.slane %v11369_v51, 2  ;;  %v11388_v38 = vrot.slane %v11386_v17, 7  ;;  %v17003_v8 = vld [vmem:[%s22463_s1 + $0x4c] sm:$0x3] }
 0x274   : > { %v11400_v23 = vshll.u32 %v11291_v22, 16  ;;  %v11361_v16 = vsel %vm18833_vm9, %v11356_v34, %v11360_v21  ;;  %v11383_v0 = vor.u32 %v11382_v1, %v11379_v54  ;;  %v11393_v44 = vrot.slane %v11391_v4, 6  ;;  %v17014_v29 = vld.sshfl [vmem:[%s18740_s21 + $0xe4] sm:$0x13 pattern:$0x76325410] }
 0x275   : > { %v11396_v37 = vrot.slane %v11394_v46, 7  ;;  %v11420_v41 = vcombine.low %v11412_v32, %v11419_v10  ;;  %v11375_v27 = vsel %vm18833_vm9, %v11370_v14, %v11374_v30  ;;  %v20786_v40 = vadd.f32 %v22589_v31, %v20699_v58  ;;  %v20793_v32 = vpop.f32.mrf.mxu0 }
 0x276   : > { %v11402_v6 = vrot.slane %v11400_v23, 7  ;;  %v11384_v22 = vrot.slane %v11383_v0, 2  ;;  %v11421_v21 = vcombine.low %v11361_v16, %v11375_v27  ;;  %v20790_v46 = vadd.f32 %v20417_v63, %v20702_v7  ;;  %v17015_v7 = vld.sshfl [vmem:[%s18740_s21 + $0xe8] sm:$0x13 pattern:$0x76325410]  ;;  %v20825_v23 = vpop.f32.mrf.mxu1 }
 0x277   : > { %v11397_v59 = vor.u32 %v11396_v37, %v11393_v44  ;;  %18074 = vmatprep.mubr.msk.bf16.mxu1 %vm349_vm2, %v11420_v41  ;;  %v20800_v58 = vadd.f32 %v20420_v35, %v20705_v36  ;;  %v20804_v30 = vadd.f32 %v20422_v18, %v20708_v62  ;;  %v11500_v49 = vand.u32 %v17003_v8, %v18732_v5  ;;  %v17016_v36 = vld.sshfl [vmem:[%s18740_s21 + $0xec] sm:$0x13 pattern:$0x76325410] }
 0x278   : > { %v20809_v63 = vadd.f32 %v20451_v3, %v20714_v47  ;;  %v11389_v51 = vsel %vm18833_vm9, %v11384_v22, %v11388_v38  ;;  %v11429_v17 = vrot.slane %v11421_v21, %v18742_v12  ;;  %v20817_v35 = vadd.f32 %v20453_v53, %v20718_v26  ;;  %v17017_v18 = vld.sshfl [vmem:[%s18740_s21 + $0xf0] sm:$0x13 pattern:$0x76325410]  ;;  %v20823_v38 = vpop.f32.mrf.mxu0 }
 0x279   : > { %v11398_v54 = vrot.slane %v11397_v59, 2  ;;  %18078 = vmatprep.subr.bf16.mxu0 %v11500_v49  ;;  %18084 = vmatprep.subr.bf16.mxu1 %v11500_v49  ;;  %v11578_v62 = vcombine.high %v17014_v29, %v17014_v29  ;;  %v11586_v34 = vcombine.high %v17015_v7, %v17015_v7  ;;  %v11594_v1 = vcombine.high %v17016_v36, %v17016_v36 }
 0x27a   : > { %v11636_v3 = vshrl.u32 %v17014_v29, 16  ;;  %18079 = vmatpush3.bf16.msra.mxu0 %v11500_v49  ;;  %v11602_v4 = vcombine.high %v17017_v18, %v17017_v18  ;;  %v11639_v10 = vshll.u32 %v17014_v29, 16  ;;  %v11650_v14 = vshrl.u32 %v17015_v7, 16 }
 0x27b   : > { %v11403_v47 = vsel %vm18833_vm9, %v11398_v54, %v11402_v6  ;;  %v11645_v16 = vshll.u32 %v11578_v62, 16  ;;  %v11653_v0 = vshll.u32 %v17015_v7, 16  ;;  %v11659_v8 = vshll.u32 %v11586_v34, 16  ;;  %v20831_v7 = vpop.f32.mrf.mxu0  ;;  %v20833_v62 = vpop.f32.mrf.mxu1 }
 0x27c   : > { %v11422_v53 = vcombine.low %v11389_v51, %v11403_v47  ;;  %v11638_v26 = vrot.slane %v11636_v3, 6  ;;  %v11641_v44 = vrot.slane %v11639_v10, 7  ;;  %v11652_v37 = vrot.slane %v11650_v14, 6  ;;  %22590 = vst [vmem:[#allocation21_spill] sm:$0xff] %v20831_v7  ;;  %22591 = vst [vmem:[#allocation22_spill] sm:$0xff] %v20833_v62 }
 0x27d   : > { %v11664_v27 = vshrl.u32 %v17016_v36, 16  ;;  %v11647_v22 = vrot.slane %v11645_v16, 7  ;;  %v11655_v6 = vrot.slane %v11653_v0, 7  ;;  %v11667_v59 = vshll.u32 %v17016_v36, 16  ;;  %18081 = vmatmul.mubr.msk.bf16.vlgmr.msra.gmra.mxu0 %vm349_vm2, %v20710_v11 }
 0x27e   : > { %v11436_v31 = vrot.slane %v11422_v53, %v18742_v12  ;;  %v11642_v21 = vor.u32 %v11641_v44, %v11638_v26  ;;  %v11661_v29 = vrot.slane %v11659_v8, 7  ;;  %v11673_v51 = vshll.u32 %v11594_v1, 16  ;;  %18092 = vmatprep.mubr.msk.bf16.mxu0 %vm349_vm2, %v11420_v41  ;;  %v17018_v26 = vld.sshfl [vmem:[%s18740_s21 + $0xf4] sm:$0x13 pattern:$0x76325410] }
 0x27f   : > { %v11666_v54 = vrot.slane %v11664_v27, 6  ;;  %v11656_v3 = vor.u32 %v11655_v6, %v11652_v37  ;;  %v11669_v47 = vrot.slane %v11667_v59, 7  ;;  %v11678_v36 = vshrl.u32 %v17017_v18, 16  ;;  %v20852_v27 = vpop.f32.mrf.mxu0 }
 0x280   : > { %v20835_v34 = vcombine.low %v11429_v17, %v11436_v31  ;;  %v11643_v10 = vrot.slane %v11642_v21, 2  ;;  %v11675_v11 = vrot.slane %v11673_v51, 7  ;;  %v11681_v14 = vshll.u32 %v17017_v18, 16  ;;  %22592 = vst [vmem:[#allocation23_spill] sm:$0xff] %v20852_v27  ;;  %v20854_v31 = vpop.f32.mrf.mxu1 }
 0x281   : > { %v11687_v53 = vshll.u32 %v11602_v4, 16  ;;  %v11657_v41 = vrot.slane %v11656_v3, 2  ;;  %v11670_v1 = vor.u32 %v11669_v47, %v11666_v54  ;;  %v11680_v16 = vrot.slane %v11678_v36, 6  ;;  %22593 = vst [vmem:[#allocation24_spill] sm:$0xff] %v20854_v31 }
 0x282   : > { %18075 = vmatmul.mubr.msk.bf16.vlgmr.msra.gmra.mxu1 %vm349_vm2, %v20835_v34  ;;  %v20842_v17 = vadd.f32 %v20470_v15, %v20742_v50  ;;  %v17019_v0 = vld.sshfl [vmem:[%s18740_s21 + $0xf8] sm:$0x13 pattern:$0x76325410]  ;;  %v11648_v44 = vsel %vm18833_vm9, %v11643_v10, %v11647_v22  ;;  %v11683_v37 = vrot.slane %v11681_v14, 7  ;;  %v20849_v4 = vadd.f32 %v20472_v48, %v20748_v24 }
 0x283   : > { %18085 = vmatpush3.bf16.msra.mxu1 %v11500_v49  ;;  %v11689_v18 = vrot.slane %v11687_v53, 7  ;;  %v17020_v8 = vld.sshfl [vmem:[%s18740_s21 + $0xfc] sm:$0x13 pattern:$0x76325410]  ;;  %v11662_v15 = vsel %vm18833_vm9, %v11657_v41, %v11661_v29  ;;  %v11671_v50 = vrot.slane %v11670_v1, 2  ;;  %v11610_v49 = vcombine.high %v17018_v26, %v17018_v26  ;;  %v20862_v29 = vpop.f32.mrf.mxu0  ;;  %v20864_v41 = vpop.f32.mrf.mxu1 }
 0x284   : > { %v17021_v6 = vld.sshfl [vmem:[%s18740_s21 + $0x100] sm:$0x13 pattern:$0x76325410]  ;;  %v11618_v59 = vcombine.high %v17019_v0, %v17019_v0  ;;  %v11684_v21 = vor.u32 %v11683_v37, %v11680_v16  ;;  %v11747_v22 = vcombine.low %v11648_v44, %v11662_v15  ;;  %v11626_v54 = vcombine.high %v17020_v8, %v17020_v8  ;;  %22594 = vst [vmem:[#allocation25_spill] sm:$0xff] %v20862_v29 }
 0x285   : > { %v11634_v51 = vcombine.high %v17021_v6, %v17021_v6  ;;  %v11676_v48 = vsel %vm18833_vm9, %v11671_v50, %v11675_v11  ;;  %v11692_v24 = vshrl.u32 %v17018_v26, 16  ;;  %v11695_v3 = vshll.u32 %v17018_v26, 16  ;;  %v20868_v7 = vpop.f32.mrf.mxu0 }
 0x286   : > { %v11701_v47 = vshll.u32 %v11610_v49, 16  ;;  %v11685_v36 = vrot.slane %v11684_v21, 2  ;;  %v11755_v10 = vrot.slane %v11747_v22, %v18742_v12  ;;  %v11706_v14 = vshrl.u32 %v17019_v0, 16 }
 0x287   : > { %v11709_v53 = vshll.u32 %v17019_v0, 16  ;;  %v11694_v1 = vrot.slane %v11692_v24, 6  ;;  %v11697_v16 = vrot.slane %v11695_v3, 7  ;;  %v11715_v37 = vshll.u32 %v11618_v59, 16  ;;  %v20870_v24 = vpop.f32.mrf.mxu1 }
 0x288   : > { %v11703_v44 = vrot.slane %v11701_v47, 7  ;;  %v11690_v15 = vsel %vm18833_vm9, %v11685_v36, %v11689_v18  ;;  %v11708_v11 = vrot.slane %v11706_v14, 6  ;;  %v11720_v26 = vshrl.u32 %v17020_v8, 16 }
 0x289   : > { %v11711_v50 = vrot.slane %v11709_v53, 7  ;;  %v11748_v49 = vcombine.low %v11676_v48, %v11690_v15  ;;  %v11698_v21 = vor.u32 %v11697_v16, %v11694_v1  ;;  %v11717_v31 = vrot.slane %v11715_v37, 7  ;;  %v17024_v37 = vld [vmem:[%s22463_s1 + $0x4e] sm:$0x3] }
 0x28a   : > { %v11723_v22 = vshll.u32 %v17020_v8, 16  ;;  %v11722_v0 = vrot.slane %v11720_v26, 6  ;;  %v11729_v62 = vshll.u32 %v11626_v54, 16  ;;  %v11734_v29 = vshrl.u32 %v17021_v6, 16  ;;  %v22597_v26 = vld [vmem:[#allocation30_spill] sm:$0xff] }
 0x28b   : > { %v11712_v27 = vor.u32 %v11711_v50, %v11708_v11  ;;  %v11762_v59 = vrot.slane %v11748_v49, %v18742_v12  ;;  %v11699_v3 = vrot.slane %v11698_v21, 2  ;;  %v11737_v47 = vshll.u32 %v17021_v6, 16  ;;  %v17035_v6 = vld.sshfl [vmem:[%s18740_s21 + $0x110] sm:$0x13 pattern:$0x76325410] }
 0x28c   : > { %v11725_v18 = vrot.slane %v11723_v22, 7  ;;  %v11731_v14 = vrot.slane %v11729_v62, 7  ;;  %v11736_v48 = vrot.slane %v11734_v29, 6  ;;  %v11743_v53 = vshll.u32 %v11634_v51, 16  ;;  %v20889_v51 = vpop.f32.mrf.mxu0  ;;  %v22598_v21 = vld [vmem:[#allocation31_spill] sm:$0xff] }
 0x28d   : > { %v11713_v36 = vrot.slane %v11712_v27, 2  ;;  %v11763_v1 = vcombine.low %v11755_v10, %v11762_v59  ;;  %v11704_v8 = vsel %vm18833_vm9, %v11699_v3, %v11703_v44  ;;  %v11739_v16 = vrot.slane %v11737_v47, 7  ;;  %v20891_v10 = vpop.f32.mrf.mxu1  ;;  %v17038_v3 = vld.sshfl [vmem:[%s18740_s21 + $0x11c] sm:$0x13 pattern:$0x76325410] }
 0x28e   : > { %v11726_v54 = vor.u32 %v11725_v18, %v11722_v0  ;;  %v11745_v11 = vrot.slane %v11743_v53, 7  ;;  %v20882_v62 = vadd.f32 %v20478_v61, %v20786_v40  ;;  %v20886_v27 = vadd.f32 %v20480_v45, %v20790_v46  ;;  %22595 = vst [vmem:[#allocation26_spill] sm:$0xff] %v20891_v10  ;;  %v17036_v61 = vld.sshfl [vmem:[%s18740_s21 + $0x114] sm:$0x13 pattern:$0x76325410] }
 0x28f   : > { %v11718_v15 = vsel %vm18833_vm9, %v11713_v36, %v11717_v31  ;;  %18086 = vmatprep.mubr.msk.bf16.mxu1 %vm349_vm2, %v11763_v1  ;;  %v11740_v31 = vor.u32 %v11739_v16, %v11736_v48  ;;  %v20896_v50 = vadd.f32 %v20501_v19, %v20800_v58  ;;  %v22596_v40 = vld [vmem:[#allocation29_spill] sm:$0xff]  ;;  %v11843_v46 = vand.u32 %v17024_v37, %v18732_v5  ;;  %v17037_v0 = vld.sshfl [vmem:[%s18740_s21 + $0x118] sm:$0x13 pattern:$0x76325410]  ;;  %v20917_v48 = vpop.f32.mrf.mxu0  ;;  %v20919_v53 = vpop.f32.mrf.mxu1 }
 0x290   : > { %v11727_v29 = vrot.slane %v11726_v54, 2  ;;  %v11764_v44 = vcombine.low %v11704_v8, %v11718_v15  ;;  %v20901_v45 = vadd.f32 %v22596_v40, %v20804_v30  ;;  %v20906_v49 = vadd.f32 %v22597_v26, %v20809_v63  ;;  %22599 = vst [vmem:[#allocation27_spill] sm:$0xff] %v20917_v48  ;;  %22600 = vst [vmem:[#allocation28_spill] sm:$0xff] %v20919_v53 }
 0x291   : > { %v20910_v22 = vadd.f32 %v22598_v21, %v20817_v35  ;;  %v11741_v58 = vrot.slane %v11740_v31, 2  ;;  %v11921_v30 = vcombine.high %v17035_v6, %v17035_v6  ;;  %18090 = vmatprep.subr.bf16.mxu0 %v11843_v46  ;;  %18096 = vmatprep.subr.bf16.mxu1 %v11843_v46  ;;  %v11929_v18 = vcombine.high %v17036_v61, %v17036_v61 }
 0x292   : > { %v11732_v19 = vsel %vm18833_vm9, %v11727_v29, %v11731_v14  ;;  %v11772_v59 = vrot.slane %v11764_v44, %v18742_v12  ;;  %v11937_v47 = vcombine.high %v17037_v0, %v17037_v0  ;;  %v11945_v36 = vcombine.high %v17038_v3, %v17038_v3  ;;  %18091 = vmatpush3.bf16.msra.mxu0 %v11843_v46 }
 0x293   : > { %v11979_v63 = vshrl.u32 %v17035_v6, 16  ;;  %v11746_v35 = vsel %vm18833_vm9, %v11741_v58, %v11745_v11  ;;  %v11982_v14 = vshll.u32 %v17035_v6, 16  ;;  %v11988_v8 = vshll.u32 %v11921_v30, 16  ;;  %v20926_v11 = vpop.f32.mrf.mxu0  ;;  %v20928_v6 = vpop.f32.mrf.mxu1 }
 0x294   : > { %v11993_v54 = vshrl.u32 %v17036_v61, 16  ;;  %v11765_v16 = vcombine.low %v11732_v19, %v11746_v35  ;;  %v11996_v15 = vshll.u32 %v17036_v61, 16  ;;  %v12002_v29 = vshll.u32 %v11929_v18, 16 }
 0x295   : > { %v11981_v37 = vrot.slane %v11979_v63, 6  ;;  %v11984_v31 = vrot.slane %v11982_v14, 7  ;;  %v11990_v44 = vrot.slane %v11988_v8, 7  ;;  %v12007_v26 = vshrl.u32 %v17037_v0, 16  ;;  %18093 = vmatmul.mubr.msk.bf16.vlgmr.msra.gmra.mxu0 %vm349_vm2, %v20835_v34 }
 0x296   : > { %v11995_v40 = vrot.slane %v11993_v54, 6  ;;  %v11779_v21 = vrot.slane %v11765_v16, %v18742_v12  ;;  %v11998_v48 = vrot.slane %v11996_v15, 7  ;;  %v12004_v53 = vrot.slane %v12002_v29, 7  ;;  %18104 = vmatprep.mubr.msk.bf16.mxu0 %vm349_vm2, %v11763_v1 }
 0x297   : > { %v12010_v10 = vshll.u32 %v17037_v0, 16  ;;  %v11985_v19 = vor.u32 %v11984_v31, %v11981_v37  ;;  %v12009_v61 = vrot.slane %v12007_v26, 6  ;;  %v12016_v58 = vshll.u32 %v11937_v47, 16 }
 0x298   : > { %v12021_v30 = vshrl.u32 %v17038_v3, 16  ;;  %v20931_v18 = vcombine.low %v11772_v59, %v11779_v21  ;;  %v11999_v63 = vor.u32 %v11998_v48, %v11995_v40  ;;  %v12024_v14 = vshll.u32 %v17038_v3, 16  ;;  %v17039_v0 = vld.sshfl [vmem:[%s18740_s21 + $0x120] sm:$0x13 pattern:$0x76325410]  ;;  %v20943_v3 = vpop.f32.mrf.mxu1 }
 0x299   : > { %v12012_v35 = vrot.slane %v12010_v10, 7  ;;  %v11986_v8 = vrot.slane %v11985_v19, 2  ;;  %v12018_v34 = vrot.slane %v12016_v58, 7  ;;  %v12030_v16 = vshll.u32 %v11945_v36, 16  ;;  %v20941_v10 = vpop.f32.mrf.mxu0  ;;  %22602 = vst [vmem:[#allocation30_spill] sm:$0xff] %v20943_v3 }
 0x29a   : > { %v12023_v54 = vrot.slane %v12021_v30, 6  ;;  %18087 = vmatmul.mubr.msk.bf16.vlgmr.msra.gmra.mxu1 %vm349_vm2, %v20931_v18  ;;  %v12000_v37 = vrot.slane %v11999_v63, 2  ;;  %v12026_v15 = vrot.slane %v12024_v14, 7  ;;  %v20938_v1 = vadd.f32 %v20516_v20, %v20842_v17  ;;  %22601 = vst [vmem:[#allocation29_spill] sm:$0xff] %v20941_v10  ;;  %v20959_v14 = vpop.f32.mrf.mxu1 }
 0x29b   : > { %v12013_v47 = vor.u32 %v12012_v35, %v12009_v61  ;;  %v17040_v59 = vld.sshfl [vmem:[%s18740_s21 + $0x124] sm:$0x13 pattern:$0x76325410]  ;;  %18097 = vmatpush3.bf16.msra.mxu1 %v11843_v46  ;;  %v11991_v36 = vsel %vm18833_vm9, %v11986_v8, %v11990_v44  ;;  %v12032_v48 = vrot.slane %v12030_v16, 7  ;;  %v20949_v29 = vadd.f32 %v20518_v57, %v20849_v4  ;;  %v20957_v4 = vpop.f32.mrf.mxu0  ;;  %22604 = vst [vmem:[#allocation32_spill] sm:$0xff] %v20959_v14 }
 0x29c   : > { %v17041_v31 = vld.sshfl [vmem:[%s18740_s21 + $0x128] sm:$0x13 pattern:$0x76325410]  ;;  %v11953_v40 = vcombine.high %v17039_v0, %v17039_v0  ;;  %v12005_v20 = vsel %vm18833_vm9, %v12000_v37, %v12004_v53  ;;  %v12027_v26 = vor.u32 %v12026_v15, %v12023_v54  ;;  %v11961_v19 = vcombine.high %v17040_v59, %v17040_v59  ;;  %22603 = vst [vmem:[#allocation31_spill] sm:$0xff] %v20957_v4 }
 0x29d   : > { %v12014_v17 = vrot.slane %v12013_v47, 2  ;;  %v17042_v21 = vld.sshfl [vmem:[%s18740_s21 + $0x12c] sm:$0x13 pattern:$0x76325410]  ;;  %v12090_v61 = vcombine.low %v11991_v36, %v12005_v20  ;;  %v11969_v58 = vcombine.high %v17041_v31, %v17041_v31  ;;  %v12035_v30 = vshrl.u32 %v17039_v0, 16  ;;  %v20964_v14 = vpop.f32.mrf.mxu0 }
 0x29e   : > { %v11977_v46 = vcombine.high %v17042_v21, %v17042_v21  ;;  %v12028_v63 = vrot.slane %v12027_v26, 2  ;;  %v12038_v35 = vshll.u32 %v17039_v0, 16  ;;  %v12044_v57 = vshll.u32 %v11953_v40, 16 }
 0x29f   : > { %v12019_v44 = vsel %vm18833_vm9, %v12014_v17, %v12018_v34  ;;  %v12098_v53 = vrot.slane %v12090_v61, %v18742_v12  ;;  %v12037_v8 = vrot.slane %v12035_v30, 6  ;;  %v12049_v54 = vshrl.u32 %v17040_v59, 16  ;;  %v20966_v61 = vpop.f32.mrf.mxu1 }
 0x2a0   : > { %v12052_v16 = vshll.u32 %v17040_v59, 16  ;;  %v12033_v37 = vsel %vm18833_vm9, %v12028_v63, %v12032_v48  ;;  %v12040_v47 = vrot.slane %v12038_v35, 7  ;;  %v12046_v15 = vrot.slane %v12044_v57, 7 }
 0x2a1   : > { %v12058_v36 = vshll.u32 %v11961_v19, 16  ;;  %v12091_v20 = vcombine.low %v12019_v44, %v12033_v37  ;;  %v12051_v34 = vrot.slane %v12049_v54, 6  ;;  %v12063_v0 = vshrl.u32 %v17041_v31, 16 }
 0x2a2   : > { %v12054_v17 = vrot.slane %v12052_v16, 7  ;;  %v12041_v40 = vor.u32 %v12040_v47, %v12037_v8  ;;  %v12066_v4 = vshll.u32 %v17041_v31, 16  ;;  %v12072_v3 = vshll.u32 %v11969_v58, 16  ;;  %v22605_v47 = vld [vmem:[#allocation8_spill] sm:$0xff] }
 0x2a3   : > { %v12060_v26 = vrot.slane %v12058_v36, 7  ;;  %v12105_v59 = vrot.slane %v12091_v20, %v18742_v12  ;;  %v12065_v10 = vrot.slane %v12063_v0, 6  ;;  %v12077_v48 = vshrl.u32 %v17042_v21, 16 }
 0x2a4   : > { %v12055_v30 = vor.u32 %v12054_v17, %v12051_v34  ;;  %v12042_v63 = vrot.slane %v12041_v40, 2  ;;  %v12068_v35 = vrot.slane %v12066_v4, 7  ;;  %v12074_v19 = vrot.slane %v12072_v3, 7  ;;  %v17045_v3 = vld [vmem:[%s22463_s1 + $0x50] sm:$0x3]  ;;  %v20982_v4 = vpop.f32.mrf.mxu1 }
 0x2a5   : > { %v12080_v44 = vshll.u32 %v17042_v21, 16  ;;  %v20969_v57 = vcombine.low %v12098_v53, %v12105_v59  ;;  %v12079_v54 = vrot.slane %v12077_v48, 6  ;;  %v12086_v31 = vshll.u32 %v11977_v46, 16  ;;  %v20980_v21 = vpop.f32.mrf.mxu0  ;;  %22606 = vst [vmem:[#allocation8_spill] sm:$0xff] %v20982_v4  ;;  %v22607_v53 = vld [vmem:[#allocation9_spill] sm:$0xff]  ;;  %v22609_v59 = vld [vmem:[#allocation11_spill] sm:$0xff] }
 0x2a6   : > { %v12056_v8 = vrot.slane %v12055_v30, 2  ;;  %v12047_v58 = vsel %vm18833_vm9, %v12042_v63, %v12046_v15  ;;  %v12069_v16 = vor.u32 %v12068_v35, %v12065_v10  ;;  %v20975_v36 = vadd.f32 %v22605_v47, %v20882_v62  ;;  %v22608_v15 = vld [vmem:[#allocation10_spill] sm:$0xff]  ;;  %v17056_v34 = vld.sshfl [vmem:[%s18740_s21 + $0x13c] sm:$0x13 pattern:$0x76325410] }
 0x2a7   : > { %v12082_v37 = vrot.slane %v12080_v44, 7  ;;  %18098 = vmatprep.mubr.msk.bf16.mxu1 %vm349_vm2, %v20969_v57  ;;  %v12088_v46 = vrot.slane %v12086_v31, 7  ;;  %v20990_v62 = vadd.f32 %v22607_v53, %v20886_v27  ;;  %v20994_v20 = vadd.f32 %v22608_v15, %v20896_v50  ;;  %v17057_v48 = vld.sshfl [vmem:[%s18740_s21 + $0x140] sm:$0x13 pattern:$0x76325410] }
 0x2a8   : > { %v12061_v10 = vsel %vm18833_vm9, %v12056_v8, %v12060_v26  ;;  %v12070_v17 = vrot.slane %v12069_v16, 2  ;;  %v20999_v30 = vadd.f32 %v22609_v59, %v20901_v45  ;;  %v12186_v26 = vand.u32 %v17045_v3, %v18732_v5  ;;  %v17058_v50 = vld.sshfl [vmem:[%s18740_s21 + $0x144] sm:$0x13 pattern:$0x76325410]  ;;  %v21018_v16 = vpop.f32.mrf.mxu1 }
 0x2a9   : > { %v12083_v0 = vor.u32 %v12082_v37, %v12079_v54  ;;  %v12107_v40 = vcombine.low %v12047_v58, %v12061_v10  ;;  %v21005_v27 = vadd.f32 %v20594_v60, %v20906_v49  ;;  %v21009_v63 = vadd.f32 %v20596_v39, %v20910_v22  ;;  %v17059_v54 = vld.sshfl [vmem:[%s18740_s21 + $0x148] sm:$0x13 pattern:$0x76325410]  ;;  %v21016_v58 = vpop.f32.mrf.mxu0  ;;  %22611 = vst [vmem:[#allocation10_spill] sm:$0xff] %v21018_v16 }
 0x2aa   : > { %v12264_v35 = vcombine.high %v17056_v34, %v17056_v34  ;;  %v12075_v44 = vsel %vm18833_vm9, %v12070_v17, %v12074_v19  ;;  %v12272_v31 = vcombine.high %v17057_v48, %v17057_v48  ;;  %22610 = vst [vmem:[#allocation9_spill] sm:$0xff] %v21016_v58  ;;  %18102 = vmatprep.subr.bf16.mxu0 %v12186_v26  ;;  %v12322_v39 = vshrl.u32 %v17056_v34, 16  ;;  %v21024_v4 = vpop.f32.mrf.mxu1 }
 0x2ab   : > { %v12084_v8 = vrot.slane %v12083_v0, 2  ;;  %v12115_v45 = vrot.slane %v12107_v40, %v18742_v12  ;;  %18108 = vmatprep.subr.bf16.mxu1 %v12186_v26  ;;  %v12280_v60 = vcombine.high %v17058_v50, %v17058_v50  ;;  %v12288_v49 = vcombine.high %v17059_v54, %v17059_v54  ;;  %18103 = vmatpush3.bf16.msra.mxu0 %v12186_v26  ;;  %v21022_v58 = vpop.f32.mrf.mxu0 }
 0x2ac   : > { %v12325_v22 = vshll.u32 %v17056_v34, 16  ;;  %v12331_v19 = vshll.u32 %v12264_v35, 16  ;;  %v12336_v47 = vshrl.u32 %v17057_v48, 16  ;;  %v12339_v3 = vshll.u32 %v17057_v48, 16 }
 0x2ad   : > { %v12089_v37 = vsel %vm18833_vm9, %v12084_v8, %v12088_v46  ;;  %v12324_v53 = vrot.slane %v12322_v39, 6  ;;  %v12345_v17 = vshll.u32 %v12272_v31, 16  ;;  %v12350_v16 = vshrl.u32 %v17058_v50, 16 }
 0x2ae   : > { %v12108_v10 = vcombine.low %v12075_v44, %v12089_v37  ;;  %v12327_v15 = vrot.slane %v12325_v22, 7  ;;  %v12333_v0 = vrot.slane %v12331_v19, 7  ;;  %v12338_v40 = vrot.slane %v12336_v47, 6  ;;  %18105 = vmatmul.mubr.msk.bf16.vlgmr.msra.gmra.mxu0 %vm349_vm2, %v20931_v18  ;;  %v21034_v18 = vpop.f32.mrf.mxu0 }
 0x2af   : > { %v12341_v59 = vrot.slane %v12339_v3, 7  ;;  %v12347_v8 = vrot.slane %v12345_v17, 7  ;;  %v12353_v35 = vshll.u32 %v17058_v50, 16  ;;  %v12352_v44 = vrot.slane %v12350_v16, 6  ;;  %18116 = vmatprep.mubr.msk.bf16.mxu0 %vm349_vm2, %v20969_v57  ;;  %22612 = vst [vmem:[#allocation11_spill] sm:$0xff] %v21034_v18  ;;  %v21036_v16 = vpop.f32.mrf.mxu1 }
 0x2b0   : > { %v12122_v34 = vrot.slane %v12108_v10, %v18742_v12  ;;  %v12328_v46 = vor.u32 %v12327_v15, %v12324_v53  ;;  %v12359_v31 = vshll.u32 %v12280_v60, 16  ;;  %v12364_v39 = vshrl.u32 %v17059_v54, 16  ;;  %v17060_v3 = vld.sshfl [vmem:[%s18740_s21 + $0x14c] sm:$0x13 pattern:$0x76325410] }
 0x2b1   : > { %v12342_v48 = vor.u32 %v12341_v59, %v12338_v40  ;;  %v12355_v19 = vrot.slane %v12353_v35, 7  ;;  %v12367_v47 = vshll.u32 %v17059_v54, 16  ;;  %v12373_v15 = vshll.u32 %v12288_v49, 16  ;;  %22613 = vst [vmem:[#allocation33_spill] sm:$0xff] %v21036_v16 }
 0x2b2   : > { %v21031_v22 = vcombine.low %v12115_v45, %v12122_v34  ;;  %v12329_v37 = vrot.slane %v12328_v46, 2  ;;  %v12361_v50 = vrot.slane %v12359_v31, 7  ;;  %v12366_v53 = vrot.slane %v12364_v39, 6 }
 0x2b3   : > { %v12343_v10 = vrot.slane %v12342_v48, 2  ;;  %v12356_v45 = vor.u32 %v12355_v19, %v12352_v44  ;;  %v12369_v60 = vrot.slane %v12367_v47, 7  ;;  %v21044_v54 = vadd.f32 %v20611_v42, %v20938_v1  ;;  %v17061_v17 = vld.sshfl [vmem:[%s18740_s21 + $0x150] sm:$0x13 pattern:$0x76325410]  ;;  %v21057_v19 = vpop.f32.mrf.mxu1 }
 0x2b4   : > { %18099 = vmatmul.mubr.msk.bf16.vlgmr.msra.gmra.mxu1 %vm349_vm2, %v21031_v22  ;;  %v12334_v57 = vsel %vm18833_vm9, %v12329_v37, %v12333_v0  ;;  %v12375_v40 = vrot.slane %v12373_v15, 7  ;;  %v21051_v59 = vadd.f32 %v20613_v52, %v20949_v29  ;;  %v17062_v34 = vld.sshfl [vmem:[%s18740_s21 + $0x154] sm:$0x13 pattern:$0x76325410]  ;;  %v12296_v46 = vcombine.high %v17060_v3, %v17060_v3  ;;  %22615 = vst [vmem:[#allocation35_spill] sm:$0xff] %v21057_v19 }
 0x2b5   : > { %18109 = vmatpush3.bf16.msra.mxu1 %v12186_v26  ;;  %v12348_v49 = vsel %vm18833_vm9, %v12343_v10, %v12347_v8  ;;  %v12357_v35 = vrot.slane %v12356_v45, 2  ;;  %v12370_v0 = vor.u32 %v12369_v60, %v12366_v53  ;;  %v17063_v44 = vld.sshfl [vmem:[%s18740_s21 + $0x158] sm:$0x13 pattern:$0x76325410]  ;;  %v12304_v31 = vcombine.high %v17061_v17, %v17061_v17  ;;  %v21055_v26 = vpop.f32.mrf.mxu0 }
 0x2b6   : > { %v12433_v48 = vcombine.low %v12334_v57, %v12348_v49  ;;  %v12312_v39 = vcombine.high %v17062_v34, %v17062_v34  ;;  %v12320_v42 = vcombine.high %v17063_v44, %v17063_v44  ;;  %v12378_v1 = vshrl.u32 %v17060_v3, 16  ;;  %22614 = vst [vmem:[#allocation34_spill] sm:$0xff] %v21055_v26 }
 0x2b7   : > { %v12381_v37 = vshll.u32 %v17060_v3, 16  ;;  %v12362_v8 = vsel %vm18833_vm9, %v12357_v35, %v12361_v50  ;;  %v12371_v52 = vrot.slane %v12370_v0, 2  ;;  %v12387_v47 = vshll.u32 %v12296_v46, 16  ;;  %v21064_v50 = vpop.f32.mrf.mxu0  ;;  %v21066_v35 = vpop.f32.mrf.mxu1 }
 0x2b8   : > { %v12441_v29 = vrot.slane %v12433_v48, %v18742_v12  ;;  %v12380_v10 = vrot.slane %v12378_v1, 6  ;;  %v12392_v15 = vshrl.u32 %v17061_v17, 16  ;;  %v12395_v57 = vshll.u32 %v17061_v17, 16 }
 0x2b9   : > { %v12383_v53 = vrot.slane %v12381_v37, 7  ;;  %v12376_v45 = vsel %vm18833_vm9, %v12371_v52, %v12375_v40  ;;  %v12389_v60 = vrot.slane %v12387_v47, 7  ;;  %v12401_v3 = vshll.u32 %v12304_v31, 16 }
 0x2ba   : > { %v12406_v49 = vshrl.u32 %v17062_v34, 16  ;;  %v12434_v26 = vcombine.low %v12362_v8, %v12376_v45  ;;  %v12394_v19 = vrot.slane %v12392_v15, 6  ;;  %v12397_v18 = vrot.slane %v12395_v57, 7 }
 0x2bb   : > { %v12384_v16 = vor.u32 %v12383_v53, %v12380_v10  ;;  %v12403_v46 = vrot.slane %v12401_v3, 7  ;;  %v12409_v48 = vshll.u32 %v17062_v34, 16  ;;  %v12415_v1 = vshll.u32 %v12312_v39, 16  ;;  %v17066_v34 = vld [vmem:[%s22463_s1 + $0x52] sm:$0x3] }
 0x2bc   : > { %v12408_v0 = vrot.slane %v12406_v49, 6  ;;  %v12448_v17 = vrot.slane %v12434_v26, %v18742_v12  ;;  %v12398_v40 = vor.u32 %v12397_v18, %v12394_v19  ;;  %v12420_v52 = vshrl.u32 %v17063_v44, 16  ;;  %v17077_v53 = vld.sshfl [vmem:[%s18740_s21 + $0xb8] sm:$0x12 pattern:$0x76325410]  ;;  %v21077_v18 = vpop.f32.mrf.mxu1 }
 0x2bd   : > { %v12385_v37 = vrot.slane %v12384_v16, 2  ;;  %v12411_v31 = vrot.slane %v12409_v48, 7  ;;  %v12417_v8 = vrot.slane %v12415_v1, 7  ;;  %v12423_v47 = vshll.u32 %v17063_v44, 16  ;;  %v21075_v16 = vpop.f32.mrf.mxu0  ;;  %v22616_v26 = vld [vmem:[#allocation12_spill] sm:$0xff]  ;;  %v22617_v49 = vld [vmem:[#allocation13_spill] sm:$0xff] }
 0x2be   : > { %v12429_v10 = vshll.u32 %v12320_v42, 16  ;;  %v12449_v15 = vcombine.low %v12441_v29, %v12448_v17  ;;  %v12399_v45 = vrot.slane %v12398_v40, 2  ;;  %v12422_v3 = vrot.slane %v12420_v52, 6 }
 0x2bf   : > { %v12390_v57 = vsel %vm18833_vm9, %v12385_v37, %v12389_v60  ;;  %v12412_v39 = vor.u32 %v12411_v31, %v12408_v0  ;;  %v12425_v44 = vrot.slane %v12423_v47, 7  ;;  %v21081_v19 = vadd.f32 %v22616_v26, %v20975_v36  ;;  %v17078_v29 = vld.sshfl [vmem:[%s18740_s21 + $0xbc] sm:$0x12 pattern:$0x76325410]  ;;  %v21114_v31 = vpop.f32.mrf.mxu1 }
 0x2c0   : > { %v12431_v42 = vrot.slane %v12429_v10, 7  ;;  %18110 = vmatprep.mubr.msk.bf16.mxu1 %vm349_vm2, %v12449_v15  ;;  %v12404_v60 = vsel %vm18833_vm9, %v12399_v45, %v12403_v46  ;;  %v21089_v48 = vadd.f32 %v22617_v49, %v20990_v62  ;;  %v21093_v1 = vadd.f32 %v20667_v28, %v20994_v20  ;;  %v17079_v36 = vld.sshfl [vmem:[%s18740_s21 + $0xc0] sm:$0x12 pattern:$0x76325410]  ;;  %22619 = vst [vmem:[#allocation13_spill] sm:$0xff] %v21114_v31 }
 0x2c1   : > { %v21097_v0 = vadd.f32 %v20669_v56, %v20999_v30  ;;  %v12413_v17 = vrot.slane %v12412_v39, 2  ;;  %v12426_v37 = vor.u32 %v12425_v44, %v12422_v3  ;;  %v12450_v40 = vcombine.low %v12390_v57, %v12404_v60  ;;  %v17080_v46 = vld.sshfl [vmem:[%s18740_s21 + $0xc4] sm:$0x12 pattern:$0x76325410]  ;;  %v21112_v30 = vpop.f32.mrf.mxu0 }
 0x2c2   : > { %v21101_v52 = vand.u32 %v17066_v34, %v18732_v5  ;;  %v21106_v62 = vadd.f32 %v20691_v55, %v21005_v27  ;;  %v21110_v28 = vadd.f32 %v20693_v9, %v21009_v63  ;;  %v12607_v20 = vcombine.high %v17077_v53, %v17077_v53  ;;  %22618 = vst [vmem:[#allocation12_spill] sm:$0xff] %v21112_v30  ;;  %v17081_v9 = vld.sshfl [vmem:[%s18740_s21 + $0xc8] sm:$0x12 pattern:$0x76325410] }
 0x2c3   : > { %v12615_v56 = vcombine.high %v17078_v29, %v17078_v29  ;;  %v12418_v47 = vsel %vm18833_vm9, %v12413_v17, %v12417_v8  ;;  %v12427_v10 = vrot.slane %v12426_v37, 2  ;;  %v12458_v15 = vrot.slane %v12450_v40, %v18742_v12  ;;  %v17082_v3 = vld.sshfl [vmem:[%s18740_s21 + $0xcc] sm:$0x12 pattern:$0x76325410]  ;;  %v21130_v30 = vpop.f32.mrf.mxu0 }
 0x2c4   : > { %18114 = vmatprep.subr.bf16.mxu0 %v21101_v52  ;;  %18120 = vmatprep.subr.bf16.mxu1 %v21101_v52  ;;  %v12623_v55 = vcombine.high %v17079_v36, %v17079_v36  ;;  %v12631_v27 = vcombine.high %v17080_v46, %v17080_v46  ;;  %v17085_v63 = vrot.slane %v17077_v53, 9  ;;  %v12666_v57 = vrot.slane %v12607_v20, 7  ;;  %v17083_v34 = vld.sshfl [vmem:[%s18740_s21 + $0xd0] sm:$0x12 pattern:$0x76325410]  ;;  %v21132_v53 = vpop.f32.mrf.mxu1 }
 0x2c5   : > { %18115 = vmatpush3.bf16.msra.mxu0 %v21101_v52  ;;  %v17086_v45 = vrot.slane %v17078_v29, 9  ;;  %v12432_v8 = vsel %vm18833_vm9, %v12427_v10, %v12431_v42  ;;  %v12670_v39 = vrot.slane %v12615_v56, 7  ;;  %v17087_v44 = vrot.slane %v17079_v36, 9  ;;  %v22621_v36 = vld [vmem:[#allocation14_spill] sm:$0xff]  ;;  %v22622_v56 = vld [vmem:[#allocation15_spill] sm:$0xff] }
 0x2c6   : > { %v12674_v26 = vrot.slane %v12623_v55, 7  ;;  %v12451_v60 = vcombine.low %v12418_v47, %v12432_v8  ;;  %v12667_v17 = vsel %vm18990_vm15, %v17085_v63, %v12666_v57  ;;  %v17088_v37 = vrot.slane %v17080_v46, 9  ;;  %v17084_v31 = vld.sshfl [vmem:[%s18740_s21 + $0xd4] sm:$0x12 pattern:$0x76325410]  ;;  %v21151_v63 = vpop.f32.mrf.mxu0  ;;  %v21153_v57 = vpop.f32.mrf.mxu1 }
 0x2c7   : > { %v12678_v40 = vrot.slane %v12631_v27, 7  ;;  %v12671_v29 = vsel %vm18990_vm15, %v17086_v45, %v12670_v39  ;;  %v21140_v20 = vadd.f32 %v22621_v36, %v21044_v54  ;;  %v21144_v47 = vadd.f32 %v22622_v56, %v21051_v59 }
 0x2c8   : > { %v12675_v42 = vsel %vm18990_vm15, %v17087_v44, %v12674_v26  ;;  %18117 = vmatmul.mubr.msk.bf16.vlgmr.msra.gmra.mxu0 %vm349_vm2, %v21031_v22  ;;  %v12465_v46 = vrot.slane %v12451_v60, %v18742_v12  ;;  %v12696_v55 = vcombine.low %v12667_v17, %v12671_v29  ;;  %v12639_v27 = vcombine.high %v17081_v9, %v17081_v9  ;;  %v17095_v60 = vld [vmem:[%s22463_s1 + $0x54] sm:$0x3]  ;;  %v21159_v17 = vpop.f32.mrf.mxu0 }
 0x2c9   : > { %v12679_v10 = vsel %vm18990_vm15, %v17088_v37, %v12678_v40  ;;  %v12647_v45 = vcombine.high %v17082_v3, %v17082_v3  ;;  %v12655_v8 = vcombine.high %v17083_v34, %v17083_v34  ;;  %v12663_v59 = vcombine.high %v17084_v31, %v17084_v31  ;;  %v21161_v37 = vpop.f32.mrf.mxu1 }
 0x2ca   : > { %v12697_v54 = vcombine.low %v12675_v42, %v12679_v10  ;;  %v12466_v39 = vcombine.low %v12458_v15, %v12465_v46  ;;  %v12704_v44 = vrot.slane %v12696_v55, %v18742_v12  ;;  %v17089_v22 = vrot.slane %v17081_v9, 9  ;;  %v18551_v15 = vld.sshfl [vmem:[%s18740_s21 + $0xc] sm:$0xf pattern:$0x76325410] }
 0x2cb   : > { %v12682_v26 = vrot.slane %v12639_v27, 7  ;;  %v17090_v29 = vrot.slane %v17082_v3, 9  ;;  %v12686_v42 = vrot.slane %v12647_v45, 7  ;;  %v17091_v36 = vrot.slane %v17083_v34, 9  ;;  %v21169_v27 = vpop.f32.mrf.mxu0  ;;  %v22624_v45 = vld [vmem:[#allocation16_spill] sm:$0xff] }
 0x2cc   : > { %v12711_v40 = vrot.slane %v12697_v54, %v18742_v12  ;;  %18111 = vmatmul.mubr.msk.bf16.vlgmr.msra.gmra.mxu1 %vm349_vm2, %v12466_v39  ;;  %v12690_v56 = vrot.slane %v12655_v8, 7  ;;  %v17092_v46 = vrot.slane %v17084_v31, 9  ;;  %v12694_v10 = vrot.slane %v12663_v59, 7  ;;  %v21171_v54 = vpop.f32.mrf.mxu1  ;;  %v22625_v31 = vld [vmem:[#allocation17_spill] sm:$0xff] }
 0x2cd   : > { %v12683_v9 = vsel %vm18990_vm15, %v17089_v22, %v12682_v26  ;;  %v18552_v55 = vld.sshfl [vmem:[%s18740_s21 + $0x14] sm:$0xf pattern:$0x76325410]  ;;  %22623 = vst [vmem:[#allocation14_spill] sm:$0xff] %v21171_v54  ;;  %18121 = vmatpush3.bf16.msra.mxu1 %v21101_v52  ;;  %v12687_v34 = vsel %vm18990_vm15, %v17090_v29, %v12686_v42  ;;  %v5296_v39 = vadd.f32 %v22624_v45, %v21081_v19 }
 0x2ce   : > { %v12712_v3 = vcombine.low %v12704_v44, %v12711_v40  ;;  %v5581_v8 = vadd.f32 %v22625_v31, %v21089_v48  ;;  %v18553_v59 = vld.sshfl [vmem:[%s18740_s21 + $0x64] sm:$0xf pattern:$0x76325410]  ;;  %v12691_v26 = vsel %vm18990_vm15, %v17091_v36, %v12690_v56  ;;  %v12695_v52 = vsel %vm18990_vm15, %v17092_v46, %v12694_v10  ;;  %v22627_v48 = vld [vmem:[#allocation19_spill] sm:$0xff]  ;;  %v22628_v36 = vld [vmem:[#allocation20_spill] sm:$0xff] }
 0x2cf   : > { %v18554_v22 = vld.sshfl [vmem:[%s18740_s21 + $0x6c] sm:$0xf pattern:$0x76325410]  ;;  %v12713_v44 = vcombine.low %v12683_v9, %v12687_v34  ;;  %v12714_v19 = vcombine.low %v12691_v26, %v12695_v52  ;;  %v5584_v45 = vadd.f32 %v22627_v48, %v21097_v0  ;;  %v12849_v31 = vand.u32 %v17095_v60, %v18732_v5  ;;  %v21200_v9 = vpop.f32.mrf.mxu0 }
 0x2d0   : > { %v22626_v40 = vld [vmem:[#allocation18_spill] sm:$0xff]  ;;  %v18555_v42 = vld.sshfl [vmem:[%s18740_s21 + $0x1c] sm:$0xf pattern:$0x76325410]  ;;  %18122 = vmatprep.mubr.msk.bf16.mxu1 %vm349_vm2, %v12712_v3  ;;  %v5297_v56 = vadd.f32 %v22628_v36, %v21106_v62  ;;  %22629 = vst [vmem:[#allocation15_spill] sm:$0xff] %v21200_v9  ;;  %v5582_v3 = vadd.f32 %v20768_v43, %v21110_v28  ;;  %v5641_v43 = vadd.f32 %v20772_v33, %v21140_v20 }
 0x2d1   : > { %v5299_v29 = vadd.f32 %v22626_v40, %v21093_v1  ;;  %v21190_v54 = vld.sshfl [vmem:[%s18740_s21 + $0xc] sm:$0x13 pattern:$0x76325410]  ;;  %v21202_v1 = vpop.f32.mrf.mxu1  ;;  %v12721_v34 = vrot.slane %v12713_v44, %v18742_v12  ;;  %v12728_v0 = vrot.slane %v12714_v19, %v18742_v12  ;;  %18126 = vmatprep.subr.bf16.mxu0 %v12849_v31  ;;  %18132 = vmatprep.subr.bf16.mxu1 %v12849_v31  ;;  %v21210_v60 = vpop.f32.mrf.mxu0  ;;  %v17116_v44 = vld [vmem:[%s22463_s1 + $0x56] sm:$0x3] }
 0x2d2   : > { %v18556_v46 = vld.sshfl [vmem:[%s18740_s21 + $0x24] sm:$0xf pattern:$0x76325410]  ;;  %22630 = vst [vmem:[#allocation16_spill] sm:$0xff] %v21202_v1  ;;  %v13378_v62 = vshrl.u32 %v21190_v54, 16  ;;  %18127 = vmatpush3.bf16.msra.mxu0 %v12849_v31  ;;  %v12824_v40 = vcombine.low %v18551_v15, %v18552_v55  ;;  %v5926_v28 = vadd.f32 %v20774_v25, %v21144_v47  ;;  %v21222_v36 = vcombine.low %v18553_v59, %v18554_v22 }
 0x2d3   : > { %v18557_v10 = vld.sshfl [vmem:[%s18740_s21 + $0x74] sm:$0xf pattern:$0x76325410]  ;;  %22631 = vst [vmem:[#allocation17_spill] sm:$0xff] %v21210_v60  ;;  %v21212_v52 = vpop.f32.mrf.mxu1  ;;  %v12729_v48 = vcombine.low %v12721_v34, %v12728_v0  ;;  %v21227_v55 = vpop.f32.mrf.mxu0  ;;  %v5639_v25 = vadd.f32 %v20793_v32, %v5296_v39  ;;  %v5924_v20 = vadd.f32 %v20795_v2, %v5581_v8  ;;  %v5642_v47 = vadd.f32 %v20823_v38, %v5299_v29  ;;  %v22637_v39 = vld [vmem:[#allocation22_spill] sm:$0xff] }
 0x2d4   : > { %v18558_v26 = vld.sshfl [vmem:[%s18740_s21 + $0x7c] sm:$0xf pattern:$0x76325410]  ;;  %22632 = vst [vmem:[#allocation18_spill] sm:$0xff] %v21212_v52  ;;  %22633 = vst [vmem:[#allocation19_spill] sm:$0xff] %v21227_v55  ;;  %18128 = vmatprep.mubr.msk.bf16.mxu0 %vm349_vm2, %v12824_v40  ;;  %v12841_v34 = vcombine.low %v18555_v42, %v18556_v46  ;;  %v5927_v0 = vadd.f32 %v20825_v23, %v5584_v45  ;;  %v13074_v55 = vand.u32 %v17116_v44, %v18732_v5 }
 0x2d5   : > { %v18559_v19 = vld.sshfl [vmem:[%s18740_s21 + $0x38] sm:$0xf pattern:$0x76325410]  ;;  %v21229_v33 = vpop.f32.mrf.mxu1  ;;  %18123 = vmatmul.mubr.msk.bf16.vlgmr.msra.gmra.mxu1 %vm349_vm2, %v12729_v48  ;;  %v21247_v32 = vpop.f32.mrf.mxu0  ;;  %v21253_v38 = vcombine.low %v18557_v10, %v18558_v26  ;;  %v5925_v8 = vadd.f32 %v22637_v39, %v5582_v3  ;;  %v13380_v29 = vrot.slane %v13378_v62, 6  ;;  %v13381_v42 = vshll.u32 %v21190_v54, 16 }
 0x2d6   : > { %v18560_v60 = vld.sshfl [vmem:[%s18740_s21 + $0x40] sm:$0xf pattern:$0x76325410]  ;;  %22634 = vst [vmem:[#allocation20_spill] sm:$0xff] %v21229_v33  ;;  %18133 = vmatpush3.bf16.msra.mxu1 %v12849_v31  ;;  %18134 = vmatprep.mubr.msk.bf16.mxu1 %vm349_vm2, %v21222_v36  ;;  %v22640_v31 = vld [vmem:[#allocation23_spill] sm:$0xff] }
 0x2d7   : > { %v18561_v52 = vld.sshfl [vmem:[%s18740_s21 + $0x90] sm:$0xf pattern:$0x76325410]  ;;  %v22635_v33 = vld [vmem:[#allocation21_spill] sm:$0xff]  ;;  %v21249_v2 = vpop.f32.mrf.mxu1  ;;  %18129 = vmatmul.mubr.msk.bf16.vlgmr.msra.gmra.mxu0 %vm349_vm2, %v12841_v34  ;;  %18138 = vmatprep.subr.bf16.mxu0 %v13074_v55  ;;  %v21259_v45 = vpop.f32.mrf.mxu0  ;;  %v21264_v46 = vadd.f32 %v22640_v31, %v5641_v43  ;;  %v22641_v10 = vld [vmem:[#allocation24_spill] sm:$0xff]  ;;  %v13049_v44 = vcombine.low %v18559_v19, %v18560_v60  ;;  %v21286_v31 = vadd.f32 %v20868_v7, %v5642_v47 }
 0x2d8   : > { %v18562_v15 = vld.sshfl [vmem:[%s18740_s21 + $0x98] sm:$0xf pattern:$0x76325410]  ;;  %v5640_v1 = vadd.f32 %v22635_v33, %v5297_v56  ;;  %22636 = vst [vmem:[#allocation21_spill] sm:$0xff] %v21249_v2  ;;  %22638 = vst [vmem:[#allocation22_spill] sm:$0xff] %v21259_v45  ;;  %18144 = vmatprep.subr.bf16.mxu1 %v13074_v55  ;;  %18139 = vmatpush3.bf16.msra.mxu0 %v13074_v55  ;;  %v21267_v26 = vadd.f32 %v22641_v10, %v5926_v28 }
 0x2d9   : > { %v21236_v59 = vld.sshfl [vmem:[%s18740_s21 + $0x48] sm:$0xf pattern:$0x76325410]  ;;  %v21261_v56 = vpop.f32.mrf.mxu1  ;;  %v17137_v3 = vld [vmem:[%s22463_s1 + $0x58] sm:$0x3]  ;;  %v21273_v48 = vcombine.low %v18561_v52, %v18562_v15  ;;  %v21275_v33 = vpop.f32.mrf.mxu0  ;;  %v21283_v28 = vadd.f32 %v20864_v41, %v5924_v20  ;;  %18140 = vmatprep.mubr.msk.bf16.mxu0 %vm349_vm2, %v13049_v44  ;;  %v21291_v52 = vadd.f32 %v20870_v24, %v5927_v0  ;;  %v13320_v24 = vcombine.high %v21190_v54, %v21190_v54 }
 0x2da   : > { %v18564_v22 = vld.sshfl [vmem:[%s18740_s21 + $0x50] sm:$0xf pattern:$0x76325410]  ;;  %22639 = vst [vmem:[#allocation36_spill] sm:$0xff] %v21261_v56  ;;  %22642 = vst [vmem:[#allocation23_spill] sm:$0xff] %v21275_v33  ;;  %v21294_v19 = vand.u32 %v17137_v3, %v18732_v5  ;;  %v21297_v15 = vadd.f32 %v20889_v51, %v5640_v1 }
 0x2db   : > { %v18565_v40 = vld.sshfl [vmem:[%s18740_s21 + $0xa0] sm:$0xf pattern:$0x76325410]  ;;  %v21277_v34 = vpop.f32.mrf.mxu1  ;;  %v13066_v60 = vcombine.low %v21236_v59, %v18564_v22  ;;  %v21300_v10 = vpop.f32.mrf.mxu0  ;;  %v22647_v20 = vld [vmem:[#allocation26_spill] sm:$0xff]  ;;  %v13383_v0 = vrot.slane %v13381_v42, 7 }
 0x2dc   : > { %v21245_v9 = vld.sshfl [vmem:[%s18740_s21 + $0x10] sm:$0x13 pattern:$0x76325410]  ;;  %22643 = vst [vmem:[#allocation24_spill] sm:$0xff] %v21277_v34  ;;  %v22644_v43 = vld [vmem:[#allocation25_spill] sm:$0xff]  ;;  %v21307_v47 = vadd.f32 %v22647_v20, %v5925_v8  ;;  %18150 = vmatprep.subr.bf16.mxu0 %v21294_v19 }
 0x2dd   : > { %v18566_v23 = vld.sshfl [vmem:[%s18740_s21 + $0xa8] sm:$0xf pattern:$0x76325410]  ;;  %v13392_v62 = vshrl.u32 %v21245_v9, 16  ;;  %v21280_v39 = vadd.f32 %v22644_v43, %v5639_v25  ;;  %22645 = vst [vmem:[#allocation25_spill] sm:$0xff] %v21300_v10  ;;  %v21302_v41 = vpop.f32.mrf.mxu1  ;;  %v13328_v22 = vcombine.high %v21245_v9, %v21245_v9  ;;  %18135 = vmatmul.mubr.msk.bf16.vlgmr.msra.gmra.mxu1 %vm349_vm2, %v21253_v38  ;;  %v13384_v42 = vor.u32 %v13383_v0, %v13380_v29 }
 0x2de   : > { %v17150_v25 = vld.sshfl [vmem:[%s18740_s21 + $0x14] sm:$0x13 pattern:$0x76325410]  ;;  %22646 = vst [vmem:[#allocation37_spill] sm:$0xff] %v21302_v41  ;;  %v21304_v7 = vcombine.low %v18565_v40, %v18566_v23  ;;  %v21317_v23 = vpop.f32.mrf.mxu0  ;;  %18145 = vmatpush3.bf16.msra.mxu1 %v13074_v55  ;;  %18146 = vmatprep.mubr.msk.bf16.mxu1 %vm349_vm2, %v21273_v48  ;;  %v13387_v54 = vshll.u32 %v13320_v24, 16 }
 0x2df   : > { %v17151_v59 = vld.sshfl [vmem:[%s18740_s21 + $0x18] sm:$0x13 pattern:$0x76325410]  ;;  %v13336_v51 = vcombine.high %v17150_v25, %v17150_v25  ;;  %v13394_v40 = vrot.slane %v13392_v62, 6  ;;  %22648 = vst [vmem:[#allocation26_spill] sm:$0xff] %v21317_v23  ;;  %v21319_v8 = vpop.f32.mrf.mxu1  ;;  %18141 = vmatmul.mubr.msk.bf16.vlgmr.msra.gmra.mxu0 %vm349_vm2, %v13066_v60  ;;  %18156 = vmatprep.subr.bf16.mxu1 %v21294_v19 }
 0x2e0   : > { %v13344_v1 = vcombine.high %v17151_v59, %v17151_v59  ;;  %22649 = vst [vmem:[#allocation38_spill] sm:$0xff] %v21319_v8  ;;  %v13395_v3 = vshll.u32 %v21245_v9, 16  ;;  %v13401_v44 = vshll.u32 %v13328_v22, 16  ;;  %v13406_v43 = vshrl.u32 %v17150_v25, 16  ;;  %v21326_v8 = vpop.f32.mrf.mxu0  ;;  %18151 = vmatpush3.bf16.msra.mxu0 %v21294_v19  ;;  %18152 = vmatprep.mubr.msk.bf16.mxu0 %vm349_vm2, %v21222_v36  ;;  %v22654_v36 = vld [vmem:[#allocation27_spill] sm:$0xff] }
 0x2e1   : > { %v13409_v62 = vshll.u32 %v17150_v25, 16  ;;  %v13415_v20 = vshll.u32 %v13336_v51, 16  ;;  %v13420_v23 = vshrl.u32 %v17151_v59, 16  ;;  %22650 = vst [vmem:[#allocation39_spill] sm:$0xff] %v21326_v8  ;;  %v21328_v55 = vpop.f32.mrf.mxu1  ;;  %v13389_v9 = vrot.slane %v13387_v54, 7 }
 0x2e2   : > { %22651 = vst [vmem:[#allocation40_spill] sm:$0xff] %v21328_v55  ;;  %v13397_v24 = vrot.slane %v13395_v3, 7  ;;  %v13403_v60 = vrot.slane %v13401_v44, 7  ;;  %v13408_v22 = vrot.slane %v13406_v43, 6  ;;  %v13385_v29 = vrot.slane %v13384_v42, 2  ;;  %v21335_v8 = vpop.f32.mrf.mxu0  ;;  %v22655_v42 = vld [vmem:[#allocation28_spill] sm:$0xff] }
 0x2e3   : > { %v17152_v41 = vld.sshfl [vmem:[%s18740_s21 + $0x1c] sm:$0x13 pattern:$0x76325410]  ;;  %v13411_v25 = vrot.slane %v13409_v62, 7  ;;  %v13417_v51 = vrot.slane %v13415_v20, 7  ;;  %v21337_v55 = vpop.f32.mrf.mxu1  ;;  %v21341_v54 = vadd.f32 %v22654_v36, %v21264_v46 }
 0x2e4   : > { %v13422_v0 = vrot.slane %v13420_v23, 6  ;;  %v17153_v10 = vld.sshfl [vmem:[%s18740_s21 + $0x20] sm:$0x13 pattern:$0x76325410]  ;;  %22652 = vst [vmem:[#allocation41_spill] sm:$0xff] %v21335_v8  ;;  %v13398_v34 = vor.u32 %v13397_v24, %v13394_v40  ;;  %v13390_v44 = vsel %vm18833_vm9, %v13385_v29, %v13389_v9  ;;  %v21348_v23 = vadd.f32 %v22655_v42, %v21267_v26 }
 0x2e5   : > { %22653 = vst [vmem:[#allocation42_spill] sm:$0xff] %v21337_v55  ;;  %v13423_v33 = vshll.u32 %v17151_v59, 16  ;;  %v13429_v56 = vshll.u32 %v13344_v1, 16  ;;  %v13412_v43 = vor.u32 %v13411_v25, %v13408_v22  ;;  %v13352_v20 = vcombine.high %v17152_v41, %v17152_v41  ;;  %v21353_v55 = vpop.f32.mrf.mxu0  ;;  %v21355_v59 = vpop.f32.mrf.mxu1  ;;  %18147 = vmatmul.mubr.msk.bf16.vlgmr.msra.gmra.mxu1 %vm349_vm2, %v21304_v7 }
 0x2e6   : > { %v17154_v3 = vld.sshfl [vmem:[%s18740_s21 + $0x24] sm:$0x13 pattern:$0x76325410]  ;;  %22656 = vst [vmem:[#allocation27_spill] sm:$0xff] %v21353_v55  ;;  %22657 = vst [vmem:[#allocation28_spill] sm:$0xff] %v21355_v59  ;;  %v13360_v24 = vcombine.high %v17153_v10, %v17153_v10  ;;  %18157 = vmatpush3.bf16.msra.mxu1 %v21294_v19 }
 0x2e7   : > { %v21351_v62 = vld.sshfl [vmem:[%s18740_s21 + $0x28] sm:$0x13 pattern:$0x76325410]  ;;  %v13399_v1 = vrot.slane %v13398_v34, 2  ;;  %v13425_v40 = vrot.slane %v13423_v33, 7  ;;  %v13368_v22 = vcombine.high %v17154_v3, %v17154_v3  ;;  %v21361_v25 = vpop.f32.mrf.mxu0  ;;  %v21363_v36 = vpop.f32.mrf.mxu1  ;;  %18153 = vmatmul.mubr.msk.bf16.vlgmr.msra.gmra.mxu0 %vm349_vm2, %v21253_v38 }
 0x2e8   : > { %v13431_v46 = vrot.slane %v13429_v56, 7  ;;  %v13413_v9 = vrot.slane %v13412_v43, 2  ;;  %v13376_v26 = vcombine.high %v21351_v62, %v21351_v62  ;;  %v13434_v29 = vshrl.u32 %v17152_v41, 16  ;;  %22658 = vst [vmem:[#allocation43_spill] sm:$0xff] %v21361_v25  ;;  %22659 = vst [vmem:[#allocation44_spill] sm:$0xff] %v21363_v36  ;;  %18164 = vmatprep.mubr.msk.bf16.mxu0 %vm349_vm2, %v21273_v48 }
 0x2e9   : > { %v13404_v33 = vsel %vm18833_vm9, %v13399_v1, %v13403_v60  ;;  %v13426_v56 = vor.u32 %v13425_v40, %v13422_v0  ;;  %v13437_v34 = vshll.u32 %v17152_v41, 16  ;;  %v13443_v42 = vshll.u32 %v13352_v20, 16  ;;  %v21372_v25 = vpop.f32.mrf.mxu0  ;;  %v21374_v36 = vpop.f32.mrf.mxu1 }
 0x2ea   : > { %v13418_v43 = vsel %vm18833_vm9, %v13413_v9, %v13417_v51  ;;  %v13489_v59 = vcombine.low %v13390_v44, %v13404_v33  ;;  %v13436_v55 = vrot.slane %v13434_v29, 6  ;;  %v13448_v8 = vshrl.u32 %v17153_v10, 16  ;;  %22660 = vst [vmem:[#allocation45_spill] sm:$0xff] %v21374_v36 }
 0x2eb   : > { %v13427_v19 = vrot.slane %v13426_v56, 2  ;;  %v13439_v45 = vrot.slane %v13437_v34, 7  ;;  %v13445_v2 = vrot.slane %v13443_v42, 7  ;;  %v13451_v60 = vshll.u32 %v17153_v10, 16  ;;  %v21379_v20 = vpop.f32.mrf.mxu0  ;;  %v21381_v38 = vpop.f32.mrf.mxu1 }
 0x2ec   : > { %v13497_v41 = vrot.slane %v13489_v59, %v18742_v12  ;;  %v13450_v51 = vrot.slane %v13448_v8, 6  ;;  %v13457_v0 = vshll.u32 %v13360_v24, 16  ;;  %v13462_v44 = vshrl.u32 %v17154_v3, 16  ;;  %22661 = vst [vmem:[#allocation46_spill] sm:$0xff] %v21379_v20  ;;  %22662 = vst [vmem:[#allocation47_spill] sm:$0xff] %v21381_v38 }
 0x2ed   : > { %v13432_v1 = vsel %vm18833_vm9, %v13427_v19, %v13431_v46  ;;  %v13440_v40 = vor.u32 %v13439_v45, %v13436_v55  ;;  %v13453_v9 = vrot.slane %v13451_v60, 7  ;;  %v13465_v29 = vshll.u32 %v17154_v3, 16  ;;  %v21385_v48 = vpop.f32.mrf.mxu0  ;;  %v21387_v59 = vpop.f32.mrf.mxu1 }
 0x2ee   : > { %v13490_v33 = vcombine.low %v13418_v43, %v13432_v1  ;;  %v13459_v10 = vrot.slane %v13457_v0, 7  ;;  %v13464_v56 = vrot.slane %v13462_v44, 6  ;;  %v13471_v34 = vshll.u32 %v13368_v22, 16 }
 0x2ef   : > { %v13441_v8 = vrot.slane %v13440_v40, 2  ;;  %v13454_v24 = vor.u32 %v13453_v9, %v13450_v51  ;;  %v13467_v42 = vrot.slane %v13465_v29, 7  ;;  %v13476_v20 = vshrl.u32 %v21351_v62, 16  ;;  %v21392_v3 = vpop.f32.mrf.mxu0  ;;  %v21394_v46 = vpop.f32.mrf.mxu1  ;;  %v17158_v51 = vld [vmem:[%s22463_s1 + $0x5a] sm:$0x3] }
 0x2f0   : > { %v13504_v38 = vrot.slane %v13490_v33, %v18742_v12  ;;  %v13473_v36 = vrot.slane %v13471_v34, 7  ;;  %v13479_v45 = vshll.u32 %v21351_v62, 16  ;;  %v13485_v55 = vshll.u32 %v13376_v26, 16  ;;  %22663 = vst [vmem:[#allocation48_spill] sm:$0xff] %v21392_v3  ;;  %22664 = vst [vmem:[#allocation49_spill] sm:$0xff] %v21394_v46  ;;  %v22668_v33 = vld [vmem:[#allocation30_spill] sm:$0xff] }
 0x2f1   : > { %v13446_v22 = vsel %vm18833_vm9, %v13441_v8, %v13445_v2  ;;  %v13455_v43 = vrot.slane %v13454_v24, 2  ;;  %v13468_v19 = vor.u32 %v13467_v42, %v13464_v56  ;;  %v13478_v60 = vrot.slane %v13476_v20, 6  ;;  %v21405_v1 = vpop.f32.mrf.mxu0  ;;  %v21407_v40 = vpop.f32.mrf.mxu1  ;;  %v17169_v29 = vld.sshfl [vmem:[%s18740_s21 + $0x38] sm:$0x13 pattern:$0x76325410] }
 0x2f2   : > { %v13505_v0 = vcombine.low %v13497_v41, %v13504_v38  ;;  %v13481_v44 = vrot.slane %v13479_v45, 7  ;;  %v13487_v62 = vrot.slane %v13485_v55, 7  ;;  %v21403_v26 = vadd.f32 %v20926_v11, %v21280_v39  ;;  %22665 = vst [vmem:[#allocation50_spill] sm:$0xff] %v21405_v1  ;;  %22666 = vst [vmem:[#allocation51_spill] sm:$0xff] %v21407_v40  ;;  %v22667_v41 = vld [vmem:[#allocation29_spill] sm:$0xff]  ;;  %v22671_v8 = vld [vmem:[#allocation31_spill] sm:$0xff] }
 0x2f3   : > { %v13460_v2 = vsel %vm18833_vm9, %v13455_v43, %v13459_v10  ;;  %v13469_v20 = vrot.slane %v13468_v19, 2  ;;  %v21413_v9 = vadd.f32 %v20928_v6, %v21283_v28  ;;  %v21417_v38 = vadd.f32 %v22667_v41, %v21286_v31  ;;  %v17170_v34 = vld.sshfl [vmem:[%s18740_s21 + $0x3c] sm:$0x13 pattern:$0x76325410]  ;;  %v21429_v6 = vpop.f32.mrf.mxu0  ;;  %v21431_v28 = vpop.f32.mrf.mxu1 }
 0x2f4   : > { %18158 = vmatprep.mubr.msk.bf16.mxu1 %vm349_vm2, %v13505_v0  ;;  %v13482_v11 = vor.u32 %v13481_v44, %v13478_v60  ;;  %v13506_v39 = vcombine.low %v13446_v22, %v13460_v2  ;;  %v21423_v56 = vadd.f32 %v22668_v33, %v21291_v52  ;;  %v21426_v10 = vand.u32 %v17158_v51, %v18732_v5  ;;  %v22672_v42 = vld [vmem:[#allocation32_spill] sm:$0xff]  ;;  %v17171_v52 = vld.sshfl [vmem:[%s18740_s21 + $0x40] sm:$0x13 pattern:$0x76325410] }
 0x2f5   : > { %22669 = vst [vmem:[#allocation29_spill] sm:$0xff] %v21429_v6  ;;  %22670 = vst [vmem:[#allocation30_spill] sm:$0xff] %v21431_v28  ;;  %v13474_v31 = vsel %vm18833_vm9, %v13469_v20, %v13473_v36  ;;  %v21437_v24 = vadd.f32 %v22671_v8, %v21297_v15  ;;  %v21441_v45 = vadd.f32 %v22672_v42, %v21307_v47  ;;  %v17172_v19 = vld.sshfl [vmem:[%s18740_s21 + $0x44] sm:$0x13 pattern:$0x76325410]  ;;  %v21448_v51 = vpop.f32.mrf.mxu0  ;;  %v21450_v15 = vpop.f32.mrf.mxu1 }
 0x2f6   : > { %v13663_v55 = vcombine.high %v17169_v29, %v17169_v29  ;;  %v13483_v22 = vrot.slane %v13482_v11, 2  ;;  %v13514_v43 = vrot.slane %v13506_v39, %v18742_v12  ;;  %18162 = vmatprep.subr.bf16.mxu0 %v21426_v10  ;;  %18168 = vmatprep.subr.bf16.mxu1 %v21426_v10  ;;  %v13671_v60 = vcombine.high %v17170_v34, %v17170_v34 }
 0x2f7   : > { %v13679_v36 = vcombine.high %v17171_v52, %v17171_v52  ;;  %22673 = vst [vmem:[#allocation31_spill] sm:$0xff] %v21448_v51  ;;  %22674 = vst [vmem:[#allocation32_spill] sm:$0xff] %v21450_v15  ;;  %18163 = vmatpush3.bf16.msra.mxu0 %v21426_v10  ;;  %v13687_v47 = vcombine.high %v17172_v19, %v17172_v19  ;;  %v13721_v44 = vshrl.u32 %v17169_v29, 16  ;;  %v13724_v2 = vshll.u32 %v17169_v29, 16  ;;  %v21455_v8 = vpop.f32.mrf.mxu0  ;;  %v21457_v42 = vpop.f32.mrf.mxu1 }
 0x2f8   : > { %v13730_v20 = vshll.u32 %v13663_v55, 16  ;;  %v13488_v41 = vsel %vm18833_vm9, %v13483_v22, %v13487_v62  ;;  %v13735_v11 = vshrl.u32 %v17170_v34, 16  ;;  %v13738_v39 = vshll.u32 %v17170_v34, 16 }
 0x2f9   : > { %v13744_v33 = vshll.u32 %v13671_v60, 16  ;;  %v13507_v28 = vcombine.low %v13474_v31, %v13488_v41  ;;  %v13723_v51 = vrot.slane %v13721_v44, 6  ;;  %v13726_v6 = vrot.slane %v13724_v2, 7  ;;  %v21461_v29 = vpop.f32.mrf.mxu0  ;;  %v21463_v62 = vpop.f32.mrf.mxu1 }
 0x2fa   : > { %v13732_v15 = vrot.slane %v13730_v20, 7  ;;  %v13737_v40 = vrot.slane %v13735_v11, 6  ;;  %v13740_v1 = vrot.slane %v13738_v39, 7  ;;  %v13749_v3 = vshrl.u32 %v17171_v52, 16  ;;  %18165 = vmatmul.mubr.msk.bf16.vlgmr.msra.gmra.mxu0 %vm349_vm2, %v21304_v7  ;;  %22675 = vst [vmem:[#allocation52_spill] sm:$0xff] %v21463_v62 }
 0x2fb   : > { %v13746_v46 = vrot.slane %v13744_v33, 7  ;;  %v13521_v34 = vrot.slane %v13507_v28, %v18742_v12  ;;  %v13727_v55 = vor.u32 %v13726_v6, %v13723_v51  ;;  %v13752_v22 = vshll.u32 %v17171_v52, 16  ;;  %18176 = vmatprep.mubr.msk.bf16.mxu0 %vm349_vm2, %v13505_v0  ;;  %v21467_v41 = vpop.f32.mrf.mxu0  ;;  %v21469_v11 = vpop.f32.mrf.mxu1  ;;  %v17173_v28 = vld.sshfl [vmem:[%s18740_s21 + $0x48] sm:$0x13 pattern:$0x76325410] }
 0x2fc   : > { %v13758_v31 = vshll.u32 %v13679_v36, 16  ;;  %v13741_v60 = vor.u32 %v13740_v1, %v13737_v40  ;;  %v13751_v44 = vrot.slane %v13749_v3, 6  ;;  %v13763_v2 = vshrl.u32 %v17172_v19, 16  ;;  %22676 = vst [vmem:[#allocation53_spill] sm:$0xff] %v21467_v41  ;;  %22677 = vst [vmem:[#allocation54_spill] sm:$0xff] %v21469_v11 }
 0x2fd   : > { %v13766_v20 = vshll.u32 %v17172_v19, 16  ;;  %v21471_v7 = vcombine.low %v13514_v43, %v13521_v34  ;;  %v13728_v39 = vrot.slane %v13727_v55, 2  ;;  %v13754_v33 = vrot.slane %v13752_v22, 7  ;;  %v21474_v1 = vpop.f32.mrf.mxu0  ;;  %v21476_v3 = vpop.f32.mrf.mxu1 }
 0x2fe   : > { %v13760_v62 = vrot.slane %v13758_v31, 7  ;;  %v13742_v6 = vrot.slane %v13741_v60, 2  ;;  %v13765_v52 = vrot.slane %v13763_v2, 6  ;;  %v13772_v0 = vshll.u32 %v13687_v47, 16  ;;  %22678 = vst [vmem:[#allocation55_spill] sm:$0xff] %v21474_v1  ;;  %22679 = vst [vmem:[#allocation56_spill] sm:$0xff] %v21476_v3 }
 0x2ff   : > { %v13768_v36 = vrot.slane %v13766_v20, 7  ;;  %18159 = vmatmul.mubr.msk.bf16.vlgmr.msra.gmra.mxu1 %vm349_vm2, %v21471_v7  ;;  %v13733_v40 = vsel %vm18833_vm9, %v13728_v39, %v13732_v15  ;;  %v13755_v43 = vor.u32 %v13754_v33, %v13751_v44  ;;  %v21484_v19 = vadd.f32 %v20964_v14, %v21341_v54  ;;  %v17174_v47 = vld.sshfl [vmem:[%s18740_s21 + $0x4c] sm:$0x13 pattern:$0x76325410]  ;;  %v21495_v15 = vpop.f32.mrf.mxu0  ;;  %v21497_v44 = vpop.f32.mrf.mxu1 }
 0x300   : > { %v21488_v51 = vadd.f32 %v20966_v61, %v21348_v23  ;;  %18169 = vmatpush3.bf16.msra.mxu1 %v21426_v10  ;;  %v13747_v34 = vsel %vm18833_vm9, %v13742_v6, %v13746_v46  ;;  %v13774_v22 = vrot.slane %v13772_v0, 7  ;;  %v17175_v31 = vld.sshfl [vmem:[%s18740_s21 + $0x50] sm:$0x13 pattern:$0x76325410]  ;;  %v13695_v60 = vcombine.high %v17173_v28, %v17173_v28  ;;  %22680 = vst [vmem:[#allocation57_spill] sm:$0xff] %v21495_v15 }
 0x301   : > { %v13769_v55 = vor.u32 %v13768_v36, %v13765_v52  ;;  %22681 = vst [vmem:[#allocation58_spill] sm:$0xff] %v21497_v44  ;;  %v13756_v14 = vrot.slane %v13755_v43, 2  ;;  %v13832_v54 = vcombine.low %v13733_v40, %v13747_v34  ;;  %v17176_v2 = vld.sshfl [vmem:[%s18740_s21 + $0x54] sm:$0x13 pattern:$0x76325410]  ;;  %v13703_v20 = vcombine.high %v17174_v47, %v17174_v47  ;;  %v21500_v3 = vpop.f32.mrf.mxu0  ;;  %v21502_v46 = vpop.f32.mrf.mxu1 }
 0x302   : > { %v13711_v61 = vcombine.high %v17175_v31, %v17175_v31  ;;  %v13719_v39 = vcombine.high %v17176_v2, %v17176_v2  ;;  %v13777_v33 = vshrl.u32 %v17173_v28, 16  ;;  %v13780_v10 = vshll.u32 %v17173_v28, 16  ;;  %22682 = vst [vmem:[#allocation59_spill] sm:$0xff] %v21500_v3  ;;  %22683 = vst [vmem:[#allocation60_spill] sm:$0xff] %v21502_v46 }
 0x303   : > { %v13770_v23 = vrot.slane %v13769_v55, 2  ;;  %v13761_v6 = vsel %vm18833_vm9, %v13756_v14, %v13760_v62  ;;  %v13840_v52 = vrot.slane %v13832_v54, %v18742_v12  ;;  %v13786_v36 = vshll.u32 %v13695_v60, 16  ;;  %v21509_v44 = vpop.f32.mrf.mxu0  ;;  %v21511_v28 = vpop.f32.mrf.mxu1 }
 0x304   : > { %v13791_v0 = vshrl.u32 %v17174_v47, 16  ;;  %v13779_v43 = vrot.slane %v13777_v33, 6  ;;  %v13782_v34 = vrot.slane %v13780_v10, 7  ;;  %v13794_v55 = vshll.u32 %v17174_v47, 16  ;;  %22684 = vst [vmem:[#allocation61_spill] sm:$0xff] %v21509_v44  ;;  %22685 = vst [vmem:[#allocation62_spill] sm:$0xff] %v21511_v28 }
 0x305   : > { %v13775_v40 = vsel %vm18833_vm9, %v13770_v23, %v13774_v22  ;;  %v13788_v15 = vrot.slane %v13786_v36, 7  ;;  %v13800_v1 = vshll.u32 %v13703_v20, 16  ;;  %v13805_v14 = vshrl.u32 %v17175_v31, 16  ;;  %v21513_v60 = vpop.f32.mrf.mxu0  ;;  %v21515_v41 = vpop.f32.mrf.mxu1 }
 0x306   : > { %v13833_v3 = vcombine.low %v13761_v6, %v13775_v40  ;;  %v13793_v46 = vrot.slane %v13791_v0, 6  ;;  %v13783_v11 = vor.u32 %v13782_v34, %v13779_v43  ;;  %v13796_v62 = vrot.slane %v13794_v55, 7 }
 0x307   : > { %v13808_v54 = vshll.u32 %v17175_v31, 16  ;;  %v13802_v23 = vrot.slane %v13800_v1, 7  ;;  %v13814_v47 = vshll.u32 %v13711_v61, 16  ;;  %v13819_v33 = vshrl.u32 %v17176_v2, 16  ;;  %v21518_v36 = vpop.f32.mrf.mxu0  ;;  %v21520_v20 = vpop.f32.mrf.mxu1 }
 0x308   : > { %v13847_v22 = vrot.slane %v13833_v3, %v18742_v12  ;;  %v13784_v10 = vrot.slane %v13783_v11, 2  ;;  %v13797_v44 = vor.u32 %v13796_v62, %v13793_v46  ;;  %v13807_v28 = vrot.slane %v13805_v14, 6  ;;  %22686 = vst [vmem:[#allocation63_spill] sm:$0xff] %v21518_v36  ;;  %22687 = vst [vmem:[#allocation64_spill] sm:$0xff] %v21520_v20  ;;  %v17179_v46 = vld [vmem:[%s22463_s1 + $0x5c] sm:$0x3] }
 0x309   : > { %v13810_v6 = vrot.slane %v13808_v54, 7  ;;  %v13816_v31 = vrot.slane %v13814_v47, 7  ;;  %v13821_v40 = vrot.slane %v13819_v33, 6  ;;  %v13822_v43 = vshll.u32 %v17176_v2, 16  ;;  %v21529_v34 = vpop.f32.mrf.mxu0  ;;  %v21531_v55 = vpop.f32.mrf.mxu1  ;;  %v22692_v47 = vld [vmem:[#allocation10_spill] sm:$0xff] }
 0x30a   : > { %v21522_v0 = vcombine.low %v13840_v52, %v13847_v22  ;;  %v13789_v3 = vsel %vm18833_vm9, %v13784_v10, %v13788_v15  ;;  %v13798_v1 = vrot.slane %v13797_v44, 2  ;;  %v13828_v11 = vshll.u32 %v13719_v39, 16  ;;  %22688 = vst [vmem:[#allocation65_spill] sm:$0xff] %v21529_v34  ;;  %22689 = vst [vmem:[#allocation66_spill] sm:$0xff] %v21531_v55  ;;  %v22690_v44 = vld [vmem:[#allocation8_spill] sm:$0xff]  ;;  %v22691_v39 = vld [vmem:[#allocation9_spill] sm:$0xff] }
 0x30b   : > { %v13811_v61 = vor.u32 %v13810_v6, %v13807_v28  ;;  %v13824_v52 = vrot.slane %v13822_v43, 7  ;;  %v21537_v15 = vadd.f32 %v20980_v21, %v21403_v26  ;;  %v21541_v2 = vadd.f32 %v22690_v44, %v21413_v9  ;;  %v17190_v62 = vld.sshfl [vmem:[%s18740_s21 + $0x64] sm:$0x13 pattern:$0x76325410]  ;;  %v21555_v26 = vpop.f32.mrf.mxu0  ;;  %v21557_v9 = vpop.f32.mrf.mxu1 }
 0x30c   : > { %18170 = vmatprep.mubr.msk.bf16.mxu1 %vm349_vm2, %v21522_v0  ;;  %v21545_v28 = vadd.f32 %v22691_v39, %v21417_v38  ;;  %v13803_v14 = vsel %vm18833_vm9, %v13798_v1, %v13802_v23  ;;  %v13830_v22 = vrot.slane %v13828_v11, 7  ;;  %v21552_v33 = vadd.f32 %v22692_v47, %v21423_v56  ;;  %v17191_v21 = vld.sshfl [vmem:[%s18740_s21 + $0x68] sm:$0x13 pattern:$0x76325410]  ;;  %22693 = vst [vmem:[#allocation8_spill] sm:$0xff] %v21555_v26 }
 0x30d   : > { %v13812_v54 = vrot.slane %v13811_v61, 2  ;;  %22694 = vst [vmem:[#allocation9_spill] sm:$0xff] %v21557_v9  ;;  %v13825_v10 = vor.u32 %v13824_v52, %v13821_v40  ;;  %v13849_v6 = vcombine.low %v13789_v3, %v13803_v14  ;;  %v21560_v38 = vand.u32 %v17179_v46, %v18732_v5  ;;  %v17192_v23 = vld.sshfl [vmem:[%s18740_s21 + $0x6c] sm:$0x13 pattern:$0x76325410]  ;;  %v21574_v40 = vpop.f32.mrf.mxu0  ;;  %v21576_v3 = vpop.f32.mrf.mxu1 }
 0x30e   : > { %v21564_v43 = vadd.f32 %v21022_v58, %v21437_v24  ;;  %v21571_v56 = vadd.f32 %v21024_v4, %v21441_v45  ;;  %v17193_v61 = vld.sshfl [vmem:[%s18740_s21 + $0x70] sm:$0x13 pattern:$0x76325410]  ;;  %v14006_v11 = vcombine.high %v17190_v62, %v17190_v62  ;;  %v14014_v44 = vcombine.high %v17191_v21, %v17191_v21  ;;  %22695 = vst [vmem:[#allocation10_spill] sm:$0xff] %v21574_v40 }
 0x30f   : > { %v13817_v1 = vsel %vm18833_vm9, %v13812_v54, %v13816_v31  ;;  %22696 = vst [vmem:[#allocation67_spill] sm:$0xff] %v21576_v3  ;;  %v13826_v46 = vrot.slane %v13825_v10, 2  ;;  %v13857_v52 = vrot.slane %v13849_v6, %v18742_v12  ;;  %18174 = vmatprep.subr.bf16.mxu0 %v21560_v38  ;;  %18180 = vmatprep.subr.bf16.mxu1 %v21560_v38  ;;  %v14064_v4 = vshrl.u32 %v17190_v62, 16  ;;  %v21582_v14 = vpop.f32.mrf.mxu0  ;;  %v21584_v54 = vpop.f32.mrf.mxu1 }
 0x310   : > { %v14022_v58 = vcombine.high %v17192_v23, %v17192_v23  ;;  %v14030_v24 = vcombine.high %v17193_v61, %v17193_v61  ;;  %18175 = vmatpush3.bf16.msra.mxu0 %v21560_v38  ;;  %v14067_v45 = vshll.u32 %v17190_v62, 16  ;;  %v14073_v31 = vshll.u32 %v14006_v11, 16  ;;  %22697 = vst [vmem:[#allocation68_spill] sm:$0xff] %v21582_v14  ;;  %22698 = vst [vmem:[#allocation69_spill] sm:$0xff] %v21584_v54 }
 0x311   : > { %v14078_v39 = vshrl.u32 %v17191_v21, 16  ;;  %v13831_v47 = vsel %vm18833_vm9, %v13826_v46, %v13830_v22  ;;  %v14081_v10 = vshll.u32 %v17191_v21, 16  ;;  %v14087_v6 = vshll.u32 %v14014_v44, 16  ;;  %v21588_v34 = vpop.f32.mrf.mxu0  ;;  %v21590_v20 = vpop.f32.mrf.mxu1 }
 0x312   : > { %v14092_v3 = vshrl.u32 %v17192_v23, 16  ;;  %v13850_v40 = vcombine.low %v13817_v1, %v13831_v47  ;;  %v14066_v9 = vrot.slane %v14064_v4, 6  ;;  %v14069_v26 = vrot.slane %v14067_v45, 7  ;;  %22699 = vst [vmem:[#allocation70_spill] sm:$0xff] %v21588_v34  ;;  %22700 = vst [vmem:[#allocation71_spill] sm:$0xff] %v21590_v20 }
 0x313   : > { %v14075_v55 = vrot.slane %v14073_v31, 7  ;;  %v14080_v62 = vrot.slane %v14078_v39, 6  ;;  %v14083_v11 = vrot.slane %v14081_v10, 7  ;;  %v14089_v36 = vrot.slane %v14087_v6, 7  ;;  %18177 = vmatmul.mubr.msk.bf16.vlgmr.msra.gmra.mxu0 %vm349_vm2, %v21471_v7  ;;  %v21597_v46 = vpop.f32.mrf.mxu0  ;;  %v21599_v4 = vpop.f32.mrf.mxu1 }
 0x314   : > { %v14094_v14 = vrot.slane %v14092_v3, 6  ;;  %v13864_v22 = vrot.slane %v13850_v40, %v18742_v12  ;;  %v14070_v21 = vor.u32 %v14069_v26, %v14066_v9  ;;  %v14095_v1 = vshll.u32 %v17192_v23, 16  ;;  %18188 = vmatprep.mubr.msk.bf16.mxu0 %vm349_vm2, %v21522_v0  ;;  %22701 = vst [vmem:[#allocation72_spill] sm:$0xff] %v21597_v46  ;;  %22702 = vst [vmem:[#allocation73_spill] sm:$0xff] %v21599_v4 }
 0x315   : > { %v14101_v44 = vshll.u32 %v14022_v58, 16  ;;  %v14084_v45 = vor.u32 %v14083_v11, %v14080_v62  ;;  %v14106_v31 = vshrl.u32 %v17193_v61, 16  ;;  %v14109_v3 = vshll.u32 %v17193_v61, 16  ;;  %v21605_v23 = vpop.f32.mrf.mxu0  ;;  %v21607_v58 = vpop.f32.mrf.mxu1 }
 0x316   : > { %v14115_v39 = vshll.u32 %v14030_v24, 16  ;;  %v21601_v47 = vcombine.low %v13857_v52, %v13864_v22  ;;  %v14071_v7 = vrot.slane %v14070_v21, 2  ;;  %v14097_v40 = vrot.slane %v14095_v1, 7  ;;  %22703 = vst [vmem:[#allocation74_spill] sm:$0xff] %v21605_v23  ;;  %22704 = vst [vmem:[#allocation75_spill] sm:$0xff] %v21607_v58  ;;  %v22705_v24 = vld [vmem:[#allocation11_spill] sm:$0xff] }
 0x317   : > { %v14103_v10 = vrot.slane %v14101_v44, 7  ;;  %v17194_v26 = vld.sshfl [vmem:[%s18740_s21 + $0x74] sm:$0x13 pattern:$0x76325410]  ;;  %v14085_v0 = vrot.slane %v14084_v45, 2  ;;  %v21615_v11 = vadd.f32 %v22705_v24, %v21484_v19  ;;  %v21622_v44 = vpop.f32.mrf.mxu0  ;;  %v21624_v45 = vpop.f32.mrf.mxu1 }
 0x318   : > { %v17195_v9 = vld.sshfl [vmem:[%s18740_s21 + $0x78] sm:$0x13 pattern:$0x76325410]  ;;  %v14108_v6 = vrot.slane %v14106_v31, 6  ;;  %v14111_v4 = vrot.slane %v14109_v3, 7  ;;  %18171 = vmatmul.mubr.msk.bf16.vlgmr.msra.gmra.mxu1 %vm349_vm2, %v21601_v47  ;;  %v14076_v61 = vsel %vm18833_vm9, %v14071_v7, %v14075_v55  ;;  %v14098_v52 = vor.u32 %v14097_v40, %v14094_v14 }
 0x319   : > { %v14117_v62 = vrot.slane %v14115_v39, 7  ;;  %v22706_v22 = vld [vmem:[#allocation33_spill] sm:$0xff]  ;;  %v17196_v1 = vld.sshfl [vmem:[%s18740_s21 + $0x7c] sm:$0x13 pattern:$0x76325410]  ;;  %18181 = vmatpush3.bf16.msra.mxu1 %v21560_v38  ;;  %v14090_v31 = vsel %vm18833_vm9, %v14085_v0, %v14089_v36  ;;  %v14038_v3 = vcombine.high %v17194_v26, %v17194_v26  ;;  %v14046_v39 = vcombine.high %v17195_v9, %v17195_v9 }
 0x31a   : > { %v21619_v21 = vadd.f32 %v22706_v22, %v21488_v51  ;;  %22707 = vst [vmem:[#allocation11_spill] sm:$0xff] %v21622_v44  ;;  %22708 = vst [vmem:[#allocation33_spill] sm:$0xff] %v21624_v45  ;;  %v14112_v55 = vor.u32 %v14111_v4, %v14108_v6  ;;  %v17197_v14 = vld.sshfl [vmem:[%s18740_s21 + $0x80] sm:$0x13 pattern:$0x76325410]  ;;  %v14175_v7 = vcombine.low %v14076_v61, %v14090_v31  ;;  %v21630_v51 = vpop.f32.mrf.mxu0  ;;  %v21632_v22 = vpop.f32.mrf.mxu1 }
 0x31b   : > { %v14099_v19 = vrot.slane %v14098_v52, 2  ;;  %v14054_v40 = vcombine.high %v17196_v1, %v17196_v1  ;;  %v14062_v24 = vcombine.high %v17197_v14, %v17197_v14  ;;  %22709 = vst [vmem:[#allocation76_spill] sm:$0xff] %v21630_v51  ;;  %22710 = vst [vmem:[#allocation77_spill] sm:$0xff] %v21632_v22  ;;  %v14120_v58 = vshrl.u32 %v17194_v26, 16 }
 0x31c   : > { %v14113_v44 = vrot.slane %v14112_v55, 2  ;;  %v14123_v45 = vshll.u32 %v17194_v26, 16  ;;  %v14129_v23 = vshll.u32 %v14038_v3, 16  ;;  %v14183_v36 = vrot.slane %v14175_v7, %v18742_v12  ;;  %v21637_v6 = vpop.f32.mrf.mxu0  ;;  %v21639_v61 = vpop.f32.mrf.mxu1 }
 0x31d   : > { %v14104_v38 = vsel %vm18833_vm9, %v14099_v19, %v14103_v10  ;;  %v14134_v4 = vshrl.u32 %v17195_v9, 16  ;;  %v14137_v0 = vshll.u32 %v17195_v9, 16  ;;  %22711 = vst [vmem:[#allocation78_spill] sm:$0xff] %v21637_v6  ;;  %22712 = vst [vmem:[#allocation79_spill] sm:$0xff] %v21639_v61  ;;  %v14122_v31 = vrot.slane %v14120_v58, 6 }
 0x31e   : > { %v14118_v52 = vsel %vm18833_vm9, %v14113_v44, %v14117_v62  ;;  %v14125_v22 = vrot.slane %v14123_v45, 7  ;;  %v14131_v55 = vrot.slane %v14129_v23, 7  ;;  %v14143_v46 = vshll.u32 %v14046_v39, 16  ;;  %v21643_v20 = vpop.f32.mrf.mxu0  ;;  %v21645_v10 = vpop.f32.mrf.mxu1 }
 0x31f   : > { %v14176_v51 = vcombine.low %v14104_v38, %v14118_v52  ;;  %v14136_v26 = vrot.slane %v14134_v4, 6  ;;  %v14139_v3 = vrot.slane %v14137_v0, 7  ;;  %v14148_v9 = vshrl.u32 %v17196_v1, 16 }
 0x320   : > { %v14126_v19 = vor.u32 %v14125_v22, %v14122_v31  ;;  %v14151_v7 = vshll.u32 %v17196_v1, 16  ;;  %v14157_v6 = vshll.u32 %v14054_v40, 16  ;;  %v14145_v54 = vrot.slane %v14143_v46, 7  ;;  %v21648_v38 = vpop.f32.mrf.mxu0  ;;  %v21650_v39 = vpop.f32.mrf.mxu1 }
 0x321   : > { %v14190_v61 = vrot.slane %v14176_v51, %v18742_v12  ;;  %v14140_v34 = vor.u32 %v14139_v3, %v14136_v26  ;;  %v14162_v62 = vshrl.u32 %v17197_v14, 16  ;;  %v14150_v44 = vrot.slane %v14148_v9, 6  ;;  %v22713_v51 = vld [vmem:[#allocation34_spill] sm:$0xff] }
 0x322   : > { %v14127_v58 = vrot.slane %v14126_v19, 2  ;;  %v14153_v23 = vrot.slane %v14151_v7, 7  ;;  %v14159_v45 = vrot.slane %v14157_v6, 7  ;;  %v14165_v52 = vshll.u32 %v17197_v14, 16  ;;  %v17200_v6 = vld [vmem:[%s22463_s1 + $0x5e] sm:$0x3]  ;;  %v21678_v9 = vpop.f32.mrf.mxu0  ;;  %v21680_v7 = vpop.f32.mrf.mxu1 }
 0x323   : > { %v14191_v4 = vcombine.low %v14183_v36, %v14190_v61  ;;  %v14141_v0 = vrot.slane %v14140_v34, 2  ;;  %v14164_v22 = vrot.slane %v14162_v62, 6  ;;  %v14171_v46 = vshll.u32 %v14062_v24, 16  ;;  %v22714_v36 = vld [vmem:[#allocation35_spill] sm:$0xff]  ;;  %22715 = vst [vmem:[#allocation34_spill] sm:$0xff] %v21678_v9 }
 0x324   : > { %v14132_v1 = vsel %vm18833_vm9, %v14127_v58, %v14131_v55  ;;  %v14154_v40 = vor.u32 %v14153_v23, %v14150_v44  ;;  %v21656_v31 = vadd.f32 %v22713_v51, %v21537_v15  ;;  %v14167_v14 = vrot.slane %v14165_v52, 7  ;;  %v17211_v15 = vld.sshfl [vmem:[%s18740_s21 + $0x90] sm:$0x13 pattern:$0x76325410]  ;;  %22716 = vst [vmem:[#allocation35_spill] sm:$0xff] %v21680_v7 }
 0x325   : > { %18182 = vmatprep.mubr.msk.bf16.mxu1 %vm349_vm2, %v14191_v4  ;;  %v14146_v34 = vsel %vm18833_vm9, %v14141_v0, %v14145_v54  ;;  %v21666_v61 = vadd.f32 %v22714_v36, %v21541_v2  ;;  %v21670_v24 = vadd.f32 %v21064_v50, %v21545_v28  ;;  %v14173_v26 = vrot.slane %v14171_v46, 7  ;;  %v17212_v54 = vld.sshfl [vmem:[%s18740_s21 + $0x94] sm:$0x13 pattern:$0x76325410]  ;;  %v21703_v46 = vpop.f32.mrf.mxu1 }
 0x326   : > { %v14155_v55 = vrot.slane %v14154_v40, 2  ;;  %v14192_v3 = vcombine.low %v14132_v1, %v14146_v34  ;;  %v21675_v19 = vadd.f32 %v21066_v35, %v21552_v33  ;;  %v14168_v2 = vor.u32 %v14167_v14, %v14164_v22  ;;  %v17213_v58 = vld.sshfl [vmem:[%s18740_s21 + $0x98] sm:$0x13 pattern:$0x76325410]  ;;  %22718 = vst [vmem:[#allocation81_spill] sm:$0xff] %v21703_v46 }
 0x327   : > { %v21683_v62 = vand.u32 %v17200_v6, %v18732_v5  ;;  %v21687_v50 = vadd.f32 %v21075_v16, %v21564_v43  ;;  %v21691_v28 = vadd.f32 %v21077_v18, %v21571_v56  ;;  %v17214_v44 = vld.sshfl [vmem:[%s18740_s21 + $0x9c] sm:$0x13 pattern:$0x76325410]  ;;  %v14349_v23 = vcombine.high %v17211_v15, %v17211_v15 }
 0x328   : > { %v14160_v35 = vsel %vm18833_vm9, %v14155_v55, %v14159_v45  ;;  %v14200_v33 = vrot.slane %v14192_v3, %v18742_v12  ;;  %v14357_v0 = vcombine.high %v17212_v54, %v17212_v54  ;;  %v14169_v22 = vrot.slane %v14168_v2, 2  ;;  %v21701_v45 = vpop.f32.mrf.mxu0 }
 0x329   : > { %18186 = vmatprep.subr.bf16.mxu0 %v21683_v62  ;;  %18192 = vmatprep.subr.bf16.mxu1 %v21683_v62  ;;  %v14365_v16 = vcombine.high %v17213_v58, %v17213_v58  ;;  %v14373_v43 = vcombine.high %v17214_v44, %v17214_v44  ;;  %v14407_v52 = vshrl.u32 %v17211_v15, 16  ;;  %v14410_v18 = vshll.u32 %v17211_v15, 16  ;;  %22717 = vst [vmem:[#allocation80_spill] sm:$0xff] %v21701_v45 }
 0x32a   : > { %18187 = vmatpush3.bf16.msra.mxu0 %v21683_v62  ;;  %v14416_v56 = vshll.u32 %v14349_v23, 16  ;;  %v14421_v1 = vshrl.u32 %v17212_v54, 16  ;;  %v14424_v40 = vshll.u32 %v17212_v54, 16  ;;  %v14174_v51 = vsel %vm18833_vm9, %v14169_v22, %v14173_v26 }
 0x32b   : > { %v14409_v6 = vrot.slane %v14407_v52, 6  ;;  %v14430_v34 = vshll.u32 %v14357_v0, 16  ;;  %v14435_v14 = vshrl.u32 %v17213_v58, 16  ;;  %v14193_v36 = vcombine.low %v14160_v35, %v14174_v51  ;;  %v21711_v35 = vpop.f32.mrf.mxu0  ;;  %v21713_v0 = vpop.f32.mrf.mxu1 }
 0x32c   : > { %v14412_v55 = vrot.slane %v14410_v18, 7  ;;  %v14418_v3 = vrot.slane %v14416_v56, 7  ;;  %v14423_v2 = vrot.slane %v14421_v1, 6  ;;  %v14426_v7 = vrot.slane %v14424_v40, 7  ;;  %22719 = vst [vmem:[#allocation82_spill] sm:$0xff] %v21711_v35  ;;  %22720 = vst [vmem:[#allocation83_spill] sm:$0xff] %v21713_v0 }
 0x32d   : > { %v14432_v15 = vrot.slane %v14430_v34, 7  ;;  %v14437_v23 = vrot.slane %v14435_v14, 6  ;;  %v14438_v9 = vshll.u32 %v17213_v58, 16  ;;  %18189 = vmatmul.mubr.msk.bf16.vlgmr.msra.gmra.mxu0 %vm349_vm2, %v21601_v47  ;;  %v14207_v54 = vrot.slane %v14193_v36, %v18742_v12 }
 0x32e   : > { %v14413_v46 = vor.u32 %v14412_v55, %v14409_v6  ;;  %v14444_v26 = vshll.u32 %v14365_v16, 16  ;;  %v14449_v22 = vshrl.u32 %v17214_v44, 16  ;;  %18200 = vmatprep.mubr.msk.bf16.mxu0 %vm349_vm2, %v14191_v4  ;;  %v14427_v52 = vor.u32 %v14426_v7, %v14423_v2  ;;  %v17215_v1 = vld.sshfl [vmem:[%s18740_s21 + $0xa0] sm:$0x13 pattern:$0x76325410]  ;;  %v21732_v2 = vpop.f32.mrf.mxu0 }
 0x32f   : > { %v14440_v18 = vrot.slane %v14438_v9, 7  ;;  %v14452_v56 = vshll.u32 %v17214_v44, 16  ;;  %v14458_v58 = vshll.u32 %v14373_v43, 16  ;;  %v21716_v40 = vcombine.low %v14200_v33, %v14207_v54  ;;  %v22721_v7 = vld [vmem:[#allocation12_spill] sm:$0xff]  ;;  %v22722_v33 = vld [vmem:[#allocation13_spill] sm:$0xff] }
 0x330   : > { %v14414_v47 = vrot.slane %v14413_v46, 2  ;;  %v14446_v51 = vrot.slane %v14444_v26, 7  ;;  %v14451_v34 = vrot.slane %v14449_v22, 6  ;;  %v14428_v16 = vrot.slane %v14427_v52, 2  ;;  %22723 = vst [vmem:[#allocation12_spill] sm:$0xff] %v21732_v2 }
 0x331   : > { %v17216_v6 = vld.sshfl [vmem:[%s18740_s21 + $0xa4] sm:$0x13 pattern:$0x76325410]  ;;  %v14441_v14 = vor.u32 %v14440_v18, %v14437_v23  ;;  %v14454_v4 = vrot.slane %v14452_v56, 7  ;;  %v14460_v36 = vrot.slane %v14458_v58, 7  ;;  %18183 = vmatmul.mubr.msk.bf16.vlgmr.msra.gmra.mxu1 %vm349_vm2, %v21716_v40  ;;  %v21725_v44 = vadd.f32 %v22721_v7, %v21615_v11  ;;  %v21734_v23 = vpop.f32.mrf.mxu1 }
 0x332   : > { %v14419_v9 = vsel %vm18833_vm9, %v14414_v47, %v14418_v3  ;;  %v21729_v43 = vadd.f32 %v22722_v33, %v21619_v21  ;;  %v17217_v46 = vld.sshfl [vmem:[%s18740_s21 + $0xa8] sm:$0x13 pattern:$0x76325410]  ;;  %v14381_v55 = vcombine.high %v17215_v1, %v17215_v1  ;;  %22724 = vst [vmem:[#allocation13_spill] sm:$0xff] %v21734_v23  ;;  %18193 = vmatpush3.bf16.msra.mxu1 %v21683_v62  ;;  %v14463_v21 = vshrl.u32 %v17215_v1, 16 }
 0x333   : > { %v14433_v54 = vsel %vm18833_vm9, %v14428_v16, %v14432_v15  ;;  %v14442_v3 = vrot.slane %v14441_v14, 2  ;;  %v14455_v26 = vor.u32 %v14454_v4, %v14451_v34  ;;  %v17218_v22 = vld.sshfl [vmem:[%s18740_s21 + $0xac] sm:$0x13 pattern:$0x76325410]  ;;  %v14389_v11 = vcombine.high %v17216_v6, %v17216_v6  ;;  %v21743_v15 = vpop.f32.mrf.mxu0  ;;  %v21745_v34 = vpop.f32.mrf.mxu1 }
 0x334   : > { %v14518_v52 = vcombine.low %v14419_v9, %v14433_v54  ;;  %v14397_v18 = vcombine.high %v17217_v46, %v17217_v46  ;;  %v14405_v56 = vcombine.high %v17218_v22, %v17218_v22  ;;  %v14466_v7 = vshll.u32 %v17215_v1, 16  ;;  %22725 = vst [vmem:[#allocation84_spill] sm:$0xff] %v21743_v15  ;;  %22726 = vst [vmem:[#allocation85_spill] sm:$0xff] %v21745_v34 }
 0x335   : > { %v14447_v58 = vsel %vm18833_vm9, %v14442_v3, %v14446_v51  ;;  %v14456_v47 = vrot.slane %v14455_v26, 2  ;;  %v14472_v33 = vshll.u32 %v14381_v55, 16  ;;  %v14465_v62 = vrot.slane %v14463_v21, 6  ;;  %v21750_v45 = vpop.f32.mrf.mxu0 }
 0x336   : > { %v14526_v23 = vrot.slane %v14518_v52, %v18742_v12  ;;  %v14477_v2 = vshrl.u32 %v17216_v6, 16  ;;  %v14480_v0 = vshll.u32 %v17216_v6, 16  ;;  %v14468_v14 = vrot.slane %v14466_v7, 7 }
 0x337   : > { %v14461_v16 = vsel %vm18833_vm9, %v14456_v47, %v14460_v36  ;;  %v14474_v4 = vrot.slane %v14472_v33, 7  ;;  %v14486_v9 = vshll.u32 %v14389_v11, 16  ;;  %v14491_v1 = vshrl.u32 %v17217_v46, 16  ;;  %v21752_v36 = vpop.f32.mrf.mxu1 }
 0x338   : > { %v14519_v54 = vcombine.low %v14447_v58, %v14461_v16  ;;  %v14479_v51 = vrot.slane %v14477_v2, 6  ;;  %v14482_v3 = vrot.slane %v14480_v0, 7  ;;  %v14469_v55 = vor.u32 %v14468_v14, %v14465_v62  ;;  %v17232_v47 = vld.sshfl [vmem:[%s18740_s21 + $0xc] sm:$0x12 pattern:$0x76325410] }
 0x339   : > { %v14488_v26 = vrot.slane %v14486_v9, 7  ;;  %v14494_v52 = vshll.u32 %v17217_v46, 16  ;;  %v14500_v21 = vshll.u32 %v14397_v18, 16  ;;  %v14493_v34 = vrot.slane %v14491_v1, 6 }
 0x33a   : > { %v14533_v6 = vrot.slane %v14519_v54, %v18742_v12  ;;  %v14483_v15 = vor.u32 %v14482_v3, %v14479_v51  ;;  %v14505_v35 = vshrl.u32 %v17218_v22, 16  ;;  %v14470_v11 = vrot.slane %v14469_v55, 2  ;;  %v17233_v62 = vld.sshfl [vmem:[%s18740_s21 + $0x10] sm:$0x12 pattern:$0x76325410] }
 0x33b   : > { %v14496_v58 = vrot.slane %v14494_v52, 7  ;;  %v14502_v2 = vrot.slane %v14500_v21, 7  ;;  %v14508_v0 = vshll.u32 %v17218_v22, 16  ;;  %v14514_v18 = vshll.u32 %v14405_v56, 16  ;;  %v17221_v22 = vld [vmem:[%s22463_s1 + $0x60] sm:$0x3] }
 0x33c   : > { %v14534_v7 = vcombine.low %v14526_v23, %v14533_v6  ;;  %v14484_v33 = vrot.slane %v14483_v15, 2  ;;  %v14507_v46 = vrot.slane %v14505_v35, 6  ;;  %v14475_v16 = vsel %vm18833_vm9, %v14470_v11, %v14474_v4  ;;  %v17235_v55 = vld.sshfl [vmem:[%s18740_s21 + $0x18] sm:$0x12 pattern:$0x76325410] }
 0x33d   : > { %v14497_v14 = vor.u32 %v14496_v58, %v14493_v34  ;;  %v14510_v9 = vrot.slane %v14508_v0, 7  ;;  %v21760_v54 = vadd.f32 %v21130_v30, %v21656_v31  ;;  %v14516_v23 = vrot.slane %v14514_v18, 7  ;;  %v17234_v30 = vld.sshfl [vmem:[%s18740_s21 + $0x14] sm:$0x12 pattern:$0x76325410]  ;;  %v21777_v31 = vpop.f32.mrf.mxu0  ;;  %v21779_v34 = vpop.f32.mrf.mxu1 }
 0x33e   : > { %18194 = vmatprep.mubr.msk.bf16.mxu1 %vm349_vm2, %v14534_v7  ;;  %v14489_v35 = vsel %vm18833_vm9, %v14484_v33, %v14488_v26  ;;  %v21770_v56 = vadd.f32 %v21132_v53, %v21666_v61  ;;  %v21774_v15 = vadd.f32 %v21151_v63, %v21670_v24  ;;  %v21783_v1 = vadd.f32 %v21153_v57, %v21675_v19  ;;  %v17236_v21 = vld.sshfl [vmem:[%s18740_s21 + $0x1c] sm:$0x12 pattern:$0x76325410] }
 0x33f   : > { %v14498_v4 = vrot.slane %v14497_v14, 2  ;;  %v14511_v51 = vor.u32 %v14510_v9, %v14507_v46  ;;  %v14535_v3 = vcombine.low %v14475_v16, %v14489_v35  ;;  %v14614_v53 = vand.u32 %v17221_v22, %v18732_v5  ;;  %v17237_v11 = vld.sshfl [vmem:[%s18740_s21 + $0x20] sm:$0x12 pattern:$0x76325410] }
 0x340   : > { %v21789_v63 = vadd.f32 %v21159_v17, %v21687_v50  ;;  %v21793_v61 = vadd.f32 %v21161_v37, %v21691_v28  ;;  %v14692_v24 = vcombine.high %v17232_v47, %v17232_v47  ;;  %v14700_v19 = vcombine.high %v17233_v62, %v17233_v62  ;;  %v17238_v58 = vld.sshfl [vmem:[%s18740_s21 + $0x24] sm:$0x12 pattern:$0x76325410]  ;;  %v21801_v37 = vpop.f32.mrf.mxu0  ;;  %v21803_v28 = vpop.f32.mrf.mxu1 }
 0x341   : > { %v14503_v26 = vsel %vm18833_vm9, %v14498_v4, %v14502_v2  ;;  %v14512_v52 = vrot.slane %v14511_v51, 2  ;;  %v14543_v57 = vrot.slane %v14535_v3, %v18742_v12  ;;  %18198 = vmatprep.subr.bf16.mxu0 %v14614_v53  ;;  %18204 = vmatprep.subr.bf16.mxu1 %v14614_v53  ;;  %v14708_v5 = vcombine.high %v17234_v30, %v17234_v30  ;;  %v17239_v14 = vld.sshfl [vmem:[%s18740_s21 + $0x28] sm:$0x12 pattern:$0x76325410]  ;;  %s271_s21 = scalar_lea.vmem [#allocation2], %s16188_s29 }
 0x342   : > { %v14716_v6 = vcombine.high %v17235_v55, %v17235_v55  ;;  %v17240_v17 = vrot.slane %v17232_v47, 9  ;;  %v14751_v50 = vrot.slane %v14692_v24, 7  ;;  %18199 = vmatpush3.bf16.msra.mxu0 %v14614_v53  ;;  %v17241_v0 = vrot.slane %v17233_v62, 9  ;;  %v21823_v24 = vpop.f32.mrf.mxu1  ;;  %s16122_s8 = sshll.u32 %s271_s21, 4  ;;  %s22418_s8 = int_to_ptr.vmem [resolvable:$true] %s16122_s8 }
 0x343   : > { %v14517_v2 = vsel %vm18833_vm9, %v14512_v52, %v14516_v23  ;;  %v14755_v7 = vrot.slane %v14700_v19, 7  ;;  %v17242_v33 = vrot.slane %v17234_v30, 9  ;;  %v14759_v16 = vrot.slane %v14708_v5, 7  ;;  %v22727_v23 = vld [vmem:[#allocation14_spill] sm:$0xff]  ;;  %s18567_s16 = scalar_lea.vmem %s22418_s8, 256  ;;  %p18574_p0 = scmp.lt.s32.totalorder %s22418_s8, %s18572_s18 }
 0x344   : > { %v14536_v46 = vcombine.low %v14503_v26, %v14517_v2  ;;  %v14752_v18 = vsel %vm18990_vm15, %v17240_v17, %v14751_v50  ;;  %v17243_v47 = vrot.slane %v17235_v55, 9  ;;  %v14763_v22 = vrot.slane %v14716_v6, 7  ;;  %v21821_v55 = vpop.f32.mrf.mxu0  ;;  %p18568_p11 = scmp.ne.s32.totalorder %s22418_s8, %s18567_s16  ;;  %p18575_p1 = scmp.lt.s32.totalorder %s18573_s19, %s18567_s16 }
 0x345   : > { %v14756_v9 = vsel %vm18990_vm15, %v17241_v0, %v14755_v7  ;;  %v7383_v35 = vadd.f32 %v21169_v27, %v21725_v44  ;;  %v7668_v4 = vadd.f32 %v22727_v23, %v21729_v43  ;;  %v14760_v30 = vsel %vm18990_vm15, %v17242_v33, %v14759_v16  ;;  %18201 = vmatmul.mubr.msk.bf16.vlgmr.msra.gmra.mxu0 %vm349_vm2, %v21716_v40  ;;  %v21832_v16 = vpop.f32.mrf.mxu1 }
 0x346   : > { %v14550_v62 = vrot.slane %v14536_v46, %v18742_v12  ;;  %v14781_v51 = vcombine.low %v14752_v18, %v14756_v9  ;;  %v14724_v3 = vcombine.high %v17236_v21, %v17236_v21  ;;  %v14764_v27 = vsel %vm18990_vm15, %v17243_v47, %v14763_v22  ;;  %v21830_v18 = vpop.f32.mrf.mxu0  ;;  %v22729_v47 = vld [vmem:[#allocation16_spill] sm:$0xff]  ;;  %p18569_p12 = pnand %p18568_p11, %p18714_p5  ;;  %p18576_p2 = por %p18575_p1, %p18574_p0 }
 0x347   : > { %v14732_v44 = vcombine.high %v17237_v11, %v17237_v11  ;;  %v14740_v26 = vcombine.high %v17238_v58, %v17238_v58  ;;  %v14748_v43 = vcombine.high %v17239_v14, %v17239_v14  ;;  %v14782_v19 = vcombine.low %v14760_v30, %v14764_v27  ;;  %v22730_v30 = vld [vmem:[#allocation17_spill] sm:$0xff] }
 0x348   : > { %v14551_v52 = vcombine.low %v14543_v57, %v14550_v62  ;;  %v14789_v5 = vrot.slane %v14781_v51, %v18742_v12  ;;  %v17244_v6 = vrot.slane %v17236_v21, 9  ;;  %v14767_v17 = vrot.slane %v14724_v3, 7  ;;  %v22731_v3 = vld [vmem:[#allocation18_spill] sm:$0xff]  ;;  %p18570_p13 = pneg %p18569_p12 }
 0x349   : > { %v17245_v50 = vrot.slane %v17237_v11, 9  ;;  %v14771_v2 = vrot.slane %v14732_v44, 7  ;;  %v17246_v40 = vrot.slane %v17238_v58, 9  ;;  %v14796_v0 = vrot.slane %v14782_v19, %v18742_v12  ;;  %v22728_v11 = vld [vmem:[#allocation15_spill] sm:$0xff]  ;;  %v22734_v19 = vld [vmem:[#allocation21_spill] sm:$0xff] }
 0x34a   : > { %18195 = vmatmul.mubr.msk.bf16.vlgmr.msra.gmra.mxu1 %vm349_vm2, %v14551_v52  ;;  %v14775_v7 = vrot.slane %v14740_v26, 7  ;;  %v17247_v33 = vrot.slane %v17239_v14, 9  ;;  %v14779_v46 = vrot.slane %v14748_v43, 7  ;;  %v14768_v57 = vsel %vm18990_vm15, %v17244_v6, %v14767_v17  ;;  %v22733_v26 = vld [vmem:[#allocation20_spill] sm:$0xff]  ;;  %v21858_v6 = vpop.f32.mrf.mxu0  ;;  %v22735_v17 = vld [vmem:[#allocation22_spill] sm:$0xff]  ;;  %p18577_p3 = pnand %p18576_p2, %p18570_p13 }
 0x34b   : > { %18205 = vmatpush3.bf16.msra.mxu1 %v14614_v53  ;;  %v14772_v21 = vsel %vm18990_vm15, %v17245_v50, %v14771_v2  ;;  %v7381_v58 = vadd.f32 %v22728_v11, %v21760_v54  ;;  %v7666_v9 = vadd.f32 %v22729_v47, %v21770_v56  ;;  %v14797_v22 = vcombine.low %v14789_v5, %v14796_v0  ;;  %v22732_v54 = vld [vmem:[#allocation19_spill] sm:$0xff]  ;;  %v22742_v11 = vld [vmem:[#allocation38_spill] sm:$0xff] }
 0x34c   : > { %v14776_v14 = vsel %vm18990_vm15, %v17246_v40, %v14775_v7  ;;  %v14780_v23 = vsel %vm18990_vm15, %v17247_v33, %v14779_v46  ;;  %v14798_v53 = vcombine.low %v14768_v57, %v14772_v21  ;;  %v7384_v51 = vadd.f32 %v22730_v30, %v21774_v15  ;;  %v21860_v15 = vpop.f32.mrf.mxu1  ;;  %v22737_v40 = vld [vmem:[#allocation23_spill] sm:$0xff]  ;;  %v22738_v7 = vld [vmem:[#allocation24_spill] sm:$0xff]  ;;  %v22739_v46 = vld [vmem:[#allocation25_spill] sm:$0xff] }
 0x34d   : > { %v14799_v62 = vcombine.low %v14776_v14, %v14780_v23  ;;  %v7669_v27 = vadd.f32 %v22731_v3, %v21783_v1  ;;  %v7382_v44 = vadd.f32 %v22732_v54, %v21789_v63  ;;  %18206 = vmatprep.mubr.msk.bf16.mxu1 %vm349_vm2, %v14797_v22  ;;  %v7667_v43 = vadd.f32 %v22733_v26, %v21793_v61  ;;  %v22736_v63 = vld [vmem:[#allocation36_spill] sm:$0xff]  ;;  %v22740_v57 = vld [vmem:[#allocation37_spill] sm:$0xff]  ;;  %v22743_v22 = vld [vmem:[#allocation39_spill] sm:$0xff] }
 0x34e   : > { %v14806_v56 = vrot.slane %v14798_v53, %v18742_v12  ;;  %v7726_v52 = vadd.f32 %v21247_v32, %v7383_v35  ;;  %v8011_v5 = vadd.f32 %v22734_v19, %v7668_v4  ;;  %v7724_v50 = vadd.f32 %v22735_v17, %v7381_v58  ;;  %v22741_v35 = vld [vmem:[#allocation26_spill] sm:$0xff]  ;;  %v22744_v23 = vld [vmem:[#allocation40_spill] sm:$0xff]  ;;  %v22745_v58 = vld [vmem:[#allocation41_spill] sm:$0xff]  ;;  %v21879_v26 = vpop.f32.mrf.mxu1 }
 0x34f   : > { %v14813_v1 = vrot.slane %v14799_v62, %v18742_v12  ;;  %v8009_v2 = vadd.f32 %v22736_v63, %v7666_v9  ;;  %v7727_v0 = vadd.f32 %v22737_v40, %v7384_v51  ;;  %v8012_v33 = vadd.f32 %v22738_v7, %v7669_v27  ;;  %v22746_v9 = vld [vmem:[#allocation42_spill] sm:$0xff]  ;;  %v22747_v51 = vld [vmem:[#allocation27_spill] sm:$0xff]  ;;  %v22748_v27 = vld [vmem:[#allocation28_spill] sm:$0xff] }
 0x350   : > { %v7725_v61 = vadd.f32 %v22739_v46, %v7382_v44  ;;  %v8010_v32 = vadd.f32 %v22740_v57, %v7667_v43  ;;  %v8069_v4 = vadd.f32 %v22741_v35, %v7726_v52  ;;  %v8354_v47 = vadd.f32 %v22742_v11, %v8011_v5  ;;  %v21877_v44 = vpop.f32.mrf.mxu0  ;;  %v22750_v52 = vld [vmem:[#allocation44_spill] sm:$0xff]  ;;  %v22758_v11 = vld [vmem:[#allocation29_spill] sm:$0xff] }
 0x351   : > { %v14814_v21 = vcombine.low %v14806_v56, %v14813_v1  ;;  %v8067_v14 = vadd.f32 %v22743_v22, %v7724_v50  ;;  %v8352_v53 = vadd.f32 %v22744_v23, %v8009_v2  ;;  %v8070_v62 = vadd.f32 %v22745_v58, %v7727_v0  ;;  %v22749_v56 = vld [vmem:[#allocation43_spill] sm:$0xff]  ;;  %v22751_v1 = vld [vmem:[#allocation45_spill] sm:$0xff]  ;;  %v22752_v50 = vld [vmem:[#allocation46_spill] sm:$0xff] }
 0x352   : > { %v8355_v30 = vadd.f32 %v22746_v9, %v8012_v33  ;;  %v8068_v3 = vadd.f32 %v22747_v51, %v7725_v61  ;;  %v8353_v54 = vadd.f32 %v22748_v27, %v8010_v32  ;;  %v8412_v43 = vadd.f32 %v22749_v56, %v8069_v4  ;;  %v22753_v2 = vld [vmem:[#allocation47_spill] sm:$0xff]  ;;  %v22754_v33 = vld [vmem:[#allocation48_spill] sm:$0xff]  ;;  %v22755_v61 = vld [vmem:[#allocation49_spill] sm:$0xff] }
 0x353   : > { %18207 = vmatmul.mubr.msk.bf16.vlgmr.msra.gmra.mxu1 %vm349_vm2, %v14814_v21  ;;  %v8617_v19 = vadd.f32 %v22750_v52, %v8354_v47  ;;  %v8410_v5 = vadd.f32 %v21372_v25, %v8067_v14  ;;  %v8615_v17 = vadd.f32 %v22751_v1, %v8352_v53  ;;  %v8413_v63 = vadd.f32 %v22752_v50, %v8070_v62  ;;  %v22756_v32 = vld [vmem:[#allocation50_spill] sm:$0xff]  ;;  %v22757_v4 = vld [vmem:[#allocation51_spill] sm:$0xff]  ;;  %v22761_v53 = vld [vmem:[#allocation32_spill] sm:$0xff]  ;;  %v21898_v62 = vpop.f32.mrf.mxu0 }
 0x354   : > { %v8618_v40 = vadd.f32 %v22753_v2, %v8355_v30  ;;  %v8411_v0 = vadd.f32 %v21385_v48, %v8068_v3  ;;  %v8616_v7 = vadd.f32 %v21387_v59, %v8353_v54  ;;  %v8732_v46 = vadd.f32 %v22754_v33, %v8412_v43  ;;  %v22759_v47 = vld [vmem:[#allocation30_spill] sm:$0xff]  ;;  %v22760_v14 = vld [vmem:[#allocation31_spill] sm:$0xff]  ;;  %v21900_v48 = vpop.f32.mrf.mxu1  ;;  %v22762_v51 = vld [vmem:[#allocation52_spill] sm:$0xff] }
 0x355   : > { %v8842_v57 = vadd.f32 %v22755_v61, %v8617_v19  ;;  %v8730_v35 = vadd.f32 %v22756_v32, %v8410_v5  ;;  %v8840_v21 = vadd.f32 %v22757_v4, %v8615_v17  ;;  %v8733_v25 = vadd.f32 %v22758_v11, %v8413_v63  ;;  %v22763_v27 = vld [vmem:[#allocation53_spill] sm:$0xff]  ;;  %v22764_v56 = vld [vmem:[#allocation54_spill] sm:$0xff]  ;;  %v22765_v52 = vld [vmem:[#allocation55_spill] sm:$0xff]  ;;  %v18071_v32 = vpop.f32.mrf.mxu0 }
 0x356   : > { %v8843_v22 = vadd.f32 %v22759_v47, %v8618_v40  ;;  %v8731_v23 = vadd.f32 %v22760_v14, %v8411_v0  ;;  %v8841_v58 = vadd.f32 %v22761_v53, %v8616_v7  ;;  %v8957_v59 = vadd.f32 %v21455_v8, %v8732_v46  ;;  %v22766_v5 = vld [vmem:[#allocation56_spill] sm:$0xff]  ;;  %v22767_v17 = vld [vmem:[#allocation57_spill] sm:$0xff]  ;;  %v22768_v63 = vld [vmem:[#allocation58_spill] sm:$0xff] }
 0x357   : > { %v9067_v9 = vadd.f32 %v21457_v42, %v8842_v57  ;;  %v8955_v30 = vadd.f32 %v21461_v29, %v8730_v35  ;;  %v9065_v3 = vadd.f32 %v22762_v51, %v8840_v21  ;;  %v8958_v54 = vadd.f32 %v22763_v27, %v8733_v25  ;;  %v22769_v40 = vld [vmem:[#allocation59_spill] sm:$0xff]  ;;  %v22770_v0 = vld [vmem:[#allocation60_spill] sm:$0xff]  ;;  %v22771_v7 = vld [vmem:[#allocation61_spill] sm:$0xff]  ;;  %v18077_v35 = vpop.f32.mrf.mxu1 }
 0x358   : > { %v9068_v43 = vadd.f32 %v22764_v56, %v8843_v22  ;;  %v8956_v19 = vadd.f32 %v22765_v52, %v8731_v23  ;;  %v9066_v1 = vadd.f32 %v22766_v5, %v8841_v58  ;;  %v9125_v50 = vadd.f32 %v22767_v17, %v8957_v59  ;;  %v22772_v33 = vld [vmem:[#allocation62_spill] sm:$0xff]  ;;  %v22773_v4 = vld [vmem:[#allocation63_spill] sm:$0xff]  ;;  %v22774_v11 = vld [vmem:[#allocation64_spill] sm:$0xff] }
 0x359   : > { %v9410_v2 = vadd.f32 %v22768_v63, %v9067_v9  ;;  %v9123_v8 = vadd.f32 %v22769_v40, %v8955_v30  ;;  %v9408_v42 = vadd.f32 %v22770_v0, %v9065_v3  ;;  %v9126_v29 = vadd.f32 %v22771_v7, %v8958_v54  ;;  %v22775_v47 = vld [vmem:[#allocation65_spill] sm:$0xff]  ;;  %v22776_v14 = vld [vmem:[#allocation66_spill] sm:$0xff]  ;;  %v22777_v53 = vld [vmem:[#allocation8_spill] sm:$0xff]  ;;  %v11481_v7 = vpop.f32.mrf.mxu1 }
 0x35a   : > { %v9411_v46 = vadd.f32 %v22772_v33, %v9068_v43  ;;  %v9124_v61 = vadd.f32 %v21513_v60, %v8956_v19  ;;  %v9409_v57 = vadd.f32 %v21515_v41, %v9066_v1  ;;  %v9468_v21 = vadd.f32 %v22773_v4, %v9125_v50  ;;  %v22778_v59 = vld [vmem:[#allocation9_spill] sm:$0xff]  ;;  %v22779_v30 = vld [vmem:[#allocation10_spill] sm:$0xff]  ;;  %v22780_v3 = vld [vmem:[#allocation67_spill] sm:$0xff] }
 0x35b   : > { %v9753_v25 = vadd.f32 %v22774_v11, %v9410_v2  ;;  %v9466_v22 = vadd.f32 %v22775_v47, %v9123_v8  ;;  %v9751_v23 = vadd.f32 %v22776_v14, %v9408_v42  ;;  %v9469_v58 = vadd.f32 %v22777_v53, %v9126_v29  ;;  %v22781_v27 = vld [vmem:[#allocation68_spill] sm:$0xff]  ;;  %v22782_v54 = vld [vmem:[#allocation69_spill] sm:$0xff]  ;;  %v22783_v43 = vld [vmem:[#allocation70_spill] sm:$0xff]  ;;  %v11196_v42 = vpop.f32.mrf.mxu0 }
 0x35c   : > { %v9754_v9 = vadd.f32 %v22778_v59, %v9411_v46  ;;  %v9467_v51 = vadd.f32 %v22779_v30, %v9124_v61  ;;  %v9752_v60 = vadd.f32 %v22780_v3, %v9409_v57  ;;  %v9811_v41 = vadd.f32 %v22781_v27, %v9468_v21  ;;  %v22784_v19 = vld [vmem:[#allocation71_spill] sm:$0xff]  ;;  %v22785_v1 = vld [vmem:[#allocation72_spill] sm:$0xff]  ;;  %v22786_v50 = vld [vmem:[#allocation73_spill] sm:$0xff] }
 0x35d   : > { %v10096_v56 = vadd.f32 %v22782_v54, %v9753_v25  ;;  %v9809_v52 = vadd.f32 %v22783_v43, %v9466_v22  ;;  %v10094_v5 = vadd.f32 %v22784_v19, %v9751_v23  ;;  %v9812_v17 = vadd.f32 %v22785_v1, %v9469_v58  ;;  %v22787_v2 = vld [vmem:[#allocation74_spill] sm:$0xff]  ;;  %v22788_v8 = vld [vmem:[#allocation75_spill] sm:$0xff]  ;;  %v22790_v46 = vld [vmem:[#allocation33_spill] sm:$0xff] }
 0x35e   : > { %v10097_v63 = vadd.f32 %v22786_v50, %v9754_v9  ;;  %v9810_v40 = vadd.f32 %v22787_v2, %v9467_v51  ;;  %v10095_v0 = vadd.f32 %v22788_v8, %v9752_v60  ;;  %v22789_v29 = vld [vmem:[#allocation11_spill] sm:$0xff]  ;;  %v22791_v57 = vld [vmem:[#allocation76_spill] sm:$0xff]  ;;  %v22792_v21 = vld [vmem:[#allocation77_spill] sm:$0xff]  ;;  %vm15055_vm2 = vcmask 130048  }
 0x35f   : > { %v10154_v33 = vadd.f32 %v22789_v29, %v9811_v41  ;;  %v10439_v61 = vadd.f32 %v22790_v46, %v10096_v56  ;;  %v10152_v4 = vadd.f32 %v22791_v57, %v9809_v52  ;;  %v10437_v11 = vadd.f32 %v22792_v21, %v10094_v5  ;;  %v22793_v25 = vld [vmem:[#allocation78_spill] sm:$0xff]  ;;  %v22794_v22 = vld [vmem:[#allocation79_spill] sm:$0xff]  ;;  %v22797_v60 = vld [vmem:[#allocation80_spill] sm:$0xff]  ;;  %v18082_v5 = vpop.f32.mrf.mxu0 }
 0x360   : > { %v10155_v47 = vadd.f32 %v22793_v25, %v9812_v17  ;;  %v10440_v14 = vadd.f32 %v22794_v22, %v10097_v63  ;;  %v10153_v23 = vadd.f32 %v21643_v20, %v9810_v40  ;;  %v10438_v53 = vadd.f32 %v21645_v10, %v10095_v0  ;;  %v22795_v9 = vld [vmem:[#allocation34_spill] sm:$0xff]  ;;  %v22796_v51 = vld [vmem:[#allocation35_spill] sm:$0xff]  ;;  %v22798_v41 = vld [vmem:[#allocation81_spill] sm:$0xff]  ;;  %v18088_v20 = vpop.f32.mrf.mxu1 }
 0x361   : > { %v10497_v58 = vadd.f32 %v21648_v38, %v10154_v33  ;;  %v10702_v59 = vadd.f32 %v21650_v39, %v10439_v61  ;;  %v10495_v30 = vadd.f32 %v22795_v9, %v10152_v4  ;;  %v10700_v3 = vadd.f32 %v22796_v51, %v10437_v11  ;;  %v22799_v56 = vld [vmem:[#allocation82_spill] sm:$0xff]  ;;  %v22800_v52 = vld [vmem:[#allocation83_spill] sm:$0xff]  ;;  %v22801_v1 = vld [vmem:[#allocation12_spill] sm:$0xff]  ;;  %v11536_v11 = vpop.f32.mrf.mxu0 }
 0x362   : > { %v10498_v27 = vadd.f32 %v22797_v60, %v10155_v47  ;;  %v10703_v54 = vadd.f32 %v22798_v41, %v10440_v14  ;;  %v10496_v43 = vadd.f32 %v22799_v56, %v10153_v23  ;;  %v10701_v19 = vadd.f32 %v22800_v52, %v10438_v53  ;;  %v22802_v17 = vld [vmem:[#allocation13_spill] sm:$0xff]  ;;  %v22803_v50 = vld [vmem:[#allocation84_spill] sm:$0xff] }
 0x363   : > { %v10817_v10 = vadd.f32 %v22801_v1, %v10497_v58  ;;  %v10927_v38 = vadd.f32 %v22802_v17, %v10702_v59  ;;  %v10815_v39 = vadd.f32 %v22803_v50, %v10495_v30  ;;  %v22804_v63 = vld [vmem:[#allocation85_spill] sm:$0xff] }
 0x364   : > { %v10925_v2 = vadd.f32 %v22804_v63, %v10700_v3  ;;  %v10818_v40 = vadd.f32 %v21750_v45, %v10498_v27  ;;  %v10928_v8 = vadd.f32 %v21752_v36, %v10703_v54  ;;  %v10816_v0 = vadd.f32 %v21777_v31, %v10496_v43  ;;  %v11821_v31 = vpop.f32.mrf.mxu1 }
 0x365   : > { %v10926_v29 = vadd.f32 %v21779_v34, %v10701_v19  ;;  %v11042_v33 = vadd.f32 %v21801_v37, %v10817_v10  ;;  %v11152_v46 = vadd.f32 %v21803_v28, %v10927_v38  ;;  %v11040_v61 = vadd.f32 %v21821_v55, %v10815_v39 }
 0x366   : > { %v11150_v57 = vadd.f32 %v21823_v24, %v10925_v2  ;;  %v11043_v4 = vadd.f32 %v21830_v18, %v10818_v40  ;;  %v11153_v21 = vadd.f32 %v21832_v16, %v10928_v8  ;;  %v11041_v45 = vadd.f32 %v21858_v6, %v10816_v0 }
 0x367   : > { %v11151_v36 = vadd.f32 %v21860_v15, %v10926_v29  ;;  %v11210_v34 = vadd.f32 %v21877_v44, %v11042_v33  ;;  %v11495_v37 = vadd.f32 %v21879_v26, %v11152_v46  ;;  %v11208_v28 = vadd.f32 %v21898_v62, %v11040_v61  ;;  %v21986_v26 = vpop.f32.mrf.mxu0 }
 0x368   : > { %v11493_v55 = vadd.f32 %v21900_v48, %v11150_v57  ;;  %v21970_v25 = vadd.f32 %v18071_v32, %v11043_v4  ;;  %v21972_v24 = vadd.f32 %v18077_v35, %v11153_v21  ;;  %v21974_v18 = vadd.f32 %v11196_v42, %v11041_v45  ;;  %v21996_v42 = vpop.f32.mrf.mxu1 }
 0x369   : > { %v21976_v16 = vadd.f32 %v11481_v7, %v11151_v36  ;;  %v21978_v6 = vadd.f32 %v18082_v5, %v11210_v34  ;;  %v21980_v15 = vadd.f32 %v18088_v20, %v11495_v37  ;;  %v21982_v47 = vadd.f32 %v11536_v11, %v11208_v28  ;;  %v21988_v62 = vpop.f32.mrf.mxu0  ;;  %v14912_v5 = vld [vmem:[%s22467_s5] sm:$0xff] }
 0x36a   : > { %v21984_v44 = vadd.f32 %v11821_v31, %v11493_v55  ;;  %v22000_v22 = vpop.f32.mrf.mxu1  ;;  %18218 = vmatprep.mubr.msk.f32.mxu0 %vm14916_vm0, %v14912_v5 }
 0x36b   : > { %v21990_v48 = vpop.f32.mrf.mxu0 }
 0x36d   : > { %v21992_v32 = vpop.f32.mrf.mxu0 }
 0x36f   : > { %v21994_v35 = vpop.f32.mrf.mxu0 }
 0x371   : > { %v21998_v7 = vpop.f32.mrf.mxu0 }
 0x373   : > { %v22002_v14 = vpop.f32.mrf.mxu0 }
 0x374   : > { %v22004_v23 = vpop.f32.mrf.mxu1 }
 0x375   : > { %v22006_v53 = vpop.f32.mrf.mxu0 }
 0x376   : > { %v22008_v58 = vpop.f32.mrf.mxu1 }
 0x377   : > { %v22010_v59 = vpop.f32.mrf.mxu0 }
 0x378   : > { %v22012_v9 = vpop.f32.mrf.mxu1 }
 0x379   : > { %v22014_v30 = vpop.f32.mrf.mxu0 }
 0x37a   : > { %v22016_v51 = vpop.f32.mrf.mxu1 }
 0x388   : > { %v18118_v3 = vpop.f32.mrf.mxu0 }
 0x38a   : > { %v12565_v27 = vpop.f32.mrf.mxu0 }
 0x38c   : > { %v22018_v60 = vpop.f32.mrf.mxu1  ;;  %v22022_v54 = vpop.f32.mrf.mxu0 }
 0x38e   : > { %v22020_v41 = vpop.f32.mrf.mxu1  ;;  %v22026_v43 = vpop.f32.mrf.mxu0 }
 0x390   : > { %v22024_v56 = vpop.f32.mrf.mxu1 }
 0x392   : > { %v22028_v52 = vpop.f32.mrf.mxu1 }
 0x393   : > { %22805 = vst [vmem:[#allocation14_spill] sm:$0xff] %v22028_v52 }
 0x395   : > { %v22034_v20 = vpop.f32.mrf.mxu1 }
 0x397   : > { %v18130_v19 = vpop.f32.mrf.mxu0  ;;  %v22036_v10 = vpop.f32.mrf.mxu1 }
 0x399   : > { %v12885_v1 = vpop.f32.mrf.mxu0  ;;  %v22038_v38 = vpop.f32.mrf.mxu1 }
 0x39a   : > { %22806 = vst [vmem:[#allocation15_spill] sm:$0xff] %v22038_v38 }
 0x39b   : > { %v18131_v17 = vpop.f32.mrf.mxu0  ;;  %v22040_v39 = vpop.f32.mrf.mxu1 }
 0x39c   : > { %22807 = vst [vmem:[#allocation16_spill] sm:$0xff] %v22040_v39 }
 0x39d   : > { %v12888_v50 = vpop.f32.mrf.mxu0  ;;  %v22042_v2 = vpop.f32.mrf.mxu1 }
 0x39e   : > { %22808 = vst [vmem:[#allocation17_spill] sm:$0xff] %v22042_v2 }
 0x39f   : > { %v18142_v63 = vpop.f32.mrf.mxu0  ;;  %v22044_v8 = vpop.f32.mrf.mxu1 }
 0x3a0   : > { %22809 = vst [vmem:[#allocation18_spill] sm:$0xff] %v22044_v8 }
 0x3a1   : > { %v13110_v40 = vpop.f32.mrf.mxu0  ;;  %v22046_v29 = vpop.f32.mrf.mxu1 }
 0x3a2   : > { %22810 = vst [vmem:[#allocation19_spill] sm:$0xff] %v22046_v29 }
 0x3a3   : > { %v18143_v0 = vpop.f32.mrf.mxu0  ;;  %v22048_v46 = vpop.f32.mrf.mxu1 }
 0x3a4   : > { %22811 = vst [vmem:[#allocation20_spill] sm:$0xff] %v22048_v46 }
 0x3a5   : > { %v13113_v33 = vpop.f32.mrf.mxu0  ;;  %v22050_v57 = vpop.f32.mrf.mxu1 }
 0x3a6   : > { %22812 = vst [vmem:[#allocation21_spill] sm:$0xff] %v22050_v57 }
 0x3a7   : > { %v18154_v61 = vpop.f32.mrf.mxu0  ;;  %v22052_v21 = vpop.f32.mrf.mxu1 }
 0x3a8   : > { %22813 = vst [vmem:[#allocation22_spill] sm:$0xff] %v22052_v21 }
 0x3a9   : > { %v13278_v4 = vpop.f32.mrf.mxu0  ;;  %v22054_v36 = vpop.f32.mrf.mxu1 }
 0x3aa   : > { %22814 = vst [vmem:[#allocation36_spill] sm:$0xff] %v22054_v36 }
 0x3ab   : > { %v18155_v45 = vpop.f32.mrf.mxu0  ;;  %v22056_v31 = vpop.f32.mrf.mxu1 }
 0x3ac   : > { %22815 = vst [vmem:[#allocation23_spill] sm:$0xff] %v22056_v31 }
 0x3ad   : > { %v13281_v11 = vpop.f32.mrf.mxu0 }
 0x3ba   : > { %v18166_v34 = vpop.f32.mrf.mxu0 }
 0x3bc   : > { %v13621_v28 = vpop.f32.mrf.mxu0 }
 0x3be   : > { %v18167_v5 = vpop.f32.mrf.mxu0 }
 0x3bf   : > { %v22058_v37 = vpop.f32.mrf.mxu1 }
 0x3c0   : > { %22816 = vst [vmem:[#allocation24_spill] sm:$0xff] %v22058_v37  ;;  %v13624_v49 = vpop.f32.mrf.mxu0  ;;  %v11896_v37 = vadd.f32 %v21990_v48, %v21978_v6 }
 0x3c1   : > { %v22060_v55 = vpop.f32.mrf.mxu1 }
 0x3c2   : > { %22817 = vst [vmem:[#allocation25_spill] sm:$0xff] %v22060_v55 }
 0x3c3   : > { %v22062_v13 = vpop.f32.mrf.mxu1 }
 0x3c4   : > { %22818 = vst [vmem:[#allocation37_spill] sm:$0xff] %v22062_v13  ;;  %v11554_v13 = vadd.f32 %v21986_v26, %v21970_v25 }
 0x3c5   : > { %v22064_v12 = vpop.f32.mrf.mxu1 }
 0x3c6   : > { %22819 = vst [vmem:[#allocation26_spill] sm:$0xff] %v22064_v12  ;;  %v11894_v12 = vadd.f32 %v21992_v32, %v21982_v47 }
 0x3c8   : > { %v12237_v38 = vadd.f32 %v22006_v53, %v11894_v12 }
 0x3ca   : > { %v12580_v26 = vadd.f32 %v12565_v27, %v12237_v38  ;;  %v12181_v27 = vadd.f32 %v22004_v23, %v21980_v15  ;;  %v11837_v15 = vadd.f32 %v22000_v22, %v21976_v16 }
 0x3d3   : > { %v18178_v46 = vpop.f32.mrf.mxu0 }
 0x3d5   : > { %v13964_v29 = vpop.f32.mrf.mxu0 }
 0x3d7   : > { %v18179_v39 = vpop.f32.mrf.mxu0 }
 0x3d8   : > { %v22066_v21 = vpop.f32.mrf.mxu1 }
 0x3d9   : > { %22820 = vst [vmem:[#allocation38_spill] sm:$0xff] %v22066_v21  ;;  %v13967_v57 = vpop.f32.mrf.mxu0  ;;  %v12239_v21 = vadd.f32 %v22002_v14, %v11896_v37  ;;  %v12900_v14 = vadd.f32 %v12885_v1, %v12580_v26 }
 0x3da   : > { %v22068_v36 = vpop.f32.mrf.mxu1 }
 0x3db   : > { %22821 = vst [vmem:[#allocation39_spill] sm:$0xff] %v22068_v36  ;;  %v11552_v36 = vadd.f32 %v21988_v62, %v21974_v18  ;;  %v12582_v52 = vadd.f32 %v18118_v3, %v12239_v21  ;;  %v13125_v53 = vadd.f32 %v13110_v40, %v12900_v14 }
 0x3dc   : > { %v22070_v31 = vpop.f32.mrf.mxu1 }
 0x3dd   : > { %22822 = vst [vmem:[#allocation40_spill] sm:$0xff] %v22070_v31  ;;  %v11897_v31 = vadd.f32 %v21994_v35, %v11554_v13  ;;  %v12902_v2 = vadd.f32 %v18130_v19, %v12582_v52 }
 0x3de   : > { %v22074_v55 = vpop.f32.mrf.mxu1 }
 0x3df   : > { %22823 = vst [vmem:[#allocation41_spill] sm:$0xff] %v22074_v55  ;;  %v11895_v55 = vadd.f32 %v21998_v7, %v11552_v36  ;;  %v12240_v25 = vadd.f32 %v22010_v59, %v11897_v31  ;;  %v13127_v18 = vadd.f32 %v18142_v63, %v12902_v2  ;;  %v13293_v36 = vadd.f32 %v13278_v4, %v13125_v53  ;;  %v22825_v31 = vld [vmem:[#allocation14_spill] sm:$0xff]  ;;  %v22832_v53 = vld [vmem:[#allocation24_spill] sm:$0xff] }
 0x3e1   : > { %v12238_v47 = vadd.f32 %v22014_v30, %v11895_v55  ;;  %v12583_v32 = vadd.f32 %v22022_v54, %v12240_v25  ;;  %v13295_v3 = vadd.f32 %v18154_v61, %v13127_v18  ;;  %v13636_v1 = vadd.f32 %v13621_v28, %v13293_v36  ;;  %v22830_v18 = vld [vmem:[#allocation19_spill] sm:$0xff] }
 0x3e3   : > { %v12581_v12 = vadd.f32 %v22026_v43, %v12238_v47  ;;  %v12903_v35 = vadd.f32 %v18131_v17, %v12583_v32  ;;  %v13638_v59 = vadd.f32 %v18166_v34, %v13295_v3  ;;  %v11839_v43 = vadd.f32 %v21996_v42, %v21972_v24  ;;  %v22829_v32 = vld [vmem:[#allocation16_spill] sm:$0xff] }
 0x3e4   : > { %v12179_v17 = vadd.f32 %v22008_v58, %v21984_v44  ;;  %v13979_v40 = vadd.f32 %v13964_v29, %v13636_v1  ;;  %v22111_v44 = vld [vmem:[%s22464_s2] ss:$0 sm:$0xff]  ;;  %v12180_v29 = vadd.f32 %v22016_v51, %v11837_v15  ;;  %v22826_v51 = vld [vmem:[#allocation15_spill] sm:$0xff] }
 0x3e5   : > { %v12901_v21 = vadd.f32 %v12888_v50, %v12581_v12  ;;  %v13128_v7 = vadd.f32 %v18143_v0, %v12903_v35  ;;  %v13981_v38 = vadd.f32 %v18178_v46, %v13638_v59  ;;  %v12524_v50 = vadd.f32 %v22018_v60, %v12181_v27  ;;  %v22831_v12 = vld [vmem:[#allocation22_spill] sm:$0xff] }
 0x3e6   : > { %v12182_v23 = vadd.f32 %v22012_v9, %v11839_v43  ;;  %v22824_v9 = vld [vmem:[#allocation17_spill] sm:$0xff]  ;;  %v12523_v34 = vadd.f32 %v22825_v31, %v12180_v29 }
 0x3e7   : > { %v13126_v52 = vadd.f32 %v13113_v33, %v12901_v21  ;;  %v13296_v19 = vadd.f32 %v18155_v45, %v13128_v7  ;;  %v12522_v33 = vadd.f32 %v22020_v41, %v12179_v17  ;;  %v12787_v46 = vadd.f32 %v22034_v20, %v12524_v50  ;;  %v22120_v20 = vld [vmem:[%s22465_s3] ss:$0 sm:$0xff]  ;;  %v22836_v17 = vld [vmem:[#allocation38_spill] sm:$0xff] }
 0x3e8   : > { %v12525_v16 = vadd.f32 %v22024_v56, %v12182_v23  ;;  %v22827_v56 = vld [vmem:[#allocation18_spill] sm:$0xff]  ;;  %v12786_v14 = vadd.f32 %v22829_v32, %v12523_v34  ;;  %v22838_v23 = vld [vmem:[#allocation37_spill] sm:$0xff] }
 0x3e9   : > { %v13294_v63 = vadd.f32 %v13281_v11, %v13126_v52  ;;  %v13639_v2 = vadd.f32 %v18167_v5, %v13296_v19  ;;  %v12785_v22 = vadd.f32 %v22036_v10, %v12522_v33  ;;  %v13012_v41 = vadd.f32 %v22824_v9, %v12787_v46  ;;  %v22828_v10 = vld [vmem:[#allocation21_spill] sm:$0xff]  ;;  %v22834_v19 = vld [vmem:[#allocation36_spill] sm:$0xff]  ;;  %v22839_v46 = vld [vmem:[#allocation39_spill] sm:$0xff] }
 0x3ea   : > { %v12788_v37 = vadd.f32 %v22826_v51, %v12525_v16  ;;  %v22841_v16 = vld [vmem:[#allocation40_spill] sm:$0xff] }
 0x3eb   : > { %v13637_v42 = vadd.f32 %v13624_v49, %v13294_v63  ;;  %v13982_v58 = vadd.f32 %v18179_v39, %v13639_v2  ;;  %v13010_v28 = vadd.f32 %v22827_v56, %v12785_v22  ;;  %v13237_v55 = vadd.f32 %v22828_v10, %v13012_v41 }
 0x3ed   : > { %v18190_v8 = vpop.f32.mrf.mxu0  ;;  %v13980_v45 = vadd.f32 %v13967_v57, %v13637_v42  ;;  %v13235_v35 = vadd.f32 %v22831_v12, %v13010_v28  ;;  %v13580_v3 = vadd.f32 %v22832_v53, %v13237_v55 }
 0x3ee   : > { %v14324_v0 = vadd.f32 %v18190_v8, %v13981_v38  ;;  %v22835_v38 = vld [vmem:[#allocation25_spill] sm:$0xff] }
 0x3ef   : > { %v14307_v48 = vpop.f32.mrf.mxu0  ;;  %v13578_v43 = vadd.f32 %v22835_v38, %v13235_v35  ;;  %v13923_v50 = vadd.f32 %v22836_v17, %v13580_v3 }
 0x3f0   : > { %v14322_v60 = vadd.f32 %v14307_v48, %v13979_v40 }
 0x3f1   : > { %v22085_v6 = vpop.f32.mrf.mxu1  ;;  %v18191_v13 = vpop.f32.mrf.mxu0 }
 0x3f2   : > { %v14325_v11 = vadd.f32 %v18191_v13, %v13982_v58  ;;  %v13013_v13 = vadd.f32 %v22830_v18, %v12788_v37  ;;  %v14266_v42 = vadd.f32 %v22085_v6, %v13923_v50 }
 0x3f3   : > { %v22091_v62 = vpop.f32.mrf.mxu1  ;;  %v14310_v54 = vpop.f32.mrf.mxu0 }
 0x3f4   : > { %v14323_v25 = vadd.f32 %v14310_v54, %v13980_v45  ;;  %v22833_v54 = vld [vmem:[#allocation20_spill] sm:$0xff]  ;;  %v13238_v1 = vadd.f32 %v22834_v19, %v13013_v13  ;;  %v22842_v45 = vld [vmem:[#allocation41_spill] sm:$0xff] }
 0x3f5   : > { %v22096_v30 = vpop.f32.mrf.mxu1  ;;  %v13011_v52 = vadd.f32 %v22833_v54, %v12786_v14  ;;  %v18631_v54 = vmov 0.0  }
 0x3f6   : > { %v13581_v33 = vadd.f32 %v22838_v23, %v13238_v1  ;;  %18224 = vmatprep.subr.mxu1 %v18631_v54  ;;  %18228 = vmatprep.mubr.msk.f32.mxu1 %vm18632_vm1, %v18631_v54 }
 0x3f7   : > { %v14252_v61 = vpop.f32.mrf.mxu1 }
 0x3f8   : > { %v13924_v22 = vadd.f32 %v22841_v16, %v13581_v33 }
 0x405   : > { %v18202_v24 = vpop.f32.mrf.mxu0 }
 0x406   : > { %v14667_v8 = vadd.f32 %v18202_v24, %v14324_v0  ;;  %v22837_v0 = vld [vmem:[#allocation23_spill] sm:$0xff]  ;;  %v13921_v24 = vadd.f32 %v22839_v46, %v13578_v43 }
 0x407   : > { %v14650_v4 = vpop.f32.mrf.mxu0  ;;  %v13236_v15 = vadd.f32 %v22837_v0, %v13011_v52 }
 0x408   : > { %v14884_v49 = vmul.f32 %v22111_v44, %v14667_v8  ;;  %v14665_v39 = vadd.f32 %v14650_v4, %v14322_v60  ;;  %v22840_v8 = vld [vmem:[#allocation26_spill] sm:$0xff]  ;;  %v14264_v9 = vadd.f32 %v22091_v62, %v13921_v24 }
 0x409   : > { %v18203_v48 = vpop.f32.mrf.mxu0  ;;  %v13579_v29 = vadd.f32 %v22840_v8, %v13236_v15 }
 0x40a   : > { %v18196_v5 = vpop.f32.mrf.mxu1  ;;  %v14894_v26 = vadd.f32 %v22120_v20, %v14884_v49  ;;  %v14882_v47 = vmul.f32 %v22111_v44, %v14665_v39  ;;  %v14668_v57 = vadd.f32 %v18203_v48, %v14325_v11  ;;  %v14267_v49 = vadd.f32 %v22096_v30, %v13924_v22  ;;  %v15042_v22 = vld [vmem:[%s22468_s6] sm:$0xff] }
 0x40b   : > { %v14653_v7 = vpop.f32.mrf.mxu0  ;;  %v14609_v41 = vadd.f32 %v18196_v5, %v14266_v42  ;;  %v13922_v11 = vadd.f32 %v22842_v45, %v13579_v29  ;;  %v15046_v45 = vld [vmem:[%s22468_s6 + $0x20] sm:$0xf] }
 0x40c   : > { %v14592_v21 = vpop.f32.mrf.mxu1  ;;  %v14892_v36 = vadd.f32 %v22120_v20, %v14882_v47  ;;  %v14885_v59 = vmul.f32 %v22111_v44, %v14668_v57  ;;  %v14666_v27 = vadd.f32 %v14653_v7, %v14323_v25  ;;  %v14898_v10 = vmax.f32 %v14894_v26, 0.0 }
 0x40d   : > { %v14607_v39 = vadd.f32 %v14592_v21, %v14264_v9  ;;  %v14265_v51 = vadd.f32 %v14252_v61, %v13922_v11  ;;  %v15043_v9 = vld [vmem:[%s22468_s6 + $0x8] sm:$0xff] }
 0x40e   : > { %v18197_v63 = vpop.f32.mrf.mxu1  ;;  %v14895_v2 = vadd.f32 %v22120_v20, %v14885_v59  ;;  %v14883_v40 = vmul.f32 %v22111_v44, %v14666_v27  ;;  %v14896_v47 = vmax.f32 %v14892_v36, 0.0  ;;  %v14915_v27 = vld [vmem:[%s22467_s5 + $0x18] sm:$0xff]  ;;  %v17270_v11 = vld [vmem:[%s22466_s4 + $0x8] sm:$0xf] }
 0x40f   : > { %v14610_v6 = vadd.f32 %v18197_v63, %v14267_v49  ;;  %v15614_v49 = vsel %vm15466_vm3, %v17270_v11, 0 }
 0x410   : > { %v14595_v58 = vpop.f32.mrf.mxu1  ;;  %v14893_v60 = vadd.f32 %v22120_v20, %v14883_v40  ;;  %v14899_v14 = vmax.f32 %v14895_v2, 0.0 }
 0x411   : > { %v14608_v55 = vadd.f32 %v14595_v58, %v14265_v51 }
 0x412   : > { %v14897_v3 = vmax.f32 %v14893_v60, 0.0 }
 0x413   : > { %v18208_v4 = vpop.f32.mrf.mxu1 }
 0x414   : > { %v14872_v31 = vadd.f32 %v18208_v4, %v14609_v41  ;;  %v15044_v41 = vld [vmem:[%s22468_s6 + $0x10] sm:$0xff]  ;;  %v15045_v4 = vld [vmem:[%s22468_s6 + $0x18] sm:$0xff] }
 0x415   : > { %v14855_v34 = vpop.f32.mrf.mxu1 }
 0x416   : > { %v14902_v37 = vmul.f32 %v22111_v44, %v14872_v31  ;;  %v14870_v56 = vadd.f32 %v14855_v34, %v14607_v39  ;;  %v17261_v39 = vld [vmem:[%s22466_s4 + $0x4] sm:$0xf] }
 0x417   : > { %v18209_v28 = vpop.f32.mrf.mxu1  ;;  %v15468_v31 = vsel %vm15466_vm3, %v17261_v39, 0 }
 0x418   : > { %v14900_v48 = vmul.f32 %v22111_v44, %v14870_v56  ;;  %v14873_v62 = vadd.f32 %v18209_v28, %v14610_v6  ;;  %v14906_v5 = vadd.f32 %v22120_v20, %v14902_v37  ;;  %v22843_v6 = vld [vmem:[#allocation5_spill] sm:$0xff] }
 0x419   : > { %v14858_v25 = vpop.f32.mrf.mxu1 }
 0x41a   : > { %v14903_v30 = vmul.f32 %v22111_v44, %v14873_v62  ;;  %v14871_v57 = vadd.f32 %v14858_v25, %v14608_v55  ;;  %v14910_v32 = vmax.f32 %v14906_v5, 0.0  ;;  %v14904_v61 = vadd.f32 %v22120_v20, %v14900_v48 }
 0x41c   : > { %v14901_v18 = vmul.f32 %v22111_v44, %v14871_v57  ;;  %v14907_v13 = vadd.f32 %v22120_v20, %v14903_v30  ;;  %v14908_v26 = vmax.f32 %v14904_v61, 0.0  ;;  %v15016_v12 = vmax.f32 %v14898_v10, %v14910_v32  ;;  %v14913_v44 = vld [vmem:[%s22467_s5 + $0x8] sm:$0xff] }
 0x41e   : > { %v14911_v35 = vmax.f32 %v14907_v13, 0.0  ;;  %v14905_v53 = vadd.f32 %v22120_v20, %v14901_v18  ;;  %v15014_v21 = vmax.f32 %v14896_v47, %v14908_v26  ;;  %v14914_v20 = vld [vmem:[%s22467_s5 + $0x10] sm:$0xff] }
 0x420   : > { %18210 = vmatprep.subr.mxu0 %v14911_v35  ;;  %v14909_v7 = vmax.f32 %v14905_v53, 0.0  ;;  %v15017_v36 = vmax.f32 %v14899_v14, %v14911_v35 }
 0x421   : > { %18211 = vmatpush3.msra.mxu0 %v14911_v35 }
 0x422   : > { %18212 = vmatprep.subr.mxu0 %v14910_v32  ;;  %v15015_v59 = vmax.f32 %v14897_v3, %v14909_v7 }
 0x423   : > { %18213 = vmatpush3.msra.mxu0 %v14910_v32 }
 0x424   : > { %18214 = vmatprep.subr.mxu0 %v14909_v7 }
 0x425   : > { %18215 = vmatpush3.msra.mxu0 %v14909_v7 }
 0x426   : > { %18216 = vmatprep.subr.mxu0 %v14908_v26 }
 0x427   : > { %18217 = vmatpush3.msra.mxu0 %v14908_v26 }
 0x428   : > { %18219 = vmatmul.mubr.msk.f32.vlgmr.msra.gmra.mxu0 %vm14916_vm0, %v14913_v44  ;;  %18243 = vmatprep.subr.bf16.mxu0 %v18631_v54 }
 0x429   : > { %18221 = vmatprep.mubr.msk.f32.mxu0 %vm14916_vm0, %v14914_v20  ;;  %18244 = vmatpush3.bf16.msra.mxu0 %v15468_v31 }
 0x42a   : > { %18249 = vmatprep.subr.bf16.mxu0 %v18631_v54 }
 0x42c   : > { %18222 = vmatmul.mubr.msk.f32.gmra.mxu0 %vm14916_vm0, %v14915_v27 }
 0x42d   : > { %18245 = vmatprep.mubr.msk.bf16.mxu0 %vm18632_vm1, %v18631_v54 }
 0x4e8   : > { %v18220_v52 = vpop.f32.mrf.mxu0 }
 0x4e9   : > { %v15019_v19 = vmax.f32 %v15015_v59, %v18220_v52 }
 0x4ea   : > { %v14995_v1 = vpop.f32.mrf.mxu0 }
 0x4eb   : > { %v15027_v38 = vcombine.high %v15019_v19, %v15019_v19  ;;  %v15018_v43 = vmax.f32 %v15014_v21, %v14995_v1 }
 0x4ec   : > { %v18223_v17 = vpop.f32.mrf.mxu0 }
 0x4ed   : > { %v15035_v50 = vmax.f32 %v15019_v19, %v15027_v38  ;;  %v15026_v63 = vcombine.high %v15018_v43, %v15018_v43  ;;  %v15021_v2 = vmax.f32 %v15017_v36, %v18223_v17 }
 0x4ee   : > { %v15005_v40 = vpop.f32.mrf.mxu0 }
 0x4ef   : > { %v15034_v0 = vmax.f32 %v15018_v43, %v15026_v63  ;;  %v15039_v15 = vmax.f32 %v15035_v50, %v15026_v63  ;;  %v15029_v23 = vcombine.high %v15021_v2, %v15021_v2  ;;  %v15020_v33 = vmax.f32 %v15016_v12, %v15005_v40 }
 0x4f1   : > { %v15038_v46 = vmax.f32 %v15034_v0, 0.0  ;;  %v15037_v24 = vmax.f32 %v15021_v2, %v15029_v23  ;;  %v15028_v42 = vcombine.high %v15020_v33, %v15020_v33 }
 0x4f3   : > { %v15051_v58 = vcombine.low %v15038_v46, %v15039_v15  ;;  %v15036_v60 = vmax.f32 %v15020_v33, %v15028_v42  ;;  %v15041_v8 = vmax.f32 %v15037_v24, %v15028_v42 }
 0x4f5   : > { %v15040_v29 = vmax.f32 %v15036_v60, %v15027_v38 }
 0x4f7   : > { %v15052_v16 = vcombine.low %v15040_v29, %v15041_v8 }
 0x4f9   : > { %18225 = vmatpush3.msra.mxu1 %v15052_v16 }
 0x4fa   : > { %18226 = vmatprep.subr.mxu1 %v18631_v54 }
 0x4fb   : > { %18227 = vmatpush3.msra.mxu1 %v15051_v58 }
 0x4fc   : > { %18229 = vmatmul.mubr.msk.f32.vlgmr.msra.gmra.mxu1 %vm15055_vm2, %v15042_v22  ;;  %18255 = vmatprep.subr.bf16.mxu1 %v18631_v54 }
 0x4fd   : > { %18231 = vmatprep.mubr.msk.f32.mxu1 %vm18632_vm1, %v18631_v54  ;;  %18256 = vmatpush3.bf16.msra.mxu1 %v15614_v49 }
 0x4fe   : > { %18267 = vmatprep.subr.bf16.mxu1 %v18631_v54 }
 0x500   : > { %18232 = vmatmul.mubr.msk.f32.gmra.mxu1 %vm15055_vm2, %v15043_v9 }
 0x501   : > { %18234 = vmatprep.mubr.msk.f32.mxu1 %vm18632_vm1, %v18631_v54 }
 0x504   : > { %18235 = vmatmul.mubr.msk.f32.gmra.mxu1 %vm15055_vm2, %v15044_v41 }
 0x505   : > { %18237 = vmatprep.mubr.msk.f32.mxu1 %vm18632_vm1, %v18631_v54 }
 0x508   : > { %18238 = vmatmul.mubr.msk.f32.gmra.mxu1 %vm15055_vm2, %v15045_v4 }
 0x509   : > { %18240 = vmatprep.mubr.msk.f32.mxu1 %vm18632_vm1, %v18631_v54 }
 0x50c   : > { %18241 = vmatmul.mubr.msk.f32.gmra.mxu1 %vm15055_vm2, %v15046_v45 }
 0x50d   : > { %18257 = vmatprep.mubr.msk.bf16.mxu1 %vm18632_vm1, %v18631_v54 }
 0x5bc   : > { %v15137_v34 = vpop.f32.mrf.mxu1 }
 0x5bd   : > { %v15166_v51 = vcombine.high %v15137_v34, %v15137_v34  ;;  %v15173_v37 = vrot.slane %v15137_v34, %v22843_v6 }
 0x5be   : > { %v18230_v56 = vpop.f32.mrf.mxu1 }
 0x5bf   : > { %v15180_v28 = vrot.slane %v15166_v51, %v22843_v6  ;;  %v15181_v10 = vcombine.high %v15173_v37, %v15173_v37 }
 0x5c0   : > { %v15142_v55 = vpop.f32.mrf.mxu1 }
 0x5c1   : > { %v15242_v48 = vcombine.low %v15173_v37, %v15181_v10  ;;  %v15182_v62 = vcombine.high %v15180_v28, %v15180_v28  ;;  %v15183_v5 = vcombine.high %v15142_v55, %v15142_v55  ;;  %v15190_v25 = vrot.slane %v15142_v55, %v22843_v6 }
 0x5c2   : > { %v18233_v47 = vpop.f32.mrf.mxu1  ;;  %v15256_v57 = vrot.slane %v15180_v28, %v22843_v6 }
 0x5c3   : > { %v15249_v30 = vrot.slane %v15242_v48, %v22843_v6  ;;  %v15197_v32 = vrot.slane %v15183_v5, %v22843_v6  ;;  %v15198_v61 = vcombine.high %v15190_v25, %v15190_v25  ;;  %v15258_v14 = vcombine.low %v15182_v62, %v15190_v25 }
 0x5c4   : > { %v15147_v18 = vpop.f32.mrf.mxu1 }
 0x5c5   : > { %v22225_v13 = vcombine.low %v15249_v30, %v15256_v57  ;;  %v15199_v26 = vcombine.high %v15197_v32, %v15197_v32  ;;  %v15200_v12 = vcombine.high %v15147_v18, %v15147_v18  ;;  %v15207_v35 = vrot.slane %v15147_v18, %v22843_v6 }
 0x5c6   : > { %v15265_v53 = vrot.slane %v15258_v14, %v22843_v6  ;;  %v15272_v3 = vrot.slane %v15198_v61, %v22843_v6  ;;  %v18236_v21 = vpop.f32.mrf.mxu1 }
 0x5c7   : > { %v15344_v7 = vpack.c.bf16 %v22225_v13, %v22225_v13  ;;  %v15274_v36 = vcombine.low %v15197_v32, %v15199_v26  ;;  %v15214_v59 = vrot.slane %v15200_v12, %v22843_v6  ;;  %v15215_v44 = vcombine.high %v15207_v35, %v15207_v35 }
 0x5c8   : > { %v22233_v20 = vcombine.low %v15265_v53, %v15272_v3  ;;  %v15152_v27 = vpop.f32.mrf.mxu1  ;;  %v15288_v43 = vrot.slane %v15207_v35, %v22843_v6 }
 0x5c9   : > { %v15361_v52 = vrot.slane %v15344_v7, %v22843_v6  ;;  %v15281_v19 = vrot.slane %v15274_v36, %v22843_v6  ;;  %v15290_v1 = vcombine.low %v15215_v44, %v15214_v59  ;;  %v15216_v40 = vcombine.high %v15214_v59, %v15214_v59 }
 0x5ca   : > { %v15345_v38 = vpack.c.bf16 %v22233_v20, %v22233_v20  ;;  %v18239_v17 = vpop.f32.mrf.mxu1  ;;  %v15224_v9 = vrot.slane %v15152_v27, %v22843_v6  ;;  %v15217_v31 = vcombine.high %v15152_v27, %v15152_v27 }
 0x5cb   : > { %v15362_v50 = vcombine.high %v15361_v52, %v15361_v52  ;;  %v15388_v63 = vshrl.u32 %v15361_v52, 16  ;;  %v15391_v2 = vshll.u32 %v15361_v52, 16  ;;  %v22243_v46 = vcombine.low %v15281_v19, %v15288_v43 }
 0x5cc   : > { %v15369_v0 = vrot.slane %v15345_v38, %v22843_v6  ;;  %v22241_v15 = vpop.f32.mrf.mxu1  ;;  %v15297_v24 = vrot.slane %v15290_v1, %v22843_v6  ;;  %v15304_v22 = vrot.slane %v15216_v40, %v22843_v6  ;;  %v17266_v51 = vrot.slane %v15361_v52, 9 }
 0x5cd   : > { %v15390_v23 = vrot.slane %v15388_v63, 6  ;;  %v15393_v33 = vrot.slane %v15391_v2, 7  ;;  %v15397_v16 = vshll.u32 %v15362_v50, 16  ;;  %v15577_v41 = vrot.slane %v15362_v50, 7 }
 0x5ce   : > { %v15370_v42 = vcombine.high %v15369_v0, %v15369_v0  ;;  %v15402_v58 = vshrl.u32 %v15369_v0, 16  ;;  %v15405_v60 = vshll.u32 %v15369_v0, 16  ;;  %v18242_v8 = vpop.f32.mrf.mxu1  ;;  %v22248_v49 = vcombine.low %v15297_v24, %v15304_v22 }
 0x5cf   : > { %v15394_v29 = vor.u32 %v15393_v33, %v15390_v23  ;;  %v15346_v39 = vpack.c.bf16 %v22243_v46, %v22243_v46  ;;  %v17267_v28 = vrot.slane %v15369_v0, 9  ;;  %v15399_v48 = vrot.slane %v15397_v16, 7 }
 0x5d0   : > { %v15404_v4 = vrot.slane %v15402_v58, 6  ;;  %v15407_v45 = vrot.slane %v15405_v60, 7  ;;  %v15411_v11 = vshll.u32 %v15370_v42, 16  ;;  %v15581_v56 = vrot.slane %v15370_v42, 7 }
 0x5d1   : > { %v15395_v34 = vrot.slane %v15394_v29, 2  ;;  %v15347_v10 = vpack.c.bf16 %v22248_v49, %v22248_v49  ;;  %v15377_v55 = vrot.slane %v15346_v39, %v22843_v6  ;;  %v15578_v5 = vsel %vm18990_vm15, %v17266_v51, %v15577_v41 }
 0x5d2   : > { %v15408_v37 = vor.u32 %v15407_v45, %v15404_v4  ;;  %v15413_v25 = vrot.slane %v15411_v11, 7  ;;  %v15232_v47 = vcombine.high %v15224_v9, %v15224_v9  ;;  %v22262_v12 = vsel %vm18990_vm15, %v17267_v28, %v15581_v56  ;;  %v17276_v45 = vld [vmem:[%s22466_s4 + $0x10] sm:$0xf] }
 0x5d3   : > { %v15378_v30 = vcombine.high %v15377_v55, %v15377_v55  ;;  %v15385_v57 = vrot.slane %v15347_v10, %v22843_v6  ;;  %v15416_v32 = vshrl.u32 %v15377_v55, 16  ;;  %v15419_v61 = vshll.u32 %v15377_v55, 16 }
 0x5d4   : > { %v15400_v18 = vsel %vm18833_vm9, %v15395_v34, %v15399_v48  ;;  %v15409_v26 = vrot.slane %v15408_v37, 2  ;;  %v15231_v35 = vrot.slane %v15217_v31, %v22843_v6  ;;  %v15306_v7 = vcombine.low %v15224_v9, %v15232_v47 }
 0x5d5   : > { %v15386_v53 = vcombine.high %v15385_v57, %v15385_v57  ;;  %v15418_v3 = vrot.slane %v15416_v32, 6  ;;  %v15421_v21 = vrot.slane %v15419_v61, 7  ;;  %v15430_v36 = vshrl.u32 %v15385_v57, 16 }
 0x5d6   : > { %v15433_v59 = vshll.u32 %v15385_v57, 16  ;;  %v17268_v44 = vrot.slane %v15377_v55, 9  ;;  %v15585_v27 = vrot.slane %v15378_v30, 7  ;;  %v15425_v19 = vshll.u32 %v15378_v30, 16 }
 0x5d7   : > { %v15422_v52 = vor.u32 %v15421_v21, %v15418_v3  ;;  %v15439_v1 = vshll.u32 %v15386_v53, 16  ;;  %v15320_v38 = vrot.slane %v15231_v35, %v22843_v6  ;;  %v15432_v43 = vrot.slane %v15430_v36, 6 }
 0x5d8   : > { %v15435_v17 = vrot.slane %v15433_v59, 7  ;;  %v17269_v50 = vrot.slane %v15385_v57, 9  ;;  %v15589_v63 = vrot.slane %v15386_v53, 7  ;;  %v15593_v2 = vcombine.low %v15578_v5, %v22262_v12  ;;  %v15350_v57 = vld [vmem:[%s22466_s4] sm:$0xf] }
 0x5d9   : > { %v15423_v40 = vrot.slane %v15422_v52, 2  ;;  %v15313_v0 = vrot.slane %v15306_v7, %v22843_v6  ;;  %v15233_v23 = vcombine.high %v15231_v35, %v15231_v35  ;;  %v22270_v24 = vsel %vm18990_vm15, %v17268_v44, %v15585_v27 }
 0x5da   : > { %v15436_v33 = vor.u32 %v15435_v17, %v15432_v43  ;;  %v22274_v42 = vsel %vm18990_vm15, %v17269_v50, %v15589_v63  ;;  %v15240_v58 = vrot.slane %v22241_v15, %v22843_v6  ;;  %v15427_v60 = vrot.slane %v15425_v19, 7 }
 0x5db   : > { %v15594_v8 = vcombine.low %v22270_v24, %v22274_v42  ;;  %v22280_v29 = vcombine.low %v15313_v0, %v15320_v38  ;;  %v15414_v16 = vsel %vm18833_vm9, %v15409_v26, %v15413_v25  ;;  %v15441_v9 = vrot.slane %v15439_v1, 7  ;;  %v17272_v38 = vld [vmem:[%s22466_s4 + $0xc] sm:$0xf] }
 0x5dc   : > { %v15437_v22 = vrot.slane %v15436_v33, 2  ;;  %v15241_v41 = vcombine.high %v15240_v58, %v15240_v58  ;;  %v15322_v4 = vcombine.low %v15233_v23, %v15240_v58  ;;  %v15428_v15 = vsel %vm18833_vm9, %v15423_v40, %v15427_v60  ;;  %v17281_v40 = vld [vmem:[%s22466_s4 + $0x18] sm:$0xf] }
 0x5dd   : > { %v15348_v11 = vpack.c.bf16 %v22280_v29, %v22280_v29  ;;  %v15601_v39 = vrot.slane %v15593_v2, %v22843_v6  ;;  %v22293_v31 = vrot.slane %v15594_v8, %v22843_v6  ;;  %v15445_v56 = vcombine.low %v15400_v18, %v15414_v16 }
 0x5de   : > { %v15329_v34 = vrot.slane %v15322_v4, %v22843_v6  ;;  %v15336_v51 = vrot.slane %v15241_v41, %v22843_v6  ;;  %v15442_v37 = vsel %vm18833_vm9, %v15437_v22, %v15441_v9  ;;  %v15773_v48 = vsel %vm15466_vm3, %v17276_v45, 0 }
 0x5df   : > { %v22300_v28 = vrot.slane %v15348_v11, %v22843_v6  ;;  %v15609_v10 = vcombine.low %v15601_v39, %v22293_v31  ;;  %v15446_v55 = vcombine.low %v15428_v15, %v15442_v37  ;;  %v15453_v61 = vrot.slane %v15445_v56, %v22843_v6  ;;  %v17287_v56 = vld [vmem:[%s22466_s4 + $0x20] sm:$0xf] }
 0x5e0   : > { %v22304_v5 = vcombine.low %v15329_v34, %v15336_v51  ;;  %v17264_v3 = vpack.c.bf16 %v22248_v49, %v22243_v46  ;;  %v15532_v7 = vsel %vm15466_vm3, %v15350_v57, 0  ;;  %v17263_v27 = vpack.c.bf16 %v22233_v20, %v22225_v13  ;;  %v17279_v34 = vld [vmem:[%s22466_s4 + $0x14] sm:$0xf] }
 0x5e1   : > { %v22308_v25 = vcombine.high %v22300_v28, %v22300_v28  ;;  %v15737_v47 = vshrl.u32 %v22300_v28, 16  ;;  %v15740_v30 = vshll.u32 %v22300_v28, 16  ;;  %18258 = vmatmul.mubr.msk.bf16.vlgmr.msra.gmra.mxu1 %vm15462_vm4, %v15609_v10  ;;  %v22320_v18 = vrot.slane %v15446_v55, %v22843_v6 }
 0x5e2   : > { %v15349_v32 = vpack.c.bf16 %v22304_v5, %v22304_v5  ;;  %18268 = vmatpush3.bf16.msra.mxu1 %v15773_v48  ;;  %18269 = vmatprep.mubr.msk.bf16.mxu1 %vm18632_vm1, %v18631_v54  ;;  %v15526_v19 = vrot.slane %v17264_v3, %v22843_v6  ;;  %v15752_v1 = vcombine.low %v15414_v16, %v15428_v15  ;;  %v15683_v0 = vsel %vm15466_vm3, %v17272_v38, 0 }
 0x5e3   : > { %v15739_v26 = vrot.slane %v15737_v47, 6  ;;  %v15742_v35 = vrot.slane %v15740_v30, 7  ;;  %v15746_v53 = vshll.u32 %v22308_v25, 16  ;;  %18279 = vmatprep.subr.bf16.mxu1 %v18631_v54  ;;  %v15461_v21 = vcombine.low %v15453_v61, %v22320_v18 }
 0x5e4   : > { %v15957_v44 = vrot.slane %v15349_v32, %v22843_v6  ;;  %v15519_v50 = vrot.slane %v17263_v27, %v22843_v6  ;;  %v17274_v33 = vpack.c.bf16 %v22280_v29, %v22248_v49  ;;  %v15760_v58 = vrot.slane %v15752_v1, %v22843_v6 }
 0x5e5   : > { %v15743_v36 = vor.u32 %v15742_v35, %v15739_v26  ;;  %v15748_v59 = vrot.slane %v15746_v53, 7  ;;  %18246 = vmatmul.mubr.msk.bf16.vlgmr.msra.gmra.mxu0 %vm15462_vm4, %v15461_v21  ;;  %v17278_v8 = vrot.slane %v22300_v28, 9  ;;  %v15820_v16 = vrot.slane %v22308_v25, 7 }
 0x5e6   : > { %18250 = vmatpush3.bf16.msra.mxu0 %v15532_v7  ;;  %18251 = vmatprep.mubr.msk.bf16.mxu0 %vm18632_vm1, %v18631_v54  ;;  %v15960_v43 = vshrl.u32 %v15957_v44, 16  ;;  %v15963_v17 = vshll.u32 %v15957_v44, 16  ;;  %v15958_v2 = vcombine.high %v15957_v44, %v15957_v44  ;;  %v15527_v23 = vcombine.low %v15519_v50, %v15526_v19 }
 0x5e7   : > { %v15744_v52 = vrot.slane %v15743_v36, 2  ;;  %18261 = vmatprep.subr.bf16.mxu0 %v18631_v54  ;;  %v17273_v41 = vpack.c.bf16 %v22243_v46, %v22233_v20  ;;  %v17282_v4 = vpack.c.bf16 %v22304_v5, %v22280_v29  ;;  %v15906_v49 = vsel %vm15466_vm3, %v17281_v40, 0 }
 0x5e8   : > { %v15962_v22 = vrot.slane %v15960_v43, 6  ;;  %v15965_v9 = vrot.slane %v15963_v17, 7  ;;  %v17286_v15 = vrot.slane %v15957_v44, 9  ;;  %v16035_v11 = vrot.slane %v15958_v2, 7 }
 0x5e9   : > { %v15749_v13 = vsel %vm18833_vm9, %v15744_v52, %v15748_v59  ;;  %v15677_v39 = vrot.slane %v17274_v33, %v22843_v6  ;;  %v15969_v46 = vshll.u32 %v15958_v2, 16  ;;  %v15821_v29 = vsel %vm18990_vm15, %v17278_v8, %v15820_v16 }
 0x5ea   : > { %v15753_v63 = vcombine.low %v15442_v37, %v15749_v13  ;;  %v15966_v20 = vor.u32 %v15965_v9, %v15962_v22  ;;  %v15670_v51 = vrot.slane %v17273_v41, %v22843_v6  ;;  %v15900_v37 = vrot.slane %v17282_v4, %v22843_v6 }
 0x5eb   : > { %v16036_v28 = vsel %vm18990_vm15, %v17286_v15, %v16035_v11  ;;  %v15845_v55 = vsel %vm15466_vm3, %v17279_v34, 0  ;;  %v15825_v48 = vcombine.low %v22274_v42, %v15821_v29  ;;  %v15971_v25 = vrot.slane %v15969_v46, 7  ;;  %v17284_v42 = vld [vmem:[%s22466_s4 + $0x1c] sm:$0xf] }
 0x5ec   : > { %v15767_v60 = vrot.slane %v15753_v63, %v22843_v6  ;;  %v15678_v10 = vcombine.low %v15670_v51, %v15677_v39  ;;  %v15967_v5 = vrot.slane %v15966_v20, 2  ;;  %v15901_v47 = vcombine.low %v15526_v19, %v15900_v37 }
 0x5ed   : > { %18252 = vmatmul.mubr.msk.bf16.vlgmr.msra.gmra.mxu0 %vm15462_vm4, %v15527_v23  ;;  %v16052_v30 = vsel %vm15466_vm3, %v17287_v56, 0  ;;  %v16039_v57 = vcombine.low %v15821_v29, %v16036_v28  ;;  %v15824_v32 = vcombine.low %v22262_v12, %v22270_v24  ;;  %v15839_v62 = vrot.slane %v15825_v48, %v22843_v6 }
 0x5ee   : > { %v15768_v45 = vcombine.low %v15760_v58, %v15767_v60  ;;  %18262 = vmatpush3.bf16.msra.mxu0 %v15683_v0  ;;  %18263 = vmatprep.mubr.msk.bf16.mxu0 %vm18632_vm1, %v18631_v54  ;;  %v15972_v12 = vsel %vm18833_vm9, %v15967_v5, %v15971_v25  ;;  %v15988_v35 = vsel %vm15466_vm3, %v17284_v42, 0 }
 0x5ef   : > { %18273 = vmatprep.subr.bf16.mxu0 %v18631_v54  ;;  %v16046_v24 = vrot.slane %v16039_v57, %v22843_v6  ;;  %v15832_v61 = vrot.slane %v15824_v32, %v22843_v6  ;;  %v15975_v53 = vcombine.low %v15749_v13, %v15972_v12 }
 0x5f0   : > { %18270 = vmatmul.mubr.msk.bf16.vlgmr.msra.gmra.mxu1 %vm15462_vm4, %v15768_v45 }
 0x5f1   : > { %18280 = vmatpush3.bf16.msra.mxu1 %v15906_v49  ;;  %18281 = vmatprep.mubr.msk.bf16.mxu1 %vm18632_vm1, %v18631_v54  ;;  %v15840_v26 = vcombine.low %v15832_v61, %v15839_v62  ;;  %v16047_v3 = vcombine.low %v22293_v31, %v16046_v24  ;;  %v15982_v14 = vrot.slane %v15975_v53, %v22843_v6 }
 0x5f2   : > { %18291 = vmatprep.subr.bf16.mxu1 %v18631_v54 }
 0x5f3   : > { %v15983_v21 = vcombine.low %v22320_v18, %v15982_v14 }
 0x5f5   : > { %18264 = vmatmul.mubr.msk.bf16.vlgmr.msra.gmra.mxu0 %vm15462_vm4, %v15678_v10 }
 0x5f6   : > { %18274 = vmatpush3.bf16.msra.mxu0 %v15845_v55  ;;  %18275 = vmatprep.mubr.msk.bf16.mxu0 %vm18632_vm1, %v18631_v54 }
 0x5f7   : > { %18285 = vmatprep.subr.bf16.mxu0 %v18631_v54 }
 0x5f8   : > { %18282 = vmatmul.mubr.msk.bf16.vlgmr.msra.gmra.mxu1 %vm15462_vm4, %v15901_v47 }
 0x5f9   : > { %18292 = vmatpush3.bf16.msra.mxu1 %v16052_v30  ;;  %18293 = vmatprep.mubr.msk.bf16.mxu1 %vm18632_vm1, %v18631_v54 }
 0x5fd   : > { %18276 = vmatmul.mubr.msk.bf16.vlgmr.msra.gmra.mxu0 %vm15462_vm4, %v15840_v26 }
 0x5fe   : > { %18286 = vmatpush3.bf16.msra.mxu0 %v15988_v35  ;;  %18287 = vmatprep.mubr.msk.bf16.mxu0 %vm18632_vm1, %v18631_v54 }
 0x600   : > { %18294 = vmatmul.mubr.msk.bf16.vlgmr.msra.gmra.mxu1 %vm15462_vm4, %v16047_v3 }
 0x605   : > { %18288 = vmatmul.mubr.msk.bf16.vlgmr.msra.gmra.mxu0 %vm15462_vm4, %v15983_v21 }
 0x6a1   : > { %v15650_v7 = vpop.f32.mrf.mxu1 }
 0x6a3   : > { %v18259_v36 = vpop.f32.mrf.mxu1 }
 0x6a5   : > { %v15653_v59 = vpop.f32.mrf.mxu1  ;;  %v15504_v44 = vpop.f32.mrf.mxu0 }
 0x6a7   : > { %v18260_v27 = vpop.f32.mrf.mxu1  ;;  %v18247_v31 = vpop.f32.mrf.mxu0 }
 0x6a9   : > { %v15507_v52 = vpop.f32.mrf.mxu0 }
 0x6ab   : > { %v18248_v19 = vpop.f32.mrf.mxu0 }
 0x6ad   : > { %v15568_v1 = vpop.f32.mrf.mxu0 }
 0x6ae   : > { %v15569_v6 = vadd.f32 %v15568_v1, %v15504_v44 }
 0x6af   : > { %v18253_v43 = vpop.f32.mrf.mxu0 }
 0x6b0   : > { %v15809_v38 = vpop.f32.mrf.mxu1  ;;  %v15657_v23 = vadd.f32 %v15650_v7, %v15569_v6 }
 0x6b1   : > { %v15571_v17 = vpop.f32.mrf.mxu0 }
 0x6b2   : > { %v18271_v54 = vpop.f32.mrf.mxu1  ;;  %v15572_v0 = vadd.f32 %v15571_v17, %v15507_v52 }
 0x6b3   : > { %v18254_v50 = vpop.f32.mrf.mxu0 }
 0x6b4   : > { %v15812_v13 = vpop.f32.mrf.mxu1  ;;  %v15658_v22 = vadd.f32 %v15653_v59, %v15572_v0 }
 0x6b5   : > { %v15719_v18 = vpop.f32.mrf.mxu0 }
 0x6b6   : > { %v18272_v63 = vpop.f32.mrf.mxu1  ;;  %v15726_v60 = vadd.f32 %v15719_v18, %v15657_v23 }
 0x6b7   : > { %v18265_v40 = vpop.f32.mrf.mxu0 }
 0x6b8   : > { %v15942_v2 = vpop.f32.mrf.mxu1  ;;  %v15816_v45 = vadd.f32 %v15809_v38, %v15726_v60 }
 0x6b9   : > { %v15722_v58 = vpop.f32.mrf.mxu0 }
 0x6ba   : > { %v18283_v33 = vpop.f32.mrf.mxu1  ;;  %v15727_v4 = vadd.f32 %v15722_v58, %v15658_v22 }
 0x6bb   : > { %v18266_v16 = vpop.f32.mrf.mxu0 }
 0x6bc   : > { %v15945_v8 = vpop.f32.mrf.mxu1  ;;  %v15817_v46 = vadd.f32 %v15812_v13, %v15727_v4 }
 0x6bd   : > { %v15881_v41 = vpop.f32.mrf.mxu0 }
 0x6be   : > { %v18284_v9 = vpop.f32.mrf.mxu1  ;;  %v15888_v11 = vadd.f32 %v15881_v41, %v15816_v45 }
 0x6bf   : > { %v18277_v15 = vpop.f32.mrf.mxu0 }
 0x6c0   : > { %v16088_v49 = vpop.f32.mrf.mxu1  ;;  %v15949_v37 = vadd.f32 %v15942_v2, %v15888_v11 }
 0x6c1   : > { %v15884_v20 = vpop.f32.mrf.mxu0 }
 0x6c2   : > { %v18295_v39 = vpop.f32.mrf.mxu1  ;;  %v15889_v51 = vadd.f32 %v15884_v20, %v15817_v46 }
 0x6c3   : > { %v18278_v34 = vpop.f32.mrf.mxu0 }
 0x6c4   : > { %v16091_v29 = vpop.f32.mrf.mxu1  ;;  %v15950_v5 = vadd.f32 %v15945_v8, %v15889_v51 }
 0x6c5   : > { %v16024_v28 = vpop.f32.mrf.mxu0 }
 0x6c6   : > { %v18296_v56 = vpop.f32.mrf.mxu1  ;;  %v16031_v10 = vadd.f32 %v16024_v28, %v15949_v37 }
 0x6c7   : > { %v18289_v55 = vpop.f32.mrf.mxu0 }
 0x6c8   : > { %v16095_v48 = vadd.f32 %v16088_v49, %v16031_v10 }
 0x6c9   : > { %v16027_v25 = vpop.f32.mrf.mxu0 }
 0x6ca   : > { %v16099_v47 = vcombine.high %v16095_v48, %v16095_v48  ;;  %16104 = vst.msk [vmem:[%s271_s21] sm:$0xf] %vm16103_vm5, %v16095_v48  ;;  %v16032_v30 = vadd.f32 %v16027_v25, %v15950_v5 }
 0x6cb   : > { %v18290_v57 = vpop.f32.mrf.mxu0 }
 0x6cc   : > { %16105 = vst.msk [vmem:[%s271_s21 + $0x4] sm:$0xf] %vm16103_vm5, %v16099_v47  ;;  %v16096_v32 = vadd.f32 %v16091_v29, %v16032_v30 }
 0x6ce   : > { %v16100_v62 = vcombine.high %v16096_v32, %v16096_v32  ;;  %16106 = vst.msk [vmem:[%s271_s21 + $0x8] sm:$0xf] %vm16103_vm5, %v16096_v32 }
 0x6d0   : > { %16107 = vst.msk [vmem:[%s271_s21 + $0xc] sm:$0xf] %vm16103_vm5, %v16100_v62 }
 0x6d1   : > { %18580 = shalt.err (!%p18577_p3)
}
 0x6d2   : > { %s18581_s20 = scalar_lea.hbm %s22416_s15, 256  ;;  %s18585_s29 = scalar_lea.hbm %s22469_s7, 512 }
 0x6d3   : > { %p18582_p4 = scmp.ne.s32.totalorder %s22416_s15, %s18581_s20  ;;  %p18586_p9 = scmp.lt.s32.totalorder %s22416_s15, %s22469_s7 }
 0x6d4   : > { %p18587_p10 = scmp.lt.s32.totalorder %s18585_s29, %s18581_s20 }
 0x6d5   : > { %p18583_p7 = pnand %p18582_p4, %p18714_p5 }
 0x6d6   : > { %p18588_p11 = por %p18587_p10, %p18586_p9 }
 0x6d7   : > { %p18584_p8 = pneg %p18583_p7 }
 0x6d9   : > { %p18589_p12 = pnand %p18588_p11, %p18584_p8 }
 0x6db   : > { %18592 = shalt.err (!%p18589_p12)
}
 0x6dc   : > { %s18634_s13 = smov 64   ;;  %s18635_s14 = smov 4  }
 0x6dd   : > { %18298 = dma.vmem_to_hbm [thread:$0]  (%p18714_p5), %s22418_s8, 256, %s22416_s15, %s22422_s28, %s18634_s13, %s18634_s13, %s18635_s14  }
 0x6de PF: > { %p18304_p13 = scmp.ge.s32.totalorder %s18627_s27, 2  ;;  %s16137_s16 = sand.u32 1, %s18615_s24  }
 0x6df   : > { %s16138_s17 = scalar_lea.sflag [#allocation3], %s16137_s16 }
 0x6e0   : > { %p18301_p0 = pnand %p18304_p13, %p18718_p6 }
 0x6e2   : > { %p18302_p1 = pneg %p18301_p0 }
 0x6e4   : > { %18610 = dma.done.wait (%p18302_p1), %s16138_s17, 256  }
 0x6e5   : > { %18612 = vsyncadd (%p18302_p1), %s16138_s17, 4294967040  ;;  %p17_p2 = scmp.ge.s32.totalorder %s18701_s30, 4   ;;  %s22846_s24 = smov %s18619_s25 }
 0x6e6   : > { %s22847_s25 = smov %s18623_s26  ;;  %s22848_s26 = smov %s18712_s10 }
 0x6e7   : > { %s22849_s27 = smov %s18701_s30  ;;  %19 = sbr.rel (!%p17_p2) target bundleno = 3 (0x3), region = 166 }
 0x6ec   :  { %16143 = vsyncpa [#allocation3], 1 }
 0x6ed   :  { %16145 = vsyncpa [#allocation3 + $0x1], 1 }

</bundles_post_ra>
